<compile_context>
chip_gen: v5e
topology: v5e:2x2
jax: 0.10.0
libtpu: 0.0.40
codegen_flags: <defaults>
</compile_context>

<pallas_src>
import math

import jax
import jax.numpy as jnp
from jax import lax
from jax.experimental import pallas as pl
from jax.experimental.pallas import tpu as pltpu


# ------------------------------ fused kernel -------------------------------- #

_COL = 7  # padded column read for tap kw=0; interiors live at column offset 8.


def _conv_relu_pool_layer(read_tap, write_out, w_ref, b_ref, tmp_ref,
                          H, W, Cin, Cout, CH):
    """One Conv3x3(pad=1) + ReLU + MaxPool2x2 layer, CH image rows per step."""
    Wo = W // 2
    CHo = CH // 2
    n_chunks = H // CH

    def chunk(ci, carry):
        h0 = ci * CH                                   # first image row of this chunk
        acc = None
        # In-kernel "im2col": 9 shifted matmuls accumulated in f32.
        for kh in range(3):
            for kw in range(3):
                a = read_tap(h0, kh, kw, CH, W).reshape(CH * W, Cin)
                t = jnp.dot(a, w_ref[kh * 3 + kw],
                            preferred_element_type=jnp.float32)
                acc = t if acc is None else acc + t
        # Bias + ReLU once (hoisted out of the tap loop).
        y = jnp.maximum(acc + b_ref[...], 0.0)         # (CH*W, Cout)
        # 2x2 maxpool, H direction (adjacent image rows) via leading-dim reshape.
        y = y.reshape(CHo, 2, W, Cout)
        y = jnp.maximum(y[:, 0], y[:, 1]).reshape(CHo * W, Cout)
        # 2x2 maxpool, W direction (adjacent columns) via stride-2 sublane loads.
        tmp_ref[0:CHo * W, 0:Cout] = y
        even = tmp_ref[pl.ds(0, CHo * Wo, stride=2), 0:Cout]
        odd = tmp_ref[pl.ds(1, CHo * Wo, stride=2), 0:Cout]
        pooled = jnp.maximum(even, odd)                # (CHo*Wo, Cout), rows = (ho, wo)
        write_out(ci, CHo, Wo, Cout, pooled)
        return carry

    lax.fori_loop(0, n_chunks, chunk, 0)


def fused_shapes_kernel(x_ref, w1_ref, b1_ref, w2_ref, b2_ref, w3_ref, b3_ref,
                        wfc_ref, bfc_ref, o_ref,
                        p2_ref, p3_ref, tmp_ref, x3_ref):
    # x_ref:  (1, 66, 73, 3) zero-padded NHWC input (interior at rows 1.., cols 8..)
    # w*_ref: (9, Cin, Cout) conv taps;  b*_ref: (1, Cout)
    # wfc_ref: (64, 32, n_out) fc weight, rows ordered p = ho*8+wo; bfc_ref: (1, n_out)
    # o_ref:  (1, 1, n_out)
    # p2_ref: (34, 41, 8)  padded layer-2 input   (VMEM scratch)
    # p3_ref: (18, 25, 16) padded layer-3 input   (VMEM scratch)
    # tmp_ref: (256, 32)   maxpool staging buffer (VMEM scratch)
    # x3_ref: (64, 32)     flattened layer-3 output, rows = (ho, wo)
    f32 = jnp.float32

    # Zero the padded buffers so their borders act as the conv 'same' padding.
    p2_ref[...] = jnp.zeros(p2_ref.shape, f32)
    p3_ref[...] = jnp.zeros(p3_ref.shape, f32)

    def read_from_input(h0, kh, kw, CH, W):
        return x_ref[0, pl.ds(h0 + kh, CH), _COL + kw:_COL + kw + W, :]

    def read_from(p_ref):
        def rd(h0, kh, kw, CH, W):
            return p_ref[pl.ds(h0 + kh, CH), _COL + kw:_COL + kw + W, :]
        return rd

    def write_padded(p_ref):
        def wr(ci, CHo, Wo, Cout, pooled):
            p_ref[pl.ds(1 + ci * CHo, CHo), 8:8 + Wo, :] = (
                pooled.reshape(CHo, Wo, Cout))
        return wr

    def write_flat(ci, CHo, Wo, Cout, pooled):
        x3_ref[pl.ds(ci * CHo * Wo, CHo * Wo), :] = pooled

    # Layer 1: (64, 64, 3) -> (32, 32, 8)
    _conv_relu_pool_layer(read_from_input, write_padded(p2_ref),
                          w1_ref, b1_ref, tmp_ref, 64, 64, 3, 8, CH=8)
    # Layer 2: (32, 32, 8) -> (16, 16, 16)
    _conv_relu_pool_layer(read_from(p2_ref), write_padded(p3_ref),
                          w2_ref, b2_ref, tmp_ref, 32, 32, 8, 16, CH=8)
    # Layer 3: (16, 16, 16) -> (8, 8, 32)
    _conv_relu_pool_layer(read_from(p3_ref), write_flat,
                          w3_ref, b3_ref, tmp_ref, 16, 16, 16, 32, CH=16)

    # Final Linear(2048 -> n_out) + ReLU, as a sum over the 64 spatial
    # positions of (1, 32) @ (32, n_out) (weight pre-ordered to HWC).
    n_out = o_ref.shape[-1]

    def fc_step(p, acc):
        xrow = x3_ref[pl.ds(p, 1), :]                  # (1, 32)
        return acc + jnp.dot(xrow, wfc_ref[p],
                             preferred_element_type=jnp.float32)

    acc = lax.fori_loop(0, 64, fc_step, jnp.zeros((1, n_out), f32))
    out = jnp.maximum(acc + bfc_ref[...], 0.0)
    o_ref[...] = out.reshape(1, 1, n_out)


# ----------------------------- pallas_call wrapper --------------------------- #

def shapes_base_model_forward(x_nchw, kp):
    """Pallas implementation of ShapesBaseModel.forward (x_nchw: (N, 3, 64, 64))."""
    n = x_nchw.shape[0]
    n_out = kp["wfc"].shape[-1]
    x = jnp.transpose(x_nchw, (0, 2, 3, 1)).astype(jnp.float32)   # NHWC
    # Zero pad: 1 row top/bottom, 8 cols left (interior sublane-aligned) + 1 right.
    xp = jnp.pad(x, ((0, 0), (1, 1), (8, 1), (0, 0)))             # (N, 66, 73, 3)

    out = pl.pallas_call(
        fused_shapes_kernel,
        out_shape=jax.ShapeDtypeStruct((n, 1, n_out), jnp.float32),
        grid=(n,),
        in_specs=[
            pl.BlockSpec((1, 66, 73, 3), lambda i: (i, 0, 0, 0)),
            pl.BlockSpec((9, 3, 8), lambda i: (0, 0, 0)),
            pl.BlockSpec((1, 8), lambda i: (0, 0)),
            pl.BlockSpec((9, 8, 16), lambda i: (0, 0, 0)),
            pl.BlockSpec((1, 16), lambda i: (0, 0)),
            pl.BlockSpec((9, 16, 32), lambda i: (0, 0, 0)),
            pl.BlockSpec((1, 32), lambda i: (0, 0)),
            pl.BlockSpec((64, 32, n_out), lambda i: (0, 0, 0)),
            pl.BlockSpec((1, n_out), lambda i: (0, 0)),
        ],
        out_specs=pl.BlockSpec((1, 1, n_out), lambda i: (i, 0, 0)),
        scratch_shapes=[
            pltpu.VMEM((34, 41, 8), jnp.float32),    # padded layer-2 input
            pltpu.VMEM((18, 25, 16), jnp.float32),   # padded layer-3 input
            pltpu.VMEM((256, 32), jnp.float32),      # maxpool staging buffer
            pltpu.VMEM((64, 32), jnp.float32),       # flattened layer-3 output
        ],
        compiler_params=pltpu.CompilerParams(
            dimension_semantics=("parallel",),
            vmem_limit_bytes=48 * 1024 * 1024,
        ),
    )(xp, kp["w1"], kp["b1"], kp["w2"], kp["b2"], kp["w3"], kp["b3"],
      kp["wfc"], kp["bfc"])
    return out.reshape(n, n_out)


# ----------------- parameter init (PyTorch layout) + relayout ---------------- #

def init_params(key, n_output=64):
    def conv_init(k, cout, cin):
        k1, k2 = jax.random.split(k)
        bound = 1.0 / math.sqrt(cin * 9)
        w = jax.random.uniform(k1, (cout, cin, 3, 3), jnp.float32, -bound, bound)
        b = jax.random.uniform(k2, (cout,), jnp.float32, -bound, bound)
        return w, b

    k1, k2, k3, k4 = jax.random.split(key, 4)
    w1, b1 = conv_init(k1, 8, 3)
    w2, b2 = conv_init(k2, 16, 8)
    w3, b3 = conv_init(k3, 32, 16)
    kf1, kf2 = jax.random.split(k4)
    bound = 1.0 / math.sqrt(2048)
    wfc = jax.random.uniform(kf1, (n_output, 2048), jnp.float32, -bound, bound)
    bfc = jax.random.uniform(kf2, (n_output,), jnp.float32, -bound, bound)
    return dict(w1=w1, b1=b1, w2=w2, b2=b2, w3=w3, b3=b3, wfc=wfc, bfc=bfc)


def prepare_kernel_params(params):
    """One-time weight re-layout into the kernel's formats (done outside jit)."""
    def conv_w(w):  # (Cout, Cin, 3, 3) -> (9, Cin, Cout), tap index = kh*3 + kw
        cout, cin = w.shape[0], w.shape[1]
        return jnp.transpose(w, (2, 3, 1, 0)).reshape(9, cin, cout)

    c3 = params["w3"].shape[0]            # 32 channels after layer 3
    n_out = params["wfc"].shape[0]
    # (n_out, 2048) with columns in torch (c, h, w) order -> (p=h*8+w, c, n_out)
    wfc3 = params["wfc"].reshape(n_out, c3, 8, 8)
    wfc3 = jnp.transpose(wfc3, (2, 3, 1, 0)).reshape(64, c3, n_out)
    return dict(
        w1=conv_w(params["w1"]), b1=params["b1"].reshape(1, -1),
        w2=conv_w(params["w2"]), b2=params["b2"].reshape(1, -1),
        w3=conv_w(params["w3"]), b3=params["b3"].reshape(1, -1),
        wfc=wfc3, bfc=params["bfc"].reshape(1, -1),
    )


# ------------------------------ JAX reference -------------------------------- #

def reference_forward(x_nchw, params):
    def conv(x, w, b):
        y = lax.conv_general_dilated(x, w, (1, 1), ((1, 1), (1, 1)),
                                     dimension_numbers=("NCHW", "OIHW", "NCHW"))
        return y + b[None, :, None, None]

    def pool(x):
        return lax.reduce_window(x, -jnp.inf, lax.max,
                                 (1, 1, 2, 2), (1, 1, 2, 2), "VALID")

    x = pool(jax.nn.relu(conv(x_nchw, params["w1"], params["b1"])))
    x = pool(jax.nn.relu(conv(x, params["w2"], params["b2"])))
    x = pool(jax.nn.relu(conv(x, params["w3"], params["b3"])))
    x = x.reshape(x.shape[0], -1)  # NCHW flatten (C-major), matches torch.flatten
    return jax.nn.relu(x @ params["wfc"].T + params["bfc"])


# ----------------------------------- main ------------------------------------ #

if __name__ == "__main__":
    key = jax.random.PRNGKey(0)
    kx, kp_key = jax.random.split(key)
    params = init_params(kp_key, n_output=64)
    kparams = prepare_kernel_params(params)     # weight relayout done once, outside jit
    x = jax.random.normal(kx, (2, 3, 64, 64), jnp.float32)  # NCHW, as the module expects

    fwd = jax.jit(shapes_base_model_forward)
    out = jax.block_until_ready(fwd(x, kparams))
    assert out.shape == (2, 64), out.shape

    ref = reference_forward(x, params)
    if not bool(jnp.allclose(out, ref, rtol=2e-2, atol=2e-2)):
        err = float(jnp.max(jnp.abs(out - ref)))
        raise AssertionError(f"Pallas output does not match JAX reference (max abs err {err})")

    print("KERNEL_OK")
</pallas_src>

<mosaic_0001>
module attributes {stable_mosaic.version = 11 : i64} {
  func.func @fused_shapes_kernel(%arg0: i32, %arg1: memref<1x66x73x3xf32, #tpu.memory_space<vmem>>, %arg2: memref<9x3x8xf32, #tpu.memory_space<vmem>>, %arg3: memref<1x8xf32, #tpu.memory_space<vmem>>, %arg4: memref<9x8x16xf32, #tpu.memory_space<vmem>>, %arg5: memref<1x16xf32, #tpu.memory_space<vmem>>, %arg6: memref<9x16x32xf32, #tpu.memory_space<vmem>>, %arg7: memref<1x32xf32, #tpu.memory_space<vmem>>, %arg8: memref<64x32x64xf32, #tpu.memory_space<vmem>>, %arg9: memref<1x64xf32, #tpu.memory_space<vmem>>, %arg10: memref<1x1x64xf32, #tpu.memory_space<vmem>>, %arg11: memref<34x41x8xf32, #tpu.memory_space<vmem>>, %arg12: memref<18x25x16xf32, #tpu.memory_space<vmem>>, %arg13: memref<256x32xf32, #tpu.memory_space<vmem>>, %arg14: memref<64x32xf32, #tpu.memory_space<vmem>>) attributes {dimension_semantics = [#tpu.dimension_semantics<parallel>], iteration_bounds = array<i64: 2>, scalar_prefetch = 0 : i64, scratch_operands = 4 : i64, tpu.core_type = #tpu.core_type<tc>, window_params = [{transform_indices = @transform_0, window_bounds = array<i64: 1, 66, 73, 3>}, {pipeline_mode = #tpu.pipeline_mode<synchronous>, transform_indices = @transform_1, window_bounds = array<i64: 9, 3, 8>}, {pipeline_mode = #tpu.pipeline_mode<synchronous>, transform_indices = @transform_2, window_bounds = array<i64: 1, 8>}, {pipeline_mode = #tpu.pipeline_mode<synchronous>, transform_indices = @transform_3, window_bounds = array<i64: 9, 8, 16>}, {pipeline_mode = #tpu.pipeline_mode<synchronous>, transform_indices = @transform_4, window_bounds = array<i64: 1, 16>}, {pipeline_mode = #tpu.pipeline_mode<synchronous>, transform_indices = @transform_5, window_bounds = array<i64: 9, 16, 32>}, {pipeline_mode = #tpu.pipeline_mode<synchronous>, transform_indices = @transform_6, window_bounds = array<i64: 1, 32>}, {pipeline_mode = #tpu.pipeline_mode<synchronous>, transform_indices = @transform_7, window_bounds = array<i64: 64, 32, 64>}, {pipeline_mode = #tpu.pipeline_mode<synchronous>, transform_indices = @transform_8, window_bounds = array<i64: 1, 64>}, {transform_indices = @transform_9, window_bounds = array<i64: 1, 1, 64>}]} {
    %cst = arith.constant 0.000000e+00 : f32
    %0 = vector.broadcast %cst : f32 to vector<34x41x8xf32>
    %c0 = arith.constant 0 : index
    %c0_0 = arith.constant 0 : index
    %c0_1 = arith.constant 0 : index
    %1 = vector.load %arg11[%c0, %c0_0, %c0_1] : memref<34x41x8xf32, #tpu.memory_space<vmem>>, vector<34x41x8xf32>
    tpu.vector_store %arg11[%c0, %c0_0, %c0_1], %0 {strides = array<i32>} : memref<34x41x8xf32, #tpu.memory_space<vmem>>, vector<34x41x8xf32>,
    %cst_2 = arith.constant 0.000000e+00 : f32
    %2 = vector.broadcast %cst_2 : f32 to vector<18x25x16xf32>
    %c0_3 = arith.constant 0 : index
    %c0_4 = arith.constant 0 : index
    %c0_5 = arith.constant 0 : index
    %3 = vector.load %arg12[%c0_3, %c0_4, %c0_5] : memref<18x25x16xf32, #tpu.memory_space<vmem>>, vector<18x25x16xf32>
    tpu.vector_store %arg12[%c0_3, %c0_4, %c0_5], %2 {strides = array<i32>} : memref<18x25x16xf32, #tpu.memory_space<vmem>>, vector<18x25x16xf32>,
    %c0_i32 = arith.constant 0 : i32
    %c8_i32 = arith.constant 8 : i32
    %4 = arith.addi %c0_i32, %c8_i32 : i32
    %c1_i32 = arith.constant 1 : i32
    scf.for %arg15 = %c0_i32 to %4 step %c1_i32  : i32 {
      %c8_i32_87 = arith.constant 8 : i32
      %107 = arith.muli %arg15, %c8_i32_87 : i32
      %c0_i32_88 = arith.constant 0 : i32
      %108 = arith.addi %107, %c0_i32_88 : i32
      %c0_89 = arith.constant 0 : index
      %109 = arith.index_cast %108 : i32 to index
      %c7_90 = arith.constant 7 : index
      %c0_91 = arith.constant 0 : index
      %110 = vector.load %arg1[%c0_89, %109, %c7_90, %c0_91] : memref<1x66x73x3xf32, #tpu.memory_space<vmem>>, vector<1x8x64x3xf32>
      %111 = vector.shape_cast %110 : vector<1x8x64x3xf32> to vector<8x64x3xf32>
      %112 = vector.shape_cast %111 : vector<8x64x3xf32> to vector<512x3xf32>
      %c0_92 = arith.constant 0 : index
      %c0_93 = arith.constant 0 : index
      %c0_94 = arith.constant 0 : index
      %113 = vector.load %arg2[%c0_92, %c0_93, %c0_94] : memref<9x3x8xf32, #tpu.memory_space<vmem>>, vector<1x3x8xf32>
      %114 = vector.shape_cast %113 : vector<1x3x8xf32> to vector<3x8xf32>
      %cst_95 = arith.constant dense<0.000000e+00> : vector<512x8xf32>
      %115 = tpu.matmul %112, %114, %cst_95 {dimension_numbers = #tpu.dot_dimension_numbers<[1], [0], [0], [1], [0, 0, 1, 1], [], []>} : vector<512x3xf32>, vector<3x8xf32>, vector<512x8xf32> -> vector<512x8xf32>
      %c0_i32_96 = arith.constant 0 : i32
      %116 = arith.addi %107, %c0_i32_96 : i32
      %c0_97 = arith.constant 0 : index
      %117 = arith.index_cast %116 : i32 to index
      %c8_98 = arith.constant 8 : index
      %c0_99 = arith.constant 0 : index
      %118 = vector.load %arg1[%c0_97, %117, %c8_98, %c0_99] : memref<1x66x73x3xf32, #tpu.memory_space<vmem>>, vector<1x8x64x3xf32>
      %119 = vector.shape_cast %118 : vector<1x8x64x3xf32> to vector<8x64x3xf32>
      %120 = vector.shape_cast %119 : vector<8x64x3xf32> to vector<512x3xf32>
      %c1_100 = arith.constant 1 : index
      %c0_101 = arith.constant 0 : index
      %c0_102 = arith.constant 0 : index
      %121 = vector.load %arg2[%c1_100, %c0_101, %c0_102] : memref<9x3x8xf32, #tpu.memory_space<vmem>>, vector<1x3x8xf32>
      %122 = vector.shape_cast %121 : vector<1x3x8xf32> to vector<3x8xf32>
      %cst_103 = arith.constant dense<0.000000e+00> : vector<512x8xf32>
      %123 = tpu.matmul %120, %122, %cst_103 {dimension_numbers = #tpu.dot_dimension_numbers<[1], [0], [0], [1], [0, 0, 1, 1], [], []>} : vector<512x3xf32>, vector<3x8xf32>, vector<512x8xf32> -> vector<512x8xf32>
      %124 = arith.addf %115, %123 : vector<512x8xf32>
      %c0_i32_104 = arith.constant 0 : i32
      %125 = arith.addi %107, %c0_i32_104 : i32
      %c0_105 = arith.constant 0 : index
      %126 = arith.index_cast %125 : i32 to index
      %c9_106 = arith.constant 9 : index
      %c0_107 = arith.constant 0 : index
      %127 = vector.load %arg1[%c0_105, %126, %c9_106, %c0_107] : memref<1x66x73x3xf32, #tpu.memory_space<vmem>>, vector<1x8x64x3xf32>
      %128 = vector.shape_cast %127 : vector<1x8x64x3xf32> to vector<8x64x3xf32>
      %129 = vector.shape_cast %128 : vector<8x64x3xf32> to vector<512x3xf32>
      %c2_108 = arith.constant 2 : index
      %c0_109 = arith.constant 0 : index
      %c0_110 = arith.constant 0 : index
      %130 = vector.load %arg2[%c2_108, %c0_109, %c0_110] : memref<9x3x8xf32, #tpu.memory_space<vmem>>, vector<1x3x8xf32>
      %131 = vector.shape_cast %130 : vector<1x3x8xf32> to vector<3x8xf32>
      %cst_111 = arith.constant dense<0.000000e+00> : vector<512x8xf32>
      %132 = tpu.matmul %129, %131, %cst_111 {dimension_numbers = #tpu.dot_dimension_numbers<[1], [0], [0], [1], [0, 0, 1, 1], [], []>} : vector<512x3xf32>, vector<3x8xf32>, vector<512x8xf32> -> vector<512x8xf32>
      %133 = arith.addf %124, %132 : vector<512x8xf32>
      %c1_i32_112 = arith.constant 1 : i32
      %134 = arith.addi %107, %c1_i32_112 : i32
      %c0_113 = arith.constant 0 : index
      %135 = arith.index_cast %134 : i32 to index
      %c7_114 = arith.constant 7 : index
      %c0_115 = arith.constant 0 : index
      %136 = vector.load %arg1[%c0_113, %135, %c7_114, %c0_115] : memref<1x66x73x3xf32, #tpu.memory_space<vmem>>, vector<1x8x64x3xf32>
      %137 = vector.shape_cast %136 : vector<1x8x64x3xf32> to vector<8x64x3xf32>
      %138 = vector.shape_cast %137 : vector<8x64x3xf32> to vector<512x3xf32>
      %c3_116 = arith.constant 3 : index
      %c0_117 = arith.constant 0 : index
      %c0_118 = arith.constant 0 : index
      %139 = vector.load %arg2[%c3_116, %c0_117, %c0_118] : memref<9x3x8xf32, #tpu.memory_space<vmem>>, vector<1x3x8xf32>
      %140 = vector.shape_cast %139 : vector<1x3x8xf32> to vector<3x8xf32>
      %cst_119 = arith.constant dense<0.000000e+00> : vector<512x8xf32>
      %141 = tpu.matmul %138, %140, %cst_119 {dimension_numbers = #tpu.dot_dimension_numbers<[1], [0], [0], [1], [0, 0, 1, 1], [], []>} : vector<512x3xf32>, vector<3x8xf32>, vector<512x8xf32> -> vector<512x8xf32>
      %142 = arith.addf %133, %141 : vector<512x8xf32>
      %c1_i32_120 = arith.constant 1 : i32
      %143 = arith.addi %107, %c1_i32_120 : i32
      %c0_121 = arith.constant 0 : index
      %144 = arith.index_cast %143 : i32 to index
      %c8_122 = arith.constant 8 : index
      %c0_123 = arith.constant 0 : index
      %145 = vector.load %arg1[%c0_121, %144, %c8_122, %c0_123] : memref<1x66x73x3xf32, #tpu.memory_space<vmem>>, vector<1x8x64x3xf32>
      %146 = vector.shape_cast %145 : vector<1x8x64x3xf32> to vector<8x64x3xf32>
      %147 = vector.shape_cast %146 : vector<8x64x3xf32> to vector<512x3xf32>
      %c4_124 = arith.constant 4 : index
      %c0_125 = arith.constant 0 : index
      %c0_126 = arith.constant 0 : index
      %148 = vector.load %arg2[%c4_124, %c0_125, %c0_126] : memref<9x3x8xf32, #tpu.memory_space<vmem>>, vector<1x3x8xf32>
      %149 = vector.shape_cast %148 : vector<1x3x8xf32> to vector<3x8xf32>
      %cst_127 = arith.constant dense<0.000000e+00> : vector<512x8xf32>
      %150 = tpu.matmul %147, %149, %cst_127 {dimension_numbers = #tpu.dot_dimension_numbers<[1], [0], [0], [1], [0, 0, 1, 1], [], []>} : vector<512x3xf32>, vector<3x8xf32>, vector<512x8xf32> -> vector<512x8xf32>
      %151 = arith.addf %142, %150 : vector<512x8xf32>
      %c1_i32_128 = arith.constant 1 : i32
      %152 = arith.addi %107, %c1_i32_128 : i32
      %c0_129 = arith.constant 0 : index
      %153 = arith.index_cast %152 : i32 to index
      %c9_130 = arith.constant 9 : index
      %c0_131 = arith.constant 0 : index
      %154 = vector.load %arg1[%c0_129, %153, %c9_130, %c0_131] : memref<1x66x73x3xf32, #tpu.memory_space<vmem>>, vector<1x8x64x3xf32>
      %155 = vector.shape_cast %154 : vector<1x8x64x3xf32> to vector<8x64x3xf32>
      %156 = vector.shape_cast %155 : vector<8x64x3xf32> to vector<512x3xf32>
      %c5_132 = arith.constant 5 : index
      %c0_133 = arith.constant 0 : index
      %c0_134 = arith.constant 0 : index
      %157 = vector.load %arg2[%c5_132, %c0_133, %c0_134] : memref<9x3x8xf32, #tpu.memory_space<vmem>>, vector<1x3x8xf32>
      %158 = vector.shape_cast %157 : vector<1x3x8xf32> to vector<3x8xf32>
      %cst_135 = arith.constant dense<0.000000e+00> : vector<512x8xf32>
      %159 = tpu.matmul %156, %158, %cst_135 {dimension_numbers = #tpu.dot_dimension_numbers<[1], [0], [0], [1], [0, 0, 1, 1], [], []>} : vector<512x3xf32>, vector<3x8xf32>, vector<512x8xf32> -> vector<512x8xf32>
      %160 = arith.addf %151, %159 : vector<512x8xf32>
      %c2_i32_136 = arith.constant 2 : i32
      %161 = arith.addi %107, %c2_i32_136 : i32
      %c0_137 = arith.constant 0 : index
      %162 = arith.index_cast %161 : i32 to index
      %c7_138 = arith.constant 7 : index
      %c0_139 = arith.constant 0 : index
      %163 = vector.load %arg1[%c0_137, %162, %c7_138, %c0_139] : memref<1x66x73x3xf32, #tpu.memory_space<vmem>>, vector<1x8x64x3xf32>
      %164 = vector.shape_cast %163 : vector<1x8x64x3xf32> to vector<8x64x3xf32>
      %165 = vector.shape_cast %164 : vector<8x64x3xf32> to vector<512x3xf32>
      %c6_140 = arith.constant 6 : index
      %c0_141 = arith.constant 0 : index
      %c0_142 = arith.constant 0 : index
      %166 = vector.load %arg2[%c6_140, %c0_141, %c0_142] : memref<9x3x8xf32, #tpu.memory_space<vmem>>, vector<1x3x8xf32>
      %167 = vector.shape_cast %166 : vector<1x3x8xf32> to vector<3x8xf32>
      %cst_143 = arith.constant dense<0.000000e+00> : vector<512x8xf32>
      %168 = tpu.matmul %165, %167, %cst_143 {dimension_numbers = #tpu.dot_dimension_numbers<[1], [0], [0], [1], [0, 0, 1, 1], [], []>} : vector<512x3xf32>, vector<3x8xf32>, vector<512x8xf32> -> vector<512x8xf32>
      %169 = arith.addf %160, %168 : vector<512x8xf32>
      %c2_i32_144 = arith.constant 2 : i32
      %170 = arith.addi %107, %c2_i32_144 : i32
      %c0_145 = arith.constant 0 : index
      %171 = arith.index_cast %170 : i32 to index
      %c8_146 = arith.constant 8 : index
      %c0_147 = arith.constant 0 : index
      %172 = vector.load %arg1[%c0_145, %171, %c8_146, %c0_147] : memref<1x66x73x3xf32, #tpu.memory_space<vmem>>, vector<1x8x64x3xf32>
      %173 = vector.shape_cast %172 : vector<1x8x64x3xf32> to vector<8x64x3xf32>
      %174 = vector.shape_cast %173 : vector<8x64x3xf32> to vector<512x3xf32>
      %c7_148 = arith.constant 7 : index
      %c0_149 = arith.constant 0 : index
      %c0_150 = arith.constant 0 : index
      %175 = vector.load %arg2[%c7_148, %c0_149, %c0_150] : memref<9x3x8xf32, #tpu.memory_space<vmem>>, vector<1x3x8xf32>
      %176 = vector.shape_cast %175 : vector<1x3x8xf32> to vector<3x8xf32>
      %cst_151 = arith.constant dense<0.000000e+00> : vector<512x8xf32>
      %177 = tpu.matmul %174, %176, %cst_151 {dimension_numbers = #tpu.dot_dimension_numbers<[1], [0], [0], [1], [0, 0, 1, 1], [], []>} : vector<512x3xf32>, vector<3x8xf32>, vector<512x8xf32> -> vector<512x8xf32>
      %178 = arith.addf %169, %177 : vector<512x8xf32>
      %c2_i32_152 = arith.constant 2 : i32
      %179 = arith.addi %107, %c2_i32_152 : i32
      %c0_153 = arith.constant 0 : index
      %180 = arith.index_cast %179 : i32 to index
      %c9_154 = arith.constant 9 : index
      %c0_155 = arith.constant 0 : index
      %181 = vector.load %arg1[%c0_153, %180, %c9_154, %c0_155] : memref<1x66x73x3xf32, #tpu.memory_space<vmem>>, vector<1x8x64x3xf32>
      %182 = vector.shape_cast %181 : vector<1x8x64x3xf32> to vector<8x64x3xf32>
      %183 = vector.shape_cast %182 : vector<8x64x3xf32> to vector<512x3xf32>
      %c8_156 = arith.constant 8 : index
      %c0_157 = arith.constant 0 : index
      %c0_158 = arith.constant 0 : index
      %184 = vector.load %arg2[%c8_156, %c0_157, %c0_158] : memref<9x3x8xf32, #tpu.memory_space<vmem>>, vector<1x3x8xf32>
      %185 = vector.shape_cast %184 : vector<1x3x8xf32> to vector<3x8xf32>
      %cst_159 = arith.constant dense<0.000000e+00> : vector<512x8xf32>
      %186 = tpu.matmul %183, %185, %cst_159 {dimension_numbers = #tpu.dot_dimension_numbers<[1], [0], [0], [1], [0, 0, 1, 1], [], []>} : vector<512x3xf32>, vector<3x8xf32>, vector<512x8xf32> -> vector<512x8xf32>
      %187 = arith.addf %178, %186 : vector<512x8xf32>
      %c0_160 = arith.constant 0 : index
      %c0_161 = arith.constant 0 : index
      %188 = vector.load %arg3[%c0_160, %c0_161] : memref<1x8xf32, #tpu.memory_space<vmem>>, vector<1x8xf32>
      %189 = vector.broadcast %188 : vector<1x8xf32> to vector<512x8xf32>
      %190 = arith.addf %187, %189 : vector<512x8xf32>
      %cst_162 = arith.constant 0.000000e+00 : f32
      %191 = vector.broadcast %cst_162 : f32 to vector<512x8xf32>
      %192 = arith.maximumf %190, %191 : vector<512x8xf32>
      %193 = vector.shape_cast %192 : vector<512x8xf32> to vector<4x2x64x8xf32>
      %194 = vector.extract_strided_slice %193 {offsets = [0, 0, 0, 0], sizes = [4, 1, 64, 8], strides = [1, 1, 1, 1]} : vector<4x2x64x8xf32> to vector<4x1x64x8xf32>
      %195 = vector.shape_cast %194 : vector<4x1x64x8xf32> to vector<4x64x8xf32>
      %196 = vector.extract_strided_slice %193 {offsets = [0, 1, 0, 0], sizes = [4, 1, 64, 8], strides = [1, 1, 1, 1]} : vector<4x2x64x8xf32> to vector<4x1x64x8xf32>
      %197 = vector.shape_cast %196 : vector<4x1x64x8xf32> to vector<4x64x8xf32>
      %198 = arith.maximumf %195, %197 : vector<4x64x8xf32>
      %199 = vector.shape_cast %198 : vector<4x64x8xf32> to vector<256x8xf32>
      %c0_163 = arith.constant 0 : index
      %c0_164 = arith.constant 0 : index
      %200 = vector.load %arg13[%c0_163, %c0_164] : memref<256x32xf32, #tpu.memory_space<vmem>>, vector<256x8xf32>
      tpu.vector_store %arg13[%c0_163, %c0_164], %199 {strides = array<i32>} : memref<256x32xf32, #tpu.memory_space<vmem>>, vector<256x8xf32>,
      %c0_165 = arith.constant 0 : index
      %c0_166 = arith.constant 0 : index
      %201 = tpu.strided_load %arg13[%c0_165, %c0_166] {strides = array<i32: 2, 1>} : memref<256x32xf32, #tpu.memory_space<vmem>>, vector<128x8xf32>
      %c1_167 = arith.constant 1 : index
      %c0_168 = arith.constant 0 : index
      %202 = tpu.strided_load %arg13[%c1_167, %c0_168] {strides = array<i32: 2, 1>} : memref<256x32xf32, #tpu.memory_space<vmem>>, vector<128x8xf32>
      %203 = arith.maximumf %201, %202 : vector<128x8xf32>
      %204 = vector.shape_cast %203 : vector<128x8xf32> to vector<4x32x8xf32>
      %c4_i32_169 = arith.constant 4 : i32
      %205 = arith.muli %arg15, %c4_i32_169 : i32
      %c1_i32_170 = arith.constant 1 : i32
      %206 = arith.addi %c1_i32_170, %205 : i32
      %207 = arith.index_cast %206 : i32 to index
      %c8_171 = arith.constant 8 : index
      %c0_172 = arith.constant 0 : index
      %208 = vector.load %arg11[%207, %c8_171, %c0_172] : memref<34x41x8xf32, #tpu.memory_space<vmem>>, vector<4x32x8xf32>
      tpu.vector_store %arg11[%207, %c8_171, %c0_172], %204 {strides = array<i32>} : memref<34x41x8xf32, #tpu.memory_space<vmem>>, vector<4x32x8xf32>,
    }
    %c8_i32_6 = arith.constant 8 : i32
    %c0_i32_7 = arith.constant 0 : i32
    %c4_i32 = arith.constant 4 : i32
    %5 = arith.addi %c0_i32_7, %c4_i32 : i32
    %c1_i32_8 = arith.constant 1 : i32
    scf.for %arg15 = %c0_i32_7 to %5 step %c1_i32_8  : i32 {
      %c8_i32_87 = arith.constant 8 : i32
      %107 = arith.muli %arg15, %c8_i32_87 : i32
      %c0_i32_88 = arith.constant 0 : i32
      %108 = arith.addi %107, %c0_i32_88 : i32
      %109 = arith.index_cast %108 : i32 to index
      %c7_89 = arith.constant 7 : index
      %c0_90 = arith.constant 0 : index
      %110 = vector.load %arg11[%109, %c7_89, %c0_90] : memref<34x41x8xf32, #tpu.memory_space<vmem>>, vector<8x32x8xf32>
      %111 = vector.shape_cast %110 : vector<8x32x8xf32> to vector<256x8xf32>
      %c0_91 = arith.constant 0 : index
      %c0_92 = arith.constant 0 : index
      %c0_93 = arith.constant 0 : index
      %112 = vector.load %arg4[%c0_91, %c0_92, %c0_93] : memref<9x8x16xf32, #tpu.memory_space<vmem>>, vector<1x8x16xf32>
      %113 = vector.shape_cast %112 : vector<1x8x16xf32> to vector<8x16xf32>
      %cst_94 = arith.constant dense<0.000000e+00> : vector<256x16xf32>
      %114 = tpu.matmul %111, %113, %cst_94 {dimension_numbers = #tpu.dot_dimension_numbers<[1], [0], [0], [1], [0, 0, 1, 1], [], []>} : vector<256x8xf32>, vector<8x16xf32>, vector<256x16xf32> -> vector<256x16xf32>
      %c0_i32_95 = arith.constant 0 : i32
      %115 = arith.addi %107, %c0_i32_95 : i32
      %116 = arith.index_cast %115 : i32 to index
      %c8_96 = arith.constant 8 : index
      %c0_97 = arith.constant 0 : index
      %117 = vector.load %arg11[%116, %c8_96, %c0_97] : memref<34x41x8xf32, #tpu.memory_space<vmem>>, vector<8x32x8xf32>
      %118 = vector.shape_cast %117 : vector<8x32x8xf32> to vector<256x8xf32>
      %c1_98 = arith.constant 1 : index
      %c0_99 = arith.constant 0 : index
      %c0_100 = arith.constant 0 : index
      %119 = vector.load %arg4[%c1_98, %c0_99, %c0_100] : memref<9x8x16xf32, #tpu.memory_space<vmem>>, vector<1x8x16xf32>
      %120 = vector.shape_cast %119 : vector<1x8x16xf32> to vector<8x16xf32>
      %cst_101 = arith.constant dense<0.000000e+00> : vector<256x16xf32>
      %121 = tpu.matmul %118, %120, %cst_101 {dimension_numbers = #tpu.dot_dimension_numbers<[1], [0], [0], [1], [0, 0, 1, 1], [], []>} : vector<256x8xf32>, vector<8x16xf32>, vector<256x16xf32> -> vector<256x16xf32>
      %122 = arith.addf %114, %121 : vector<256x16xf32>
      %c0_i32_102 = arith.constant 0 : i32
      %123 = arith.addi %107, %c0_i32_102 : i32
      %124 = arith.index_cast %123 : i32 to index
      %c9_103 = arith.constant 9 : index
      %c0_104 = arith.constant 0 : index
      %125 = vector.load %arg11[%124, %c9_103, %c0_104] : memref<34x41x8xf32, #tpu.memory_space<vmem>>, vector<8x32x8xf32>
      %126 = vector.shape_cast %125 : vector<8x32x8xf32> to vector<256x8xf32>
      %c2_105 = arith.constant 2 : index
      %c0_106 = arith.constant 0 : index
      %c0_107 = arith.constant 0 : index
      %127 = vector.load %arg4[%c2_105, %c0_106, %c0_107] : memref<9x8x16xf32, #tpu.memory_space<vmem>>, vector<1x8x16xf32>
      %128 = vector.shape_cast %127 : vector<1x8x16xf32> to vector<8x16xf32>
      %cst_108 = arith.constant dense<0.000000e+00> : vector<256x16xf32>
      %129 = tpu.matmul %126, %128, %cst_108 {dimension_numbers = #tpu.dot_dimension_numbers<[1], [0], [0], [1], [0, 0, 1, 1], [], []>} : vector<256x8xf32>, vector<8x16xf32>, vector<256x16xf32> -> vector<256x16xf32>
      %130 = arith.addf %122, %129 : vector<256x16xf32>
      %c1_i32_109 = arith.constant 1 : i32
      %131 = arith.addi %107, %c1_i32_109 : i32
      %132 = arith.index_cast %131 : i32 to index
      %c7_110 = arith.constant 7 : index
      %c0_111 = arith.constant 0 : index
      %133 = vector.load %arg11[%132, %c7_110, %c0_111] : memref<34x41x8xf32, #tpu.memory_space<vmem>>, vector<8x32x8xf32>
      %134 = vector.shape_cast %133 : vector<8x32x8xf32> to vector<256x8xf32>
      %c3_112 = arith.constant 3 : index
      %c0_113 = arith.constant 0 : index
      %c0_114 = arith.constant 0 : index
      %135 = vector.load %arg4[%c3_112, %c0_113, %c0_114] : memref<9x8x16xf32, #tpu.memory_space<vmem>>, vector<1x8x16xf32>
      %136 = vector.shape_cast %135 : vector<1x8x16xf32> to vector<8x16xf32>
      %cst_115 = arith.constant dense<0.000000e+00> : vector<256x16xf32>
      %137 = tpu.matmul %134, %136, %cst_115 {dimension_numbers = #tpu.dot_dimension_numbers<[1], [0], [0], [1], [0, 0, 1, 1], [], []>} : vector<256x8xf32>, vector<8x16xf32>, vector<256x16xf32> -> vector<256x16xf32>
      %138 = arith.addf %130, %137 : vector<256x16xf32>
      %c1_i32_116 = arith.constant 1 : i32
      %139 = arith.addi %107, %c1_i32_116 : i32
      %140 = arith.index_cast %139 : i32 to index
      %c8_117 = arith.constant 8 : index
      %c0_118 = arith.constant 0 : index
      %141 = vector.load %arg11[%140, %c8_117, %c0_118] : memref<34x41x8xf32, #tpu.memory_space<vmem>>, vector<8x32x8xf32>
      %142 = vector.shape_cast %141 : vector<8x32x8xf32> to vector<256x8xf32>
      %c4_119 = arith.constant 4 : index
      %c0_120 = arith.constant 0 : index
      %c0_121 = arith.constant 0 : index
      %143 = vector.load %arg4[%c4_119, %c0_120, %c0_121] : memref<9x8x16xf32, #tpu.memory_space<vmem>>, vector<1x8x16xf32>
      %144 = vector.shape_cast %143 : vector<1x8x16xf32> to vector<8x16xf32>
      %cst_122 = arith.constant dense<0.000000e+00> : vector<256x16xf32>
      %145 = tpu.matmul %142, %144, %cst_122 {dimension_numbers = #tpu.dot_dimension_numbers<[1], [0], [0], [1], [0, 0, 1, 1], [], []>} : vector<256x8xf32>, vector<8x16xf32>, vector<256x16xf32> -> vector<256x16xf32>
      %146 = arith.addf %138, %145 : vector<256x16xf32>
      %c1_i32_123 = arith.constant 1 : i32
      %147 = arith.addi %107, %c1_i32_123 : i32
      %148 = arith.index_cast %147 : i32 to index
      %c9_124 = arith.constant 9 : index
      %c0_125 = arith.constant 0 : index
      %149 = vector.load %arg11[%148, %c9_124, %c0_125] : memref<34x41x8xf32, #tpu.memory_space<vmem>>, vector<8x32x8xf32>
      %150 = vector.shape_cast %149 : vector<8x32x8xf32> to vector<256x8xf32>
      %c5_126 = arith.constant 5 : index
      %c0_127 = arith.constant 0 : index
      %c0_128 = arith.constant 0 : index
      %151 = vector.load %arg4[%c5_126, %c0_127, %c0_128] : memref<9x8x16xf32, #tpu.memory_space<vmem>>, vector<1x8x16xf32>
      %152 = vector.shape_cast %151 : vector<1x8x16xf32> to vector<8x16xf32>
      %cst_129 = arith.constant dense<0.000000e+00> : vector<256x16xf32>
      %153 = tpu.matmul %150, %152, %cst_129 {dimension_numbers = #tpu.dot_dimension_numbers<[1], [0], [0], [1], [0, 0, 1, 1], [], []>} : vector<256x8xf32>, vector<8x16xf32>, vector<256x16xf32> -> vector<256x16xf32>
      %154 = arith.addf %146, %153 : vector<256x16xf32>
      %c2_i32_130 = arith.constant 2 : i32
      %155 = arith.addi %107, %c2_i32_130 : i32
      %156 = arith.index_cast %155 : i32 to index
      %c7_131 = arith.constant 7 : index
      %c0_132 = arith.constant 0 : index
      %157 = vector.load %arg11[%156, %c7_131, %c0_132] : memref<34x41x8xf32, #tpu.memory_space<vmem>>, vector<8x32x8xf32>
      %158 = vector.shape_cast %157 : vector<8x32x8xf32> to vector<256x8xf32>
      %c6_133 = arith.constant 6 : index
      %c0_134 = arith.constant 0 : index
      %c0_135 = arith.constant 0 : index
      %159 = vector.load %arg4[%c6_133, %c0_134, %c0_135] : memref<9x8x16xf32, #tpu.memory_space<vmem>>, vector<1x8x16xf32>
      %160 = vector.shape_cast %159 : vector<1x8x16xf32> to vector<8x16xf32>
      %cst_136 = arith.constant dense<0.000000e+00> : vector<256x16xf32>
      %161 = tpu.matmul %158, %160, %cst_136 {dimension_numbers = #tpu.dot_dimension_numbers<[1], [0], [0], [1], [0, 0, 1, 1], [], []>} : vector<256x8xf32>, vector<8x16xf32>, vector<256x16xf32> -> vector<256x16xf32>
      %162 = arith.addf %154, %161 : vector<256x16xf32>
      %c2_i32_137 = arith.constant 2 : i32
      %163 = arith.addi %107, %c2_i32_137 : i32
      %164 = arith.index_cast %163 : i32 to index
      %c8_138 = arith.constant 8 : index
      %c0_139 = arith.constant 0 : index
      %165 = vector.load %arg11[%164, %c8_138, %c0_139] : memref<34x41x8xf32, #tpu.memory_space<vmem>>, vector<8x32x8xf32>
      %166 = vector.shape_cast %165 : vector<8x32x8xf32> to vector<256x8xf32>
      %c7_140 = arith.constant 7 : index
      %c0_141 = arith.constant 0 : index
      %c0_142 = arith.constant 0 : index
      %167 = vector.load %arg4[%c7_140, %c0_141, %c0_142] : memref<9x8x16xf32, #tpu.memory_space<vmem>>, vector<1x8x16xf32>
      %168 = vector.shape_cast %167 : vector<1x8x16xf32> to vector<8x16xf32>
      %cst_143 = arith.constant dense<0.000000e+00> : vector<256x16xf32>
      %169 = tpu.matmul %166, %168, %cst_143 {dimension_numbers = #tpu.dot_dimension_numbers<[1], [0], [0], [1], [0, 0, 1, 1], [], []>} : vector<256x8xf32>, vector<8x16xf32>, vector<256x16xf32> -> vector<256x16xf32>
      %170 = arith.addf %162, %169 : vector<256x16xf32>
      %c2_i32_144 = arith.constant 2 : i32
      %171 = arith.addi %107, %c2_i32_144 : i32
      %172 = arith.index_cast %171 : i32 to index
      %c9_145 = arith.constant 9 : index
      %c0_146 = arith.constant 0 : index
      %173 = vector.load %arg11[%172, %c9_145, %c0_146] : memref<34x41x8xf32, #tpu.memory_space<vmem>>, vector<8x32x8xf32>
      %174 = vector.shape_cast %173 : vector<8x32x8xf32> to vector<256x8xf32>
      %c8_147 = arith.constant 8 : index
      %c0_148 = arith.constant 0 : index
      %c0_149 = arith.constant 0 : index
      %175 = vector.load %arg4[%c8_147, %c0_148, %c0_149] : memref<9x8x16xf32, #tpu.memory_space<vmem>>, vector<1x8x16xf32>
      %176 = vector.shape_cast %175 : vector<1x8x16xf32> to vector<8x16xf32>
      %cst_150 = arith.constant dense<0.000000e+00> : vector<256x16xf32>
      %177 = tpu.matmul %174, %176, %cst_150 {dimension_numbers = #tpu.dot_dimension_numbers<[1], [0], [0], [1], [0, 0, 1, 1], [], []>} : vector<256x8xf32>, vector<8x16xf32>, vector<256x16xf32> -> vector<256x16xf32>
      %178 = arith.addf %170, %177 : vector<256x16xf32>
      %c0_151 = arith.constant 0 : index
      %c0_152 = arith.constant 0 : index
      %179 = vector.load %arg5[%c0_151, %c0_152] : memref<1x16xf32, #tpu.memory_space<vmem>>, vector<1x16xf32>
      %180 = vector.broadcast %179 : vector<1x16xf32> to vector<256x16xf32>
      %181 = arith.addf %178, %180 : vector<256x16xf32>
      %cst_153 = arith.constant 0.000000e+00 : f32
      %182 = vector.broadcast %cst_153 : f32 to vector<256x16xf32>
      %183 = arith.maximumf %181, %182 : vector<256x16xf32>
      %184 = vector.shape_cast %183 : vector<256x16xf32> to vector<4x2x32x16xf32>
      %185 = vector.extract_strided_slice %184 {offsets = [0, 0, 0, 0], sizes = [4, 1, 32, 16], strides = [1, 1, 1, 1]} : vector<4x2x32x16xf32> to vector<4x1x32x16xf32>
      %186 = vector.shape_cast %185 : vector<4x1x32x16xf32> to vector<4x32x16xf32>
      %187 = vector.extract_strided_slice %184 {offsets = [0, 1, 0, 0], sizes = [4, 1, 32, 16], strides = [1, 1, 1, 1]} : vector<4x2x32x16xf32> to vector<4x1x32x16xf32>
      %188 = vector.shape_cast %187 : vector<4x1x32x16xf32> to vector<4x32x16xf32>
      %189 = arith.maximumf %186, %188 : vector<4x32x16xf32>
      %190 = vector.shape_cast %189 : vector<4x32x16xf32> to vector<128x16xf32>
      %c0_154 = arith.constant 0 : index
      %c0_155 = arith.constant 0 : index
      %191 = vector.load %arg13[%c0_154, %c0_155] : memref<256x32xf32, #tpu.memory_space<vmem>>, vector<128x16xf32>
      tpu.vector_store %arg13[%c0_154, %c0_155], %190 {strides = array<i32>} : memref<256x32xf32, #tpu.memory_space<vmem>>, vector<128x16xf32>,
      %c0_156 = arith.constant 0 : index
      %c0_157 = arith.constant 0 : index
      %192 = tpu.strided_load %arg13[%c0_156, %c0_157] {strides = array<i32: 2, 1>} : memref<256x32xf32, #tpu.memory_space<vmem>>, vector<64x16xf32>
      %c1_158 = arith.constant 1 : index
      %c0_159 = arith.constant 0 : index
      %193 = tpu.strided_load %arg13[%c1_158, %c0_159] {strides = array<i32: 2, 1>} : memref<256x32xf32, #tpu.memory_space<vmem>>, vector<64x16xf32>
      %194 = arith.maximumf %192, %193 : vector<64x16xf32>
      %195 = vector.shape_cast %194 : vector<64x16xf32> to vector<4x16x16xf32>
      %c4_i32_160 = arith.constant 4 : i32
      %196 = arith.muli %arg15, %c4_i32_160 : i32
      %c1_i32_161 = arith.constant 1 : i32
      %197 = arith.addi %c1_i32_161, %196 : i32
      %198 = arith.index_cast %197 : i32 to index
      %c8_162 = arith.constant 8 : index
      %c0_163 = arith.constant 0 : index
      %199 = vector.load %arg12[%198, %c8_162, %c0_163] : memref<18x25x16xf32, #tpu.memory_space<vmem>>, vector<4x16x16xf32>
      tpu.vector_store %arg12[%198, %c8_162, %c0_163], %195 {strides = array<i32>} : memref<18x25x16xf32, #tpu.memory_space<vmem>>, vector<4x16x16xf32>,
    }
    %c4_i32_9 = arith.constant 4 : i32
    %c0_i32_10 = arith.constant 0 : i32
    %c16_i32 = arith.constant 16 : i32
    %6 = arith.muli %c0_i32_10, %c16_i32 : i32
    %c0_i32_11 = arith.constant 0 : i32
    %7 = arith.addi %6, %c0_i32_11 : i32
    %8 = arith.index_cast %7 : i32 to index
    %c7 = arith.constant 7 : index
    %c0_12 = arith.constant 0 : index
    %9 = vector.load %arg12[%8, %c7, %c0_12] : memref<18x25x16xf32, #tpu.memory_space<vmem>>, vector<16x16x16xf32>
    %10 = vector.shape_cast %9 : vector<16x16x16xf32> to vector<256x16xf32>
    %c0_13 = arith.constant 0 : index
    %c0_14 = arith.constant 0 : index
    %c0_15 = arith.constant 0 : index
    %11 = vector.load %arg6[%c0_13, %c0_14, %c0_15] : memref<9x16x32xf32, #tpu.memory_space<vmem>>, vector<1x16x32xf32>
    %12 = vector.shape_cast %11 : vector<1x16x32xf32> to vector<16x32xf32>
    %cst_16 = arith.constant dense<0.000000e+00> : vector<256x32xf32>
    %13 = tpu.matmul %10, %12, %cst_16 {dimension_numbers = #tpu.dot_dimension_numbers<[1], [0], [0], [1], [0, 0, 1, 1], [], []>} : vector<256x16xf32>, vector<16x32xf32>, vector<256x32xf32> -> vector<256x32xf32>
    %c0_i32_17 = arith.constant 0 : i32
    %14 = arith.addi %6, %c0_i32_17 : i32
    %15 = arith.index_cast %14 : i32 to index
    %c8 = arith.constant 8 : index
    %c0_18 = arith.constant 0 : index
    %16 = vector.load %arg12[%15, %c8, %c0_18] : memref<18x25x16xf32, #tpu.memory_space<vmem>>, vector<16x16x16xf32>
    %17 = vector.shape_cast %16 : vector<16x16x16xf32> to vector<256x16xf32>
    %c1 = arith.constant 1 : index
    %c0_19 = arith.constant 0 : index
    %c0_20 = arith.constant 0 : index
    %18 = vector.load %arg6[%c1, %c0_19, %c0_20] : memref<9x16x32xf32, #tpu.memory_space<vmem>>, vector<1x16x32xf32>
    %19 = vector.shape_cast %18 : vector<1x16x32xf32> to vector<16x32xf32>
    %cst_21 = arith.constant dense<0.000000e+00> : vector<256x32xf32>
    %20 = tpu.matmul %17, %19, %cst_21 {dimension_numbers = #tpu.dot_dimension_numbers<[1], [0], [0], [1], [0, 0, 1, 1], [], []>} : vector<256x16xf32>, vector<16x32xf32>, vector<256x32xf32> -> vector<256x32xf32>
    %21 = arith.addf %13, %20 : vector<256x32xf32>
    %c0_i32_22 = arith.constant 0 : i32
    %22 = arith.addi %6, %c0_i32_22 : i32
    %23 = arith.index_cast %22 : i32 to index
    %c9 = arith.constant 9 : index
    %c0_23 = arith.constant 0 : index
    %24 = vector.load %arg12[%23, %c9, %c0_23] : memref<18x25x16xf32, #tpu.memory_space<vmem>>, vector<16x16x16xf32>
    %25 = vector.shape_cast %24 : vector<16x16x16xf32> to vector<256x16xf32>
    %c2 = arith.constant 2 : index
    %c0_24 = arith.constant 0 : index
    %c0_25 = arith.constant 0 : index
    %26 = vector.load %arg6[%c2, %c0_24, %c0_25] : memref<9x16x32xf32, #tpu.memory_space<vmem>>, vector<1x16x32xf32>
    %27 = vector.shape_cast %26 : vector<1x16x32xf32> to vector<16x32xf32>
    %cst_26 = arith.constant dense<0.000000e+00> : vector<256x32xf32>
    %28 = tpu.matmul %25, %27, %cst_26 {dimension_numbers = #tpu.dot_dimension_numbers<[1], [0], [0], [1], [0, 0, 1, 1], [], []>} : vector<256x16xf32>, vector<16x32xf32>, vector<256x32xf32> -> vector<256x32xf32>
    %29 = arith.addf %21, %28 : vector<256x32xf32>
    %c1_i32_27 = arith.constant 1 : i32
    %30 = arith.addi %6, %c1_i32_27 : i32
    %31 = arith.index_cast %30 : i32 to index
    %c7_28 = arith.constant 7 : index
    %c0_29 = arith.constant 0 : index
    %32 = vector.load %arg12[%31, %c7_28, %c0_29] : memref<18x25x16xf32, #tpu.memory_space<vmem>>, vector<16x16x16xf32>
    %33 = vector.shape_cast %32 : vector<16x16x16xf32> to vector<256x16xf32>
    %c3 = arith.constant 3 : index
    %c0_30 = arith.constant 0 : index
    %c0_31 = arith.constant 0 : index
    %34 = vector.load %arg6[%c3, %c0_30, %c0_31] : memref<9x16x32xf32, #tpu.memory_space<vmem>>, vector<1x16x32xf32>
    %35 = vector.shape_cast %34 : vector<1x16x32xf32> to vector<16x32xf32>
    %cst_32 = arith.constant dense<0.000000e+00> : vector<256x32xf32>
    %36 = tpu.matmul %33, %35, %cst_32 {dimension_numbers = #tpu.dot_dimension_numbers<[1], [0], [0], [1], [0, 0, 1, 1], [], []>} : vector<256x16xf32>, vector<16x32xf32>, vector<256x32xf32> -> vector<256x32xf32>
    %37 = arith.addf %29, %36 : vector<256x32xf32>
    %c1_i32_33 = arith.constant 1 : i32
    %38 = arith.addi %6, %c1_i32_33 : i32
    %39 = arith.index_cast %38 : i32 to index
    %c8_34 = arith.constant 8 : index
    %c0_35 = arith.constant 0 : index
    %40 = vector.load %arg12[%39, %c8_34, %c0_35] : memref<18x25x16xf32, #tpu.memory_space<vmem>>, vector<16x16x16xf32>
    %41 = vector.shape_cast %40 : vector<16x16x16xf32> to vector<256x16xf32>
    %c4 = arith.constant 4 : index
    %c0_36 = arith.constant 0 : index
    %c0_37 = arith.constant 0 : index
    %42 = vector.load %arg6[%c4, %c0_36, %c0_37] : memref<9x16x32xf32, #tpu.memory_space<vmem>>, vector<1x16x32xf32>
    %43 = vector.shape_cast %42 : vector<1x16x32xf32> to vector<16x32xf32>
    %cst_38 = arith.constant dense<0.000000e+00> : vector<256x32xf32>
    %44 = tpu.matmul %41, %43, %cst_38 {dimension_numbers = #tpu.dot_dimension_numbers<[1], [0], [0], [1], [0, 0, 1, 1], [], []>} : vector<256x16xf32>, vector<16x32xf32>, vector<256x32xf32> -> vector<256x32xf32>
    %45 = arith.addf %37, %44 : vector<256x32xf32>
    %c1_i32_39 = arith.constant 1 : i32
    %46 = arith.addi %6, %c1_i32_39 : i32
    %47 = arith.index_cast %46 : i32 to index
    %c9_40 = arith.constant 9 : index
    %c0_41 = arith.constant 0 : index
    %48 = vector.load %arg12[%47, %c9_40, %c0_41] : memref<18x25x16xf32, #tpu.memory_space<vmem>>, vector<16x16x16xf32>
    %49 = vector.shape_cast %48 : vector<16x16x16xf32> to vector<256x16xf32>
    %c5 = arith.constant 5 : index
    %c0_42 = arith.constant 0 : index
    %c0_43 = arith.constant 0 : index
    %50 = vector.load %arg6[%c5, %c0_42, %c0_43] : memref<9x16x32xf32, #tpu.memory_space<vmem>>, vector<1x16x32xf32>
    %51 = vector.shape_cast %50 : vector<1x16x32xf32> to vector<16x32xf32>
    %cst_44 = arith.constant dense<0.000000e+00> : vector<256x32xf32>
    %52 = tpu.matmul %49, %51, %cst_44 {dimension_numbers = #tpu.dot_dimension_numbers<[1], [0], [0], [1], [0, 0, 1, 1], [], []>} : vector<256x16xf32>, vector<16x32xf32>, vector<256x32xf32> -> vector<256x32xf32>
    %53 = arith.addf %45, %52 : vector<256x32xf32>
    %c2_i32 = arith.constant 2 : i32
    %54 = arith.addi %6, %c2_i32 : i32
    %55 = arith.index_cast %54 : i32 to index
    %c7_45 = arith.constant 7 : index
    %c0_46 = arith.constant 0 : index
    %56 = vector.load %arg12[%55, %c7_45, %c0_46] : memref<18x25x16xf32, #tpu.memory_space<vmem>>, vector<16x16x16xf32>
    %57 = vector.shape_cast %56 : vector<16x16x16xf32> to vector<256x16xf32>
    %c6 = arith.constant 6 : index
    %c0_47 = arith.constant 0 : index
    %c0_48 = arith.constant 0 : index
    %58 = vector.load %arg6[%c6, %c0_47, %c0_48] : memref<9x16x32xf32, #tpu.memory_space<vmem>>, vector<1x16x32xf32>
    %59 = vector.shape_cast %58 : vector<1x16x32xf32> to vector<16x32xf32>
    %cst_49 = arith.constant dense<0.000000e+00> : vector<256x32xf32>
    %60 = tpu.matmul %57, %59, %cst_49 {dimension_numbers = #tpu.dot_dimension_numbers<[1], [0], [0], [1], [0, 0, 1, 1], [], []>} : vector<256x16xf32>, vector<16x32xf32>, vector<256x32xf32> -> vector<256x32xf32>
    %61 = arith.addf %53, %60 : vector<256x32xf32>
    %c2_i32_50 = arith.constant 2 : i32
    %62 = arith.addi %6, %c2_i32_50 : i32
    %63 = arith.index_cast %62 : i32 to index
    %c8_51 = arith.constant 8 : index
    %c0_52 = arith.constant 0 : index
    %64 = vector.load %arg12[%63, %c8_51, %c0_52] : memref<18x25x16xf32, #tpu.memory_space<vmem>>, vector<16x16x16xf32>
    %65 = vector.shape_cast %64 : vector<16x16x16xf32> to vector<256x16xf32>
    %c7_53 = arith.constant 7 : index
    %c0_54 = arith.constant 0 : index
    %c0_55 = arith.constant 0 : index
    %66 = vector.load %arg6[%c7_53, %c0_54, %c0_55] : memref<9x16x32xf32, #tpu.memory_space<vmem>>, vector<1x16x32xf32>
    %67 = vector.shape_cast %66 : vector<1x16x32xf32> to vector<16x32xf32>
    %cst_56 = arith.constant dense<0.000000e+00> : vector<256x32xf32>
    %68 = tpu.matmul %65, %67, %cst_56 {dimension_numbers = #tpu.dot_dimension_numbers<[1], [0], [0], [1], [0, 0, 1, 1], [], []>} : vector<256x16xf32>, vector<16x32xf32>, vector<256x32xf32> -> vector<256x32xf32>
    %69 = arith.addf %61, %68 : vector<256x32xf32>
    %c2_i32_57 = arith.constant 2 : i32
    %70 = arith.addi %6, %c2_i32_57 : i32
    %71 = arith.index_cast %70 : i32 to index
    %c9_58 = arith.constant 9 : index
    %c0_59 = arith.constant 0 : index
    %72 = vector.load %arg12[%71, %c9_58, %c0_59] : memref<18x25x16xf32, #tpu.memory_space<vmem>>, vector<16x16x16xf32>
    %73 = vector.shape_cast %72 : vector<16x16x16xf32> to vector<256x16xf32>
    %c8_60 = arith.constant 8 : index
    %c0_61 = arith.constant 0 : index
    %c0_62 = arith.constant 0 : index
    %74 = vector.load %arg6[%c8_60, %c0_61, %c0_62] : memref<9x16x32xf32, #tpu.memory_space<vmem>>, vector<1x16x32xf32>
    %75 = vector.shape_cast %74 : vector<1x16x32xf32> to vector<16x32xf32>
    %cst_63 = arith.constant dense<0.000000e+00> : vector<256x32xf32>
    %76 = tpu.matmul %73, %75, %cst_63 {dimension_numbers = #tpu.dot_dimension_numbers<[1], [0], [0], [1], [0, 0, 1, 1], [], []>} : vector<256x16xf32>, vector<16x32xf32>, vector<256x32xf32> -> vector<256x32xf32>
    %77 = arith.addf %69, %76 : vector<256x32xf32>
    %c0_64 = arith.constant 0 : index
    %c0_65 = arith.constant 0 : index
    %78 = vector.load %arg7[%c0_64, %c0_65] : memref<1x32xf32, #tpu.memory_space<vmem>>, vector<1x32xf32>
    %79 = vector.broadcast %78 : vector<1x32xf32> to vector<256x32xf32>
    %80 = arith.addf %77, %79 : vector<256x32xf32>
    %cst_66 = arith.constant 0.000000e+00 : f32
    %81 = vector.broadcast %cst_66 : f32 to vector<256x32xf32>
    %82 = arith.maximumf %80, %81 : vector<256x32xf32>
    %83 = vector.shape_cast %82 : vector<256x32xf32> to vector<8x2x16x32xf32>
    %84 = vector.extract_strided_slice %83 {offsets = [0, 0, 0, 0], sizes = [8, 1, 16, 32], strides = [1, 1, 1, 1]} : vector<8x2x16x32xf32> to vector<8x1x16x32xf32>
    %85 = vector.shape_cast %84 : vector<8x1x16x32xf32> to vector<8x16x32xf32>
    %86 = vector.extract_strided_slice %83 {offsets = [0, 1, 0, 0], sizes = [8, 1, 16, 32], strides = [1, 1, 1, 1]} : vector<8x2x16x32xf32> to vector<8x1x16x32xf32>
    %87 = vector.shape_cast %86 : vector<8x1x16x32xf32> to vector<8x16x32xf32>
    %88 = arith.maximumf %85, %87 : vector<8x16x32xf32>
    %89 = vector.shape_cast %88 : vector<8x16x32xf32> to vector<128x32xf32>
    %c0_67 = arith.constant 0 : index
    %c0_68 = arith.constant 0 : index
    %90 = vector.load %arg13[%c0_67, %c0_68] : memref<256x32xf32, #tpu.memory_space<vmem>>, vector<128x32xf32>
    tpu.vector_store %arg13[%c0_67, %c0_68], %89 {strides = array<i32>} : memref<256x32xf32, #tpu.memory_space<vmem>>, vector<128x32xf32>,
    %c0_69 = arith.constant 0 : index
    %c0_70 = arith.constant 0 : index
    %91 = tpu.strided_load %arg13[%c0_69, %c0_70] {strides = array<i32: 2, 1>} : memref<256x32xf32, #tpu.memory_space<vmem>>, vector<64x32xf32>
    %c1_71 = arith.constant 1 : index
    %c0_72 = arith.constant 0 : index
    %92 = tpu.strided_load %arg13[%c1_71, %c0_72] {strides = array<i32: 2, 1>} : memref<256x32xf32, #tpu.memory_space<vmem>>, vector<64x32xf32>
    %93 = arith.maximumf %91, %92 : vector<64x32xf32>
    %c8_i32_73 = arith.constant 8 : i32
    %94 = arith.muli %c0_i32_10, %c8_i32_73 : i32
    %c8_i32_74 = arith.constant 8 : i32
    %95 = arith.muli %94, %c8_i32_74 : i32
    %96 = arith.index_cast %95 : i32 to index
    %c0_75 = arith.constant 0 : index
    %97 = vector.load %arg14[%96, %c0_75] : memref<64x32xf32, #tpu.memory_space<vmem>>, vector<64x32xf32>
    tpu.vector_store %arg14[%96, %c0_75], %93 {strides = array<i32>} : memref<64x32xf32, #tpu.memory_space<vmem>>, vector<64x32xf32>,
    %c1_i32_76 = arith.constant 1 : i32
    %cst_77 = arith.constant 0.000000e+00 : f32
    %98 = vector.broadcast %cst_77 : f32 to vector<1x64xf32>
    %c0_i32_78 = arith.constant 0 : i32
    %c64_i32 = arith.constant 64 : i32
    %99 = arith.addi %c0_i32_78, %c64_i32 : i32
    %c1_i32_79 = arith.constant 1 : i32
    %100 = scf.for %arg15 = %c0_i32_78 to %99 step %c1_i32_79 iter_args(%arg16 = %98) -> (vector<1x64xf32>)  : i32 {
      %107 = arith.index_cast %arg15 : i32 to index
      %c0_87 = arith.constant 0 : index
      %108 = vector.load %arg14[%107, %c0_87] : memref<64x32xf32, #tpu.memory_space<vmem>>, vector<1x32xf32>
      %109 = arith.index_cast %arg15 : i32 to index
      %c0_88 = arith.constant 0 : index
      %c0_89 = arith.constant 0 : index
      %110 = vector.load %arg8[%109, %c0_88, %c0_89] : memref<64x32x64xf32, #tpu.memory_space<vmem>>, vector<1x32x64xf32>
      %111 = vector.shape_cast %110 : vector<1x32x64xf32> to vector<32x64xf32>
      %cst_90 = arith.constant dense<0.000000e+00> : vector<1x64xf32>
      %112 = tpu.matmul %108, %111, %cst_90 {dimension_numbers = #tpu.dot_dimension_numbers<[1], [0], [0], [1], [0, 0, 1, 1], [], []>} : vector<1x32xf32>, vector<32x64xf32>, vector<1x64xf32> -> vector<1x64xf32>
      %113 = arith.addf %arg16, %112 : vector<1x64xf32>
      scf.yield %113 : vector<1x64xf32>
    }
    %c64_i32_80 = arith.constant 64 : i32
    %c0_81 = arith.constant 0 : index
    %c0_82 = arith.constant 0 : index
    %101 = vector.load %arg9[%c0_81, %c0_82] : memref<1x64xf32, #tpu.memory_space<vmem>>, vector<1x64xf32>
    %102 = arith.addf %100, %101 : vector<1x64xf32>
    %cst_83 = arith.constant 0.000000e+00 : f32
    %103 = vector.broadcast %cst_83 : f32 to vector<1x64xf32>
    %104 = arith.maximumf %102, %103 : vector<1x64xf32>
    %105 = vector.shape_cast %104 : vector<1x64xf32> to vector<1x1x64xf32>
    %c0_84 = arith.constant 0 : index
    %c0_85 = arith.constant 0 : index
    %c0_86 = arith.constant 0 : index
    %106 = vector.load %arg10[%c0_84, %c0_85, %c0_86] : memref<1x1x64xf32, #tpu.memory_space<vmem>>, vector<1x1x64xf32>
    tpu.vector_store %arg10[%c0_84, %c0_85, %c0_86], %105 {strides = array<i32>} : memref<1x1x64xf32, #tpu.memory_space<vmem>>, vector<1x1x64xf32>,
    return
  }
  func.func @transform_0(%arg0: i32) -> (i32, i32, i32, i32) {
    %c0_i32 = arith.constant 0 : i32
    %c0_i32_0 = arith.constant 0 : i32
    %c0_i32_1 = arith.constant 0 : i32
    %c0_i32_2 = arith.constant 0 : i32
    return %arg0, %c0_i32, %c0_i32_0, %c0_i32_1 : i32, i32, i32, i32
  }
  func.func @transform_1(%arg0: i32) -> (i32, i32, i32) {
    %c0_i32 = arith.constant 0 : i32
    %c0_i32_0 = arith.constant 0 : i32
    %c0_i32_1 = arith.constant 0 : i32
    %c0_i32_2 = arith.constant 0 : i32
    return %c0_i32, %c0_i32_0, %c0_i32_1 : i32, i32, i32
  }
  func.func @transform_2(%arg0: i32) -> (i32, i32) {
    %c0_i32 = arith.constant 0 : i32
    %c0_i32_0 = arith.constant 0 : i32
    %c0_i32_1 = arith.constant 0 : i32
    return %c0_i32, %c0_i32_0 : i32, i32
  }
  func.func @transform_3(%arg0: i32) -> (i32, i32, i32) {
    %c0_i32 = arith.constant 0 : i32
    %c0_i32_0 = arith.constant 0 : i32
    %c0_i32_1 = arith.constant 0 : i32
    %c0_i32_2 = arith.constant 0 : i32
    return %c0_i32, %c0_i32_0, %c0_i32_1 : i32, i32, i32
  }
  func.func @transform_4(%arg0: i32) -> (i32, i32) {
    %c0_i32 = arith.constant 0 : i32
    %c0_i32_0 = arith.constant 0 : i32
    %c0_i32_1 = arith.constant 0 : i32
    return %c0_i32, %c0_i32_0 : i32, i32
  }
  func.func @transform_5(%arg0: i32) -> (i32, i32, i32) {
    %c0_i32 = arith.constant 0 : i32
    %c0_i32_0 = arith.constant 0 : i32
    %c0_i32_1 = arith.constant 0 : i32
    %c0_i32_2 = arith.constant 0 : i32
    return %c0_i32, %c0_i32_0, %c0_i32_1 : i32, i32, i32
  }
  func.func @transform_6(%arg0: i32) -> (i32, i32) {
    %c0_i32 = arith.constant 0 : i32
    %c0_i32_0 = arith.constant 0 : i32
    %c0_i32_1 = arith.constant 0 : i32
    return %c0_i32, %c0_i32_0 : i32, i32
  }
  func.func @transform_7(%arg0: i32) -> (i32, i32, i32) {
    %c0_i32 = arith.constant 0 : i32
    %c0_i32_0 = arith.constant 0 : i32
    %c0_i32_1 = arith.constant 0 : i32
    %c0_i32_2 = arith.constant 0 : i32
    return %c0_i32, %c0_i32_0, %c0_i32_1 : i32, i32, i32
  }
  func.func @transform_8(%arg0: i32) -> (i32, i32) {
    %c0_i32 = arith.constant 0 : i32
    %c0_i32_0 = arith.constant 0 : i32
    %c0_i32_1 = arith.constant 0 : i32
    return %c0_i32, %c0_i32_0 : i32, i32
  }
  func.func @transform_9(%arg0: i32) -> (i32, i32, i32) {
    %c0_i32 = arith.constant 0 : i32
    %c0_i32_0 = arith.constant 0 : i32
    %c0_i32_1 = arith.constant 0 : i32
    return %arg0, %c0_i32, %c0_i32_0 : i32, i32, i32
  }
}

</mosaic_0001>

<bundles_post_ra>
// kernel: shapes_base_model_forward.1
= control target key start
LH: loop header
LB: loop body
LE: loop exit
PB: predicated region body
PF: predicated region fallthrough
CT: control target
= control target key end

     0   :  { %14 = vsyncpa [#allocation7], 0  ;;  %s17986_s0 = inlined_call_operand.vmem [shape: f32[2,66,73,3], index: 0, kind: input, shape index: {}]   ;;  %s17987_s1 = inlined_call_operand.vmem [shape: f32[9,3,8], index: 1, kind: input, shape index: {}]   ;;  %s17988_s2 = inlined_call_operand.vmem [shape: f32[1,8], index: 2, kind: input, shape index: {}]   ;;  %s17989_s3 = inlined_call_operand.vmem [shape: f32[9,8,16], index: 3, kind: input, shape index: {}]   ;;  %s17990_s4 = inlined_call_operand.vmem [shape: f32[1,16], index: 4, kind: input, shape index: {}]   ;;  %s17991_s5 = inlined_call_operand.vmem [shape: f32[9,16,32], index: 5, kind: input, shape index: {}]   ;;  %s17992_s6 = inlined_call_operand.vmem [shape: f32[1,32], index: 6, kind: input, shape index: {}]   ;;  %s17993_s7 = inlined_call_operand.vmem [shape: f32[64,32,64], index: 7, kind: input, shape index: {}]   ;;  %s17994_s8 = inlined_call_operand.vmem [shape: f32[1,64], index: 8, kind: input, shape index: {}]   ;;  %s17995_s9 = inlined_call_operand.hbm [shape: f32[2,1,64], index: 9, kind: output, shape index: {}]  }
   0x1   :  { %16 = vsyncpa [#allocation7 + $0x1], 0  ;;  %s12960_s30 = smov 0   ;;  %s12962_s10 = smov 0  }
   0x2   :  { %s12964_s11 = smov 0   ;;  %s12966_s12 = smov 0  }
   0x3 LB: > { %s12981_s13 = sadd.s32 4294967295, %s12891_s12   ;;  %s10905_s14 = sadd.s32 4294967294, %s12891_s12   ;;  %s12891_s12 = sphi %s12966_s12, %s18329_s12   ;;  %s12887_s11 = sphi %s12964_s11, %s18328_s11   ;;  %s12883_s10 = sphi %s12962_s10, %s18327_s10   ;;  %s12879_s30 = sphi %s12960_s30, %s18326_s30  }
   0x4   : > { %s12985_s15 = sadd.s32 1, %s12891_s12   ;;  %s223_s16 = sadd.s32 1, %s12887_s11 }
   0x5   : > { %s220_s17 = ssub.s32 %s12891_s12, %s12985_s15  ;;  %p233_p0 = scmp.ne.s32.totalorder %s12887_s11, %s12883_s10 }
   0x6   : > { %p221_p1 = scmp.eq.s32.totalorder %s220_s17, 0  ;;  %p234_p2 = scmp.eq.s32.totalorder %s12981_s13, 1 }
   0x7   : > { %p239_p3 = scmp.ne.s32.totalorder %s12883_s10, %s12879_s30  ;;  %p240_p4 = scmp.eq.s32.totalorder %s10905_s14, 1 }
   0x8   : > { %s12996_s18 = scalar_select %p221_p1, %s12887_s11, %s223_s16  }
   0x9   : > { %p12998_p5 = por %p234_p2, %p233_p0  ;;  %p13002_p6 = por %p240_p4, %p239_p3 }
   0xa   : > { %p10908_p7 = scmp.ge.s32.totalorder %s12891_s12, 1  ;;  %p290_p8 = scmp.lt.s32.totalorder %s12891_s12, 3 }
   0xc   : > { %p291_p9 = pnand %p10908_p7, %p290_p8 }
   0xe   : > { %294 = sbr.rel (%p291_p9) target bundleno = 3207 (0xc87), region = 56 }
  0x13   : > { %s323_s21 = sand.u32 1, %s12883_s10   ;;  %p325_p10 = scmp.lt.s32.totalorder %s12981_s13, 1  ;;  %vm330_vm0 = vcmask 64512   ;;  %v12909_v0 = vmov 0.0   ;;  %vm336_vm1 = vcmask 57344   ;;  %vm536_vm2 = vcmask 130048  }
  0x14   : > { %331 = vst.msk [vmem:[#allocation2] sm:$0xff] %vm330_vm0, %v12909_v0  ;;  %vm540_vm3 = vcmask 122880   ;;  %s13570_s27 = scalar_lea.vmem [#allocation6], %s323_s21  ;;  %s13572_s28 = smov 0  }
  0x15   : > { %s326_s22 = scalar_select %p325_p10, %s12981_s13, 1  ;;  %332 = vst.msk [vmem:[#allocation2 + $0x8] sm:$0xff] %vm330_vm0, %v12909_v0 }
  0x16   : > { %333 = vst.msk [vmem:[#allocation2 + $0x10] sm:$0xff] %vm330_vm0, %v12909_v0 }
  0x17   : > { %s12736_s23 = smul.u32 5280, %s326_s22  ;;  %334 = vst.msk [vmem:[#allocation2 + $0x18] sm:$0xff] %vm330_vm0, %v12909_v0 }
  0x18   : > { %335 = vst.msk [vmem:[#allocation2 + $0x20] sm:$0xff] %vm330_vm0, %v12909_v0 }
  0x19   : > { %s13024_s26 = scalar_lea.vmem %s17986_s0, %s12736_s23  ;;  %338 = vst.msk [vmem:[#allocation2 + $0x30] sm:$0xff] %vm330_vm0, %v12909_v0 }
  0x1a   : > { %339 = vst.msk [vmem:[#allocation2 + $0x38] sm:$0xff] %vm330_vm0, %v12909_v0 }
  0x1b   : > { %340 = vst.msk [vmem:[#allocation2 + $0x40] sm:$0xff] %vm330_vm0, %v12909_v0 }
  0x1c   : > { %341 = vst.msk [vmem:[#allocation2 + $0x48] sm:$0xff] %vm330_vm0, %v12909_v0 }
  0x1d   : > { %342 = vst.msk [vmem:[#allocation2 + $0x50] sm:$0xff] %vm330_vm0, %v12909_v0 }
  0x1e   : > { %344 = vst.msk [vmem:[#allocation2 + $0x60] sm:$0xff] %vm330_vm0, %v12909_v0 }
  0x1f   : > { %345 = vst.msk [vmem:[#allocation2 + $0x68] sm:$0xff] %vm330_vm0, %v12909_v0 }
  0x20   : > { %346 = vst.msk [vmem:[#allocation2 + $0x70] sm:$0xff] %vm330_vm0, %v12909_v0 }
  0x21   : > { %347 = vst.msk [vmem:[#allocation2 + $0x78] sm:$0xff] %vm330_vm0, %v12909_v0 }
  0x22   : > { %348 = vst.msk [vmem:[#allocation2 + $0x80] sm:$0xff] %vm330_vm0, %v12909_v0 }
  0x23   : > { %350 = vst.msk [vmem:[#allocation2 + $0x90] sm:$0xff] %vm330_vm0, %v12909_v0 }
  0x24   : > { %351 = vst.msk [vmem:[#allocation2 + $0x98] sm:$0xff] %vm330_vm0, %v12909_v0 }
  0x25   : > { %352 = vst.msk [vmem:[#allocation2 + $0xa0] sm:$0xff] %vm330_vm0, %v12909_v0 }
  0x26   : > { %353 = vst.msk [vmem:[#allocation2 + $0xa8] sm:$0xff] %vm330_vm0, %v12909_v0 }
  0x27   : > { %354 = vst.msk [vmem:[#allocation2 + $0xb0] sm:$0xff] %vm330_vm0, %v12909_v0 }
  0x28   : > { %356 = vst.msk [vmem:[#allocation2 + $0xc0] sm:$0xff] %vm330_vm0, %v12909_v0 }
  0x29   : > { %357 = vst.msk [vmem:[#allocation2 + $0xc8] sm:$0xff] %vm330_vm0, %v12909_v0 }
  0x2a   : > { %358 = vst.msk [vmem:[#allocation2 + $0xd0] sm:$0xff] %vm330_vm0, %v12909_v0 }
  0x2b   : > { %359 = vst.msk [vmem:[#allocation2 + $0xd8] sm:$0xff] %vm330_vm0, %v12909_v0 }
  0x2c   : > { %360 = vst.msk [vmem:[#allocation2 + $0xe0] sm:$0xff] %vm330_vm0, %v12909_v0 }
  0x2d   : > { %362 = vst.msk [vmem:[#allocation2 + $0xf0] sm:$0xff] %vm330_vm0, %v12909_v0 }
  0x2e   : > { %363 = vst.msk [vmem:[#allocation2 + $0xf8] sm:$0xff] %vm330_vm0, %v12909_v0 }
  0x2f   : > { %364 = vst.msk [vmem:[#allocation2 + $0x100] sm:$0xff] %vm330_vm0, %v12909_v0 }
  0x30   : > { %365 = vst.msk [vmem:[#allocation2 + $0x108] sm:$0xff] %vm330_vm0, %v12909_v0 }
  0x31   : > { %366 = vst.msk [vmem:[#allocation2 + $0x110] sm:$0xff] %vm330_vm0, %v12909_v0 }
  0x32   : > { %368 = vst.msk [vmem:[#allocation2 + $0x120] sm:$0xff] %vm330_vm0, %v12909_v0 }
  0x33   : > { %369 = vst.msk [vmem:[#allocation2 + $0x128] sm:$0xff] %vm330_vm0, %v12909_v0 }
  0x34   : > { %370 = vst.msk [vmem:[#allocation2 + $0x130] sm:$0xff] %vm330_vm0, %v12909_v0 }
  0x35   : > { %371 = vst.msk [vmem:[#allocation2 + $0x138] sm:$0xff] %vm330_vm0, %v12909_v0 }
  0x36   : > { %372 = vst.msk [vmem:[#allocation2 + $0x140] sm:$0xff] %vm330_vm0, %v12909_v0 }
  0x37   : > { %374 = vst.msk [vmem:[#allocation2 + $0x150] sm:$0xff] %vm330_vm0, %v12909_v0 }
  0x38   : > { %375 = vst.msk [vmem:[#allocation2 + $0x158] sm:$0xff] %vm330_vm0, %v12909_v0 }
  0x39   : > { %376 = vst.msk [vmem:[#allocation2 + $0x160] sm:$0xff] %vm330_vm0, %v12909_v0 }
  0x3a   : > { %377 = vst.msk [vmem:[#allocation2 + $0x168] sm:$0xff] %vm330_vm0, %v12909_v0 }
  0x3b   : > { %378 = vst.msk [vmem:[#allocation2 + $0x170] sm:$0xff] %vm330_vm0, %v12909_v0 }
  0x3c   : > { %380 = vst.msk [vmem:[#allocation2 + $0x180] sm:$0xff] %vm330_vm0, %v12909_v0 }
  0x3d   : > { %381 = vst.msk [vmem:[#allocation2 + $0x188] sm:$0xff] %vm330_vm0, %v12909_v0 }
  0x3e   : > { %382 = vst.msk [vmem:[#allocation2 + $0x190] sm:$0xff] %vm330_vm0, %v12909_v0 }
  0x3f   : > { %383 = vst.msk [vmem:[#allocation2 + $0x198] sm:$0xff] %vm330_vm0, %v12909_v0 }
  0x40   : > { %384 = vst.msk [vmem:[#allocation2 + $0x1a0] sm:$0xff] %vm330_vm0, %v12909_v0 }
  0x41   : > { %386 = vst.msk [vmem:[#allocation2 + $0x1b0] sm:$0xff] %vm330_vm0, %v12909_v0 }
  0x42   : > { %387 = vst.msk [vmem:[#allocation2 + $0x1b8] sm:$0xff] %vm330_vm0, %v12909_v0 }
  0x43   : > { %388 = vst.msk [vmem:[#allocation2 + $0x1c0] sm:$0xff] %vm330_vm0, %v12909_v0 }
  0x44   : > { %389 = vst.msk [vmem:[#allocation2 + $0x1c8] sm:$0xff] %vm330_vm0, %v12909_v0 }
  0x45   : > { %390 = vst.msk [vmem:[#allocation2 + $0x1d0] sm:$0xff] %vm330_vm0, %v12909_v0 }
  0x46   : > { %392 = vst.msk [vmem:[#allocation2 + $0x1e0] sm:$0xff] %vm330_vm0, %v12909_v0 }
  0x47   : > { %393 = vst.msk [vmem:[#allocation2 + $0x1e8] sm:$0xff] %vm330_vm0, %v12909_v0 }
  0x48   : > { %394 = vst.msk [vmem:[#allocation2 + $0x1f0] sm:$0xff] %vm330_vm0, %v12909_v0 }
  0x49   : > { %395 = vst.msk [vmem:[#allocation2 + $0x1f8] sm:$0xff] %vm330_vm0, %v12909_v0 }
  0x4a   : > { %396 = vst.msk [vmem:[#allocation2 + $0x200] sm:$0xff] %vm330_vm0, %v12909_v0 }
  0x4b   : > { %398 = vst.msk [vmem:[#allocation2 + $0x210] sm:$0xff] %vm330_vm0, %v12909_v0 }
  0x4c   : > { %399 = vst.msk [vmem:[#allocation2 + $0x218] sm:$0xff] %vm330_vm0, %v12909_v0 }
  0x4d   : > { %400 = vst.msk [vmem:[#allocation2 + $0x220] sm:$0xff] %vm330_vm0, %v12909_v0 }
  0x4e   : > { %401 = vst.msk [vmem:[#allocation2 + $0x228] sm:$0xff] %vm330_vm0, %v12909_v0 }
  0x4f   : > { %402 = vst.msk [vmem:[#allocation2 + $0x230] sm:$0xff] %vm330_vm0, %v12909_v0 }
  0x50   : > { %404 = vst.msk [vmem:[#allocation2 + $0x240] sm:$0xff] %vm330_vm0, %v12909_v0 }
  0x51   : > { %405 = vst.msk [vmem:[#allocation2 + $0x248] sm:$0xff] %vm330_vm0, %v12909_v0 }
  0x52   : > { %406 = vst.msk [vmem:[#allocation2 + $0x250] sm:$0xff] %vm330_vm0, %v12909_v0 }
  0x53   : > { %407 = vst.msk [vmem:[#allocation2 + $0x258] sm:$0xff] %vm330_vm0, %v12909_v0 }
  0x54   : > { %408 = vst.msk [vmem:[#allocation2 + $0x260] sm:$0xff] %vm330_vm0, %v12909_v0 }
  0x55   : > { %410 = vst.msk [vmem:[#allocation2 + $0x270] sm:$0xff] %vm330_vm0, %v12909_v0 }
  0x56   : > { %411 = vst.msk [vmem:[#allocation2 + $0x278] sm:$0xff] %vm330_vm0, %v12909_v0 }
  0x57   : > { %412 = vst.msk [vmem:[#allocation2 + $0x280] sm:$0xff] %vm330_vm0, %v12909_v0 }
  0x58   : > { %413 = vst.msk [vmem:[#allocation2 + $0x288] sm:$0xff] %vm330_vm0, %v12909_v0 }
  0x59   : > { %414 = vst.msk [vmem:[#allocation2 + $0x290] sm:$0xff] %vm330_vm0, %v12909_v0 }
  0x5a   : > { %416 = vst.msk [vmem:[#allocation2 + $0x2a0] sm:$0xff] %vm330_vm0, %v12909_v0 }
  0x5b   : > { %417 = vst.msk [vmem:[#allocation2 + $0x2a8] sm:$0xff] %vm330_vm0, %v12909_v0 }
  0x5c   : > { %418 = vst.msk [vmem:[#allocation2 + $0x2b0] sm:$0xff] %vm330_vm0, %v12909_v0 }
  0x5d   : > { %419 = vst.msk [vmem:[#allocation2 + $0x2b8] sm:$0xff] %vm330_vm0, %v12909_v0 }
  0x5e   : > { %420 = vst.msk [vmem:[#allocation2 + $0x2c0] sm:$0xff] %vm330_vm0, %v12909_v0 }
  0x5f   : > { %422 = vst.msk [vmem:[#allocation2 + $0x2d0] sm:$0xff] %vm330_vm0, %v12909_v0 }
  0x60   : > { %423 = vst.msk [vmem:[#allocation2 + $0x2d8] sm:$0xff] %vm330_vm0, %v12909_v0 }
  0x61   : > { %424 = vst.msk [vmem:[#allocation2 + $0x2e0] sm:$0xff] %vm330_vm0, %v12909_v0 }
  0x62   : > { %425 = vst.msk [vmem:[#allocation2 + $0x2e8] sm:$0xff] %vm330_vm0, %v12909_v0 }
  0x63   : > { %426 = vst.msk [vmem:[#allocation2 + $0x2f0] sm:$0xff] %vm330_vm0, %v12909_v0 }
  0x64   : > { %428 = vst.msk [vmem:[#allocation2 + $0x300] sm:$0xff] %vm330_vm0, %v12909_v0 }
  0x65   : > { %429 = vst.msk [vmem:[#allocation2 + $0x308] sm:$0xff] %vm330_vm0, %v12909_v0 }
  0x66   : > { %430 = vst.msk [vmem:[#allocation2 + $0x310] sm:$0xff] %vm330_vm0, %v12909_v0 }
  0x67   : > { %431 = vst.msk [vmem:[#allocation2 + $0x318] sm:$0xff] %vm330_vm0, %v12909_v0 }
  0x68   : > { %432 = vst.msk [vmem:[#allocation2 + $0x320] sm:$0xff] %vm330_vm0, %v12909_v0 }
  0x69   : > { %434 = vst.msk [vmem:[#allocation2 + $0x330] sm:$0xff] %vm330_vm0, %v12909_v0 }
  0x6a   : > { %435 = vst.msk [vmem:[#allocation2 + $0x338] sm:$0xff] %vm330_vm0, %v12909_v0 }
  0x6b   : > { %436 = vst.msk [vmem:[#allocation2 + $0x340] sm:$0xff] %vm330_vm0, %v12909_v0 }
  0x6c   : > { %437 = vst.msk [vmem:[#allocation2 + $0x348] sm:$0xff] %vm330_vm0, %v12909_v0 }
  0x6d   : > { %438 = vst.msk [vmem:[#allocation2 + $0x350] sm:$0xff] %vm330_vm0, %v12909_v0 }
  0x6e   : > { %440 = vst.msk [vmem:[#allocation2 + $0x360] sm:$0xff] %vm330_vm0, %v12909_v0 }
  0x6f   : > { %441 = vst.msk [vmem:[#allocation2 + $0x368] sm:$0xff] %vm330_vm0, %v12909_v0 }
  0x70   : > { %442 = vst.msk [vmem:[#allocation2 + $0x370] sm:$0xff] %vm330_vm0, %v12909_v0 }
  0x71   : > { %443 = vst.msk [vmem:[#allocation2 + $0x378] sm:$0xff] %vm330_vm0, %v12909_v0 }
  0x72   : > { %444 = vst.msk [vmem:[#allocation2 + $0x380] sm:$0xff] %vm330_vm0, %v12909_v0 }
  0x73   : > { %446 = vst.msk [vmem:[#allocation2 + $0x390] sm:$0xff] %vm330_vm0, %v12909_v0 }
  0x74   : > { %447 = vst.msk [vmem:[#allocation2 + $0x398] sm:$0xff] %vm330_vm0, %v12909_v0 }
  0x75   : > { %448 = vst.msk [vmem:[#allocation2 + $0x3a0] sm:$0xff] %vm330_vm0, %v12909_v0 }
  0x76   : > { %449 = vst.msk [vmem:[#allocation2 + $0x3a8] sm:$0xff] %vm330_vm0, %v12909_v0 }
  0x77   : > { %450 = vst.msk [vmem:[#allocation2 + $0x3b0] sm:$0xff] %vm330_vm0, %v12909_v0 }
  0x78   : > { %452 = vst.msk [vmem:[#allocation2 + $0x3c0] sm:$0xff] %vm330_vm0, %v12909_v0 }
  0x79   : > { %453 = vst.msk [vmem:[#allocation2 + $0x3c8] sm:$0xff] %vm330_vm0, %v12909_v0 }
  0x7a   : > { %454 = vst.msk [vmem:[#allocation2 + $0x3d0] sm:$0xff] %vm330_vm0, %v12909_v0 }
  0x7b   : > { %455 = vst.msk [vmem:[#allocation2 + $0x3d8] sm:$0xff] %vm330_vm0, %v12909_v0 }
  0x7c   : > { %456 = vst.msk [vmem:[#allocation2 + $0x3e0] sm:$0xff] %vm330_vm0, %v12909_v0 }
  0x7d   : > { %458 = vst.msk [vmem:[#allocation2 + $0x3f0] sm:$0xff] %vm330_vm0, %v12909_v0 }
  0x7e   : > { %459 = vst.msk [vmem:[#allocation2 + $0x3f8] sm:$0xff] %vm330_vm0, %v12909_v0 }
  0x7f   : > { %460 = vst.msk [vmem:[#allocation2 + $0x400] sm:$0xff] %vm330_vm0, %v12909_v0 }
  0x80   : > { %461 = vst.msk [vmem:[#allocation2 + $0x408] sm:$0xff] %vm330_vm0, %v12909_v0 }
  0x81   : > { %462 = vst.msk [vmem:[#allocation2 + $0x410] sm:$0xff] %vm330_vm0, %v12909_v0 }
  0x82   : > { %464 = vst.msk [vmem:[#allocation2 + $0x420] sm:$0xff] %vm330_vm0, %v12909_v0 }
  0x83   : > { %465 = vst.msk [vmem:[#allocation2 + $0x428] sm:$0xff] %vm330_vm0, %v12909_v0 }
  0x84   : > { %466 = vst.msk [vmem:[#allocation2 + $0x430] sm:$0xff] %vm330_vm0, %v12909_v0 }
  0x85   : > { %467 = vst.msk [vmem:[#allocation2 + $0x438] sm:$0xff] %vm330_vm0, %v12909_v0 }
  0x86   : > { %468 = vst.msk [vmem:[#allocation2 + $0x440] sm:$0xff] %vm330_vm0, %v12909_v0 }
  0x87   : > { %470 = vst.msk [vmem:[#allocation2 + $0x450] sm:$0xff] %vm330_vm0, %v12909_v0 }
  0x88   : > { %471 = vst.msk [vmem:[#allocation2 + $0x458] sm:$0xff] %vm330_vm0, %v12909_v0 }
  0x89   : > { %472 = vst.msk [vmem:[#allocation2 + $0x460] sm:$0xff] %vm330_vm0, %v12909_v0 }
  0x8a   : > { %473 = vst.msk [vmem:[#allocation2 + $0x468] sm:$0xff] %vm330_vm0, %v12909_v0 }
  0x8b   : > { %474 = vst.msk [vmem:[#allocation2 + $0x470] sm:$0xff] %vm330_vm0, %v12909_v0 }
  0x8c   : > { %476 = vst.msk [vmem:[#allocation2 + $0x480] sm:$0xff] %vm330_vm0, %v12909_v0 }
  0x8d   : > { %477 = vst.msk [vmem:[#allocation2 + $0x488] sm:$0xff] %vm330_vm0, %v12909_v0 }
  0x8e   : > { %478 = vst.msk [vmem:[#allocation2 + $0x490] sm:$0xff] %vm330_vm0, %v12909_v0 }
  0x8f   : > { %479 = vst.msk [vmem:[#allocation2 + $0x498] sm:$0xff] %vm330_vm0, %v12909_v0 }
  0x90   : > { %480 = vst.msk [vmem:[#allocation2 + $0x4a0] sm:$0xff] %vm330_vm0, %v12909_v0 }
  0x91   : > { %482 = vst.msk [vmem:[#allocation2 + $0x4b0] sm:$0xff] %vm330_vm0, %v12909_v0 }
  0x92   : > { %483 = vst.msk [vmem:[#allocation2 + $0x4b8] sm:$0xff] %vm330_vm0, %v12909_v0 }
  0x93   : > { %484 = vst.msk [vmem:[#allocation2 + $0x4c0] sm:$0xff] %vm330_vm0, %v12909_v0 }
  0x94   : > { %485 = vst.msk [vmem:[#allocation2 + $0x4c8] sm:$0xff] %vm330_vm0, %v12909_v0 }
  0x95   : > { %486 = vst.msk [vmem:[#allocation2 + $0x4d0] sm:$0xff] %vm330_vm0, %v12909_v0 }
  0x96   : > { %488 = vst.msk [vmem:[#allocation2 + $0x4e0] sm:$0xff] %vm330_vm0, %v12909_v0 }
  0x97   : > { %489 = vst.msk [vmem:[#allocation2 + $0x4e8] sm:$0xff] %vm330_vm0, %v12909_v0 }
  0x98   : > { %490 = vst.msk [vmem:[#allocation2 + $0x4f0] sm:$0xff] %vm330_vm0, %v12909_v0 }
  0x99   : > { %491 = vst.msk [vmem:[#allocation2 + $0x4f8] sm:$0xff] %vm330_vm0, %v12909_v0 }
  0x9a   : > { %492 = vst.msk [vmem:[#allocation2 + $0x500] sm:$0xff] %vm330_vm0, %v12909_v0 }
  0x9b   : > { %494 = vst.msk [vmem:[#allocation2 + $0x510] sm:$0xff] %vm330_vm0, %v12909_v0 }
  0x9c   : > { %495 = vst.msk [vmem:[#allocation2 + $0x518] sm:$0xff] %vm330_vm0, %v12909_v0 }
  0x9d   : > { %496 = vst.msk [vmem:[#allocation2 + $0x520] sm:$0xff] %vm330_vm0, %v12909_v0 }
  0x9e   : > { %497 = vst.msk [vmem:[#allocation2 + $0x528] sm:$0xff] %vm330_vm0, %v12909_v0 }
  0x9f   : > { %498 = vst.msk [vmem:[#allocation2 + $0x530] sm:$0xff] %vm330_vm0, %v12909_v0 }
  0xa0   : > { %500 = vst.msk [vmem:[#allocation2 + $0x540] sm:$0xff] %vm330_vm0, %v12909_v0 }
  0xa1   : > { %501 = vst.msk [vmem:[#allocation2 + $0x548] sm:$0xff] %vm330_vm0, %v12909_v0 }
  0xa2   : > { %502 = vst.msk [vmem:[#allocation2 + $0x550] sm:$0xff] %vm330_vm0, %v12909_v0 }
  0xa3   : > { %503 = vst.msk [vmem:[#allocation2 + $0x558] sm:$0xff] %vm330_vm0, %v12909_v0 }
  0xa4   : > { %504 = vst.msk [vmem:[#allocation2 + $0x560] sm:$0xff] %vm330_vm0, %v12909_v0 }
  0xa5   : > { %506 = vst.msk [vmem:[#allocation2 + $0x570] sm:$0xff] %vm330_vm0, %v12909_v0 }
  0xa6   : > { %507 = vst.msk [vmem:[#allocation2 + $0x578] sm:$0xff] %vm330_vm0, %v12909_v0 }
  0xa7   : > { %508 = vst.msk [vmem:[#allocation2 + $0x580] sm:$0xff] %vm330_vm0, %v12909_v0 }
  0xa8   : > { %509 = vst.msk [vmem:[#allocation2 + $0x588] sm:$0xff] %vm330_vm0, %v12909_v0 }
  0xa9   : > { %510 = vst.msk [vmem:[#allocation2 + $0x590] sm:$0xff] %vm330_vm0, %v12909_v0 }
  0xaa   : > { %512 = vst.msk [vmem:[#allocation2 + $0x5a0] sm:$0xff] %vm330_vm0, %v12909_v0 }
  0xab   : > { %513 = vst.msk [vmem:[#allocation2 + $0x5a8] sm:$0xff] %vm330_vm0, %v12909_v0 }
  0xac   : > { %514 = vst.msk [vmem:[#allocation2 + $0x5b0] sm:$0xff] %vm330_vm0, %v12909_v0 }
  0xad   : > { %515 = vst.msk [vmem:[#allocation2 + $0x5b8] sm:$0xff] %vm330_vm0, %v12909_v0 }
  0xae   : > { %516 = vst.msk [vmem:[#allocation2 + $0x5c0] sm:$0xff] %vm330_vm0, %v12909_v0 }
  0xaf   : > { %518 = vst.msk [vmem:[#allocation2 + $0x5d0] sm:$0xff] %vm330_vm0, %v12909_v0 }
  0xb0   : > { %519 = vst.msk [vmem:[#allocation2 + $0x5d8] sm:$0xff] %vm330_vm0, %v12909_v0 }
  0xb1   : > { %520 = vst.msk [vmem:[#allocation2 + $0x5e0] sm:$0xff] %vm330_vm0, %v12909_v0 }
  0xb2   : > { %521 = vst.msk [vmem:[#allocation2 + $0x5e8] sm:$0xff] %vm330_vm0, %v12909_v0 }
  0xb3   : > { %522 = vst.msk [vmem:[#allocation2 + $0x5f0] sm:$0xff] %vm330_vm0, %v12909_v0 }
  0xb4   : > { %524 = vst.msk [vmem:[#allocation2 + $0x600] sm:$0xff] %vm330_vm0, %v12909_v0 }
  0xb5   : > { %525 = vst.msk [vmem:[#allocation2 + $0x608] sm:$0xff] %vm330_vm0, %v12909_v0 }
  0xb6   : > { %526 = vst.msk [vmem:[#allocation2 + $0x610] sm:$0xff] %vm330_vm0, %v12909_v0 }
  0xb7   : > { %527 = vst.msk [vmem:[#allocation2 + $0x618] sm:$0xff] %vm330_vm0, %v12909_v0 }
  0xb8   : > { %528 = vst.msk [vmem:[#allocation2 + $0x620] sm:$0xff] %vm330_vm0, %v12909_v0 }
  0xb9   : > { %530 = vst.msk [vmem:[#allocation2 + $0x630] sm:$0xff] %vm330_vm0, %v12909_v0 }
  0xba   : > { %531 = vst.msk [vmem:[#allocation2 + $0x638] sm:$0xff] %vm330_vm0, %v12909_v0 }
  0xbb   : > { %532 = vst.msk [vmem:[#allocation2 + $0x640] sm:$0xff] %vm330_vm0, %v12909_v0 }
  0xbc   : > { %533 = vst.msk [vmem:[#allocation2 + $0x648] sm:$0xff] %vm330_vm0, %v12909_v0 }
  0xbd   : > { %534 = vst.msk [vmem:[#allocation2 + $0x650] sm:$0xff] %vm330_vm0, %v12909_v0 }
  0xbe   : > { %337 = vst.msk [vmem:[#allocation2 + $0x28] sm:$0x1] %vm336_vm1, %v12909_v0 }
  0xbf   : > { %343 = vst.msk [vmem:[#allocation2 + $0x58] sm:$0x1] %vm336_vm1, %v12909_v0 }
  0xc0   : > { %349 = vst.msk [vmem:[#allocation2 + $0x88] sm:$0x1] %vm336_vm1, %v12909_v0 }
  0xc1   : > { %355 = vst.msk [vmem:[#allocation2 + $0xb8] sm:$0x1] %vm336_vm1, %v12909_v0 }
  0xc2   : > { %361 = vst.msk [vmem:[#allocation2 + $0xe8] sm:$0x1] %vm336_vm1, %v12909_v0 }
  0xc3   : > { %367 = vst.msk [vmem:[#allocation2 + $0x118] sm:$0x1] %vm336_vm1, %v12909_v0 }
  0xc4   : > { %373 = vst.msk [vmem:[#allocation2 + $0x148] sm:$0x1] %vm336_vm1, %v12909_v0 }
  0xc5   : > { %379 = vst.msk [vmem:[#allocation2 + $0x178] sm:$0x1] %vm336_vm1, %v12909_v0 }
  0xc6   : > { %385 = vst.msk [vmem:[#allocation2 + $0x1a8] sm:$0x1] %vm336_vm1, %v12909_v0 }
  0xc7   : > { %391 = vst.msk [vmem:[#allocation2 + $0x1d8] sm:$0x1] %vm336_vm1, %v12909_v0 }
  0xc8   : > { %397 = vst.msk [vmem:[#allocation2 + $0x208] sm:$0x1] %vm336_vm1, %v12909_v0 }
  0xc9   : > { %403 = vst.msk [vmem:[#allocation2 + $0x238] sm:$0x1] %vm336_vm1, %v12909_v0 }
  0xca   : > { %409 = vst.msk [vmem:[#allocation2 + $0x268] sm:$0x1] %vm336_vm1, %v12909_v0 }
  0xcb   : > { %415 = vst.msk [vmem:[#allocation2 + $0x298] sm:$0x1] %vm336_vm1, %v12909_v0 }
  0xcc   : > { %421 = vst.msk [vmem:[#allocation2 + $0x2c8] sm:$0x1] %vm336_vm1, %v12909_v0 }
  0xcd   : > { %427 = vst.msk [vmem:[#allocation2 + $0x2f8] sm:$0x1] %vm336_vm1, %v12909_v0 }
  0xce   : > { %433 = vst.msk [vmem:[#allocation2 + $0x328] sm:$0x1] %vm336_vm1, %v12909_v0 }
  0xcf   : > { %439 = vst.msk [vmem:[#allocation2 + $0x358] sm:$0x1] %vm336_vm1, %v12909_v0 }
  0xd0   : > { %445 = vst.msk [vmem:[#allocation2 + $0x388] sm:$0x1] %vm336_vm1, %v12909_v0 }
  0xd1   : > { %451 = vst.msk [vmem:[#allocation2 + $0x3b8] sm:$0x1] %vm336_vm1, %v12909_v0 }
  0xd2   : > { %457 = vst.msk [vmem:[#allocation2 + $0x3e8] sm:$0x1] %vm336_vm1, %v12909_v0 }
  0xd3   : > { %463 = vst.msk [vmem:[#allocation2 + $0x418] sm:$0x1] %vm336_vm1, %v12909_v0 }
  0xd4   : > { %469 = vst.msk [vmem:[#allocation2 + $0x448] sm:$0x1] %vm336_vm1, %v12909_v0 }
  0xd5   : > { %475 = vst.msk [vmem:[#allocation2 + $0x478] sm:$0x1] %vm336_vm1, %v12909_v0 }
  0xd6   : > { %481 = vst.msk [vmem:[#allocation2 + $0x4a8] sm:$0x1] %vm336_vm1, %v12909_v0 }
  0xd7   : > { %487 = vst.msk [vmem:[#allocation2 + $0x4d8] sm:$0x1] %vm336_vm1, %v12909_v0 }
  0xd8   : > { %493 = vst.msk [vmem:[#allocation2 + $0x508] sm:$0x1] %vm336_vm1, %v12909_v0 }
  0xd9   : > { %499 = vst.msk [vmem:[#allocation2 + $0x538] sm:$0x1] %vm336_vm1, %v12909_v0 }
  0xda   : > { %505 = vst.msk [vmem:[#allocation2 + $0x568] sm:$0x1] %vm336_vm1, %v12909_v0 }
  0xdb   : > { %511 = vst.msk [vmem:[#allocation2 + $0x598] sm:$0x1] %vm336_vm1, %v12909_v0 }
  0xdc   : > { %517 = vst.msk [vmem:[#allocation2 + $0x5c8] sm:$0x1] %vm336_vm1, %v12909_v0 }
  0xdd   : > { %523 = vst.msk [vmem:[#allocation2 + $0x5f8] sm:$0x1] %vm336_vm1, %v12909_v0 }
  0xde   : > { %529 = vst.msk [vmem:[#allocation2 + $0x628] sm:$0x1] %vm336_vm1, %v12909_v0 }
  0xdf   : > { %535 = vst.msk [vmem:[#allocation2 + $0x658] sm:$0x1] %vm336_vm1, %v12909_v0 }
  0xe0   : > { %537 = vst.msk [vmem:[#allocation3] sm:$0xff] %vm536_vm2, %v12909_v0 }
  0xe1   : > { %538 = vst.msk [vmem:[#allocation3 + $0x8] sm:$0xff] %vm536_vm2, %v12909_v0 }
  0xe2   : > { %539 = vst.msk [vmem:[#allocation3 + $0x10] sm:$0xff] %vm536_vm2, %v12909_v0 }
  0xe3   : > { %542 = vst.msk [vmem:[#allocation3 + $0x20] sm:$0xff] %vm536_vm2, %v12909_v0 }
  0xe4   : > { %543 = vst.msk [vmem:[#allocation3 + $0x28] sm:$0xff] %vm536_vm2, %v12909_v0 }
  0xe5   : > { %544 = vst.msk [vmem:[#allocation3 + $0x30] sm:$0xff] %vm536_vm2, %v12909_v0 }
  0xe6   : > { %546 = vst.msk [vmem:[#allocation3 + $0x40] sm:$0xff] %vm536_vm2, %v12909_v0 }
  0xe7   : > { %547 = vst.msk [vmem:[#allocation3 + $0x48] sm:$0xff] %vm536_vm2, %v12909_v0 }
  0xe8   : > { %548 = vst.msk [vmem:[#allocation3 + $0x50] sm:$0xff] %vm536_vm2, %v12909_v0 }
  0xe9   : > { %550 = vst.msk [vmem:[#allocation3 + $0x60] sm:$0xff] %vm536_vm2, %v12909_v0 }
  0xea   : > { %551 = vst.msk [vmem:[#allocation3 + $0x68] sm:$0xff] %vm536_vm2, %v12909_v0 }
  0xeb   : > { %552 = vst.msk [vmem:[#allocation3 + $0x70] sm:$0xff] %vm536_vm2, %v12909_v0 }
  0xec   : > { %554 = vst.msk [vmem:[#allocation3 + $0x80] sm:$0xff] %vm536_vm2, %v12909_v0 }
  0xed   : > { %555 = vst.msk [vmem:[#allocation3 + $0x88] sm:$0xff] %vm536_vm2, %v12909_v0 }
  0xee   : > { %556 = vst.msk [vmem:[#allocation3 + $0x90] sm:$0xff] %vm536_vm2, %v12909_v0 }
  0xef   : > { %558 = vst.msk [vmem:[#allocation3 + $0xa0] sm:$0xff] %vm536_vm2, %v12909_v0 }
  0xf0   : > { %559 = vst.msk [vmem:[#allocation3 + $0xa8] sm:$0xff] %vm536_vm2, %v12909_v0 }
  0xf1   : > { %560 = vst.msk [vmem:[#allocation3 + $0xb0] sm:$0xff] %vm536_vm2, %v12909_v0 }
  0xf2   : > { %562 = vst.msk [vmem:[#allocation3 + $0xc0] sm:$0xff] %vm536_vm2, %v12909_v0 }
  0xf3   : > { %563 = vst.msk [vmem:[#allocation3 + $0xc8] sm:$0xff] %vm536_vm2, %v12909_v0 }
  0xf4   : > { %564 = vst.msk [vmem:[#allocation3 + $0xd0] sm:$0xff] %vm536_vm2, %v12909_v0 }
  0xf5   : > { %566 = vst.msk [vmem:[#allocation3 + $0xe0] sm:$0xff] %vm536_vm2, %v12909_v0 }
  0xf6   : > { %567 = vst.msk [vmem:[#allocation3 + $0xe8] sm:$0xff] %vm536_vm2, %v12909_v0 }
  0xf7   : > { %568 = vst.msk [vmem:[#allocation3 + $0xf0] sm:$0xff] %vm536_vm2, %v12909_v0 }
  0xf8   : > { %570 = vst.msk [vmem:[#allocation3 + $0x100] sm:$0xff] %vm536_vm2, %v12909_v0 }
  0xf9   : > { %571 = vst.msk [vmem:[#allocation3 + $0x108] sm:$0xff] %vm536_vm2, %v12909_v0 }
  0xfa   : > { %572 = vst.msk [vmem:[#allocation3 + $0x110] sm:$0xff] %vm536_vm2, %v12909_v0 }
  0xfb   : > { %574 = vst.msk [vmem:[#allocation3 + $0x120] sm:$0xff] %vm536_vm2, %v12909_v0 }
  0xfc   : > { %575 = vst.msk [vmem:[#allocation3 + $0x128] sm:$0xff] %vm536_vm2, %v12909_v0 }
  0xfd   : > { %576 = vst.msk [vmem:[#allocation3 + $0x130] sm:$0xff] %vm536_vm2, %v12909_v0 }
  0xfe   : > { %578 = vst.msk [vmem:[#allocation3 + $0x140] sm:$0xff] %vm536_vm2, %v12909_v0 }
  0xff   : > { %579 = vst.msk [vmem:[#allocation3 + $0x148] sm:$0xff] %vm536_vm2, %v12909_v0 }
 0x100   : > { %580 = vst.msk [vmem:[#allocation3 + $0x150] sm:$0xff] %vm536_vm2, %v12909_v0 }
 0x101   : > { %582 = vst.msk [vmem:[#allocation3 + $0x160] sm:$0xff] %vm536_vm2, %v12909_v0 }
 0x102   : > { %583 = vst.msk [vmem:[#allocation3 + $0x168] sm:$0xff] %vm536_vm2, %v12909_v0 }
 0x103   : > { %584 = vst.msk [vmem:[#allocation3 + $0x170] sm:$0xff] %vm536_vm2, %v12909_v0 }
 0x104   : > { %586 = vst.msk [vmem:[#allocation3 + $0x180] sm:$0xff] %vm536_vm2, %v12909_v0 }
 0x105   : > { %587 = vst.msk [vmem:[#allocation3 + $0x188] sm:$0xff] %vm536_vm2, %v12909_v0 }
 0x106   : > { %588 = vst.msk [vmem:[#allocation3 + $0x190] sm:$0xff] %vm536_vm2, %v12909_v0 }
 0x107   : > { %590 = vst.msk [vmem:[#allocation3 + $0x1a0] sm:$0xff] %vm536_vm2, %v12909_v0 }
 0x108   : > { %591 = vst.msk [vmem:[#allocation3 + $0x1a8] sm:$0xff] %vm536_vm2, %v12909_v0 }
 0x109   : > { %592 = vst.msk [vmem:[#allocation3 + $0x1b0] sm:$0xff] %vm536_vm2, %v12909_v0 }
 0x10a   : > { %594 = vst.msk [vmem:[#allocation3 + $0x1c0] sm:$0xff] %vm536_vm2, %v12909_v0 }
 0x10b   : > { %595 = vst.msk [vmem:[#allocation3 + $0x1c8] sm:$0xff] %vm536_vm2, %v12909_v0 }
 0x10c   : > { %596 = vst.msk [vmem:[#allocation3 + $0x1d0] sm:$0xff] %vm536_vm2, %v12909_v0 }
 0x10d   : > { %598 = vst.msk [vmem:[#allocation3 + $0x1e0] sm:$0xff] %vm536_vm2, %v12909_v0 }
 0x10e   : > { %599 = vst.msk [vmem:[#allocation3 + $0x1e8] sm:$0xff] %vm536_vm2, %v12909_v0 }
 0x10f   : > { %600 = vst.msk [vmem:[#allocation3 + $0x1f0] sm:$0xff] %vm536_vm2, %v12909_v0 }
 0x110   : > { %602 = vst.msk [vmem:[#allocation3 + $0x200] sm:$0xff] %vm536_vm2, %v12909_v0 }
 0x111   : > { %603 = vst.msk [vmem:[#allocation3 + $0x208] sm:$0xff] %vm536_vm2, %v12909_v0 }
 0x112   : > { %604 = vst.msk [vmem:[#allocation3 + $0x210] sm:$0xff] %vm536_vm2, %v12909_v0 }
 0x113   : > { %606 = vst.msk [vmem:[#allocation3 + $0x220] sm:$0xff] %vm536_vm2, %v12909_v0 }
 0x114   : > { %607 = vst.msk [vmem:[#allocation3 + $0x228] sm:$0xff] %vm536_vm2, %v12909_v0 }
 0x115   : > { %608 = vst.msk [vmem:[#allocation3 + $0x230] sm:$0xff] %vm536_vm2, %v12909_v0 }
 0x116   : > { %541 = vst.msk [vmem:[#allocation3 + $0x18] sm:$0x1] %vm540_vm3, %v12909_v0 }
 0x117   : > { %545 = vst.msk [vmem:[#allocation3 + $0x38] sm:$0x1] %vm540_vm3, %v12909_v0 }
 0x118   : > { %549 = vst.msk [vmem:[#allocation3 + $0x58] sm:$0x1] %vm540_vm3, %v12909_v0 }
 0x119   : > { %553 = vst.msk [vmem:[#allocation3 + $0x78] sm:$0x1] %vm540_vm3, %v12909_v0 }
 0x11a   : > { %557 = vst.msk [vmem:[#allocation3 + $0x98] sm:$0x1] %vm540_vm3, %v12909_v0 }
 0x11b   : > { %561 = vst.msk [vmem:[#allocation3 + $0xb8] sm:$0x1] %vm540_vm3, %v12909_v0 }
 0x11c   : > { %565 = vst.msk [vmem:[#allocation3 + $0xd8] sm:$0x1] %vm540_vm3, %v12909_v0 }
 0x11d   : > { %569 = vst.msk [vmem:[#allocation3 + $0xf8] sm:$0x1] %vm540_vm3, %v12909_v0 }
 0x11e   : > { %573 = vst.msk [vmem:[#allocation3 + $0x118] sm:$0x1] %vm540_vm3, %v12909_v0 }
 0x11f   : > { %577 = vst.msk [vmem:[#allocation3 + $0x138] sm:$0x1] %vm540_vm3, %v12909_v0 }
 0x120   : > { %581 = vst.msk [vmem:[#allocation3 + $0x158] sm:$0x1] %vm540_vm3, %v12909_v0 }
 0x121   : > { %585 = vst.msk [vmem:[#allocation3 + $0x178] sm:$0x1] %vm540_vm3, %v12909_v0 }
 0x122   : > { %589 = vst.msk [vmem:[#allocation3 + $0x198] sm:$0x1] %vm540_vm3, %v12909_v0 }
 0x123   : > { %593 = vst.msk [vmem:[#allocation3 + $0x1b8] sm:$0x1] %vm540_vm3, %v12909_v0 }
 0x124   : > { %597 = vst.msk [vmem:[#allocation3 + $0x1d8] sm:$0x1] %vm540_vm3, %v12909_v0 }
 0x125   : > { %601 = vst.msk [vmem:[#allocation3 + $0x1f8] sm:$0x1] %vm540_vm3, %v12909_v0 }
 0x126   : > { %605 = vst.msk [vmem:[#allocation3 + $0x218] sm:$0x1] %vm540_vm3, %v12909_v0 }
 0x127   : > { %609 = vst.msk [vmem:[#allocation3 + $0x238] sm:$0x1] %vm540_vm3, %v12909_v0 }
 0x128 LB: >> { %v10912_v1 = vld [vmem:[%s17987_s1 + $0x4] sm:$0x7]  ;;  %vm943_vm4 = vcmask 1042432   ;;  %v11043_v2 = vld [vmem:[%s17987_s1 + $0x8] sm:$0x7]  ;;  %s10911_s29 = smul.u32 640, %s12895_s28  ;;  %s12895_s28 = sphi %s13572_s28, %s615_s28  }
 0x129   : >> { %12724 = vmatpush.msk.msra.mxu1 %vm943_vm4, %v10912_v1  ;;  %12725 = vmatpush.msk.msra.mxu2 %vm943_vm4, %v10912_v1  ;;  %v11175_v3 = vld [vmem:[%s17987_s1 + $0xc] sm:$0x7]  ;;  %v683_v4 = vld [vmem:[%s17987_s1] sm:$0x7]  ;;  %v11305_v5 = vld [vmem:[%s17987_s1 + $0x10] sm:$0x7] }
 0x12a   : >> { %12726 = vmatpush.msk.msra.mxu3 %vm943_vm4, %v10912_v1  ;;  %vm750_vm5 = vcmask 23552   ;;  %s13600_s17 = scalar_lea.vmem %s13024_s26, %s10911_s29  ;;  %10913 = vmatpush.msk.msra.mxu0 %vm943_vm4, %v10912_v1  ;;  %v11567_v58 = vld [vmem:[%s17987_s1 + $0x18] sm:$0x7]  ;;  %v11697_v59 = vld [vmem:[%s17987_s1 + $0x1c] sm:$0x7]  ;;  %s11894_s25 = smul.u32 192, %s12895_s28 }
 0x12b   : >> { %11044 = vmatpush.msk.msrb.mxu2 %vm943_vm4, %v11043_v2  ;;  %10978 = vmatpush.msk.msrb.mxu1 %vm943_vm4, %v683_v4  ;;  %v13604_v6 = vld [vmem:[%s13600_s17 + $0xa8] sm:$0xff]  ;;  %v13619_v10 = vld [vmem:[%s13600_s17 + $0xb0] sm:$0xff]  ;;  %v13633_v14 = vld [vmem:[%s13600_s17 + $0xb8] sm:$0xff]  ;;  %s615_s28 = sadd.s32 1, %s12895_s28  }
 0x12c   : >> { %11176 = vmatpush.msk.msrb.mxu3 %vm943_vm4, %v11175_v3  ;;  %v13607_v7 = vld [vmem:[%s13600_s17 + $0x148] sm:$0xff]  ;;  %11306 = vmatpush.msk.msrb.mxu0 %vm943_vm4, %v11305_v5  ;;  %v13622_v11 = vld [vmem:[%s13600_s17 + $0x150] sm:$0xff]  ;;  %v13636_v15 = vld [vmem:[%s13600_s17 + $0x158] sm:$0xff]  ;;  %s15202_s29 = scalar_lea.vmem [#allocation2], %s11894_s25  ;;  %p612_p11 = scmp.ge.s32.totalorder %s615_s28, 8  }
 0x12d   : >> { %v732_v8 = vld [vmem:[%s13600_s17 + $0x1e8] sm:$0xff]  ;;  %10930 = vmatmul.msk.f32.vlgmr.msra.gmra.mxu1 %vm750_vm5, %v13604_v6  ;;  %10946 = vmatmul.msk.f32.vlgmr.msra.gmra.mxu2 %vm750_vm5, %v13607_v7  ;;  %v733_v12 = vld [vmem:[%s13600_s17 + $0x1f0] sm:$0xff]  ;;  %v734_v16 = vld [vmem:[%s13600_s17 + $0x1f8] sm:$0xff] }
 0x12e   : >> { %v684_v9 = vld [vmem:[%s13600_s17 + $0x8] sm:$0xff]  ;;  %10962 = vmatmul.msk.f32.vlgmr.msra.gmra.mxu3 %vm750_vm5, %v732_v8  ;;  %v685_v13 = vld [vmem:[%s13600_s17 + $0x10] sm:$0xff]  ;;  %v686_v17 = vld [vmem:[%s13600_s17 + $0x18] sm:$0xff]  ;;  %11568 = vmatpush.msk.msra.mxu2 %vm943_vm4, %v11567_v58 }
 0x12f   : >> { %10914 = vmatmul.msk.f32.vlgmr.msra.gmra.mxu0 %vm750_vm5, %v684_v9  ;;  %v13647_v18 = vld [vmem:[%s13600_s17 + $0xc0] sm:$0xff]  ;;  %v13661_v22 = vld [vmem:[%s13600_s17 + $0xc8] sm:$0xff]  ;;  %v13675_v26 = vld [vmem:[%s13600_s17 + $0xd0] sm:$0xff]  ;;  %11698 = vmatpush.msk.msra.mxu3 %vm943_vm4, %v11697_v59 }
 0x130   : >> { %v13650_v19 = vld [vmem:[%s13600_s17 + $0x160] sm:$0xff]  ;;  %v13664_v23 = vld [vmem:[%s13600_s17 + $0x168] sm:$0xff]  ;;  %v721_v27 = vld [vmem:[%s13600_s17 + $0x170] sm:$0xff] }
 0x131   : >> { %v735_v20 = vld [vmem:[%s13600_s17 + $0x200] sm:$0xff]  ;;  %v736_v24 = vld [vmem:[%s13600_s17 + $0x208] sm:$0xff]  ;;  %v737_v28 = vld [vmem:[%s13600_s17 + $0x210] sm:$0xff] }
 0x132   : >> { %v687_v21 = vld [vmem:[%s13600_s17 + $0x20] sm:$0xff]  ;;  %v688_v25 = vld [vmem:[%s13600_s17 + $0x28] sm:$0xff]  ;;  %v689_v29 = vld [vmem:[%s13600_s17 + $0x30] sm:$0xff] }
 0x133   : >> { %v13686_v30 = vld [vmem:[%s13600_s17 + $0xd8] sm:$0xff]  ;;  %v13697_v34 = vld [vmem:[%s13600_s17 + $0xe0] sm:$0xff]  ;;  %v13736_v46 = vld [vmem:[%s13600_s17 + $0x108] sm:$0xff] }
 0x134   : >> { %v722_v31 = vld [vmem:[%s13600_s17 + $0x178] sm:$0xff]  ;;  %v723_v35 = vld [vmem:[%s13600_s17 + $0x180] sm:$0xff]  ;;  %v726_v47 = vld [vmem:[%s13600_s17 + $0x1a8] sm:$0xff] }
 0x135   : >> { %10931 = vmatmul.msk.f32.gmra.mxu1 %vm750_vm5, %v13619_v10  ;;  %10947 = vmatmul.msk.f32.gmra.mxu2 %vm750_vm5, %v13622_v11  ;;  %v738_v32 = vld [vmem:[%s13600_s17 + $0x218] sm:$0xff]  ;;  %v739_v36 = vld [vmem:[%s13600_s17 + $0x220] sm:$0xff]  ;;  %v742_v48 = vld [vmem:[%s13600_s17 + $0x248] sm:$0xff] }
 0x136   : >> { %10963 = vmatmul.msk.f32.gmra.mxu3 %vm750_vm5, %v733_v12  ;;  %v690_v33 = vld [vmem:[%s13600_s17 + $0x38] sm:$0xff]  ;;  %v691_v37 = vld [vmem:[%s13600_s17 + $0x40] sm:$0xff]  ;;  %v13741_v49 = vld [vmem:[%s13600_s17 + $0x68] sm:$0xff] }
 0x137   : >> { %10915 = vmatmul.msk.f32.gmra.mxu0 %vm750_vm5, %v685_v13  ;;  %v13708_v38 = vld [vmem:[%s13600_s17 + $0xf8] sm:$0xff]  ;;  %v13722_v42 = vld [vmem:[%s13600_s17 + $0x100] sm:$0xff]  ;;  %v13750_v50 = vld [vmem:[%s13600_s17 + $0x110] sm:$0xff] }
 0x138   : >> { %v724_v39 = vld [vmem:[%s13600_s17 + $0x198] sm:$0xff]  ;;  %v725_v43 = vld [vmem:[%s13600_s17 + $0x1a0] sm:$0xff]  ;;  %v727_v51 = vld [vmem:[%s13600_s17 + $0x1b0] sm:$0xff] }
 0x139   : >> { %v740_v40 = vld [vmem:[%s13600_s17 + $0x238] sm:$0xff]  ;;  %v741_v44 = vld [vmem:[%s13600_s17 + $0x240] sm:$0xff]  ;;  %v743_v52 = vld [vmem:[%s13600_s17 + $0x250] sm:$0xff] }
 0x13a   : >> { %v13713_v41 = vld [vmem:[%s13600_s17 + $0x58] sm:$0xff]  ;;  %v13727_v45 = vld [vmem:[%s13600_s17 + $0x60] sm:$0xff]  ;;  %v13755_v53 = vld [vmem:[%s13600_s17 + $0x70] sm:$0xff] }
 0x13b   : >> { %v13764_v54 = vld [vmem:[%s13600_s17 + $0x118] sm:$0xff]  ;;  %v11435_v60 = vld [vmem:[%s17987_s1 + $0x14] sm:$0x7]  ;;  %v13790_v61 = vld [vmem:[%s13600_s17 + $0x120] sm:$0xff] }
 0x13c   : >> { %v728_v55 = vld [vmem:[%s13600_s17 + $0x1b8] sm:$0xff]  ;;  %11436 = vmatpush.msk.msra.mxu1 %vm943_vm4, %v11435_v60  ;;  %v729_v62 = vld [vmem:[%s13600_s17 + $0x1c0] sm:$0xff]  ;;  %v13808_v2 = vld [vmem:[%s13600_s17 + $0x128] sm:$0xff] }
 0x13d   : >> { %10932 = vmatmul.msk.f32.gmra.mxu1 %vm750_vm5, %v13633_v14  ;;  %10948 = vmatmul.msk.f32.gmra.mxu2 %vm750_vm5, %v13636_v15  ;;  %v744_v56 = vld [vmem:[%s13600_s17 + $0x258] sm:$0xff]  ;;  %v745_v63 = vld [vmem:[%s13600_s17 + $0x260] sm:$0xff]  ;;  %v730_v3 = vld [vmem:[%s13600_s17 + $0x1c8] sm:$0xff] }
 0x13e   : >> { %10964 = vmatmul.msk.f32.gmra.mxu3 %vm750_vm5, %v734_v16  ;;  %v13769_v57 = vld [vmem:[%s13600_s17 + $0x78] sm:$0xff]  ;;  %v13795_v0 = vld [vmem:[%s13600_s17 + $0x80] sm:$0xff]  ;;  %v746_v4 = vld [vmem:[%s13600_s17 + $0x268] sm:$0xff] }
 0x13f   : >> { %10916 = vmatmul.msk.f32.gmra.mxu0 %vm750_vm5, %v686_v17  ;;  %v11827_v1 = vld [vmem:[%s17987_s1 + $0x20] sm:$0x7]  ;;  %v13813_v5 = vld [vmem:[%s13600_s17 + $0x88] sm:$0xff]  ;;  %v13822_v8 = vld [vmem:[%s13600_s17 + $0x130] sm:$0xff] }
 0x140   : >> { %11828 = vmatpush.msk.msra.mxu0 %vm943_vm4, %v11827_v1  ;;  %v731_v9 = vld [vmem:[%s13600_s17 + $0x1d0] sm:$0xff]  ;;  %v619_v17 = vld [vmem:[%s13600_s17 + $0x7] sm:$0xff] }
 0x141   : >> { %v747_v12 = vld [vmem:[%s13600_s17 + $0x270] sm:$0xff]  ;;  %v623_v59 = vld [vmem:[%s13600_s17 + $0x27] sm:$0xff] }
 0x142   : >> { %v13827_v13 = vld [vmem:[%s13600_s17 + $0x90] sm:$0xff] }
 0x143   : >> { %v1564_v60 = vld [vmem:[%s13600_s17 + $0x29] sm:$0xff] }
 0x145   : >> { %10933 = vmatmul.msk.f32.gmra.mxu1 %vm750_vm5, %v13647_v18  ;;  %10949 = vmatmul.msk.f32.gmra.mxu2 %vm750_vm5, %v13650_v19 }
 0x146   : >> { %10965 = vmatmul.msk.f32.gmra.mxu3 %vm750_vm5, %v735_v20  ;;  %v1560_v20 = vld [vmem:[%s13600_s17 + $0x9] sm:$0xff] }
 0x147   : >> { %10917 = vmatmul.msk.f32.gmra.mxu0 %vm750_vm5, %v687_v21  ;;  %v13840_v21 = vld [vmem:[%s13600_s17 + $0x57] sm:$0xff] }
 0x14d   : >> { %10934 = vmatmul.msk.f32.gmra.mxu1 %vm750_vm5, %v13661_v22  ;;  %10950 = vmatmul.msk.f32.gmra.mxu2 %vm750_vm5, %v13664_v23 }
 0x14e   : >> { %10966 = vmatmul.msk.f32.gmra.mxu3 %vm750_vm5, %v736_v24 }
 0x14f   : >> { %10918 = vmatmul.msk.f32.gmra.mxu0 %vm750_vm5, %v688_v25 }
 0x155   : >> { %10935 = vmatmul.msk.f32.gmra.mxu1 %vm750_vm5, %v13675_v26  ;;  %10951 = vmatmul.msk.f32.gmra.mxu2 %vm750_vm5, %v721_v27 }
 0x156   : >> { %10967 = vmatmul.msk.f32.gmra.mxu3 %vm750_vm5, %v737_v28 }
 0x157   : >> { %10919 = vmatmul.msk.f32.gmra.mxu0 %vm750_vm5, %v689_v29  ;;  %v620_v29 = vld [vmem:[%s13600_s17 + $0xf] sm:$0xff] }
 0x15d   : >> { %10936 = vmatmul.msk.f32.gmra.mxu1 %vm750_vm5, %v13686_v30  ;;  %10952 = vmatmul.msk.f32.gmra.mxu2 %vm750_vm5, %v722_v31  ;;  %v1561_v31 = vld [vmem:[%s13600_s17 + $0x11] sm:$0xff] }
 0x15e   : >> { %10968 = vmatmul.msk.f32.gmra.mxu3 %vm750_vm5, %v738_v32  ;;  %v13859_v32 = vld [vmem:[%s13600_s17 + $0x5f] sm:$0xff] }
 0x15f   : >> { %10920 = vmatmul.msk.f32.gmra.mxu0 %vm750_vm5, %v690_v33 }
 0x165   : >> { %10937 = vmatmul.msk.f32.gmra.mxu1 %vm750_vm5, %v13697_v34  ;;  %10953 = vmatmul.msk.f32.gmra.mxu2 %vm750_vm5, %v723_v35 }
 0x166   : >> { %10969 = vmatmul.msk.f32.gmra.mxu3 %vm750_vm5, %v739_v36 }
 0x167   : >> { %10921 = vmatmul.msk.f32.gmra.mxu0 %vm750_vm5, %v691_v37 }
 0x16d   : >> { %10938 = vmatmul.msk.f32.gmra.mxu1 %vm750_vm5, %v13708_v38  ;;  %10954 = vmatmul.msk.f32.gmra.mxu2 %vm750_vm5, %v724_v39  ;;  %v621_v39 = vld [vmem:[%s13600_s17 + $0x17] sm:$0xff] }
 0x16e   : >> { %10970 = vmatmul.msk.f32.gmra.mxu3 %vm750_vm5, %v740_v40  ;;  %v1562_v40 = vld [vmem:[%s13600_s17 + $0x19] sm:$0xff] }
 0x16f   : >> { %10922 = vmatmul.msk.f32.gmra.mxu0 %vm750_vm5, %v13713_v41 }
 0x175   : >> { %10939 = vmatmul.msk.f32.gmra.mxu1 %vm750_vm5, %v13722_v42  ;;  %10955 = vmatmul.msk.f32.gmra.mxu2 %vm750_vm5, %v725_v43 }
 0x176   : >> { %10971 = vmatmul.msk.f32.gmra.mxu3 %vm750_vm5, %v741_v44 }
 0x177   : >> { %10923 = vmatmul.msk.f32.gmra.mxu0 %vm750_vm5, %v13727_v45 }
 0x17d   : >> { %10940 = vmatmul.msk.f32.gmra.mxu1 %vm750_vm5, %v13736_v46  ;;  %10956 = vmatmul.msk.f32.gmra.mxu2 %vm750_vm5, %v726_v47 }
 0x17e   : >> { %10972 = vmatmul.msk.f32.gmra.mxu3 %vm750_vm5, %v742_v48  ;;  %v622_v48 = vld [vmem:[%s13600_s17 + $0x1f] sm:$0xff] }
 0x17f   : >> { %10924 = vmatmul.msk.f32.gmra.mxu0 %vm750_vm5, %v13741_v49 }
 0x185   : >> { %10941 = vmatmul.msk.f32.gmra.mxu1 %vm750_vm5, %v13750_v50  ;;  %10957 = vmatmul.msk.f32.gmra.mxu2 %vm750_vm5, %v727_v51  ;;  %v1563_v51 = vld [vmem:[%s13600_s17 + $0x21] sm:$0xff] }
 0x186   : >> { %10973 = vmatmul.msk.f32.gmra.mxu3 %vm750_vm5, %v743_v52  ;;  %v13897_v52 = vld [vmem:[%s13600_s17 + $0x6f] sm:$0xff] }
 0x187   : >> { %10925 = vmatmul.msk.f32.gmra.mxu0 %vm750_vm5, %v13755_v53 }
 0x18d   : >> { %10942 = vmatmul.msk.f32.gmra.mxu1 %vm750_vm5, %v13764_v54  ;;  %10958 = vmatmul.msk.f32.gmra.mxu2 %vm750_vm5, %v728_v55 }
 0x18e   : >> { %10974 = vmatmul.msk.f32.gmra.mxu3 %vm750_vm5, %v744_v56 }
 0x18f   : >> { %10926 = vmatmul.msk.f32.gmra.mxu0 %vm750_vm5, %v13769_v57 }
 0x195   : >> { %10943 = vmatmul.msk.f32.gmra.mxu1 %vm750_vm5, %v13790_v61  ;;  %10959 = vmatmul.msk.f32.gmra.mxu2 %vm750_vm5, %v729_v62  ;;  %v13916_v62 = vld [vmem:[%s13600_s17 + $0x77] sm:$0xff] }
 0x196   : >> { %10975 = vmatmul.msk.f32.gmra.mxu3 %vm750_vm5, %v745_v63 }
 0x197   : >> { %10927 = vmatmul.msk.f32.gmra.mxu0 %vm750_vm5, %v13795_v0 }
 0x19d   : >> { %10944 = vmatmul.msk.f32.gmra.mxu1 %vm750_vm5, %v13808_v2  ;;  %10960 = vmatmul.msk.f32.gmra.mxu2 %vm750_vm5, %v730_v3 }
 0x19e   : >> { %10976 = vmatmul.msk.f32.gmra.mxu3 %vm750_vm5, %v746_v4  ;;  %v624_v4 = vld [vmem:[%s13600_s17 + $0x2f] sm:$0xff] }
 0x19f   : >> { %10928 = vmatmul.msk.f32.gmra.mxu0 %vm750_vm5, %v13813_v5 }
 0x1a5   : >> { %10945 = vmatmul.msk.f32.gmra.mxu1 %vm750_vm5, %v13822_v8  ;;  %10961 = vmatmul.msk.f32.gmra.mxu2 %vm750_vm5, %v731_v9  ;;  %v1565_v9 = vld [vmem:[%s13600_s17 + $0x31] sm:$0xff] }
 0x1a6   : >> { %10977 = vmatmul.msk.f32.gmra.mxu3 %vm750_vm5, %v747_v12  ;;  %v13935_v12 = vld [vmem:[%s13600_s17 + $0x7f] sm:$0xff] }
 0x1a7   : >> { %10929 = vmatmul.msk.f32.gmra.mxu0 %vm750_vm5, %v13827_v13 }
 0x1aa   : >> { %v13835_v16 = vpop.f32.mrf.mxu1 }
 0x1ac   : >> { %v13842_v24 = vpop.f32.mrf.mxu0 }
 0x1ad   : >> { %10979 = vmatmul.msk.f32.vlgmr.msrb.gmra.mxu1 %vm750_vm5, %v619_v17  ;;  %11045 = vmatmul.msk.f32.vlgmr.msrb.gmra.mxu2 %vm750_vm5, %v1560_v20 }
 0x1ae   : >> { %11177 = vmatmul.msk.f32.vlgmr.msrb.gmra.mxu3 %vm750_vm5, %v13840_v21 }
 0x1af   : >> { %11307 = vmatmul.msk.f32.vlgmr.msrb.gmra.mxu0 %vm750_vm5, %v13713_v41  ;;  %v13878_v41 = vld [vmem:[%s13600_s17 + $0x67] sm:$0xff] }
 0x1b0   : >> { %v13850_v25 = vpop.f32.mrf.mxu2 }
 0x1b1   : >> { %18044 = vst [vmem:[#allocation9_spill] sm:$0xff] %v13850_v25  ;;  %v13852_v27 = vpop.f32.mrf.mxu3 }
 0x1b2   : >> { %18045 = vst [vmem:[#allocation10_spill] sm:$0xff] %v13852_v27  ;;  %v13854_v28 = vpop.f32.mrf.mxu1  ;;  %v14029_v27 = vld [vmem:[%s13600_s17 + $0xb7] sm:$0xff] }
 0x1b4   : >> { %v13861_v33 = vpop.f32.mrf.mxu0 }
 0x1b5   : >> { %10980 = vmatmul.msk.f32.gmra.mxu1 %vm750_vm5, %v620_v29  ;;  %11046 = vmatmul.msk.f32.gmra.mxu2 %vm750_vm5, %v1561_v31  ;;  %v625_v31 = vld [vmem:[%s13600_s17 + $0x37] sm:$0xff] }
 0x1b6   : >> { %11178 = vmatmul.msk.f32.gmra.mxu3 %vm750_vm5, %v13859_v32 }
 0x1b7   : >> { %11308 = vmatmul.msk.f32.gmra.mxu0 %vm750_vm5, %v13727_v45 }
 0x1b8   : >> { %v13869_v35 = vpop.f32.mrf.mxu2 }
 0x1b9   : >> { %18046 = vst [vmem:[#allocation11_spill] sm:$0xff] %v13869_v35  ;;  %v13871_v36 = vpop.f32.mrf.mxu3  ;;  %v1577_v35 = vld [vmem:[%s13600_s17 + $0xb1] sm:$0xff] }
 0x1ba   : >> { %18047 = vst [vmem:[#allocation12_spill] sm:$0xff] %v13871_v36  ;;  %v13873_v37 = vpop.f32.mrf.mxu1  ;;  %v1570_v36 = vld [vmem:[%s13600_s17 + $0x69] sm:$0xff] }
 0x1bc   : >> { %v13880_v43 = vpop.f32.mrf.mxu0 }
 0x1bd   : >> { %10981 = vmatmul.msk.f32.gmra.mxu1 %vm750_vm5, %v621_v39  ;;  %11047 = vmatmul.msk.f32.gmra.mxu2 %vm750_vm5, %v1562_v40  ;;  %v1566_v39 = vld [vmem:[%s13600_s17 + $0x39] sm:$0xff]  ;;  %v13954_v40 = vld [vmem:[%s13600_s17 + $0x87] sm:$0xff] }
 0x1be   : >> { %11179 = vmatmul.msk.f32.gmra.mxu3 %vm750_vm5, %v13878_v41 }
 0x1bf   : >> { %11309 = vmatmul.msk.f32.gmra.mxu0 %vm750_vm5, %v13741_v49 }
 0x1c0   : >> { %v13888_v44 = vpop.f32.mrf.mxu2 }
 0x1c1   : >> { %18048 = vst [vmem:[#allocation13_spill] sm:$0xff] %v13888_v44  ;;  %v13890_v45 = vpop.f32.mrf.mxu3 }
 0x1c2   : >> { %18049 = vst [vmem:[#allocation14_spill] sm:$0xff] %v13890_v45  ;;  %v13892_v47 = vpop.f32.mrf.mxu1  ;;  %v14010_v45 = vld [vmem:[%s13600_s17 + $0xaf] sm:$0xff] }
 0x1c4   : >> { %v13899_v55 = vpop.f32.mrf.mxu0 }
 0x1c5   : >> { %10982 = vmatmul.msk.f32.gmra.mxu1 %vm750_vm5, %v622_v48  ;;  %11048 = vmatmul.msk.f32.gmra.mxu2 %vm750_vm5, %v1563_v51 }
 0x1c6   : >> { %11180 = vmatmul.msk.f32.gmra.mxu3 %vm750_vm5, %v13897_v52 }
 0x1c7   : >> { %11310 = vmatmul.msk.f32.gmra.mxu0 %vm750_vm5, %v13755_v53 }
 0x1c8   : >> { %v13907_v49 = vpop.f32.mrf.mxu2 }
 0x1c9   : >> { %18050 = vst [vmem:[#allocation15_spill] sm:$0xff] %v13907_v49  ;;  %v13909_v56 = vpop.f32.mrf.mxu3  ;;  %v14141_v49 = vld [vmem:[%s13600_s17 + $0xf7] sm:$0xff] }
 0x1ca   : >> { %18051 = vst [vmem:[#allocation16_spill] sm:$0xff] %v13909_v56  ;;  %v13911_v58 = vpop.f32.mrf.mxu1  ;;  %v1569_v56 = vld [vmem:[%s13600_s17 + $0x61] sm:$0xff] }
 0x1cc   : >> { %v13918_v63 = vpop.f32.mrf.mxu0 }
 0x1cd   : >> { %10983 = vmatmul.msk.f32.gmra.mxu1 %vm750_vm5, %v623_v59  ;;  %11049 = vmatmul.msk.f32.gmra.mxu2 %vm750_vm5, %v1564_v60  ;;  %v626_v60 = vld [vmem:[%s13600_s17 + $0x3f] sm:$0xff] }
 0x1ce   : >> { %11181 = vmatmul.msk.f32.gmra.mxu3 %vm750_vm5, %v13916_v62 }
 0x1cf   : >> { %11311 = vmatmul.msk.f32.gmra.mxu0 %vm750_vm5, %v13769_v57 }
 0x1d0   : >> { %v13926_v53 = vpop.f32.mrf.mxu2 }
 0x1d1   : >> { %18052 = vst [vmem:[#allocation17_spill] sm:$0xff] %v13926_v53  ;;  %v13928_v1 = vpop.f32.mrf.mxu3  ;;  %v14124_v53 = vld [vmem:[%s13600_s17 + $0xdf] sm:$0xff] }
 0x1d2   : >> { %18053 = vst [vmem:[#allocation18_spill] sm:$0xff] %v13928_v1  ;;  %v13930_v3 = vpop.f32.mrf.mxu1  ;;  %v13991_v1 = vld [vmem:[%s13600_s17 + $0xa7] sm:$0xff] }
 0x1d4   : >> { %v13937_v17 = vpop.f32.mrf.mxu0 }
 0x1d5   : >> { %10984 = vmatmul.msk.f32.gmra.mxu1 %vm750_vm5, %v624_v4  ;;  %11050 = vmatmul.msk.f32.gmra.mxu2 %vm750_vm5, %v1565_v9  ;;  %v1567_v4 = vld [vmem:[%s13600_s17 + $0x41] sm:$0xff]  ;;  %v13973_v9 = vld [vmem:[%s13600_s17 + $0x8f] sm:$0xff] }
 0x1d6   : >> { %11182 = vmatmul.msk.f32.gmra.mxu3 %vm750_vm5, %v13935_v12 }
 0x1d7   : >> { %11312 = vmatmul.msk.f32.gmra.mxu0 %vm750_vm5, %v13795_v0 }
 0x1d8   : >> { %v13945_v57 = vpop.f32.mrf.mxu2 }
 0x1d9   : >> { %18054 = vst [vmem:[#allocation19_spill] sm:$0xff] %v13945_v57  ;;  %v13947_v20 = vpop.f32.mrf.mxu3  ;;  %v14105_v57 = vld [vmem:[%s13600_s17 + $0xd7] sm:$0xff] }
 0x1da   : >> { %18055 = vst [vmem:[#allocation20_spill] sm:$0xff] %v13947_v20  ;;  %v13949_v29 = vpop.f32.mrf.mxu1  ;;  %v1568_v20 = vld [vmem:[%s13600_s17 + $0x59] sm:$0xff] }
 0x1dc   : >> { %v13956_v48 = vpop.f32.mrf.mxu0 }
 0x1dd   : >> { %10985 = vmatmul.msk.f32.gmra.mxu1 %vm750_vm5, %v625_v31  ;;  %11051 = vmatmul.msk.f32.gmra.mxu2 %vm750_vm5, %v1566_v39 }
 0x1de   : >> { %11183 = vmatmul.msk.f32.gmra.mxu3 %vm750_vm5, %v13954_v40 }
 0x1df   : >> { %11313 = vmatmul.msk.f32.gmra.mxu0 %vm750_vm5, %v13813_v5 }
 0x1e0   : >> { %v13964_v0 = vpop.f32.mrf.mxu2 }
 0x1e1   : >> { %18056 = vst [vmem:[#allocation21_spill] sm:$0xff] %v13964_v0  ;;  %v13966_v51 = vpop.f32.mrf.mxu3  ;;  %v14086_v0 = vld [vmem:[%s13600_s17 + $0xcf] sm:$0xff] }
 0x1e2   : >> { %18057 = vst [vmem:[#allocation22_spill] sm:$0xff] %v13966_v51  ;;  %v13968_v59 = vpop.f32.mrf.mxu1 }
 0x1e4   : >> { %v13975_v31 = vpop.f32.mrf.mxu0 }
 0x1e5   : >> { %10986 = vmatmul.msk.f32.gmra.mxu1 %vm750_vm5, %v626_v60  ;;  %11052 = vmatmul.msk.f32.gmra.mxu2 %vm750_vm5, %v1567_v4 }
 0x1e6   : >> { %11184 = vmatmul.msk.f32.gmra.mxu3 %vm750_vm5, %v13973_v9 }
 0x1e7   : >> { %11314 = vmatmul.msk.f32.gmra.mxu0 %vm750_vm5, %v13827_v13 }
 0x1e8   : >> { %v13983_v5 = vpop.f32.mrf.mxu2 }
 0x1e9   : >> { %18058 = vst [vmem:[#allocation23_spill] sm:$0xff] %v13983_v5  ;;  %v13985_v39 = vpop.f32.mrf.mxu3  ;;  %v14067_v5 = vld [vmem:[%s13600_s17 + $0xc7] sm:$0xff] }
 0x1ea   : >> { %18059 = vst [vmem:[#allocation24_spill] sm:$0xff] %v13985_v39  ;;  %v13987_v51 = vpop.f32.mrf.mxu1 }
 0x1ec   : >> { %v13993_v60 = vpop.f32.mrf.mxu0 }
 0x1ed   : >> { %10987 = vmatmul.msk.f32.gmra.mxu1 %vm750_vm5, %v13840_v21  ;;  %11053 = vmatmul.msk.f32.gmra.mxu2 %vm750_vm5, %v1568_v20 }
 0x1ee   : >> { %11185 = vmatmul.msk.f32.gmra.mxu3 %vm750_vm5, %v13991_v1 }
 0x1ef   : >> { %11315 = vmatmul.msk.f32.gmra.mxu0 %vm750_vm5, %v13604_v6 }
 0x1f0   : >> { %v14002_v13 = vpop.f32.mrf.mxu2 }
 0x1f1   : >> { %18060 = vst [vmem:[#allocation25_spill] sm:$0xff] %v14002_v13  ;;  %v14004_v4 = vpop.f32.mrf.mxu3  ;;  %v14048_v13 = vld [vmem:[%s13600_s17 + $0xbf] sm:$0xff] }
 0x1f2   : >> { %18061 = vst [vmem:[#allocation26_spill] sm:$0xff] %v14004_v4  ;;  %v14006_v39 = vpop.f32.mrf.mxu1 }
 0x1f4   : >> { %v14012_v21 = vpop.f32.mrf.mxu0 }
 0x1f5   : >> { %10988 = vmatmul.msk.f32.gmra.mxu1 %vm750_vm5, %v13859_v32  ;;  %11054 = vmatmul.msk.f32.gmra.mxu2 %vm750_vm5, %v1569_v56 }
 0x1f6   : >> { %11186 = vmatmul.msk.f32.gmra.mxu3 %vm750_vm5, %v14010_v45 }
 0x1f7   : >> { %11316 = vmatmul.msk.f32.gmra.mxu0 %vm750_vm5, %v13619_v10 }
 0x1f8   : >> { %v14021_v6 = vpop.f32.mrf.mxu2 }
 0x1f9   : >> { %18062 = vst [vmem:[#allocation27_spill] sm:$0xff] %v14021_v6  ;;  %v14023_v20 = vpop.f32.mrf.mxu3  ;;  %v1571_v6 = vld [vmem:[%s13600_s17 + $0x71] sm:$0xff] }
 0x1fa   : >> { %18063 = vst [vmem:[#allocation28_spill] sm:$0xff] %v14023_v20  ;;  %v14025_v4 = vpop.f32.mrf.mxu1 }
 0x1fc   : >> { %v14031_v32 = vpop.f32.mrf.mxu0 }
 0x1fd   : >> { %10989 = vmatmul.msk.f32.gmra.mxu1 %vm750_vm5, %v13878_v41  ;;  %11055 = vmatmul.msk.f32.gmra.mxu2 %vm750_vm5, %v1570_v36 }
 0x1fe   : >> { %11187 = vmatmul.msk.f32.gmra.mxu3 %vm750_vm5, %v14029_v27 }
 0x1ff   : >> { %11317 = vmatmul.msk.f32.gmra.mxu0 %vm750_vm5, %v13633_v14 }
 0x200   : >> { %v14040_v10 = vpop.f32.mrf.mxu2 }
 0x201   : >> { %18064 = vst [vmem:[#allocation29_spill] sm:$0xff] %v14040_v10  ;;  %v14042_v56 = vpop.f32.mrf.mxu3  ;;  %v1572_v10 = vld [vmem:[%s13600_s17 + $0x79] sm:$0xff] }
 0x202   : >> { %18065 = vst [vmem:[#allocation30_spill] sm:$0xff] %v14042_v56  ;;  %v14044_v20 = vpop.f32.mrf.mxu1 }
 0x204   : >> { %v14050_v41 = vpop.f32.mrf.mxu0 }
 0x205   : >> { %10990 = vmatmul.msk.f32.gmra.mxu1 %vm750_vm5, %v13897_v52  ;;  %11056 = vmatmul.msk.f32.gmra.mxu2 %vm750_vm5, %v1571_v6 }
 0x206   : >> { %11188 = vmatmul.msk.f32.gmra.mxu3 %vm750_vm5, %v14048_v13 }
 0x207   : >> { %11318 = vmatmul.msk.f32.gmra.mxu0 %vm750_vm5, %v13647_v18 }
 0x208   : >> { %v14059_v14 = vpop.f32.mrf.mxu2 }
 0x209   : >> { %18066 = vst [vmem:[#allocation31_spill] sm:$0xff] %v14059_v14  ;;  %v14061_v36 = vpop.f32.mrf.mxu3  ;;  %v1573_v14 = vld [vmem:[%s13600_s17 + $0x81] sm:$0xff] }
 0x20a   : >> { %18067 = vst [vmem:[#allocation32_spill] sm:$0xff] %v14061_v36  ;;  %v14063_v56 = vpop.f32.mrf.mxu1 }
 0x20c   : >> { %v14069_v52 = vpop.f32.mrf.mxu0 }
 0x20d   : >> { %10991 = vmatmul.msk.f32.gmra.mxu1 %vm750_vm5, %v13916_v62  ;;  %11057 = vmatmul.msk.f32.gmra.mxu2 %vm750_vm5, %v1572_v10 }
 0x20e   : >> { %11189 = vmatmul.msk.f32.gmra.mxu3 %vm750_vm5, %v14067_v5 }
 0x20f   : >> { %11319 = vmatmul.msk.f32.gmra.mxu0 %vm750_vm5, %v13661_v22 }
 0x210   : >> { %v14078_v18 = vpop.f32.mrf.mxu2 }
 0x211   : >> { %18068 = vst [vmem:[#allocation33_spill] sm:$0xff] %v14078_v18  ;;  %v14080_v6 = vpop.f32.mrf.mxu3  ;;  %v1574_v18 = vld [vmem:[%s13600_s17 + $0x89] sm:$0xff] }
 0x212   : >> { %18069 = vst [vmem:[#allocation34_spill] sm:$0xff] %v14080_v6  ;;  %v14082_v36 = vpop.f32.mrf.mxu1 }
 0x214   : >> { %v14088_v62 = vpop.f32.mrf.mxu0 }
 0x215   : >> { %10992 = vmatmul.msk.f32.gmra.mxu1 %vm750_vm5, %v13935_v12  ;;  %11058 = vmatmul.msk.f32.gmra.mxu2 %vm750_vm5, %v1573_v14 }
 0x216   : >> { %11190 = vmatmul.msk.f32.gmra.mxu3 %vm750_vm5, %v14086_v0 }
 0x217   : >> { %11320 = vmatmul.msk.f32.gmra.mxu0 %vm750_vm5, %v13675_v26 }
 0x218   : >> { %v14097_v22 = vpop.f32.mrf.mxu2 }
 0x219   : >> { %18070 = vst [vmem:[#allocation35_spill] sm:$0xff] %v14097_v22  ;;  %v14099_v10 = vpop.f32.mrf.mxu3  ;;  %v1575_v22 = vld [vmem:[%s13600_s17 + $0x91] sm:$0xff] }
 0x21a   : >> { %18071 = vst [vmem:[#allocation36_spill] sm:$0xff] %v14099_v10  ;;  %v14101_v6 = vpop.f32.mrf.mxu1 }
 0x21c   : >> { %v14107_v12 = vpop.f32.mrf.mxu0 }
 0x21d   : >> { %10993 = vmatmul.msk.f32.gmra.mxu1 %vm750_vm5, %v13954_v40  ;;  %11059 = vmatmul.msk.f32.gmra.mxu2 %vm750_vm5, %v1574_v18 }
 0x21e   : >> { %11191 = vmatmul.msk.f32.gmra.mxu3 %vm750_vm5, %v14105_v57 }
 0x21f   : >> { %11321 = vmatmul.msk.f32.gmra.mxu0 %vm750_vm5, %v13686_v30 }
 0x220   : >> { %v14116_v26 = vpop.f32.mrf.mxu2 }
 0x221   : >> { %18072 = vst [vmem:[#allocation37_spill] sm:$0xff] %v14116_v26  ;;  %v14118_v14 = vpop.f32.mrf.mxu3  ;;  %v1576_v26 = vld [vmem:[%s13600_s17 + $0xa9] sm:$0xff] }
 0x222   : >> { %18073 = vst [vmem:[#allocation38_spill] sm:$0xff] %v14118_v14  ;;  %v14120_v10 = vpop.f32.mrf.mxu1 }
 0x223   : >> { %18074 = vst [vmem:[#allocation39_spill] sm:$0xff] %v14120_v10  ;;  %v14153_v10 = vld [vmem:[%s13600_s17 + $0xff] sm:$0xff] }
 0x224   : >> { %v14126_v40 = vpop.f32.mrf.mxu0 }
 0x225   : >> { %10994 = vmatmul.msk.f32.gmra.mxu1 %vm750_vm5, %v13973_v9  ;;  %11060 = vmatmul.msk.f32.gmra.mxu2 %vm750_vm5, %v1575_v22 }
 0x226   : >> { %11192 = vmatmul.msk.f32.gmra.mxu3 %vm750_vm5, %v14124_v53 }
 0x227   : >> { %11322 = vmatmul.msk.f32.gmra.mxu0 %vm750_vm5, %v13697_v34 }
 0x228   : >> { %v14135_v30 = vpop.f32.mrf.mxu2 }
 0x229   : >> { %18075 = vst [vmem:[#allocation40_spill] sm:$0xff] %v14135_v30  ;;  %v14137_v18 = vpop.f32.mrf.mxu3 }
 0x22a   : >> { %18076 = vst [vmem:[#allocation41_spill] sm:$0xff] %v14137_v18  ;;  %v1368_v14 = vpop.f32.mrf.mxu1 }
 0x22b   : >> { %v1369_v34 = vadd.f32 %v1368_v14, %v13842_v24 }
 0x22c   : >> { %v2909_v44 = vpop.f32.mrf.mxu0 }
 0x22d   : >> { %10995 = vmatmul.msk.f32.gmra.mxu1 %vm750_vm5, %v13991_v1  ;;  %11061 = vmatmul.msk.f32.gmra.mxu2 %vm750_vm5, %v1576_v26 }
 0x22e   : >> { %11193 = vmatmul.msk.f32.gmra.mxu3 %vm750_vm5, %v14141_v49 }
 0x22f   : >> { %11323 = vmatmul.msk.f32.gmra.mxu0 %vm750_vm5, %v13708_v38 }
 0x230   : >> { %v1838_v9 = vpop.f32.mrf.mxu2 }
 0x231   : >> { %v2030_v22 = vadd.f32 %v1838_v9, %v1369_v34  ;;  %v2375_v18 = vpop.f32.mrf.mxu3  ;;  %v14167_v9 = vld [vmem:[%s13600_s17 + $0x107] sm:$0xff] }
 0x232   : >> { %v1371_v30 = vpop.f32.mrf.mxu1 }
 0x233   : >> { %v2567_v25 = vadd.f32 %v2375_v18, %v2030_v22  ;;  %v1372_v38 = vadd.f32 %v1371_v30, %v13861_v33 }
 0x234   : >> { %v2912_v1 = vpop.f32.mrf.mxu0 }
 0x235   : >> { %v14155_v26 = vadd.f32 %v2909_v44, %v2567_v25  ;;  %10996 = vmatmul.msk.f32.gmra.mxu1 %vm750_vm5, %v14010_v45  ;;  %11062 = vmatmul.msk.f32.gmra.mxu2 %vm750_vm5, %v1577_v35  ;;  %v1578_v25 = vld [vmem:[%s13600_s17 + $0xb9] sm:$0xff] }
 0x236   : >> { %11194 = vmatmul.msk.f32.gmra.mxu3 %vm750_vm5, %v14153_v10 }
 0x237   : >> { %11324 = vmatmul.msk.f32.gmra.mxu0 %vm750_vm5, %v13722_v42 }
 0x238   : >> { %v1841_v24 = vpop.f32.mrf.mxu2 }
 0x239   : >> { %v2031_v14 = vadd.f32 %v1841_v24, %v1372_v38  ;;  %v2378_v18 = vpop.f32.mrf.mxu3 }
 0x23a   : >> { %v1374_v34 = vpop.f32.mrf.mxu1 }
 0x23b   : >> { %v2568_v44 = vadd.f32 %v2378_v18, %v2031_v14  ;;  %v1375_v42 = vadd.f32 %v1374_v34, %v13880_v43  ;;  %v14181_v14 = vld [vmem:[%s13600_s17 + $0x10f] sm:$0xff] }
 0x23c   : >> { %v2915_v45 = vpop.f32.mrf.mxu0 }
 0x23d   : >> { %v14169_v35 = vadd.f32 %v2912_v1, %v2568_v44  ;;  %10997 = vmatmul.msk.f32.gmra.mxu1 %vm750_vm5, %v14029_v27  ;;  %11063 = vmatmul.msk.f32.gmra.mxu2 %vm750_vm5, %v1578_v25  ;;  %v1579_v1 = vld [vmem:[%s13600_s17 + $0xc1] sm:$0xff] }
 0x23e   : >> { %11195 = vmatmul.msk.f32.gmra.mxu3 %vm750_vm5, %v14167_v9 }
 0x23f   : >> { %11325 = vmatmul.msk.f32.gmra.mxu0 %vm750_vm5, %v13736_v46 }
 0x240   : >> { %v1844_v33 = vpop.f32.mrf.mxu2 }
 0x241   : >> { %v2032_v30 = vadd.f32 %v1844_v33, %v1375_v42  ;;  %v2381_v22 = vpop.f32.mrf.mxu3  ;;  %v14195_v33 = vld [vmem:[%s13600_s17 + $0x117] sm:$0xff] }
 0x242   : >> { %v1377_v38 = vpop.f32.mrf.mxu1 }
 0x243   : >> { %v2569_v24 = vadd.f32 %v2381_v22, %v2032_v30  ;;  %v1378_v46 = vadd.f32 %v1377_v38, %v13899_v55 }
 0x244   : >> { %v2918_v27 = vpop.f32.mrf.mxu0 }
 0x245   : >> { %v14183_v18 = vadd.f32 %v2915_v45, %v2569_v24  ;;  %10998 = vmatmul.msk.f32.gmra.mxu1 %vm750_vm5, %v14048_v13  ;;  %11064 = vmatmul.msk.f32.gmra.mxu2 %vm750_vm5, %v1579_v1  ;;  %v1580_v45 = vld [vmem:[%s13600_s17 + $0xc9] sm:$0xff]  ;;  %v1581_v24 = vld [vmem:[%s13600_s17 + $0xd1] sm:$0xff] }
 0x246   : >> { %11196 = vmatmul.msk.f32.gmra.mxu3 %vm750_vm5, %v14181_v14 }
 0x247   : >> { %11326 = vmatmul.msk.f32.gmra.mxu0 %vm750_vm5, %v13750_v50 }
 0x248   : >> { %v1847_v43 = vpop.f32.mrf.mxu2 }
 0x249   : >> { %v2033_v34 = vadd.f32 %v1847_v43, %v1378_v46  ;;  %v2384_v25 = vpop.f32.mrf.mxu3  ;;  %v14209_v46 = vld [vmem:[%s13600_s17 + $0x11f] sm:$0xff] }
 0x24a   : >> { %v1380_v44 = vpop.f32.mrf.mxu1 }
 0x24b   : >> { %v2570_v42 = vadd.f32 %v2384_v25, %v2033_v34  ;;  %v1381_v50 = vadd.f32 %v1380_v44, %v13918_v63 }
 0x24c   : >> { %v2921_v13 = vpop.f32.mrf.mxu0 }
 0x24d   : >> { %v14197_v30 = vadd.f32 %v2918_v27, %v2570_v42  ;;  %10999 = vmatmul.msk.f32.gmra.mxu1 %vm750_vm5, %v14067_v5  ;;  %11065 = vmatmul.msk.f32.gmra.mxu2 %vm750_vm5, %v1580_v45  ;;  %v1582_v45 = vld [vmem:[%s13600_s17 + $0xd9] sm:$0xff] }
 0x24e   : >> { %11197 = vmatmul.msk.f32.gmra.mxu3 %vm750_vm5, %v14195_v33 }
 0x24f   : >> { %11327 = vmatmul.msk.f32.gmra.mxu0 %vm750_vm5, %v13764_v54 }
 0x250   : >> { %v1850_v55 = vpop.f32.mrf.mxu2 }
 0x251   : >> { %v2034_v22 = vadd.f32 %v1850_v55, %v1381_v50  ;;  %v2387_v38 = vpop.f32.mrf.mxu3 }
 0x252   : >> { %v1383_v1 = vpop.f32.mrf.mxu1 }
 0x253   : >> { %v2571_v27 = vadd.f32 %v2387_v38, %v2034_v22  ;;  %v1384_v54 = vadd.f32 %v1383_v1, %v13937_v17  ;;  %v1583_v1 = vld [vmem:[%s13600_s17 + $0xe1] sm:$0xff] }
 0x254   : >> { %v2924_v5 = vpop.f32.mrf.mxu0 }
 0x255   : >> { %v14211_v43 = vadd.f32 %v2921_v13, %v2571_v27  ;;  %11000 = vmatmul.msk.f32.gmra.mxu1 %vm750_vm5, %v14086_v0  ;;  %11066 = vmatmul.msk.f32.gmra.mxu2 %vm750_vm5, %v1581_v24  ;;  %v14223_v13 = vld [vmem:[%s13600_s17 + $0x127] sm:$0xff]  ;;  %v14237_v27 = vld [vmem:[%s13600_s17 + $0x12f] sm:$0xff] }
 0x256   : >> { %11198 = vmatmul.msk.f32.gmra.mxu3 %vm750_vm5, %v14209_v46 }
 0x257   : >> { %11328 = vmatmul.msk.f32.gmra.mxu0 %vm750_vm5, %v13790_v61 }
 0x258   : >> { %v1853_v63 = vpop.f32.mrf.mxu2 }
 0x259   : >> { %v2035_v34 = vadd.f32 %v1853_v63, %v1384_v54  ;;  %v2390_v25 = vpop.f32.mrf.mxu3 }
 0x25a   : >> { %v1386_v44 = vpop.f32.mrf.mxu1 }
 0x25b   : >> { %v2572_v42 = vadd.f32 %v2390_v25, %v2035_v34  ;;  %v1387_v61 = vadd.f32 %v1386_v44, %v13956_v48  ;;  %v1584_v25 = vld [vmem:[%s13600_s17 + $0xf9] sm:$0xff] }
 0x25c   : >> { %v2927_v0 = vpop.f32.mrf.mxu0 }
 0x25d   : >> { %v14225_v50 = vadd.f32 %v2924_v5, %v2572_v42  ;;  %11001 = vmatmul.msk.f32.gmra.mxu1 %vm750_vm5, %v14105_v57  ;;  %11067 = vmatmul.msk.f32.gmra.mxu2 %vm750_vm5, %v1582_v45  ;;  %v14251_v45 = vld [vmem:[%s13600_s17 + $0x147] sm:$0xff] }
 0x25e   : >> { %11199 = vmatmul.msk.f32.gmra.mxu3 %vm750_vm5, %v14223_v13 }
 0x25f   : >> { %11329 = vmatmul.msk.f32.gmra.mxu0 %vm750_vm5, %v13808_v2 }
 0x260   : >> { %v1856_v17 = vpop.f32.mrf.mxu2 }
 0x261   : >> { %v2036_v55 = vadd.f32 %v1856_v17, %v1387_v61  ;;  %v2393_v22 = vpop.f32.mrf.mxu3 }
 0x262   : >> { %v1389_v38 = vpop.f32.mrf.mxu1 }
 0x263   : >> { %v2573_v24 = vadd.f32 %v2393_v22, %v2036_v55  ;;  %v1390_v2 = vadd.f32 %v1389_v38, %v13975_v31  ;;  %v1585_v55 = vld [vmem:[%s13600_s17 + $0x101] sm:$0xff]  ;;  %v14265_v38 = vld [vmem:[%s13600_s17 + $0x14f] sm:$0xff] }
 0x264   : >> { %v2930_v57 = vpop.f32.mrf.mxu0 }
 0x265   : >> { %v14239_v5 = vadd.f32 %v2927_v0, %v2573_v24  ;;  %11002 = vmatmul.msk.f32.gmra.mxu1 %vm750_vm5, %v14124_v53  ;;  %11068 = vmatmul.msk.f32.gmra.mxu2 %vm750_vm5, %v1583_v1 }
 0x266   : >> { %11200 = vmatmul.msk.f32.gmra.mxu3 %vm750_vm5, %v14237_v27 }
 0x267   : >> { %11330 = vmatmul.msk.f32.gmra.mxu0 %vm750_vm5, %v13822_v8 }
 0x268   : >> { %v1859_v48 = vpop.f32.mrf.mxu2 }
 0x269   : >> { %v2037_v54 = vadd.f32 %v1859_v48, %v1390_v2  ;;  %v2396_v63 = vpop.f32.mrf.mxu3  ;;  %v1586_v48 = vld [vmem:[%s13600_s17 + $0x109] sm:$0xff] }
 0x26a   : >> { %v1392_v34 = vpop.f32.mrf.mxu1 }
 0x26b   : >> { %v2574_v44 = vadd.f32 %v2396_v63, %v2037_v54  ;;  %v1393_v8 = vadd.f32 %v1392_v34, %v13993_v60  ;;  %v14279_v63 = vld [vmem:[%s13600_s17 + $0x157] sm:$0xff] }
 0x26c   : >> { %v2933_v53 = vpop.f32.mrf.mxu0 }
 0x26d   : >> { %v14253_v42 = vadd.f32 %v2930_v57, %v2574_v44  ;;  %11003 = vmatmul.msk.f32.gmra.mxu1 %vm750_vm5, %v14141_v49  ;;  %11069 = vmatmul.msk.f32.gmra.mxu2 %vm750_vm5, %v1584_v25 }
 0x26e   : >> { %11201 = vmatmul.msk.f32.gmra.mxu3 %vm750_vm5, %v14251_v45 }
 0x26f   : >> { %11331 = vmatmul.msk.f32.gmra.mxu0 %vm750_vm5, %v13607_v7 }
 0x270   : >> { %v1862_v31 = vpop.f32.mrf.mxu2 }
 0x271   : >> { %v2038_v0 = vadd.f32 %v1862_v31, %v1393_v8  ;;  %v2399_v61 = vpop.f32.mrf.mxu3  ;;  %v1587_v8 = vld [vmem:[%s13600_s17 + $0x111] sm:$0xff] }
 0x272   : >> { %v1395_v17 = vpop.f32.mrf.mxu1 }
 0x273   : >> { %v2575_v22 = vadd.f32 %v2399_v61, %v2038_v0  ;;  %v1396_v7 = vadd.f32 %v1395_v17, %v14012_v21  ;;  %v14293_v0 = vld [vmem:[%s13600_s17 + $0x15f] sm:$0xff] }
 0x274   : >> { %v2936_v49 = vpop.f32.mrf.mxu0 }
 0x275   : >> { %v14267_v1 = vadd.f32 %v2933_v53, %v2575_v22  ;;  %11004 = vmatmul.msk.f32.gmra.mxu1 %vm750_vm5, %v14153_v10  ;;  %11070 = vmatmul.msk.f32.gmra.mxu2 %vm750_vm5, %v1585_v55 }
 0x276   : >> { %11202 = vmatmul.msk.f32.gmra.mxu3 %vm750_vm5, %v14265_v38 }
 0x277   : >> { %11332 = vmatmul.msk.f32.gmra.mxu0 %vm750_vm5, %v13622_v11 }
 0x278   : >> { %v1865_v60 = vpop.f32.mrf.mxu2 }
 0x279   : >> { %v2039_v24 = vadd.f32 %v1865_v60, %v1396_v7  ;;  %v2402_v57 = vpop.f32.mrf.mxu3  ;;  %v14307_v60 = vld [vmem:[%s13600_s17 + $0x167] sm:$0xff] }
 0x27a   : >> { %v1398_v2 = vpop.f32.mrf.mxu1 }
 0x27b   : >> { %v2576_v54 = vadd.f32 %v2402_v57, %v2039_v24  ;;  %v1399_v11 = vadd.f32 %v1398_v2, %v14031_v32 }
 0x27c   : >> { %v2939_v10 = vpop.f32.mrf.mxu0 }
 0x27d   : >> { %v14281_v34 = vadd.f32 %v2936_v49, %v2576_v54  ;;  %11005 = vmatmul.msk.f32.gmra.mxu1 %vm750_vm5, %v14167_v9  ;;  %11071 = vmatmul.msk.f32.gmra.mxu2 %vm750_vm5, %v1586_v48  ;;  %v1588_v49 = vld [vmem:[%s13600_s17 + $0x119] sm:$0xff]  ;;  %v1589_v54 = vld [vmem:[%s13600_s17 + $0x121] sm:$0xff] }
 0x27e   : >> { %11203 = vmatmul.msk.f32.gmra.mxu3 %vm750_vm5, %v14279_v63 }
 0x27f   : >> { %11333 = vmatmul.msk.f32.gmra.mxu0 %vm750_vm5, %v13636_v15 }
 0x280   : >> { %v1868_v21 = vpop.f32.mrf.mxu2 }
 0x281   : >> { %v2040_v25 = vadd.f32 %v1868_v21, %v1399_v11  ;;  %v2405_v44 = vpop.f32.mrf.mxu3  ;;  %v14321_v11 = vld [vmem:[%s13600_s17 + $0x16f] sm:$0xff] }
 0x282   : >> { %v1401_v53 = vpop.f32.mrf.mxu1  ;;  %v11270_v21 = vld [vmem:[%s13600_s17 + $0x170] sm:$0xff] }
 0x283   : >> { %v2577_v31 = vadd.f32 %v2405_v44, %v2040_v25  ;;  %v1402_v15 = vadd.f32 %v1401_v53, %v14050_v41 }
 0x284   : >> { %v2942_v9 = vpop.f32.mrf.mxu0 }
 0x285   : >> { %v14295_v61 = vadd.f32 %v2939_v10, %v2577_v31  ;;  %11006 = vmatmul.msk.f32.gmra.mxu1 %vm750_vm5, %v14181_v14  ;;  %11072 = vmatmul.msk.f32.gmra.mxu2 %vm750_vm5, %v1587_v8  ;;  %v1590_v31 = vld [vmem:[%s13600_s17 + $0x129] sm:$0xff] }
 0x286   : >> { %11204 = vmatmul.msk.f32.gmra.mxu3 %vm750_vm5, %v14293_v0 }
 0x287   : >> { %11334 = vmatmul.msk.f32.gmra.mxu0 %vm750_vm5, %v13650_v19 }
 0x288   : >> { %v1871_v32 = vpop.f32.mrf.mxu2 }
 0x289   : >> { %v2041_v17 = vadd.f32 %v1871_v32, %v1402_v15  ;;  %v2408_v55 = vpop.f32.mrf.mxu3  ;;  %v14335_v15 = vld [vmem:[%s13600_s17 + $0x177] sm:$0xff] }
 0x28a   : >> { %v1404_v22 = vpop.f32.mrf.mxu1  ;;  %v11271_v32 = vld [vmem:[%s13600_s17 + $0x178] sm:$0xff] }
 0x28b   : >> { %v2578_v7 = vadd.f32 %v2408_v55, %v2041_v17  ;;  %v1405_v19 = vadd.f32 %v1404_v22, %v14069_v52 }
 0x28c   : >> { %v2945_v14 = vpop.f32.mrf.mxu0 }
 0x28d   : >> { %v14309_v24 = vadd.f32 %v2942_v9, %v2578_v7  ;;  %11007 = vmatmul.msk.f32.gmra.mxu1 %vm750_vm5, %v14195_v33  ;;  %11073 = vmatmul.msk.f32.gmra.mxu2 %vm750_vm5, %v1588_v49 }
 0x28e   : >> { %11205 = vmatmul.msk.f32.gmra.mxu3 %vm750_vm5, %v14307_v60 }
 0x28f   : >> { %11335 = vmatmul.msk.f32.gmra.mxu0 %vm750_vm5, %v13664_v23 }
 0x290   : >> { %v1874_v41 = vpop.f32.mrf.mxu2 }
 0x291   : >> { %v2042_v57 = vadd.f32 %v1874_v41, %v1405_v19  ;;  %v2411_v2 = vpop.f32.mrf.mxu3  ;;  %v14349_v41 = vld [vmem:[%s13600_s17 + $0x17f] sm:$0xff] }
 0x292   : >> { %v1407_v48 = vpop.f32.mrf.mxu1 }
 0x293   : >> { %v2579_v10 = vadd.f32 %v2411_v2, %v2042_v57  ;;  %v1408_v23 = vadd.f32 %v1407_v48, %v14088_v62  ;;  %v11272_v57 = vld [vmem:[%s13600_s17 + $0x180] sm:$0xff] }
 0x294   : >> { %v2948_v33 = vpop.f32.mrf.mxu0 }
 0x295   : >> { %v14324_v25 = vadd.f32 %v2945_v14, %v2579_v10  ;;  %11008 = vmatmul.msk.f32.gmra.mxu1 %vm750_vm5, %v14209_v46  ;;  %11074 = vmatmul.msk.f32.gmra.mxu2 %vm750_vm5, %v1589_v54  ;;  %v1591_v14 = vld [vmem:[%s13600_s17 + $0x131] sm:$0xff] }
 0x296   : >> { %11206 = vmatmul.msk.f32.gmra.mxu3 %vm750_vm5, %v14321_v11 }
 0x297   : >> { %11336 = vmatmul.msk.f32.gmra.mxu0 %vm750_vm5, %v11270_v21  ;;  %v1592_v21 = vld [vmem:[%s13600_s17 + $0x149] sm:$0xff] }
 0x298   : >> { %v1877_v52 = vpop.f32.mrf.mxu2 }
 0x299   : >> { %v2043_v44 = vadd.f32 %v1877_v52, %v1408_v23  ;;  %v2414_v53 = vpop.f32.mrf.mxu3  ;;  %v14363_v52 = vld [vmem:[%s13600_s17 + $0x197] sm:$0xff] }
 0x29a   : >> { %v1410_v8 = vpop.f32.mrf.mxu1 }
 0x29b   : >> { %v2580_v9 = vadd.f32 %v2414_v53, %v2043_v44  ;;  %v1411_v62 = vadd.f32 %v1410_v8, %v14107_v12  ;;  %v11273_v44 = vld [vmem:[%s13600_s17 + $0x198] sm:$0xff] }
 0x29c   : >> { %v2951_v46 = vpop.f32.mrf.mxu0 }
 0x29d   : >> { %v14338_v17 = vadd.f32 %v2948_v33, %v2580_v9  ;;  %11009 = vmatmul.msk.f32.gmra.mxu1 %vm750_vm5, %v14223_v13  ;;  %11075 = vmatmul.msk.f32.gmra.mxu2 %vm750_vm5, %v1590_v31 }
 0x29e   : >> { %11207 = vmatmul.msk.f32.gmra.mxu3 %vm750_vm5, %v14335_v15 }
 0x29f   : >> { %11337 = vmatmul.msk.f32.gmra.mxu0 %vm750_vm5, %v11271_v32  ;;  %v1593_v32 = vld [vmem:[%s13600_s17 + $0x151] sm:$0xff] }
 0x2a0   : >> { %v1880_v55 = vpop.f32.mrf.mxu2 }
 0x2a1   : >> { %v2044_v22 = vadd.f32 %v1880_v55, %v1411_v62  ;;  %v2417_v49 = vpop.f32.mrf.mxu3  ;;  %v14377_v55 = vld [vmem:[%s13600_s17 + $0x19f] sm:$0xff] }
 0x2a2   : >> { %v1413_v7 = vpop.f32.mrf.mxu1 }
 0x2a3   : >> { %v2581_v19 = vadd.f32 %v2417_v49, %v2044_v22  ;;  %v1414_v12 = vadd.f32 %v1413_v7, %v14126_v40  ;;  %v11274_v22 = vld [vmem:[%s13600_s17 + $0x1a0] sm:$0xff] }
 0x2a4   : >> { %v2954_v13 = vpop.f32.mrf.mxu0 }
 0x2a5   : >> { %v14352_v2 = vadd.f32 %v2951_v46, %v2581_v19  ;;  %11010 = vmatmul.msk.f32.gmra.mxu1 %vm750_vm5, %v14237_v27  ;;  %11076 = vmatmul.msk.f32.gmra.mxu2 %vm750_vm5, %v1591_v14 }
 0x2a6   : >> { %11208 = vmatmul.msk.f32.gmra.mxu3 %vm750_vm5, %v14349_v41 }
 0x2a7   : >> { %11338 = vmatmul.msk.f32.gmra.mxu0 %vm750_vm5, %v11272_v57  ;;  %v1594_v57 = vld [vmem:[%s13600_s17 + $0x159] sm:$0xff] }
 0x2a8   : >> { %v1883_v48 = vpop.f32.mrf.mxu2 }
 0x2a9   : >> { %v2045_v54 = vadd.f32 %v1883_v48, %v1414_v12  ;;  %v2420_v10 = vpop.f32.mrf.mxu3  ;;  %v14391_v48 = vld [vmem:[%s13600_s17 + $0x1a7] sm:$0xff] }
 0x2aa   : >> { %v1416_v33 = vpop.f32.mrf.mxu1 }
 0x2ab   : >> { %v2582_v23 = vadd.f32 %v2420_v10, %v2045_v54  ;;  %v1417_v40 = vadd.f32 %v1416_v33, %v13835_v16  ;;  %v11275_v54 = vld [vmem:[%s13600_s17 + $0x1a8] sm:$0xff] }
 0x2ac   : >> { %v2957_v27 = vpop.f32.mrf.mxu0 }
 0x2ad   : >> { %v14366_v53 = vadd.f32 %v2954_v13, %v2582_v23  ;;  %11011 = vmatmul.msk.f32.gmra.mxu1 %vm750_vm5, %v14251_v45  ;;  %11077 = vmatmul.msk.f32.gmra.mxu2 %vm750_vm5, %v1592_v21 }
 0x2ae   : >> { %11209 = vmatmul.msk.f32.gmra.mxu3 %vm750_vm5, %v14363_v52 }
 0x2af   : >> { %11339 = vmatmul.msk.f32.gmra.mxu0 %vm750_vm5, %v11273_v44  ;;  %v1595_v44 = vld [vmem:[%s13600_s17 + $0x161] sm:$0xff] }
 0x2b0   : >> { %v1886_v8 = vpop.f32.mrf.mxu2 }
 0x2b1   : >> { %v2046_v31 = vadd.f32 %v1886_v8, %v1417_v40  ;;  %v2423_v9 = vpop.f32.mrf.mxu3  ;;  %v14405_v8 = vld [vmem:[%s13600_s17 + $0x1af] sm:$0xff] }
 0x2b2   : >> { %v1419_v46 = vpop.f32.mrf.mxu1 }
 0x2b3   : >> { %v2583_v62 = vadd.f32 %v2423_v9, %v2046_v31  ;;  %v1420_v16 = vadd.f32 %v1419_v46, %v13854_v28  ;;  %v11276_v31 = vld [vmem:[%s13600_s17 + $0x1b0] sm:$0xff] }
 0x2b4   : >> { %v2960_v45 = vpop.f32.mrf.mxu0 }
 0x2b5   : >> { %v14380_v49 = vadd.f32 %v2957_v27, %v2583_v62  ;;  %11012 = vmatmul.msk.f32.gmra.mxu1 %vm750_vm5, %v14265_v38  ;;  %11078 = vmatmul.msk.f32.gmra.mxu2 %vm750_vm5, %v1593_v32 }
 0x2b6   : >> { %11210 = vmatmul.msk.f32.gmra.mxu3 %vm750_vm5, %v14377_v55 }
 0x2b7   : >> { %11340 = vmatmul.msk.f32.gmra.mxu0 %vm750_vm5, %v11274_v22  ;;  %v1596_v22 = vld [vmem:[%s13600_s17 + $0x169] sm:$0xff] }
 0x2b8   : >> { %v1889_v7 = vpop.f32.mrf.mxu2 }
 0x2b9   : >> { %v2047_v14 = vadd.f32 %v1889_v7, %v1420_v16  ;;  %v2426_v19 = vpop.f32.mrf.mxu3  ;;  %v14419_v7 = vld [vmem:[%s13600_s17 + $0x1b7] sm:$0xff] }
 0x2ba   : >> { %v1422_v13 = vpop.f32.mrf.mxu1 }
 0x2bb   : >> { %v2584_v12 = vadd.f32 %v2426_v19, %v2047_v14  ;;  %v1423_v28 = vadd.f32 %v1422_v13, %v13873_v37  ;;  %v11277_v14 = vld [vmem:[%s13600_s17 + $0x1b8] sm:$0xff] }
 0x2bc   : >> { %v2963_v38 = vpop.f32.mrf.mxu0 }
 0x2bd   : >> { %v14394_v10 = vadd.f32 %v2960_v45, %v2584_v12  ;;  %11013 = vmatmul.msk.f32.gmra.mxu1 %vm750_vm5, %v14279_v63  ;;  %11079 = vmatmul.msk.f32.gmra.mxu2 %vm750_vm5, %v1594_v57 }
 0x2be   : >> { %11211 = vmatmul.msk.f32.gmra.mxu3 %vm750_vm5, %v14391_v48 }
 0x2bf   : >> { %11341 = vmatmul.msk.f32.gmra.mxu0 %vm750_vm5, %v11275_v54  ;;  %v1597_v54 = vld [vmem:[%s13600_s17 + $0x171] sm:$0xff] }
 0x2c0   : >> { %v1892_v33 = vpop.f32.mrf.mxu2 }
 0x2c1   : >> { %v2048_v21 = vadd.f32 %v1892_v33, %v1423_v28  ;;  %v2429_v23 = vpop.f32.mrf.mxu3  ;;  %v14433_v33 = vld [vmem:[%s13600_s17 + $0x1bf] sm:$0xff] }
 0x2c2   : >> { %v1425_v27 = vpop.f32.mrf.mxu1 }
 0x2c3   : >> { %v2585_v40 = vadd.f32 %v2429_v23, %v2048_v21  ;;  %v1426_v37 = vadd.f32 %v1425_v27, %v13892_v47  ;;  %v11278_v21 = vld [vmem:[%s13600_s17 + $0x1c0] sm:$0xff] }
 0x2c4   : >> { %v2966_v63 = vpop.f32.mrf.mxu0 }
 0x2c5   : >> { %v14408_v9 = vadd.f32 %v2963_v38, %v2585_v40  ;;  %11014 = vmatmul.msk.f32.gmra.mxu1 %vm750_vm5, %v14293_v0  ;;  %11080 = vmatmul.msk.f32.gmra.mxu2 %vm750_vm5, %v1595_v44 }
 0x2c6   : >> { %11212 = vmatmul.msk.f32.gmra.mxu3 %vm750_vm5, %v14405_v8 }
 0x2c7   : >> { %11342 = vmatmul.msk.f32.gmra.mxu0 %vm750_vm5, %v11276_v31  ;;  %v1598_v31 = vld [vmem:[%s13600_s17 + $0x179] sm:$0xff] }
 0x2c8   : >> { %v1895_v46 = vpop.f32.mrf.mxu2 }
 0x2c9   : >> { %v2049_v32 = vadd.f32 %v1895_v46, %v1426_v37  ;;  %v2432_v62 = vpop.f32.mrf.mxu3  ;;  %v14447_v46 = vld [vmem:[%s13600_s17 + $0x1c7] sm:$0xff] }
 0x2ca   : >> { %v1428_v45 = vpop.f32.mrf.mxu1 }
 0x2cb   : >> { %v2586_v16 = vadd.f32 %v2432_v62, %v2049_v32  ;;  %v1429_v47 = vadd.f32 %v1428_v45, %v13911_v58  ;;  %v11279_v32 = vld [vmem:[%s13600_s17 + $0x1c8] sm:$0xff] }
 0x2cc   : >> { %v2969_v0 = vpop.f32.mrf.mxu0 }
 0x2cd   : >> { %v14422_v19 = vadd.f32 %v2966_v63, %v2586_v16  ;;  %11015 = vmatmul.msk.f32.gmra.mxu1 %vm750_vm5, %v14307_v60  ;;  %11081 = vmatmul.msk.f32.gmra.mxu2 %vm750_vm5, %v1596_v22 }
 0x2ce   : >> { %11213 = vmatmul.msk.f32.gmra.mxu3 %vm750_vm5, %v14419_v7 }
 0x2cf   : >> { %11343 = vmatmul.msk.f32.gmra.mxu0 %vm750_vm5, %v11277_v14  ;;  %v1599_v14 = vld [vmem:[%s13600_s17 + $0x181] sm:$0xff] }
 0x2d0   : >> { %v1898_v13 = vpop.f32.mrf.mxu2 }
 0x2d1   : >> { %v2050_v57 = vadd.f32 %v1898_v13, %v1429_v47  ;;  %v2435_v12 = vpop.f32.mrf.mxu3  ;;  %v14461_v13 = vld [vmem:[%s13600_s17 + $0x1cf] sm:$0xff] }
 0x2d2   : >> { %v1431_v38 = vpop.f32.mrf.mxu1 }
 0x2d3   : >> { %v2587_v28 = vadd.f32 %v2435_v12, %v2050_v57  ;;  %v1432_v58 = vadd.f32 %v1431_v38, %v13930_v3  ;;  %v11280_v57 = vld [vmem:[%s13600_s17 + $0x1d0] sm:$0xff] }
 0x2d4   : >> { %v2972_v60 = vpop.f32.mrf.mxu0 }
 0x2d5   : >> { %v14436_v23 = vadd.f32 %v2969_v0, %v2587_v28  ;;  %11016 = vmatmul.msk.f32.gmra.mxu1 %vm750_vm5, %v14321_v11  ;;  %11082 = vmatmul.msk.f32.gmra.mxu2 %vm750_vm5, %v1597_v54 }
 0x2d6   : >> { %11214 = vmatmul.msk.f32.gmra.mxu3 %vm750_vm5, %v14433_v33 }
 0x2d7   : >> { %11344 = vmatmul.msk.f32.gmra.mxu0 %vm750_vm5, %v11278_v21  ;;  %v1600_v21 = vld [vmem:[%s13600_s17 + $0x199] sm:$0xff] }
 0x2d8   : >> { %v1901_v27 = vpop.f32.mrf.mxu2 }
 0x2d9   : >> { %v2051_v44 = vadd.f32 %v1901_v27, %v1432_v58  ;;  %v2438_v40 = vpop.f32.mrf.mxu3  ;;  %v14475_v27 = vld [vmem:[%s13600_s17 + $0x1e7] sm:$0xff] }
 0x2da   : >> { %v1434_v63 = vpop.f32.mrf.mxu1 }
 0x2db   : >> { %v2588_v37 = vadd.f32 %v2438_v40, %v2051_v44  ;;  %v1435_v3 = vadd.f32 %v1434_v63, %v13949_v29  ;;  %v11281_v44 = vld [vmem:[%s13600_s17 + $0x1e8] sm:$0xff] }
 0x2dc   : >> { %v2975_v11 = vpop.f32.mrf.mxu0 }
 0x2dd   : >> { %v14450_v62 = vadd.f32 %v2972_v60, %v2588_v37  ;;  %11017 = vmatmul.msk.f32.gmra.mxu1 %vm750_vm5, %v14335_v15  ;;  %11083 = vmatmul.msk.f32.gmra.mxu2 %vm750_vm5, %v1598_v31 }
 0x2de   : >> { %11215 = vmatmul.msk.f32.gmra.mxu3 %vm750_vm5, %v14447_v46 }
 0x2df   : >> { %11345 = vmatmul.msk.f32.gmra.mxu0 %vm750_vm5, %v11279_v32  ;;  %v1601_v32 = vld [vmem:[%s13600_s17 + $0x1a1] sm:$0xff] }
 0x2e0   : >> { %v1904_v45 = vpop.f32.mrf.mxu2 }
 0x2e1   : >> { %v2052_v22 = vadd.f32 %v1904_v45, %v1435_v3  ;;  %v2441_v16 = vpop.f32.mrf.mxu3  ;;  %v14489_v45 = vld [vmem:[%s13600_s17 + $0x1ef] sm:$0xff] }
 0x2e2   : >> { %v1437_v0 = vpop.f32.mrf.mxu1 }
 0x2e3   : >> { %v2589_v47 = vadd.f32 %v2441_v16, %v2052_v22  ;;  %v1438_v29 = vadd.f32 %v1437_v0, %v13968_v59  ;;  %v11282_v22 = vld [vmem:[%s13600_s17 + $0x1f0] sm:$0xff] }
 0x2e4   : >> { %v2978_v15 = vpop.f32.mrf.mxu0 }
 0x2e5   : >> { %v14464_v12 = vadd.f32 %v2975_v11, %v2589_v47  ;;  %11018 = vmatmul.msk.f32.gmra.mxu1 %vm750_vm5, %v14349_v41  ;;  %11084 = vmatmul.msk.f32.gmra.mxu2 %vm750_vm5, %v1599_v14 }
 0x2e6   : >> { %11216 = vmatmul.msk.f32.gmra.mxu3 %vm750_vm5, %v14461_v13 }
 0x2e7   : >> { %11346 = vmatmul.msk.f32.gmra.mxu0 %vm750_vm5, %v11280_v57  ;;  %v1602_v57 = vld [vmem:[%s13600_s17 + $0x1a9] sm:$0xff] }
 0x2e8   : >> { %v1907_v38 = vpop.f32.mrf.mxu2 }
 0x2e9   : >> { %v2053_v54 = vadd.f32 %v1907_v38, %v1438_v29  ;;  %v2444_v28 = vpop.f32.mrf.mxu3  ;;  %v14503_v38 = vld [vmem:[%s13600_s17 + $0x1f7] sm:$0xff] }
 0x2ea   : >> { %v1440_v60 = vpop.f32.mrf.mxu1 }
 0x2eb   : >> { %v2590_v58 = vadd.f32 %v2444_v28, %v2053_v54  ;;  %v1441_v59 = vadd.f32 %v1440_v60, %v13987_v51  ;;  %v11283_v54 = vld [vmem:[%s13600_s17 + $0x1f8] sm:$0xff] }
 0x2ec   : >> { %v2981_v41 = vpop.f32.mrf.mxu0 }
 0x2ed   : >> { %v14478_v40 = vadd.f32 %v2978_v15, %v2590_v58  ;;  %11019 = vmatmul.msk.f32.gmra.mxu1 %vm750_vm5, %v14363_v52  ;;  %11085 = vmatmul.msk.f32.gmra.mxu2 %vm750_vm5, %v1600_v21 }
 0x2ee   : >> { %11217 = vmatmul.msk.f32.gmra.mxu3 %vm750_vm5, %v14475_v27 }
 0x2ef   : >> { %11347 = vmatmul.msk.f32.gmra.mxu0 %vm750_vm5, %v11281_v44  ;;  %v1603_v44 = vld [vmem:[%s13600_s17 + $0x1b1] sm:$0xff] }
 0x2f0   : >> { %v1910_v63 = vpop.f32.mrf.mxu2 }
 0x2f1   : >> { %v2054_v31 = vadd.f32 %v1910_v63, %v1441_v59  ;;  %v2447_v37 = vpop.f32.mrf.mxu3  ;;  %v14517_v63 = vld [vmem:[%s13600_s17 + $0x1ff] sm:$0xff] }
 0x2f2   : >> { %v1443_v11 = vpop.f32.mrf.mxu1 }
 0x2f3   : >> { %v2591_v3 = vadd.f32 %v2447_v37, %v2054_v31  ;;  %v1444_v51 = vadd.f32 %v1443_v11, %v14006_v39  ;;  %v11284_v31 = vld [vmem:[%s13600_s17 + $0x200] sm:$0xff] }
 0x2f4   : >> { %v2984_v52 = vpop.f32.mrf.mxu0 }
 0x2f5   : >> { %v14492_v16 = vadd.f32 %v2981_v41, %v2591_v3  ;;  %11020 = vmatmul.msk.f32.gmra.mxu1 %vm750_vm5, %v14377_v55  ;;  %11086 = vmatmul.msk.f32.gmra.mxu2 %vm750_vm5, %v1601_v32 }
 0x2f6   : >> { %11218 = vmatmul.msk.f32.gmra.mxu3 %vm750_vm5, %v14489_v45 }
 0x2f7   : >> { %11348 = vmatmul.msk.f32.gmra.mxu0 %vm750_vm5, %v11282_v22  ;;  %v1604_v22 = vld [vmem:[%s13600_s17 + $0x1b9] sm:$0xff] }
 0x2f8   : >> { %v1913_v0 = vpop.f32.mrf.mxu2 }
 0x2f9   : >> { %v2055_v14 = vadd.f32 %v1913_v0, %v1444_v51  ;;  %v2450_v47 = vpop.f32.mrf.mxu3  ;;  %v14531_v0 = vld [vmem:[%s13600_s17 + $0x207] sm:$0xff] }
 0x2fa   : >> { %v1446_v15 = vpop.f32.mrf.mxu1 }
 0x2fb   : >> { %v2592_v29 = vadd.f32 %v2450_v47, %v2055_v14  ;;  %v1447_v39 = vadd.f32 %v1446_v15, %v14025_v4  ;;  %v11285_v14 = vld [vmem:[%s13600_s17 + $0x208] sm:$0xff] }
 0x2fc   : >> { %v2987_v55 = vpop.f32.mrf.mxu0 }
 0x2fd   : >> { %v14506_v28 = vadd.f32 %v2984_v52, %v2592_v29  ;;  %11021 = vmatmul.msk.f32.gmra.mxu1 %vm750_vm5, %v14391_v48  ;;  %11087 = vmatmul.msk.f32.gmra.mxu2 %vm750_vm5, %v1602_v57 }
 0x2fe   : >> { %11219 = vmatmul.msk.f32.gmra.mxu3 %vm750_vm5, %v14503_v38 }
 0x2ff   : >> { %11349 = vmatmul.msk.f32.gmra.mxu0 %vm750_vm5, %v11283_v54  ;;  %v1605_v54 = vld [vmem:[%s13600_s17 + $0x1c1] sm:$0xff] }
 0x300   : >> { %v1916_v60 = vpop.f32.mrf.mxu2 }
 0x301   : >> { %v2056_v21 = vadd.f32 %v1916_v60, %v1447_v39  ;;  %v2453_v58 = vpop.f32.mrf.mxu3  ;;  %v14545_v60 = vld [vmem:[%s13600_s17 + $0x20f] sm:$0xff] }
 0x302   : >> { %v1449_v41 = vpop.f32.mrf.mxu1 }
 0x303   : >> { %v2593_v59 = vadd.f32 %v2453_v58, %v2056_v21  ;;  %v1450_v4 = vadd.f32 %v1449_v41, %v14044_v20  ;;  %v11286_v21 = vld [vmem:[%s13600_s17 + $0x210] sm:$0xff] }
 0x304   : >> { %v2990_v48 = vpop.f32.mrf.mxu0 }
 0x305   : >> { %v14520_v37 = vadd.f32 %v2987_v55, %v2593_v59  ;;  %11022 = vmatmul.msk.f32.gmra.mxu1 %vm750_vm5, %v14405_v8  ;;  %11088 = vmatmul.msk.f32.gmra.mxu2 %vm750_vm5, %v1603_v44 }
 0x306   : >> { %11220 = vmatmul.msk.f32.gmra.mxu3 %vm750_vm5, %v14517_v63 }
 0x307   : >> { %11350 = vmatmul.msk.f32.gmra.mxu0 %vm750_vm5, %v11284_v31  ;;  %v1606_v31 = vld [vmem:[%s13600_s17 + $0x1c9] sm:$0xff] }
 0x308   : >> { %v1919_v11 = vpop.f32.mrf.mxu2 }
 0x309   : >> { %v2057_v32 = vadd.f32 %v1919_v11, %v1450_v4  ;;  %v2456_v3 = vpop.f32.mrf.mxu3  ;;  %v14559_v11 = vld [vmem:[%s13600_s17 + $0x217] sm:$0xff] }
 0x30a   : >> { %v1452_v52 = vpop.f32.mrf.mxu1 }
 0x30b   : >> { %v2594_v51 = vadd.f32 %v2456_v3, %v2057_v32  ;;  %v1453_v20 = vadd.f32 %v1452_v52, %v14063_v56  ;;  %v11287_v32 = vld [vmem:[%s13600_s17 + $0x218] sm:$0xff] }
 0x30c   : >> { %v2993_v8 = vpop.f32.mrf.mxu0 }
 0x30d   : >> { %v14534_v47 = vadd.f32 %v2990_v48, %v2594_v51  ;;  %11023 = vmatmul.msk.f32.gmra.mxu1 %vm750_vm5, %v14419_v7  ;;  %11089 = vmatmul.msk.f32.gmra.mxu2 %vm750_vm5, %v1604_v22 }
 0x30e   : >> { %11221 = vmatmul.msk.f32.gmra.mxu3 %vm750_vm5, %v14531_v0 }
 0x30f   : >> { %11351 = vmatmul.msk.f32.gmra.mxu0 %vm750_vm5, %v11285_v14  ;;  %v1607_v14 = vld [vmem:[%s13600_s17 + $0x1d1] sm:$0xff] }
 0x310   : >> { %v1922_v15 = vpop.f32.mrf.mxu2 }
 0x311   : >> { %v2058_v57 = vadd.f32 %v1922_v15, %v1453_v20  ;;  %v2459_v29 = vpop.f32.mrf.mxu3  ;;  %v14573_v15 = vld [vmem:[%s13600_s17 + $0x21f] sm:$0xff] }
 0x312   : >> { %v1455_v55 = vpop.f32.mrf.mxu1 }
 0x313   : >> { %v2595_v39 = vadd.f32 %v2459_v29, %v2058_v57  ;;  %v1456_v56 = vadd.f32 %v1455_v55, %v14082_v36  ;;  %v11288_v57 = vld [vmem:[%s13600_s17 + $0x220] sm:$0xff] }
 0x314   : >> { %v2996_v7 = vpop.f32.mrf.mxu0 }
 0x315   : >> { %v14548_v58 = vadd.f32 %v2993_v8, %v2595_v39  ;;  %11024 = vmatmul.msk.f32.gmra.mxu1 %vm750_vm5, %v14433_v33  ;;  %11090 = vmatmul.msk.f32.gmra.mxu2 %vm750_vm5, %v1605_v54 }
 0x316   : >> { %11222 = vmatmul.msk.f32.gmra.mxu3 %vm750_vm5, %v14545_v60 }
 0x317   : >> { %11352 = vmatmul.msk.f32.gmra.mxu0 %vm750_vm5, %v11286_v21 }
 0x318   : >> { %v1925_v41 = vpop.f32.mrf.mxu2 }
 0x319   : >> { %v2059_v44 = vadd.f32 %v1925_v41, %v1456_v56  ;;  %v2462_v59 = vpop.f32.mrf.mxu3  ;;  %v1608_v56 = vld [vmem:[%s13600_s17 + $0x1e9] sm:$0xff] }
 0x31a   : >> { %v1458_v48 = vpop.f32.mrf.mxu1 }
 0x31b   : >> { %v2596_v4 = vadd.f32 %v2462_v59, %v2059_v44  ;;  %v1459_v36 = vadd.f32 %v1458_v48, %v14101_v6  ;;  %v18077_v6 = vld [vmem:[#allocation39_spill] sm:$0xff] }
 0x31c   : >> { %v2999_v33 = vpop.f32.mrf.mxu0  ;;  %v14587_v44 = vld [vmem:[%s13600_s17 + $0x237] sm:$0xff] }
 0x31d   : >> { %v14562_v3 = vadd.f32 %v2996_v7, %v2596_v4  ;;  %11025 = vmatmul.msk.f32.gmra.mxu1 %vm750_vm5, %v14447_v46  ;;  %11091 = vmatmul.msk.f32.gmra.mxu2 %vm750_vm5, %v1606_v31  ;;  %v11289_v59 = vld [vmem:[%s13600_s17 + $0x238] sm:$0xff]  ;;  %v18078_v31 = vld [vmem:[#allocation9_spill] sm:$0xff] }
 0x31e   : >> { %11223 = vmatmul.msk.f32.gmra.mxu3 %vm750_vm5, %v14559_v11 }
 0x31f   : >> { %11353 = vmatmul.msk.f32.gmra.mxu0 %vm750_vm5, %v11287_v32 }
 0x320   : >> { %v1928_v52 = vpop.f32.mrf.mxu2 }
 0x321   : >> { %v2060_v22 = vadd.f32 %v1928_v52, %v1459_v36  ;;  %v2465_v51 = vpop.f32.mrf.mxu3 }
 0x322   : >> { %v1461_v8 = vpop.f32.mrf.mxu1 }
 0x323   : >> { %v2597_v20 = vadd.f32 %v2465_v51, %v2060_v22  ;;  %v1462_v55 = vadd.f32 %v1461_v8, %v18077_v6  ;;  %v1609_v22 = vld [vmem:[%s13600_s17 + $0x1f1] sm:$0xff]  ;;  %v14601_v8 = vld [vmem:[%s13600_s17 + $0x23f] sm:$0xff] }
 0x324   : >> { %v3002_v46 = vpop.f32.mrf.mxu0 }
 0x325   : >> { %v14576_v29 = vadd.f32 %v2999_v33, %v2597_v20  ;;  %11026 = vmatmul.msk.f32.gmra.mxu1 %vm750_vm5, %v14461_v13  ;;  %11092 = vmatmul.msk.f32.gmra.mxu2 %vm750_vm5, %v1607_v14  ;;  %v11290_v14 = vld [vmem:[%s13600_s17 + $0x240] sm:$0xff] }
 0x326   : >> { %11224 = vmatmul.msk.f32.gmra.mxu3 %vm750_vm5, %v14573_v15 }
 0x327   : >> { %11354 = vmatmul.msk.f32.gmra.mxu0 %vm750_vm5, %v11288_v57 }
 0x328   : >> { %v1931_v54 = vpop.f32.mrf.mxu2 }
 0x329   : >> { %v2061_v39 = vadd.f32 %v1931_v54, %v1462_v55  ;;  %v2468_v7 = vpop.f32.mrf.mxu3 }
 0x32a   : >> { %v1464_v21 = vpop.f32.mrf.mxu1 }
 0x32b   : >> { %v2598_v41 = vadd.f32 %v2468_v7, %v2061_v39  ;;  %v1465_v4 = vadd.f32 %v1464_v21, %v18078_v31  ;;  %v1610_v7 = vld [vmem:[%s13600_s17 + $0x1f9] sm:$0xff] }
 0x32c   : >> { %v3005_v13 = vpop.f32.mrf.mxu0 }
 0x32d   : >> { %v14590_v48 = vadd.f32 %v3002_v46, %v2598_v41  ;;  %11027 = vmatmul.msk.f32.gmra.mxu1 %vm750_vm5, %v14475_v27  ;;  %11093 = vmatmul.msk.f32.gmra.mxu2 %vm750_vm5, %v1608_v56  ;;  %v18079_v46 = vld [vmem:[#allocation11_spill] sm:$0xff]  ;;  %v14615_v56 = vld [vmem:[%s13600_s17 + $0x247] sm:$0xff] }
 0x32e   : >> { %11225 = vmatmul.msk.f32.gmra.mxu3 %vm750_vm5, %v14587_v44  ;;  %v11291_v41 = vld [vmem:[%s13600_s17 + $0x248] sm:$0xff] }
 0x32f   : >> { %11355 = vmatmul.msk.f32.gmra.mxu0 %vm750_vm5, %v11289_v59  ;;  %v18080_v59 = vld [vmem:[#allocation13_spill] sm:$0xff] }
 0x330   : >> { %v1934_v33 = vpop.f32.mrf.mxu2 }
 0x331   : >> { %v2062_v32 = vadd.f32 %v1934_v33, %v1465_v4  ;;  %v2471_v36 = vpop.f32.mrf.mxu3 }
 0x332   : >> { %v1467_v52 = vpop.f32.mrf.mxu1 }
 0x333   : >> { %v2599_v51 = vadd.f32 %v2471_v36, %v2062_v32  ;;  %v1468_v57 = vadd.f32 %v1467_v52, %v18079_v46  ;;  %v1611_v52 = vld [vmem:[%s13600_s17 + $0x201] sm:$0xff] }
 0x334   : >> { %v3008_v27 = vpop.f32.mrf.mxu0  ;;  %v18081_v46 = vld [vmem:[#allocation15_spill] sm:$0xff] }
 0x335   : >> { %v14604_v20 = vadd.f32 %v3005_v13, %v2599_v51  ;;  %11028 = vmatmul.msk.f32.gmra.mxu1 %vm750_vm5, %v14489_v45  ;;  %11094 = vmatmul.msk.f32.gmra.mxu2 %vm750_vm5, %v1609_v22  ;;  %v14629_v51 = vld [vmem:[%s13600_s17 + $0x24f] sm:$0xff] }
 0x336   : >> { %11226 = vmatmul.msk.f32.gmra.mxu3 %vm750_vm5, %v14601_v8 }
 0x337   : >> { %11356 = vmatmul.msk.f32.gmra.mxu0 %vm750_vm5, %v11290_v14 }
 0x338   : >> { %v1937_v6 = vpop.f32.mrf.mxu2 }
 0x339   : >> { %v2063_v55 = vadd.f32 %v1937_v6, %v1468_v57  ;;  %v2474_v54 = vpop.f32.mrf.mxu3 }
 0x33a   : >> { %v1470_v39 = vpop.f32.mrf.mxu1 }
 0x33b   : >> { %v2600_v21 = vadd.f32 %v2474_v54, %v2063_v55  ;;  %v1471_v31 = vadd.f32 %v1470_v39, %v18080_v59 }
 0x33c   : >> { %v3011_v45 = vpop.f32.mrf.mxu0 }
 0x33d   : >> { %v14618_v13 = vadd.f32 %v3008_v27, %v2600_v21  ;;  %11029 = vmatmul.msk.f32.gmra.mxu1 %vm750_vm5, %v14503_v38  ;;  %11095 = vmatmul.msk.f32.gmra.mxu2 %vm750_vm5, %v1610_v7  ;;  %v11292_v27 = vld [vmem:[%s13600_s17 + $0x250] sm:$0xff] }
 0x33e   : >> { %11227 = vmatmul.msk.f32.gmra.mxu3 %vm750_vm5, %v14615_v56  ;;  %v1612_v7 = vld [vmem:[%s13600_s17 + $0x209] sm:$0xff] }
 0x33f   : >> { %11357 = vmatmul.msk.f32.gmra.mxu0 %vm750_vm5, %v11291_v41  ;;  %v11293_v41 = vld [vmem:[%s13600_s17 + $0x258] sm:$0xff] }
 0x340   : >> { %v1940_v4 = vpop.f32.mrf.mxu2 }
 0x341   : >> { %v2064_v33 = vadd.f32 %v1940_v4, %v1471_v31  ;;  %v2477_v32 = vpop.f32.mrf.mxu3  ;;  %v18082_v31 = vld [vmem:[#allocation17_spill] sm:$0xff] }
 0x342   : >> { %v1473_v36 = vpop.f32.mrf.mxu1 }
 0x343   : >> { %v2601_v22 = vadd.f32 %v2477_v32, %v2064_v33  ;;  %v1474_v57 = vadd.f32 %v1473_v36, %v18081_v46  ;;  %v11294_v46 = vld [vmem:[%s13600_s17 + $0x260] sm:$0xff] }
 0x344   : >> { %v3014_v38 = vpop.f32.mrf.mxu0 }
 0x345   : >> { %v14632_v14 = vadd.f32 %v3011_v45, %v2601_v22  ;;  %11030 = vmatmul.msk.f32.gmra.mxu1 %vm750_vm5, %v14517_v63  ;;  %11096 = vmatmul.msk.f32.gmra.mxu2 %vm750_vm5, %v1611_v52  ;;  %v14643_v45 = vld [vmem:[%s13600_s17 + $0x257] sm:$0xff] }
 0x346   : >> { %11228 = vmatmul.msk.f32.gmra.mxu3 %vm750_vm5, %v14629_v51  ;;  %v1613_v22 = vld [vmem:[%s13600_s17 + $0x211] sm:$0xff] }
 0x347   : >> { %11358 = vmatmul.msk.f32.gmra.mxu0 %vm750_vm5, %v11292_v27  ;;  %v14657_v27 = vld [vmem:[%s13600_s17 + $0x25f] sm:$0xff] }
 0x348   : >> { %v1943_v6 = vpop.f32.mrf.mxu2 }
 0x349   : >> { %v2065_v55 = vadd.f32 %v1943_v6, %v1474_v57  ;;  %v2480_v54 = vpop.f32.mrf.mxu3  ;;  %v18083_v6 = vld [vmem:[#allocation19_spill] sm:$0xff] }
 0x34a   : >> { %v1476_v39 = vpop.f32.mrf.mxu1 }
 0x34b   : >> { %v2602_v21 = vadd.f32 %v2480_v54, %v2065_v55  ;;  %v1477_v4 = vadd.f32 %v1476_v39, %v18082_v31  ;;  %v14671_v31 = vld [vmem:[%s13600_s17 + $0x267] sm:$0xff] }
 0x34c   : >> { %v3017_v63 = vpop.f32.mrf.mxu0 }
 0x34d   : >> { %v14646_v59 = vadd.f32 %v3014_v38, %v2602_v21  ;;  %11031 = vmatmul.msk.f32.gmra.mxu1 %vm750_vm5, %v14531_v0  ;;  %11097 = vmatmul.msk.f32.gmra.mxu2 %vm750_vm5, %v1612_v7 }
 0x34e   : >> { %11229 = vmatmul.msk.f32.gmra.mxu3 %vm750_vm5, %v14643_v45 }
 0x34f   : >> { %11359 = vmatmul.msk.f32.gmra.mxu0 %vm750_vm5, %v11293_v41  ;;  %v1614_v41 = vld [vmem:[%s13600_s17 + $0x219] sm:$0xff] }
 0x350   : >> { %v1946_v33 = vpop.f32.mrf.mxu2 }
 0x351   : >> { %v2066_v32 = vadd.f32 %v1946_v33, %v1477_v4  ;;  %v2483_v36 = vpop.f32.mrf.mxu3  ;;  %v11295_v4 = vld [vmem:[%s13600_s17 + $0x268] sm:$0xff] }
 0x352   : >> { %v1479_v52 = vpop.f32.mrf.mxu1 }
 0x353   : >> { %v2603_v38 = vadd.f32 %v2483_v36, %v2066_v32  ;;  %v1480_v55 = vadd.f32 %v1479_v52, %v18083_v6  ;;  %v18084_v32 = vld [vmem:[#allocation21_spill] sm:$0xff]  ;;  %v1615_v6 = vld [vmem:[%s13600_s17 + $0x221] sm:$0xff] }
 0x354   : >> { %v3020_v0 = vpop.f32.mrf.mxu0 }
 0x355   : >> { %v14660_v57 = vadd.f32 %v3017_v63, %v2603_v38  ;;  %11032 = vmatmul.msk.f32.gmra.mxu1 %vm750_vm5, %v14545_v60  ;;  %11098 = vmatmul.msk.f32.gmra.mxu2 %vm750_vm5, %v1613_v22 }
 0x356   : >> { %11230 = vmatmul.msk.f32.gmra.mxu3 %vm750_vm5, %v14657_v27 }
 0x357   : >> { %11360 = vmatmul.msk.f32.gmra.mxu0 %vm750_vm5, %v11294_v46 }
 0x358   : >> { %v1949_v54 = vpop.f32.mrf.mxu2 }
 0x359   : >> { %v2067_v39 = vadd.f32 %v1949_v54, %v1480_v55  ;;  %v2486_v7 = vpop.f32.mrf.mxu3  ;;  %v14685_v55 = vld [vmem:[%s13600_s17 + $0x26f] sm:$0xff] }
 0x35a   : >> { %v1482_v21 = vpop.f32.mrf.mxu1  ;;  %v11296_v54 = vld [vmem:[%s13600_s17 + $0x270] sm:$0xff] }
 0x35b   : >> { %v2604_v63 = vadd.f32 %v2486_v7, %v2067_v39  ;;  %v1483_v36 = vadd.f32 %v1482_v21, %v18084_v32  ;;  %v18086_v7 = vld [vmem:[#allocation23_spill] sm:$0xff] }
 0x35c   : >> { %v3023_v60 = vpop.f32.mrf.mxu0 }
 0x35d   : >> { %v14674_v33 = vadd.f32 %v3020_v0, %v2604_v63  ;;  %11033 = vmatmul.msk.f32.gmra.mxu1 %vm750_vm5, %v14559_v11  ;;  %11099 = vmatmul.msk.f32.gmra.mxu2 %vm750_vm5, %v1614_v41 }
 0x35e   : >> { %11231 = vmatmul.msk.f32.gmra.mxu3 %vm750_vm5, %v14671_v31 }
 0x35f   : >> { %11361 = vmatmul.msk.f32.gmra.mxu0 %vm750_vm5, %v11295_v4 }
 0x360   : >> { %v1952_v52 = vpop.f32.mrf.mxu2 }
 0x361   : >> { %v2068_v22 = vadd.f32 %v1952_v52, %v1483_v36  ;;  %v2489_v38 = vpop.f32.mrf.mxu3  ;;  %v1616_v36 = vld [vmem:[%s13600_s17 + $0x239] sm:$0xff]  ;;  %v11167_v52 = vld [vmem:[%s13600_s17 + $0x287] sm:$0xff] }
 0x362   : >> { %v1485_v46 = vpop.f32.mrf.mxu1 }
 0x363   : >> { %v2605_v0 = vadd.f32 %v2489_v38, %v2068_v22  ;;  %v1486_v21 = vadd.f32 %v1485_v46, %v18086_v7  ;;  %v18088_v46 = vld [vmem:[#allocation25_spill] sm:$0xff] }
 0x364   : >> { %v3026_v11 = vpop.f32.mrf.mxu0 }
 0x365   : >> { %v14688_v39 = vadd.f32 %v3023_v60, %v2605_v0  ;;  %11034 = vmatmul.msk.f32.gmra.mxu1 %vm750_vm5, %v14573_v15  ;;  %11100 = vmatmul.msk.f32.gmra.mxu2 %vm750_vm5, %v1615_v6  ;;  %v11297_v15 = vld [vmem:[%s13600_s17 + $0x288] sm:$0xff] }
 0x366   : >> { %11232 = vmatmul.msk.f32.gmra.mxu3 %vm750_vm5, %v14685_v55 }
 0x367   : >> { %18085 = vst [vmem:[#allocation39_spill] sm:$0xff] %v14688_v39  ;;  %11362 = vmatmul.msk.f32.gmra.mxu0 %vm750_vm5, %v11296_v54  ;;  %v15158_v39 = vld [vmem:[%s13600_s17 + $0x1a9] sm:$0xff] }
 0x368   : >> { %v1955_v41 = vpop.f32.mrf.mxu2 }
 0x369   : >> { %v2069_v63 = vadd.f32 %v1955_v41, %v1486_v21  ;;  %v2492_v4 = vpop.f32.mrf.mxu3  ;;  %v1617_v41 = vld [vmem:[%s13600_s17 + $0x241] sm:$0xff] }
 0x36a   : >> { %v1488_v32 = vpop.f32.mrf.mxu1 }
 0x36b   : >> { %v2606_v60 = vadd.f32 %v2492_v4, %v2069_v63  ;;  %v1489_v6 = vadd.f32 %v1488_v32, %v18088_v46  ;;  %v18090_v32 = vld [vmem:[#allocation27_spill] sm:$0xff] }
 0x36c   : >> { %v3029_v22 = vpop.f32.mrf.mxu0 }
 0x36d   : >> { %v14700_v38 = vadd.f32 %v3026_v11, %v2606_v60  ;;  %11035 = vmatmul.msk.f32.gmra.mxu1 %vm750_vm5, %v14587_v44  ;;  %11101 = vmatmul.msk.f32.gmra.mxu2 %vm750_vm5, %v1616_v36  ;;  %v11168_v11 = vld [vmem:[%s13600_s17 + $0x28f] sm:$0xff] }
 0x36e   : >> { %11233 = vmatmul.msk.f32.gmra.mxu3 %vm750_vm5, %v11167_v52  ;;  %v11298_v44 = vld [vmem:[%s13600_s17 + $0x290] sm:$0xff] }
 0x36f   : >> { %18087 = vst [vmem:[#allocation9_spill] sm:$0xff] %v14700_v38  ;;  %11363 = vmatmul.msk.f32.gmra.mxu0 %vm750_vm5, %v11297_v15 }
 0x370   : >> { %v1958_v0 = vpop.f32.mrf.mxu2 }
 0x371   : >> { %v2070_v54 = vadd.f32 %v1958_v0, %v1489_v6  ;;  %v2495_v7 = vpop.f32.mrf.mxu3  ;;  %v1618_v0 = vld [vmem:[%s13600_s17 + $0x249] sm:$0xff] }
 0x372   : >> { %v1491_v21 = vpop.f32.mrf.mxu1 }
 0x373   : >> { %v2607_v63 = vadd.f32 %v2495_v7, %v2070_v54  ;;  %v1492_v36 = vadd.f32 %v1491_v21, %v18090_v32  ;;  %v18092_v21 = vld [vmem:[#allocation29_spill] sm:$0xff] }
 0x374   : >> { %v3032_v4 = vpop.f32.mrf.mxu0 }
 0x375   : >> { %v14711_v60 = vadd.f32 %v3029_v22, %v2607_v63  ;;  %11036 = vmatmul.msk.f32.gmra.mxu1 %vm750_vm5, %v14601_v8  ;;  %11102 = vmatmul.msk.f32.gmra.mxu2 %vm750_vm5, %v1617_v41  ;;  %v11169_v22 = vld [vmem:[%s13600_s17 + $0x297] sm:$0xff] }
 0x376   : >> { %11234 = vmatmul.msk.f32.gmra.mxu3 %vm750_vm5, %v11168_v11  ;;  %v11299_v8 = vld [vmem:[%s13600_s17 + $0x298] sm:$0xff] }
 0x377   : >> { %18089 = vst [vmem:[#allocation11_spill] sm:$0xff] %v14711_v60  ;;  %11364 = vmatmul.msk.f32.gmra.mxu0 %vm750_vm5, %v11298_v44 }
 0x378   : >> { %v1961_v52 = vpop.f32.mrf.mxu2 }
 0x379   : >> { %v2071_v15 = vadd.f32 %v1961_v52, %v1492_v36  ;;  %v2498_v46 = vpop.f32.mrf.mxu3  ;;  %v1619_v52 = vld [vmem:[%s13600_s17 + $0x251] sm:$0xff] }
 0x37a   : >> { %v1494_v6 = vpop.f32.mrf.mxu1 }
 0x37b   : >> { %v2608_v54 = vadd.f32 %v2498_v46, %v2071_v15  ;;  %v1495_v41 = vadd.f32 %v1494_v6, %v18092_v21  ;;  %v18094_v6 = vld [vmem:[#allocation31_spill] sm:$0xff] }
 0x37c   : >> { %v3035_v7 = vpop.f32.mrf.mxu0 }
 0x37d   : >> { %v14722_v63 = vadd.f32 %v3032_v4, %v2608_v54  ;;  %11037 = vmatmul.msk.f32.gmra.mxu1 %vm750_vm5, %v14615_v56  ;;  %11103 = vmatmul.msk.f32.gmra.mxu2 %vm750_vm5, %v1618_v0  ;;  %v11170_v4 = vld [vmem:[%s13600_s17 + $0x29f] sm:$0xff] }
 0x37e   : >> { %11235 = vmatmul.msk.f32.gmra.mxu3 %vm750_vm5, %v11169_v22  ;;  %v11300_v56 = vld [vmem:[%s13600_s17 + $0x2a0] sm:$0xff] }
 0x37f   : >> { %18091 = vst [vmem:[#allocation13_spill] sm:$0xff] %v14722_v63  ;;  %11365 = vmatmul.msk.f32.gmra.mxu0 %vm750_vm5, %v11299_v8  ;;  %v11510_v63 = vld [vmem:[%s13600_s17 + $0xdf] sm:$0xff] }
 0x380   : >> { %v1964_v11 = vpop.f32.mrf.mxu2 }
 0x381   : >> { %v2072_v44 = vadd.f32 %v1964_v11, %v1495_v41  ;;  %v2501_v32 = vpop.f32.mrf.mxu3  ;;  %v1620_v11 = vld [vmem:[%s13600_s17 + $0x259] sm:$0xff] }
 0x382   : >> { %v1497_v36 = vpop.f32.mrf.mxu1 }
 0x383   : >> { %v2609_v15 = vadd.f32 %v2501_v32, %v2072_v44  ;;  %v1498_v0 = vadd.f32 %v1497_v36, %v18094_v6  ;;  %v18096_v36 = vld [vmem:[#allocation33_spill] sm:$0xff] }
 0x384   : >> { %v3038_v46 = vpop.f32.mrf.mxu0 }
 0x385   : >> { %v14733_v54 = vadd.f32 %v3035_v7, %v2609_v15  ;;  %11038 = vmatmul.msk.f32.gmra.mxu1 %vm750_vm5, %v14629_v51  ;;  %11104 = vmatmul.msk.f32.gmra.mxu2 %vm750_vm5, %v1619_v52  ;;  %v11171_v7 = vld [vmem:[%s13600_s17 + $0x2a7] sm:$0xff] }
 0x386   : >> { %11236 = vmatmul.msk.f32.gmra.mxu3 %vm750_vm5, %v11170_v4  ;;  %v11301_v51 = vld [vmem:[%s13600_s17 + $0x2a8] sm:$0xff] }
 0x387   : >> { %18093 = vst [vmem:[#allocation15_spill] sm:$0xff] %v14733_v54  ;;  %11366 = vmatmul.msk.f32.gmra.mxu0 %vm750_vm5, %v11300_v56  ;;  %v11509_v54 = vld [vmem:[%s13600_s17 + $0xd7] sm:$0xff] }
 0x388   : >> { %v1967_v22 = vpop.f32.mrf.mxu2 }
 0x389   : >> { %v2073_v8 = vadd.f32 %v1967_v22, %v1498_v0  ;;  %v2504_v21 = vpop.f32.mrf.mxu3  ;;  %v1621_v22 = vld [vmem:[%s13600_s17 + $0x261] sm:$0xff] }
 0x38a   : >> { %v1500_v41 = vpop.f32.mrf.mxu1 }
 0x38b   : >> { %v2610_v44 = vadd.f32 %v2504_v21, %v2073_v8  ;;  %v1501_v52 = vadd.f32 %v1500_v41, %v18096_v36  ;;  %v18098_v41 = vld [vmem:[#allocation35_spill] sm:$0xff] }
 0x38c   : >> { %v3041_v32 = vpop.f32.mrf.mxu0 }
 0x38d   : >> { %v14744_v15 = vadd.f32 %v3038_v46, %v2610_v44  ;;  %11039 = vmatmul.msk.f32.gmra.mxu1 %vm750_vm5, %v14643_v45  ;;  %11105 = vmatmul.msk.f32.gmra.mxu2 %vm750_vm5, %v1620_v11  ;;  %v11172_v46 = vld [vmem:[%s13600_s17 + $0x2af] sm:$0xff] }
 0x38e   : >> { %11237 = vmatmul.msk.f32.gmra.mxu3 %vm750_vm5, %v11171_v7  ;;  %v11302_v45 = vld [vmem:[%s13600_s17 + $0x2b0] sm:$0xff] }
 0x38f   : >> { %18095 = vst [vmem:[#allocation17_spill] sm:$0xff] %v14744_v15  ;;  %11367 = vmatmul.msk.f32.gmra.mxu0 %vm750_vm5, %v11301_v51  ;;  %v11508_v15 = vld [vmem:[%s13600_s17 + $0xcf] sm:$0xff] }
 0x390   : >> { %v1970_v4 = vpop.f32.mrf.mxu2 }
 0x391   : >> { %v2074_v56 = vadd.f32 %v1970_v4, %v1501_v52  ;;  %v2507_v6 = vpop.f32.mrf.mxu3  ;;  %v1622_v4 = vld [vmem:[%s13600_s17 + $0x269] sm:$0xff] }
 0x392   : >> { %v1503_v0 = vpop.f32.mrf.mxu1 }
 0x393   : >> { %v2611_v8 = vadd.f32 %v2507_v6, %v2074_v56  ;;  %v1504_v11 = vadd.f32 %v1503_v0, %v18098_v41  ;;  %v18100_v0 = vld [vmem:[#allocation37_spill] sm:$0xff] }
 0x394   : >> { %v3044_v21 = vpop.f32.mrf.mxu0 }
 0x395   : >> { %v14755_v44 = vadd.f32 %v3041_v32, %v2611_v8  ;;  %11040 = vmatmul.msk.f32.gmra.mxu1 %vm750_vm5, %v14657_v27  ;;  %11106 = vmatmul.msk.f32.gmra.mxu2 %vm750_vm5, %v1621_v22  ;;  %v11173_v32 = vld [vmem:[%s13600_s17 + $0x2b7] sm:$0xff] }
 0x396   : >> { %11238 = vmatmul.msk.f32.gmra.mxu3 %vm750_vm5, %v11172_v46  ;;  %v11303_v27 = vld [vmem:[%s13600_s17 + $0x2b8] sm:$0xff] }
 0x397   : >> { %18097 = vst [vmem:[#allocation19_spill] sm:$0xff] %v14755_v44  ;;  %11368 = vmatmul.msk.f32.gmra.mxu0 %vm750_vm5, %v11302_v45  ;;  %v11507_v44 = vld [vmem:[%s13600_s17 + $0xc7] sm:$0xff] }
 0x398   : >> { %v1973_v7 = vpop.f32.mrf.mxu2 }
 0x399   : >> { %v2075_v51 = vadd.f32 %v1973_v7, %v1504_v11  ;;  %v2510_v36 = vpop.f32.mrf.mxu3  ;;  %v1623_v7 = vld [vmem:[%s13600_s17 + $0x271] sm:$0xff] }
 0x39a   : >> { %v1506_v52 = vpop.f32.mrf.mxu1 }
 0x39b   : >> { %v2612_v56 = vadd.f32 %v2510_v36, %v2075_v51  ;;  %v1507_v22 = vadd.f32 %v1506_v52, %v18100_v0  ;;  %v11174_v51 = vld [vmem:[%s13600_s17 + $0x2bf] sm:$0xff] }
 0x39c   : >> { %v3047_v6 = vpop.f32.mrf.mxu0  ;;  %v18102_v52 = vld [vmem:[#allocation40_spill] sm:$0xff] }
 0x39d   : >> { %v14766_v8 = vadd.f32 %v3044_v21, %v2612_v56  ;;  %11041 = vmatmul.msk.f32.gmra.mxu1 %vm750_vm5, %v14671_v31  ;;  %11107 = vmatmul.msk.f32.gmra.mxu2 %vm750_vm5, %v1622_v4  ;;  %v11304_v31 = vld [vmem:[%s13600_s17 + $0x2c0] sm:$0xff] }
 0x39e   : >> { %11239 = vmatmul.msk.f32.gmra.mxu3 %vm750_vm5, %v11173_v32 }
 0x39f   : >> { %18099 = vst [vmem:[#allocation21_spill] sm:$0xff] %v14766_v8  ;;  %11369 = vmatmul.msk.f32.gmra.mxu0 %vm750_vm5, %v11303_v27  ;;  %v11506_v8 = vld [vmem:[%s13600_s17 + $0xbf] sm:$0xff] }
 0x3a0   : >> { %v1976_v46 = vpop.f32.mrf.mxu2 }
 0x3a1   : >> { %v2076_v45 = vadd.f32 %v1976_v46, %v1507_v22  ;;  %v2513_v41 = vpop.f32.mrf.mxu3  ;;  %v11371_v46 = vld [vmem:[%s13600_s17 + $0x59] sm:$0xff] }
 0x3a2   : >> { %v1509_v11 = vpop.f32.mrf.mxu1 }
 0x3a3   : >> { %v2613_v21 = vadd.f32 %v2513_v41, %v2076_v45  ;;  %v1510_v56 = vadd.f32 %v1509_v11, %v18102_v52  ;;  %v11503_v45 = vld [vmem:[%s13600_s17 + $0xa7] sm:$0xff]  ;;  %v18104_v11 = vld [vmem:[#allocation10_spill] sm:$0xff] }
 0x3a4   : >> { %v3050_v36 = vpop.f32.mrf.mxu0  ;;  %v11633_v41 = vld [vmem:[%s13600_s17 + $0xa8] sm:$0xff] }
 0x3a5   : >> { %v14777_v4 = vadd.f32 %v3047_v6, %v2613_v21  ;;  %11042 = vmatmul.msk.f32.gmra.mxu1 %vm750_vm5, %v14685_v55  ;;  %11108 = vmatmul.msk.f32.gmra.mxu2 %vm750_vm5, %v1623_v7  ;;  %v14789_v21 = vld [vmem:[%s13600_s17 + $0xa9] sm:$0xff] }
 0x3a6   : >> { %11240 = vmatmul.msk.f32.gmra.mxu3 %vm750_vm5, %v11174_v51 }
 0x3a7   : >> { %18101 = vst [vmem:[#allocation23_spill] sm:$0xff] %v14777_v4  ;;  %11370 = vmatmul.msk.f32.gmra.mxu0 %vm750_vm5, %v11304_v31  ;;  %v11505_v4 = vld [vmem:[%s13600_s17 + $0xb7] sm:$0xff] }
 0x3a8   : >> { %v1979_v32 = vpop.f32.mrf.mxu2 }
 0x3a9   : >> { %v2077_v27 = vadd.f32 %v1979_v32, %v1510_v56  ;;  %v2516_v0 = vpop.f32.mrf.mxu3 }
 0x3aa   : >> { %v1512_v22 = vpop.f32.mrf.mxu1 }
 0x3ab   : >> { %v2614_v6 = vadd.f32 %v2516_v0, %v2077_v27  ;;  %v1513_v51 = vadd.f32 %v1512_v22, %v18104_v11  ;;  %v11372_v27 = vld [vmem:[%s13600_s17 + $0x61] sm:$0xff]  ;;  %v11504_v0 = vld [vmem:[%s13600_s17 + $0xaf] sm:$0xff] }
 0x3ac   : >> { %v3053_v55 = vpop.f32.mrf.mxu0  ;;  %v18106_v22 = vld [vmem:[#allocation12_spill] sm:$0xff] }
 0x3ad   : >> { %v14791_v7 = vadd.f32 %v3050_v36, %v2614_v6  ;;  %11437 = vmatmul.msk.f32.vlgmr.msra.gmra.mxu1 %vm750_vm5, %v11371_v46  ;;  %11569 = vmatmul.msk.f32.vlgmr.msra.gmra.mxu2 %vm750_vm5, %v11503_v45  ;;  %v11634_v6 = vld [vmem:[%s13600_s17 + $0xb0] sm:$0xff] }
 0x3ae   : >> { %11699 = vmatmul.msk.f32.vlgmr.msra.gmra.mxu3 %vm750_vm5, %v11633_v41  ;;  %v14803_v45 = vld [vmem:[%s13600_s17 + $0xb1] sm:$0xff] }
 0x3af   : >> { %18103 = vst [vmem:[#allocation25_spill] sm:$0xff] %v14791_v7  ;;  %11829 = vmatmul.msk.f32.vlgmr.msra.gmra.mxu0 %vm750_vm5, %v14789_v21  ;;  %v11373_v7 = vld [vmem:[%s13600_s17 + $0x69] sm:$0xff] }
 0x3b0   : >> { %v1982_v31 = vpop.f32.mrf.mxu2 }
 0x3b1   : >> { %v2078_v52 = vadd.f32 %v1982_v31, %v1513_v51  ;;  %v2519_v56 = vpop.f32.mrf.mxu3 }
 0x3b2   : >> { %v1515_v32 = vpop.f32.mrf.mxu1 }
 0x3b3   : >> { %v2615_v36 = vadd.f32 %v2519_v56, %v2078_v52  ;;  %v1516_v11 = vadd.f32 %v1515_v32, %v18106_v22  ;;  %v18108_v32 = vld [vmem:[#allocation14_spill] sm:$0xff] }
 0x3b4   : >> { %v3056_v46 = vpop.f32.mrf.mxu0 }
 0x3b5   : >> { %v14805_v41 = vadd.f32 %v3053_v55, %v2615_v36  ;;  %11438 = vmatmul.msk.f32.gmra.mxu1 %vm750_vm5, %v11372_v27  ;;  %11570 = vmatmul.msk.f32.gmra.mxu2 %vm750_vm5, %v11504_v0  ;;  %v11635_v36 = vld [vmem:[%s13600_s17 + $0xb8] sm:$0xff] }
 0x3b6   : >> { %11700 = vmatmul.msk.f32.gmra.mxu3 %vm750_vm5, %v11634_v6  ;;  %v14817_v0 = vld [vmem:[%s13600_s17 + $0xb9] sm:$0xff] }
 0x3b7   : >> { %18105 = vst [vmem:[#allocation27_spill] sm:$0xff] %v14805_v41  ;;  %11830 = vmatmul.msk.f32.gmra.mxu0 %vm750_vm5, %v14803_v45  ;;  %v11374_v41 = vld [vmem:[%s13600_s17 + $0x71] sm:$0xff] }
 0x3b8   : >> { %v1985_v51 = vpop.f32.mrf.mxu2 }
 0x3b9   : >> { %v2079_v31 = vadd.f32 %v1985_v51, %v1516_v11  ;;  %v2522_v52 = vpop.f32.mrf.mxu3 }
 0x3ba   : >> { %v1518_v56 = vpop.f32.mrf.mxu1 }
 0x3bb   : >> { %v2616_v55 = vadd.f32 %v2522_v52, %v2079_v31  ;;  %v1519_v22 = vadd.f32 %v1518_v56, %v18108_v32  ;;  %v18110_v56 = vld [vmem:[#allocation16_spill] sm:$0xff] }
 0x3bc   : >> { %v3059_v27 = vpop.f32.mrf.mxu0 }
 0x3bd   : >> { %v14819_v6 = vadd.f32 %v3056_v46, %v2616_v55  ;;  %11439 = vmatmul.msk.f32.gmra.mxu1 %vm750_vm5, %v11373_v7  ;;  %11571 = vmatmul.msk.f32.gmra.mxu2 %vm750_vm5, %v11505_v4  ;;  %v11636_v55 = vld [vmem:[%s13600_s17 + $0xc0] sm:$0xff] }
 0x3be   : >> { %11701 = vmatmul.msk.f32.gmra.mxu3 %vm750_vm5, %v11635_v36  ;;  %v14831_v4 = vld [vmem:[%s13600_s17 + $0xc1] sm:$0xff] }
 0x3bf   : >> { %18107 = vst [vmem:[#allocation29_spill] sm:$0xff] %v14819_v6  ;;  %11831 = vmatmul.msk.f32.gmra.mxu0 %vm750_vm5, %v14817_v0  ;;  %v11375_v6 = vld [vmem:[%s13600_s17 + $0x79] sm:$0xff] }
 0x3c0   : >> { %v1988_v11 = vpop.f32.mrf.mxu2 }
 0x3c1   : >> { %v2080_v51 = vadd.f32 %v1988_v11, %v1519_v22  ;;  %v2525_v31 = vpop.f32.mrf.mxu3 }
 0x3c2   : >> { %v1521_v52 = vpop.f32.mrf.mxu1 }
 0x3c3   : >> { %v2617_v46 = vadd.f32 %v2525_v31, %v2080_v51  ;;  %v1522_v32 = vadd.f32 %v1521_v52, %v18110_v56  ;;  %v18112_v52 = vld [vmem:[#allocation18_spill] sm:$0xff] }
 0x3c4   : >> { %v3062_v7 = vpop.f32.mrf.mxu0 }
 0x3c5   : >> { %v14833_v36 = vadd.f32 %v3059_v27, %v2617_v46  ;;  %11440 = vmatmul.msk.f32.gmra.mxu1 %vm750_vm5, %v11374_v41  ;;  %11572 = vmatmul.msk.f32.gmra.mxu2 %vm750_vm5, %v11506_v8  ;;  %v11637_v46 = vld [vmem:[%s13600_s17 + $0xc8] sm:$0xff] }
 0x3c6   : >> { %11702 = vmatmul.msk.f32.gmra.mxu3 %vm750_vm5, %v11636_v55  ;;  %v14845_v8 = vld [vmem:[%s13600_s17 + $0xc9] sm:$0xff] }
 0x3c7   : >> { %18109 = vst [vmem:[#allocation31_spill] sm:$0xff] %v14833_v36  ;;  %11832 = vmatmul.msk.f32.gmra.mxu0 %vm750_vm5, %v14831_v4  ;;  %v11376_v36 = vld [vmem:[%s13600_s17 + $0x81] sm:$0xff] }
 0x3c8   : >> { %v1991_v22 = vpop.f32.mrf.mxu2 }
 0x3c9   : >> { %v2081_v11 = vadd.f32 %v1991_v22, %v1522_v32  ;;  %v2528_v51 = vpop.f32.mrf.mxu3 }
 0x3ca   : >> { %v1524_v31 = vpop.f32.mrf.mxu1 }
 0x3cb   : >> { %v2618_v27 = vadd.f32 %v2528_v51, %v2081_v11  ;;  %v1525_v56 = vadd.f32 %v1524_v31, %v18112_v52  ;;  %v18114_v31 = vld [vmem:[#allocation20_spill] sm:$0xff] }
 0x3cc   : >> { %v3065_v41 = vpop.f32.mrf.mxu0 }
 0x3cd   : >> { %v14847_v55 = vadd.f32 %v3062_v7, %v2618_v27  ;;  %11441 = vmatmul.msk.f32.gmra.mxu1 %vm750_vm5, %v11375_v6  ;;  %11573 = vmatmul.msk.f32.gmra.mxu2 %vm750_vm5, %v11507_v44  ;;  %v11638_v27 = vld [vmem:[%s13600_s17 + $0xd0] sm:$0xff] }
 0x3ce   : >> { %11703 = vmatmul.msk.f32.gmra.mxu3 %vm750_vm5, %v11637_v46  ;;  %v14859_v44 = vld [vmem:[%s13600_s17 + $0xd1] sm:$0xff] }
 0x3cf   : >> { %18111 = vst [vmem:[#allocation33_spill] sm:$0xff] %v14847_v55  ;;  %11833 = vmatmul.msk.f32.gmra.mxu0 %vm750_vm5, %v14845_v8  ;;  %v11377_v55 = vld [vmem:[%s13600_s17 + $0x89] sm:$0xff] }
 0x3d0   : >> { %v1994_v32 = vpop.f32.mrf.mxu2 }
 0x3d1   : >> { %v2082_v22 = vadd.f32 %v1994_v32, %v1525_v56  ;;  %v2531_v11 = vpop.f32.mrf.mxu3 }
 0x3d2   : >> { %v1527_v51 = vpop.f32.mrf.mxu1 }
 0x3d3   : >> { %v2619_v7 = vadd.f32 %v2531_v11, %v2082_v22  ;;  %v1528_v52 = vadd.f32 %v1527_v51, %v18114_v31  ;;  %v18116_v51 = vld [vmem:[#allocation22_spill] sm:$0xff] }
 0x3d4   : >> { %v3068_v6 = vpop.f32.mrf.mxu0 }
 0x3d5   : >> { %v14861_v46 = vadd.f32 %v3065_v41, %v2619_v7  ;;  %11442 = vmatmul.msk.f32.gmra.mxu1 %vm750_vm5, %v11376_v36  ;;  %11574 = vmatmul.msk.f32.gmra.mxu2 %vm750_vm5, %v11508_v15  ;;  %v11639_v7 = vld [vmem:[%s13600_s17 + $0xd8] sm:$0xff] }
 0x3d6   : >> { %11704 = vmatmul.msk.f32.gmra.mxu3 %vm750_vm5, %v11638_v27  ;;  %v14873_v15 = vld [vmem:[%s13600_s17 + $0xd9] sm:$0xff] }
 0x3d7   : >> { %18113 = vst [vmem:[#allocation35_spill] sm:$0xff] %v14861_v46  ;;  %11834 = vmatmul.msk.f32.gmra.mxu0 %vm750_vm5, %v14859_v44  ;;  %v11378_v46 = vld [vmem:[%s13600_s17 + $0x91] sm:$0xff] }
 0x3d8   : >> { %v1997_v56 = vpop.f32.mrf.mxu2 }
 0x3d9   : >> { %v2083_v32 = vadd.f32 %v1997_v56, %v1528_v52  ;;  %v2534_v22 = vpop.f32.mrf.mxu3 }
 0x3da   : >> { %v1530_v11 = vpop.f32.mrf.mxu1 }
 0x3db   : >> { %v2620_v41 = vadd.f32 %v2534_v22, %v2083_v32  ;;  %v1531_v31 = vadd.f32 %v1530_v11, %v18116_v51  ;;  %v18118_v11 = vld [vmem:[#allocation24_spill] sm:$0xff] }
 0x3dc   : >> { %v3071_v36 = vpop.f32.mrf.mxu0 }
 0x3dd   : >> { %v14875_v27 = vadd.f32 %v3068_v6, %v2620_v41  ;;  %11443 = vmatmul.msk.f32.gmra.mxu1 %vm750_vm5, %v11377_v55  ;;  %11575 = vmatmul.msk.f32.gmra.mxu2 %vm750_vm5, %v11509_v54  ;;  %v11640_v41 = vld [vmem:[%s13600_s17 + $0xe0] sm:$0xff] }
 0x3de   : >> { %11705 = vmatmul.msk.f32.gmra.mxu3 %vm750_vm5, %v11639_v7  ;;  %v14887_v54 = vld [vmem:[%s13600_s17 + $0xe1] sm:$0xff] }
 0x3df   : >> { %18115 = vst [vmem:[#allocation37_spill] sm:$0xff] %v14875_v27  ;;  %11835 = vmatmul.msk.f32.gmra.mxu0 %vm750_vm5, %v14873_v15  ;;  %v11511_v27 = vld [vmem:[%s13600_s17 + $0xf7] sm:$0xff] }
 0x3e0   : >> { %v2000_v52 = vpop.f32.mrf.mxu2 }
 0x3e1   : >> { %v2084_v56 = vadd.f32 %v2000_v52, %v1531_v31  ;;  %v2537_v32 = vpop.f32.mrf.mxu3 }
 0x3e2   : >> { %v1533_v22 = vpop.f32.mrf.mxu1 }
 0x3e3   : >> { %v2621_v6 = vadd.f32 %v2537_v32, %v2084_v56  ;;  %v1534_v51 = vadd.f32 %v1533_v22, %v18118_v11  ;;  %v18120_v22 = vld [vmem:[#allocation26_spill] sm:$0xff] }
 0x3e4   : >> { %v3074_v55 = vpop.f32.mrf.mxu0 }
 0x3e5   : >> { %v14889_v7 = vadd.f32 %v3071_v36, %v2621_v6  ;;  %11444 = vmatmul.msk.f32.gmra.mxu1 %vm750_vm5, %v11378_v46  ;;  %11576 = vmatmul.msk.f32.gmra.mxu2 %vm750_vm5, %v11510_v63  ;;  %v11641_v36 = vld [vmem:[%s13600_s17 + $0xf8] sm:$0xff] }
 0x3e6   : >> { %11706 = vmatmul.msk.f32.gmra.mxu3 %vm750_vm5, %v11640_v41  ;;  %v14900_v46 = vld [vmem:[%s13600_s17 + $0xf9] sm:$0xff] }
 0x3e7   : >> { %18117 = vst [vmem:[#allocation40_spill] sm:$0xff] %v14889_v7  ;;  %11836 = vmatmul.msk.f32.gmra.mxu0 %vm750_vm5, %v14887_v54 }
 0x3e8   : >> { %v2003_v31 = vpop.f32.mrf.mxu2 }
 0x3e9   : >> { %v2085_v52 = vadd.f32 %v2003_v31, %v1534_v51  ;;  %v2540_v56 = vpop.f32.mrf.mxu3 }
 0x3ea   : >> { %v1536_v32 = vpop.f32.mrf.mxu1 }
 0x3eb   : >> { %v2622_v60 = vadd.f32 %v2540_v56, %v2085_v52  ;;  %v1537_v41 = vadd.f32 %v1536_v32, %v18120_v22  ;;  %v11512_v56 = vld [vmem:[%s13600_s17 + $0xff] sm:$0xff] }
 0x3ec   : >> { %v3077_v6 = vpop.f32.mrf.mxu0  ;;  %v18122_v32 = vld [vmem:[#allocation28_spill] sm:$0xff] }
 0x3ed   : >> { %v14902_v63 = vadd.f32 %v3074_v55, %v2622_v60  ;;  %11445 = vmatmul.msk.f32.gmra.mxu1 %vm750_vm5, %v14789_v21  ;;  %11577 = vmatmul.msk.f32.gmra.mxu2 %vm750_vm5, %v11511_v27  ;;  %v11642_v55 = vld [vmem:[%s13600_s17 + $0x100] sm:$0xff] }
 0x3ee   : >> { %11707 = vmatmul.msk.f32.gmra.mxu3 %vm750_vm5, %v11641_v36  ;;  %v14914_v21 = vld [vmem:[%s13600_s17 + $0x101] sm:$0xff] }
 0x3ef   : >> { %18119 = vst [vmem:[#allocation10_spill] sm:$0xff] %v14902_v63  ;;  %11837 = vmatmul.msk.f32.gmra.mxu0 %vm750_vm5, %v14900_v46 }
 0x3f0   : >> { %v2006_v11 = vpop.f32.mrf.mxu2 }
 0x3f1   : >> { %v2086_v51 = vadd.f32 %v2006_v11, %v1537_v41  ;;  %v2543_v31 = vpop.f32.mrf.mxu3 }
 0x3f2   : >> { %v1539_v52 = vpop.f32.mrf.mxu1 }
 0x3f3   : >> { %v2623_v60 = vadd.f32 %v2543_v31, %v2086_v51  ;;  %v1540_v36 = vadd.f32 %v1539_v52, %v18122_v32  ;;  %v11513_v31 = vld [vmem:[%s13600_s17 + $0x107] sm:$0xff]  ;;  %v18124_v52 = vld [vmem:[#allocation30_spill] sm:$0xff] }
 0x3f4   : >> { %v3080_v63 = vpop.f32.mrf.mxu0 }
 0x3f5   : >> { %v14916_v27 = vadd.f32 %v3077_v6, %v2623_v60  ;;  %11446 = vmatmul.msk.f32.gmra.mxu1 %vm750_vm5, %v14803_v45  ;;  %11578 = vmatmul.msk.f32.gmra.mxu2 %vm750_vm5, %v11512_v56  ;;  %v11643_v60 = vld [vmem:[%s13600_s17 + $0x108] sm:$0xff] }
 0x3f6   : >> { %11708 = vmatmul.msk.f32.gmra.mxu3 %vm750_vm5, %v11642_v55  ;;  %v14928_v45 = vld [vmem:[%s13600_s17 + $0x109] sm:$0xff] }
 0x3f7   : >> { %18121 = vst [vmem:[#allocation12_spill] sm:$0xff] %v14916_v27  ;;  %11838 = vmatmul.msk.f32.gmra.mxu0 %vm750_vm5, %v14914_v21 }
 0x3f8   : >> { %v2009_v22 = vpop.f32.mrf.mxu2 }
 0x3f9   : >> { %v2087_v41 = vadd.f32 %v2009_v22, %v1540_v36  ;;  %v2546_v11 = vpop.f32.mrf.mxu3 }
 0x3fa   : >> { %v1542_v51 = vpop.f32.mrf.mxu1 }
 0x3fb   : >> { %v2624_v6 = vadd.f32 %v2546_v11, %v2087_v41  ;;  %v1543_v55 = vadd.f32 %v1542_v51, %v18124_v52  ;;  %v11514_v11 = vld [vmem:[%s13600_s17 + $0x10f] sm:$0xff]  ;;  %v18126_v51 = vld [vmem:[#allocation32_spill] sm:$0xff] }
 0x3fc   : >> { %v3083_v27 = vpop.f32.mrf.mxu0 }
 0x3fd   : >> { %v14930_v56 = vadd.f32 %v3080_v63, %v2624_v6  ;;  %11447 = vmatmul.msk.f32.gmra.mxu1 %vm750_vm5, %v14817_v0  ;;  %11579 = vmatmul.msk.f32.gmra.mxu2 %vm750_vm5, %v11513_v31  ;;  %v11644_v6 = vld [vmem:[%s13600_s17 + $0x110] sm:$0xff] }
 0x3fe   : >> { %11709 = vmatmul.msk.f32.gmra.mxu3 %vm750_vm5, %v11643_v60  ;;  %v14942_v0 = vld [vmem:[%s13600_s17 + $0x111] sm:$0xff] }
 0x3ff   : >> { %18123 = vst [vmem:[#allocation14_spill] sm:$0xff] %v14930_v56  ;;  %11839 = vmatmul.msk.f32.gmra.mxu0 %vm750_vm5, %v14928_v45 }
 0x400   : >> { %v2012_v32 = vpop.f32.mrf.mxu2 }
 0x401   : >> { %v2088_v36 = vadd.f32 %v2012_v32, %v1543_v55  ;;  %v2549_v22 = vpop.f32.mrf.mxu3 }
 0x402   : >> { %v1545_v41 = vpop.f32.mrf.mxu1 }
 0x403   : >> { %v2625_v63 = vadd.f32 %v2549_v22, %v2088_v36  ;;  %v1546_v60 = vadd.f32 %v1545_v41, %v18126_v51  ;;  %v11515_v22 = vld [vmem:[%s13600_s17 + $0x117] sm:$0xff] }
 0x404   : >> { %v3086_v56 = vpop.f32.mrf.mxu0  ;;  %v18128_v41 = vld [vmem:[#allocation34_spill] sm:$0xff] }
 0x405   : >> { %v14944_v31 = vadd.f32 %v3083_v27, %v2625_v63  ;;  %11448 = vmatmul.msk.f32.gmra.mxu1 %vm750_vm5, %v14831_v4  ;;  %11580 = vmatmul.msk.f32.gmra.mxu2 %vm750_vm5, %v11514_v11  ;;  %v11645_v63 = vld [vmem:[%s13600_s17 + $0x118] sm:$0xff] }
 0x406   : >> { %11710 = vmatmul.msk.f32.gmra.mxu3 %vm750_vm5, %v11644_v6  ;;  %v14956_v4 = vld [vmem:[%s13600_s17 + $0x119] sm:$0xff] }
 0x407   : >> { %18125 = vst [vmem:[#allocation16_spill] sm:$0xff] %v14944_v31  ;;  %11840 = vmatmul.msk.f32.gmra.mxu0 %vm750_vm5, %v14942_v0 }
 0x408   : >> { %v2015_v52 = vpop.f32.mrf.mxu2 }
 0x409   : >> { %v2089_v55 = vadd.f32 %v2015_v52, %v1546_v60  ;;  %v2552_v32 = vpop.f32.mrf.mxu3 }
 0x40a   : >> { %v1548_v36 = vpop.f32.mrf.mxu1 }
 0x40b   : >> { %v2626_v27 = vadd.f32 %v2552_v32, %v2089_v55  ;;  %v1549_v6 = vadd.f32 %v1548_v36, %v18128_v41  ;;  %v11516_v32 = vld [vmem:[%s13600_s17 + $0x11f] sm:$0xff] }
 0x40c   : >> { %v3089_v31 = vpop.f32.mrf.mxu0  ;;  %v18130_v36 = vld [vmem:[#allocation36_spill] sm:$0xff] }
 0x40d   : >> { %v14958_v11 = vadd.f32 %v3086_v56, %v2626_v27  ;;  %11449 = vmatmul.msk.f32.gmra.mxu1 %vm750_vm5, %v14845_v8  ;;  %11581 = vmatmul.msk.f32.gmra.mxu2 %vm750_vm5, %v11515_v22  ;;  %v11646_v27 = vld [vmem:[%s13600_s17 + $0x120] sm:$0xff] }
 0x40e   : >> { %11711 = vmatmul.msk.f32.gmra.mxu3 %vm750_vm5, %v11645_v63  ;;  %v14970_v8 = vld [vmem:[%s13600_s17 + $0x121] sm:$0xff] }
 0x40f   : >> { %18127 = vst [vmem:[#allocation18_spill] sm:$0xff] %v14958_v11  ;;  %11841 = vmatmul.msk.f32.gmra.mxu0 %vm750_vm5, %v14956_v4 }
 0x410   : >> { %v2018_v51 = vpop.f32.mrf.mxu2 }
 0x411   : >> { %v2090_v60 = vadd.f32 %v2018_v51, %v1549_v6  ;;  %v2555_v52 = vpop.f32.mrf.mxu3 }
 0x412   : >> { %v1551_v55 = vpop.f32.mrf.mxu1 }
 0x413   : >> { %v2627_v56 = vadd.f32 %v2555_v52, %v2090_v60  ;;  %v1552_v63 = vadd.f32 %v1551_v55, %v18130_v36  ;;  %v11517_v52 = vld [vmem:[%s13600_s17 + $0x127] sm:$0xff]  ;;  %v18132_v55 = vld [vmem:[#allocation38_spill] sm:$0xff] }
 0x414   : >> { %v3092_v11 = vpop.f32.mrf.mxu0 }
 0x415   : >> { %v14972_v22 = vadd.f32 %v3089_v31, %v2627_v56  ;;  %11450 = vmatmul.msk.f32.gmra.mxu1 %vm750_vm5, %v14859_v44  ;;  %11582 = vmatmul.msk.f32.gmra.mxu2 %vm750_vm5, %v11516_v32  ;;  %v11647_v56 = vld [vmem:[%s13600_s17 + $0x128] sm:$0xff] }
 0x416   : >> { %11712 = vmatmul.msk.f32.gmra.mxu3 %vm750_vm5, %v11646_v27  ;;  %v14984_v44 = vld [vmem:[%s13600_s17 + $0x129] sm:$0xff] }
 0x417   : >> { %18129 = vst [vmem:[#allocation20_spill] sm:$0xff] %v14972_v22  ;;  %11842 = vmatmul.msk.f32.gmra.mxu0 %vm750_vm5, %v14970_v8 }
 0x418   : >> { %v2021_v41 = vpop.f32.mrf.mxu2 }
 0x419   : >> { %v2091_v6 = vadd.f32 %v2021_v41, %v1552_v63  ;;  %v2558_v51 = vpop.f32.mrf.mxu3 }
 0x41a   : >> { %v1554_v60 = vpop.f32.mrf.mxu1 }
 0x41b   : >> { %v2628_v31 = vadd.f32 %v2558_v51, %v2091_v6  ;;  %v1555_v27 = vadd.f32 %v1554_v60, %v18132_v55  ;;  %v11518_v51 = vld [vmem:[%s13600_s17 + $0x12f] sm:$0xff] }
 0x41c   : >> { %v3095_v22 = vpop.f32.mrf.mxu0  ;;  %v18134_v60 = vld [vmem:[#allocation41_spill] sm:$0xff] }
 0x41d   : >> { %v14986_v32 = vadd.f32 %v3092_v11, %v2628_v31  ;;  %11451 = vmatmul.msk.f32.gmra.mxu1 %vm750_vm5, %v14873_v15  ;;  %11583 = vmatmul.msk.f32.gmra.mxu2 %vm750_vm5, %v11517_v52  ;;  %v11648_v31 = vld [vmem:[%s13600_s17 + $0x130] sm:$0xff] }
 0x41e   : >> { %11713 = vmatmul.msk.f32.gmra.mxu3 %vm750_vm5, %v11647_v56  ;;  %v14998_v15 = vld [vmem:[%s13600_s17 + $0x131] sm:$0xff] }
 0x41f   : >> { %18131 = vst [vmem:[#allocation22_spill] sm:$0xff] %v14986_v32  ;;  %11843 = vmatmul.msk.f32.gmra.mxu0 %vm750_vm5, %v14984_v44 }
 0x420   : >> { %v2024_v36 = vpop.f32.mrf.mxu2 }
 0x421   : >> { %v2092_v63 = vadd.f32 %v2024_v36, %v1555_v27  ;;  %v2561_v41 = vpop.f32.mrf.mxu3 }
 0x422   : >> { %v1557_v6 = vpop.f32.mrf.mxu1 }
 0x423   : >> { %v2629_v11 = vadd.f32 %v2561_v41, %v2092_v63  ;;  %v1558_v56 = vadd.f32 %v1557_v6, %v18134_v60  ;;  %v11519_v41 = vld [vmem:[%s13600_s17 + $0x147] sm:$0xff] }
 0x424   : >> { %v3098_v32 = vpop.f32.mrf.mxu0 }
 0x425   : >> { %v15000_v52 = vadd.f32 %v3095_v22, %v2629_v11  ;;  %11452 = vmatmul.msk.f32.gmra.mxu1 %vm750_vm5, %v14887_v54  ;;  %11584 = vmatmul.msk.f32.gmra.mxu2 %vm750_vm5, %v11518_v51  ;;  %v11649_v54 = vld [vmem:[%s13600_s17 + $0x148] sm:$0xff] }
 0x426   : >> { %11714 = vmatmul.msk.f32.gmra.mxu3 %vm750_vm5, %v11648_v31  ;;  %v15013_v51 = vld [vmem:[%s13600_s17 + $0x149] sm:$0xff] }
 0x427   : >> { %18133 = vst [vmem:[#allocation24_spill] sm:$0xff] %v15000_v52  ;;  %11844 = vmatmul.msk.f32.gmra.mxu0 %vm750_vm5, %v14998_v15 }
 0x428   : >> { %v2027_v55 = vpop.f32.mrf.mxu2 }
 0x429   : >> { %v2093_v27 = vadd.f32 %v2027_v55, %v1558_v56  ;;  %v2564_v36 = vpop.f32.mrf.mxu3  ;;  %v11520_v55 = vld [vmem:[%s13600_s17 + $0x14f] sm:$0xff] }
 0x42a   : >> { %v3443_v63 = vpop.f32.mrf.mxu1 }
 0x42b   : >> { %v2630_v22 = vadd.f32 %v2564_v36, %v2093_v27  ;;  %v3635_v11 = vadd.f32 %v3443_v63, %v14155_v26  ;;  %v11650_v36 = vld [vmem:[%s13600_s17 + $0x150] sm:$0xff] }
 0x42c   : >> { %v5048_v52 = vpop.f32.mrf.mxu0 }
 0x42d   : >> { %v15015_v31 = vadd.f32 %v3098_v32, %v2630_v22  ;;  %11453 = vmatmul.msk.f32.gmra.mxu1 %vm750_vm5, %v14900_v46  ;;  %11585 = vmatmul.msk.f32.gmra.mxu2 %vm750_vm5, %v11519_v41  ;;  %v15027_v46 = vld [vmem:[%s13600_s17 + $0x151] sm:$0xff] }
 0x42e   : >> { %11715 = vmatmul.msk.f32.gmra.mxu3 %vm750_vm5, %v11649_v54 }
 0x42f   : >> { %18135 = vst [vmem:[#allocation26_spill] sm:$0xff] %v15015_v31  ;;  %11845 = vmatmul.msk.f32.gmra.mxu0 %vm750_vm5, %v15013_v51  ;;  %v11529_v31 = vld [vmem:[%s13600_s17 + $0x1a7] sm:$0xff] }
 0x430   : >> { %v3980_v6 = vpop.f32.mrf.mxu2 }
 0x431   : >> { %v4172_v26 = vadd.f32 %v3980_v6, %v3635_v11  ;;  %v4514_v60 = vpop.f32.mrf.mxu3  ;;  %v11521_v6 = vld [vmem:[%s13600_s17 + $0x157] sm:$0xff] }
 0x432   : >> { %v3446_v56 = vpop.f32.mrf.mxu1 }
 0x433   : >> { %v3636_v27 = vadd.f32 %v3446_v56, %v14169_v35  ;;  %v4706_v32 = vadd.f32 %v4514_v60, %v4172_v26  ;;  %v11651_v60 = vld [vmem:[%s13600_s17 + $0x158] sm:$0xff] }
 0x434   : >> { %v5051_v63 = vpop.f32.mrf.mxu0 }
 0x435   : >> { %v15029_v41 = vadd.f32 %v5048_v52, %v4706_v32  ;;  %11454 = vmatmul.msk.f32.gmra.mxu1 %vm750_vm5, %v14914_v21  ;;  %11586 = vmatmul.msk.f32.gmra.mxu2 %vm750_vm5, %v11520_v55  ;;  %v15041_v21 = vld [vmem:[%s13600_s17 + $0x159] sm:$0xff] }
 0x436   : >> { %11716 = vmatmul.msk.f32.gmra.mxu3 %vm750_vm5, %v11650_v36 }
 0x437   : >> { %11846 = vmatmul.msk.f32.gmra.mxu0 %vm750_vm5, %v15027_v46 }
 0x438   : >> { %v3983_v35 = vpop.f32.mrf.mxu2 }
 0x439   : >> { %v4173_v22 = vadd.f32 %v3983_v35, %v3636_v27  ;;  %v4517_v11 = vpop.f32.mrf.mxu3  ;;  %v11522_v35 = vld [vmem:[%s13600_s17 + $0x15f] sm:$0xff] }
 0x43a   : >> { %v3449_v54 = vpop.f32.mrf.mxu1 }
 0x43b   : >> { %v3637_v26 = vadd.f32 %v3449_v54, %v14183_v18  ;;  %v4707_v52 = vadd.f32 %v4517_v11, %v4173_v22  ;;  %v11652_v11 = vld [vmem:[%s13600_s17 + $0x160] sm:$0xff] }
 0x43c   : >> { %v5054_v56 = vpop.f32.mrf.mxu0 }
 0x43d   : >> { %v15043_v55 = vadd.f32 %v5051_v63, %v4707_v52  ;;  %11455 = vmatmul.msk.f32.gmra.mxu1 %vm750_vm5, %v14928_v45  ;;  %11587 = vmatmul.msk.f32.gmra.mxu2 %vm750_vm5, %v11521_v6  ;;  %v15055_v45 = vld [vmem:[%s13600_s17 + $0x161] sm:$0xff] }
 0x43e   : >> { %11717 = vmatmul.msk.f32.gmra.mxu3 %vm750_vm5, %v11651_v60 }
 0x43f   : >> { %11847 = vmatmul.msk.f32.gmra.mxu0 %vm750_vm5, %v15041_v21 }
 0x440   : >> { %v3986_v18 = vpop.f32.mrf.mxu2 }
 0x441   : >> { %v4174_v27 = vadd.f32 %v3986_v18, %v3637_v26  ;;  %v4520_v32 = vpop.f32.mrf.mxu3  ;;  %v11523_v18 = vld [vmem:[%s13600_s17 + $0x167] sm:$0xff] }
 0x442   : >> { %v3452_v36 = vpop.f32.mrf.mxu1 }
 0x443   : >> { %v3638_v22 = vadd.f32 %v3452_v36, %v14197_v30  ;;  %v4708_v63 = vadd.f32 %v4520_v32, %v4174_v27  ;;  %v11653_v32 = vld [vmem:[%s13600_s17 + $0x168] sm:$0xff] }
 0x444   : >> { %v5057_v54 = vpop.f32.mrf.mxu0 }
 0x445   : >> { %v15057_v6 = vadd.f32 %v5054_v56, %v4708_v63  ;;  %11456 = vmatmul.msk.f32.gmra.mxu1 %vm750_vm5, %v14942_v0  ;;  %11588 = vmatmul.msk.f32.gmra.mxu2 %vm750_vm5, %v11522_v35  ;;  %v15069_v0 = vld [vmem:[%s13600_s17 + $0x169] sm:$0xff] }
 0x446   : >> { %11718 = vmatmul.msk.f32.gmra.mxu3 %vm750_vm5, %v11652_v11 }
 0x447   : >> { %11848 = vmatmul.msk.f32.gmra.mxu0 %vm750_vm5, %v15055_v45 }
 0x448   : >> { %v3989_v30 = vpop.f32.mrf.mxu2 }
 0x449   : >> { %v4175_v26 = vadd.f32 %v3989_v30, %v3638_v22  ;;  %v4523_v52 = vpop.f32.mrf.mxu3  ;;  %v11524_v30 = vld [vmem:[%s13600_s17 + $0x16f] sm:$0xff] }
 0x44a   : >> { %v3455_v60 = vpop.f32.mrf.mxu1 }
 0x44b   : >> { %v3639_v27 = vadd.f32 %v3455_v60, %v14211_v43  ;;  %v4709_v56 = vadd.f32 %v4523_v52, %v4175_v26  ;;  %v11654_v52 = vld [vmem:[%s13600_s17 + $0x170] sm:$0xff] }
 0x44c   : >> { %v5060_v36 = vpop.f32.mrf.mxu0 }
 0x44d   : >> { %v15071_v35 = vadd.f32 %v5057_v54, %v4709_v56  ;;  %11457 = vmatmul.msk.f32.gmra.mxu1 %vm750_vm5, %v14956_v4  ;;  %11589 = vmatmul.msk.f32.gmra.mxu2 %vm750_vm5, %v11523_v18  ;;  %v15083_v4 = vld [vmem:[%s13600_s17 + $0x171] sm:$0xff] }
 0x44e   : >> { %11719 = vmatmul.msk.f32.gmra.mxu3 %vm750_vm5, %v11653_v32 }
 0x44f   : >> { %11849 = vmatmul.msk.f32.gmra.mxu0 %vm750_vm5, %v15069_v0 }
 0x450   : >> { %v3992_v43 = vpop.f32.mrf.mxu2 }
 0x451   : >> { %v4176_v22 = vadd.f32 %v3992_v43, %v3639_v27  ;;  %v4526_v63 = vpop.f32.mrf.mxu3  ;;  %v11525_v43 = vld [vmem:[%s13600_s17 + $0x177] sm:$0xff] }
 0x452   : >> { %v3458_v11 = vpop.f32.mrf.mxu1 }
 0x453   : >> { %v3640_v26 = vadd.f32 %v3458_v11, %v14225_v50  ;;  %v4710_v54 = vadd.f32 %v4526_v63, %v4176_v22  ;;  %v11655_v63 = vld [vmem:[%s13600_s17 + $0x178] sm:$0xff] }
 0x454   : >> { %v5063_v60 = vpop.f32.mrf.mxu0 }
 0x455   : >> { %v15085_v18 = vadd.f32 %v5060_v36, %v4710_v54  ;;  %11458 = vmatmul.msk.f32.gmra.mxu1 %vm750_vm5, %v14970_v8  ;;  %11590 = vmatmul.msk.f32.gmra.mxu2 %vm750_vm5, %v11524_v30  ;;  %v15097_v8 = vld [vmem:[%s13600_s17 + $0x179] sm:$0xff] }
 0x456   : >> { %11720 = vmatmul.msk.f32.gmra.mxu3 %vm750_vm5, %v11654_v52 }
 0x457   : >> { %11850 = vmatmul.msk.f32.gmra.mxu0 %vm750_vm5, %v15083_v4 }
 0x458   : >> { %v3995_v50 = vpop.f32.mrf.mxu2 }
 0x459   : >> { %v4177_v27 = vadd.f32 %v3995_v50, %v3640_v26  ;;  %v4529_v56 = vpop.f32.mrf.mxu3  ;;  %v11526_v50 = vld [vmem:[%s13600_s17 + $0x17f] sm:$0xff] }
 0x45a   : >> { %v3461_v32 = vpop.f32.mrf.mxu1 }
 0x45b   : >> { %v3641_v22 = vadd.f32 %v3461_v32, %v14239_v5  ;;  %v4711_v36 = vadd.f32 %v4529_v56, %v4177_v27  ;;  %v11656_v56 = vld [vmem:[%s13600_s17 + $0x180] sm:$0xff] }
 0x45c   : >> { %v5066_v11 = vpop.f32.mrf.mxu0  ;;  %v15111_v32 = vld [vmem:[%s13600_s17 + $0x181] sm:$0xff] }
 0x45d   : >> { %v15099_v30 = vadd.f32 %v5063_v60, %v4711_v36  ;;  %11459 = vmatmul.msk.f32.gmra.mxu1 %vm750_vm5, %v14984_v44  ;;  %11591 = vmatmul.msk.f32.gmra.mxu2 %vm750_vm5, %v11525_v43 }
 0x45e   : >> { %11721 = vmatmul.msk.f32.gmra.mxu3 %vm750_vm5, %v11655_v63 }
 0x45f   : >> { %11851 = vmatmul.msk.f32.gmra.mxu0 %vm750_vm5, %v15097_v8 }
 0x460   : >> { %v3998_v5 = vpop.f32.mrf.mxu2 }
 0x461   : >> { %v4178_v26 = vadd.f32 %v3998_v5, %v3641_v22  ;;  %v4532_v54 = vpop.f32.mrf.mxu3  ;;  %v11527_v5 = vld [vmem:[%s13600_s17 + $0x197] sm:$0xff] }
 0x462   : >> { %v3464_v52 = vpop.f32.mrf.mxu1 }
 0x463   : >> { %v3642_v27 = vadd.f32 %v3464_v52, %v14253_v42  ;;  %v4712_v60 = vadd.f32 %v4532_v54, %v4178_v26  ;;  %v11657_v54 = vld [vmem:[%s13600_s17 + $0x198] sm:$0xff] }
 0x464   : >> { %v5069_v44 = vpop.f32.mrf.mxu0  ;;  %v15124_v52 = vld [vmem:[%s13600_s17 + $0x199] sm:$0xff] }
 0x465   : >> { %v15113_v43 = vadd.f32 %v5066_v11, %v4712_v60  ;;  %11460 = vmatmul.msk.f32.gmra.mxu1 %vm750_vm5, %v14998_v15  ;;  %11592 = vmatmul.msk.f32.gmra.mxu2 %vm750_vm5, %v11526_v50  ;;  %v15138_v60 = vld [vmem:[%s17988_s2] ss:$0 sm:$0xff] }
 0x466   : >> { %11722 = vmatmul.msk.f32.gmra.mxu3 %vm750_vm5, %v11656_v56 }
 0x467   : >> { %11852 = vmatmul.msk.f32.gmra.mxu0 %vm750_vm5, %v15111_v32 }
 0x468   : >> { %v4001_v42 = vpop.f32.mrf.mxu2 }
 0x469   : >> { %v4179_v22 = vadd.f32 %v4001_v42, %v3642_v27  ;;  %v4535_v36 = vpop.f32.mrf.mxu3 }
 0x46a   : >> { %v3467_v63 = vpop.f32.mrf.mxu1 }
 0x46b   : >> { %v4713_v26 = vadd.f32 %v4535_v36, %v4179_v22  ;;  %v3643_v50 = vadd.f32 %v3467_v63, %v14267_v1  ;;  %v11528_v22 = vld [vmem:[%s13600_s17 + $0x19f] sm:$0xff] }
 0x46c   : >> { %v5072_v11 = vpop.f32.mrf.mxu0  ;;  %v11658_v36 = vld [vmem:[%s13600_s17 + $0x1a0] sm:$0xff] }
 0x46d   : >> { %v15126_v15 = vadd.f32 %v5069_v44, %v4713_v26  ;;  %11461 = vmatmul.msk.f32.gmra.mxu1 %vm750_vm5, %v15013_v51  ;;  %11593 = vmatmul.msk.f32.gmra.mxu2 %vm750_vm5, %v11527_v5  ;;  %v15143_v26 = vld [vmem:[%s13600_s17 + $0x1a1] sm:$0xff] }
 0x46e   : >> { %11723 = vmatmul.msk.f32.gmra.mxu3 %vm750_vm5, %v11657_v54  ;;  %v5308_v54 = vadd.f32 %v15138_v60, %v15029_v41 }
 0x46f   : >> { %11853 = vmatmul.msk.f32.gmra.mxu0 %vm750_vm5, %v15124_v52 }
 0x470   : >> { %v4004_v27 = vpop.f32.mrf.mxu2 }
 0x471   : >> { %v4180_v56 = vadd.f32 %v4004_v27, %v3643_v50  ;;  %v4538_v44 = vpop.f32.mrf.mxu3 }
 0x472   : >> { %v3470_v42 = vpop.f32.mrf.mxu1 }
 0x473   : >> { %v4714_v51 = vadd.f32 %v4538_v44, %v4180_v56  ;;  %v3644_v63 = vadd.f32 %v3470_v42, %v14281_v34  ;;  %v5372_v56 = vmax.f32 %v5308_v54, 0.0 }
 0x474   : >> { %v5075_v5 = vpop.f32.mrf.mxu0 }
 0x475   : >> { %v5248_v1 = vadd.f32 %v5072_v11, %v4714_v51  ;;  %11462 = vmatmul.msk.f32.gmra.mxu1 %vm750_vm5, %v15027_v46  ;;  %11594 = vmatmul.msk.f32.gmra.mxu2 %vm750_vm5, %v11528_v22  ;;  %v11659_v22 = vld [vmem:[%s13600_s17 + $0x1a8] sm:$0xff] }
 0x476   : >> { %11724 = vmatmul.msk.f32.gmra.mxu3 %vm750_vm5, %v11658_v36  ;;  %v5309_v36 = vadd.f32 %v15138_v60, %v15043_v55 }
 0x477   : >> { %11854 = vmatmul.msk.f32.gmra.mxu0 %vm750_vm5, %v15143_v26  ;;  %v5316_v50 = vadd.f32 %v15138_v60, %v5248_v1 }
 0x478   : >> { %v4007_v27 = vpop.f32.mrf.mxu2  ;;  %v5373_v1 = vmax.f32 %v5309_v36, 0.0 }
 0x479   : >> { %v5380_v41 = vmax.f32 %v5316_v50, 0.0  ;;  %v4181_v11 = vadd.f32 %v4007_v27, %v3644_v63  ;;  %v4541_v44 = vpop.f32.mrf.mxu3 }
 0x47a   : >> { %v3473_v51 = vpop.f32.mrf.mxu1 }
 0x47b   : >> { %v5436_v46 = vmax.f32 %v5372_v56, %v5380_v41  ;;  %v4715_v7 = vadd.f32 %v4541_v44, %v4181_v11  ;;  %v3645_v42 = vadd.f32 %v3473_v51, %v14295_v61  ;;  %v11660_v56 = vld [vmem:[%s13600_s17 + $0x1b0] sm:$0xff]  ;;  %v5310_v44 = vadd.f32 %v15138_v60, %v15057_v6 }
 0x47c   : >> { %v5078_v38 = vpop.f32.mrf.mxu0  ;;  %v15174_v11 = vld [vmem:[%s13600_s17 + $0x1b1] sm:$0xff] }
 0x47d   : >> { %5468 = vst.msk [vmem:[#allocation4] sm:$0xff] %vm330_vm0, %v5436_v46  ;;  %v5249_v34 = vadd.f32 %v5075_v5, %v4715_v7  ;;  %11463 = vmatmul.msk.f32.gmra.mxu1 %vm750_vm5, %v15041_v21  ;;  %11595 = vmatmul.msk.f32.gmra.mxu2 %vm750_vm5, %v11529_v31  ;;  %v11530_v21 = vld [vmem:[%s13600_s17 + $0x1af] sm:$0xff] }
 0x47e   : >> { %11725 = vmatmul.msk.f32.gmra.mxu3 %vm750_vm5, %v11659_v22  ;;  %v5374_v22 = vmax.f32 %v5310_v44, 0.0 }
 0x47f   : >> { %11855 = vmatmul.msk.f32.gmra.mxu0 %vm750_vm5, %v15158_v39  ;;  %v5317_v54 = vadd.f32 %v15138_v60, %v5249_v34 }
 0x480   : >> { %v4010_v55 = vpop.f32.mrf.mxu2 }
 0x481   : >> { %v5381_v63 = vmax.f32 %v5317_v54, 0.0  ;;  %v4182_v7 = vadd.f32 %v4010_v55, %v3645_v42  ;;  %v4544_v5 = vpop.f32.mrf.mxu3  ;;  %v11531_v42 = vld [vmem:[%s13600_s17 + $0x1b7] sm:$0xff] }
 0x482   : >> { %v3476_v50 = vpop.f32.mrf.mxu1 }
 0x483   : >> { %v5437_v27 = vmax.f32 %v5373_v1, %v5381_v63  ;;  %v4716_v31 = vadd.f32 %v4544_v5, %v4182_v7  ;;  %v3646_v51 = vadd.f32 %v3476_v50, %v14309_v24  ;;  %v11661_v1 = vld [vmem:[%s13600_s17 + $0x1b8] sm:$0xff]  ;;  %v5311_v24 = vadd.f32 %v15138_v60, %v15071_v35 }
 0x484   : >> { %v5081_v41 = vpop.f32.mrf.mxu0  ;;  %v15191_v7 = vld [vmem:[%s13600_s17 + $0x1b9] sm:$0xff] }
 0x485   : >> { %5469 = vst.msk [vmem:[#allocation4 + $0x8] sm:$0xff] %vm330_vm0, %v5437_v27  ;;  %v5250_v61 = vadd.f32 %v5078_v38, %v4716_v31  ;;  %11464 = vmatmul.msk.f32.gmra.mxu1 %vm750_vm5, %v15055_v45  ;;  %11596 = vmatmul.msk.f32.gmra.mxu2 %vm750_vm5, %v11530_v21 }
 0x486   : >> { %11726 = vmatmul.msk.f32.gmra.mxu3 %vm750_vm5, %v11660_v56 }
 0x487   : >> { %11856 = vmatmul.msk.f32.gmra.mxu0 %vm750_vm5, %v15174_v11  ;;  %v5318_v6 = vadd.f32 %v15138_v60, %v5250_v61 }
 0x488   : >> { %v4013_v46 = vpop.f32.mrf.mxu2 }
 0x489   : >> { %v5382_v38 = vmax.f32 %v5318_v6, 0.0  ;;  %v4183_v36 = vadd.f32 %v4013_v46, %v3646_v51  ;;  %v4547_v34 = vpop.f32.mrf.mxu3  ;;  %v11532_v6 = vld [vmem:[%s13600_s17 + $0x1bf] sm:$0xff] }
 0x48a   : >> { %v3479_v45 = vpop.f32.mrf.mxu1 }
 0x48b   : >> { %v5438_v54 = vmax.f32 %v5374_v22, %v5382_v38  ;;  %v4717_v55 = vadd.f32 %v4547_v34, %v4183_v36  ;;  %v3647_v35 = vadd.f32 %v3479_v45, %v14324_v25  ;;  %v11662_v38 = vld [vmem:[%s13600_s17 + $0x1c0] sm:$0xff] }
 0x48c   : >> { %v5084_v63 = vpop.f32.mrf.mxu0  ;;  %v5500_v5 = vld [vmem:[#allocation4] ss:$2 sm:$0xff]  ;;  %v5532_v21 = vld [vmem:[#allocation4 + $0x1] ss:$2 sm:$0xff] }
 0x48d   : >> { %v5563_v50 = vmax.f32 %v5500_v5, %v5532_v21  ;;  %5470 = vst.msk [vmem:[#allocation4 + $0x10] sm:$0xff] %vm330_vm0, %v5438_v54  ;;  %v5251_v27 = vadd.f32 %v5081_v41, %v4717_v55  ;;  %11465 = vmatmul.msk.f32.gmra.mxu1 %vm750_vm5, %v15069_v0  ;;  %11597 = vmatmul.msk.f32.gmra.mxu2 %vm750_vm5, %v11531_v42  ;;  %v5375_v0 = vmax.f32 %v5311_v24, 0.0  ;;  %v15211_v34 = vld [vmem:[%s13600_s17 + $0x1c1] sm:$0xff] }
 0x48e   : >> { %11727 = vmatmul.msk.f32.gmra.mxu3 %vm750_vm5, %v11661_v1  ;;  %v5312_v42 = vadd.f32 %v15138_v60, %v15085_v18  ;;  %v11533_v24 = vld [vmem:[%s13600_s17 + $0x1c7] sm:$0xff] }
 0x48f   : >> { %11857 = vmatmul.msk.f32.gmra.mxu0 %vm750_vm5, %v15191_v7  ;;  %11895 = vst.msk [vmem:[%s15202_s29 + $0x38] sm:$0xff] %vm330_vm0, %v5563_v50  ;;  %v5319_v31 = vadd.f32 %v15138_v60, %v5251_v27  ;;  %v11663_v27 = vld [vmem:[%s13600_s17 + $0x1c8] sm:$0xff] }
 0x490   : >> { %v4016_v56 = vpop.f32.mrf.mxu2  ;;  %v5376_v55 = vmax.f32 %v5312_v42, 0.0 }
 0x491   : >> { %v5383_v41 = vmax.f32 %v5319_v31, 0.0  ;;  %v4184_v44 = vadd.f32 %v4016_v56, %v3647_v35  ;;  %v4550_v61 = vpop.f32.mrf.mxu3  ;;  %v15227_v31 = vld [vmem:[%s13600_s17 + $0x1c9] sm:$0xff] }
 0x492   : >> { %v3482_v51 = vpop.f32.mrf.mxu1 }
 0x493   : >> { %v5439_v46 = vmax.f32 %v5375_v0, %v5383_v41  ;;  %v4718_v22 = vadd.f32 %v4550_v61, %v4184_v44  ;;  %v3648_v45 = vadd.f32 %v3482_v51, %v14338_v17  ;;  %v5313_v17 = vadd.f32 %v15138_v60, %v15099_v30 }
 0x494   : >> { %v5087_v36 = vpop.f32.mrf.mxu0 }
 0x495   : >> { %5471 = vst.msk [vmem:[#allocation4 + $0x18] sm:$0xff] %vm330_vm0, %v5439_v46  ;;  %v5252_v25 = vadd.f32 %v5084_v63, %v4718_v22  ;;  %11466 = vmatmul.msk.f32.gmra.mxu1 %vm750_vm5, %v15083_v4  ;;  %11598 = vmatmul.msk.f32.gmra.mxu2 %vm750_vm5, %v11532_v6  ;;  %v5377_v6 = vmax.f32 %v5313_v17, 0.0 }
 0x496   : >> { %11728 = vmatmul.msk.f32.gmra.mxu3 %vm750_vm5, %v11662_v38 }
 0x497   : >> { %11858 = vmatmul.msk.f32.gmra.mxu0 %vm750_vm5, %v15211_v34  ;;  %v5320_v54 = vadd.f32 %v15138_v60, %v5252_v25 }
 0x498   : >> { %v4019_v18 = vpop.f32.mrf.mxu2 }
 0x499   : >> { %v5384_v1 = vmax.f32 %v5320_v54, 0.0  ;;  %v4185_v63 = vadd.f32 %v4019_v18, %v3648_v45  ;;  %v4553_v5 = vpop.f32.mrf.mxu3  ;;  %v11664_v45 = vld [vmem:[%s13600_s17 + $0x1d0] sm:$0xff] }
 0x49a   : >> { %v3485_v21 = vpop.f32.mrf.mxu1  ;;  %v15245_v18 = vld [vmem:[%s13600_s17 + $0x1d1] sm:$0xff] }
 0x49b   : >> { %v5440_v4 = vmax.f32 %v5376_v55, %v5384_v1  ;;  %v4719_v50 = vadd.f32 %v4553_v5, %v4185_v63  ;;  %v3649_v30 = vadd.f32 %v3485_v21, %v14352_v2  ;;  %v5314_v55 = vadd.f32 %v15138_v60, %v15113_v43 }
 0x49c   : >> { %v5090_v35 = vpop.f32.mrf.mxu0  ;;  %v5502_v56 = vld [vmem:[#allocation4 + $0x10] ss:$2 sm:$0xff]  ;;  %v5534_v0 = vld [vmem:[#allocation4 + $0x11] ss:$2 sm:$0xff] }
 0x49d   : >> { %v5564_v41 = vmax.f32 %v5502_v56, %v5534_v0  ;;  %5472 = vst.msk [vmem:[#allocation4 + $0x20] sm:$0xff] %vm330_vm0, %v5440_v4  ;;  %v5253_v44 = vadd.f32 %v5087_v36, %v4719_v50  ;;  %11467 = vmatmul.msk.f32.gmra.mxu1 %vm750_vm5, %v15097_v8  ;;  %11599 = vmatmul.msk.f32.gmra.mxu2 %vm750_vm5, %v11533_v24  ;;  %v11534_v36 = vld [vmem:[%s13600_s17 + $0x1cf] sm:$0xff]  ;;  %v5378_v5 = vmax.f32 %v5314_v55, 0.0 }
 0x49e   : >> { %11729 = vmatmul.msk.f32.gmra.mxu3 %vm750_vm5, %v11663_v27  ;;  %v11665_v0 = vld [vmem:[%s13600_s17 + $0x1e8] sm:$0xff]  ;;  %v15280_v55 = vld [vmem:[%s13600_s17 + $0x1f1] sm:$0xff] }
 0x49f   : >> { %11859 = vmatmul.msk.f32.gmra.mxu0 %vm750_vm5, %v15227_v31  ;;  %11896 = vst.msk [vmem:[%s15202_s29 + $0x40] sm:$0xff] %vm330_vm0, %v5564_v41  ;;  %v5321_v61 = vadd.f32 %v15138_v60, %v5253_v44  ;;  %v15262_v41 = vld [vmem:[%s13600_s17 + $0x1e9] sm:$0xff] }
 0x4a0   : >> { %v4022_v51 = vpop.f32.mrf.mxu2 }
 0x4a1   : >> { %v5385_v46 = vmax.f32 %v5321_v61, 0.0  ;;  %v4186_v22 = vadd.f32 %v4022_v51, %v3649_v30  ;;  %v4556_v8 = vpop.f32.mrf.mxu3  ;;  %v5315_v30 = vadd.f32 %v15138_v60, %v15126_v15 }
 0x4a2   : >> { %v3488_v38 = vpop.f32.mrf.mxu1 }
 0x4a3   : >> { %v5441_v42 = vmax.f32 %v5377_v6, %v5385_v46  ;;  %v4720_v25 = vadd.f32 %v4556_v8, %v4186_v22  ;;  %v3650_v1 = vadd.f32 %v3488_v38, %v14366_v53  ;;  %v5379_v6 = vmax.f32 %v5315_v30, 0.0 }
 0x4a4   : >> { %v5093_v54 = vpop.f32.mrf.mxu0 }
 0x4a5   : >> { %5473 = vst.msk [vmem:[#allocation4 + $0x28] sm:$0xff] %vm330_vm0, %v5441_v42  ;;  %v5254_v2 = vadd.f32 %v5090_v35, %v4720_v25  ;;  %11468 = vmatmul.msk.f32.gmra.mxu1 %vm750_vm5, %v15111_v32  ;;  %11600 = vmatmul.msk.f32.gmra.mxu2 %vm750_vm5, %v11534_v36  ;;  %v11535_v32 = vld [vmem:[%s13600_s17 + $0x1e7] sm:$0xff] }
 0x4a6   : >> { %11730 = vmatmul.msk.f32.gmra.mxu3 %vm750_vm5, %v11664_v45  ;;  %v11666_v45 = vld [vmem:[%s13600_s17 + $0x1f0] sm:$0xff] }
 0x4a7   : >> { %11860 = vmatmul.msk.f32.gmra.mxu0 %vm750_vm5, %v15245_v18  ;;  %v5322_v63 = vadd.f32 %v15138_v60, %v5254_v2 }
 0x4a8   : >> { %v4025_v43 = vpop.f32.mrf.mxu2 }
 0x4a9   : >> { %v5386_v21 = vmax.f32 %v5322_v63, 0.0  ;;  %v4187_v24 = vadd.f32 %v4025_v43, %v3650_v1  ;;  %v4559_v4 = vpop.f32.mrf.mxu3 }
 0x4aa   : >> { %v3491_v50 = vpop.f32.mrf.mxu1 }
 0x4ab   : >> { %v5442_v27 = vmax.f32 %v5378_v5, %v5386_v21  ;;  %v3651_v35 = vadd.f32 %v3491_v50, %v14380_v49  ;;  %v4721_v56 = vadd.f32 %v4559_v4, %v4187_v24  ;;  %v11537_v5 = vld [vmem:[%s13600_s17 + $0x1f7] sm:$0xff] }
 0x4ac   : >> { %v5096_v17 = vpop.f32.mrf.mxu0  ;;  %v5504_v44 = vld [vmem:[#allocation4 + $0x20] ss:$2 sm:$0xff]  ;;  %v5536_v53 = vld [vmem:[#allocation4 + $0x21] ss:$2 sm:$0xff]  ;;  %v11667_v4 = vld [vmem:[%s13600_s17 + $0x1f8] sm:$0xff] }
 0x4ad   : >> { %v5565_v61 = vmax.f32 %v5504_v44, %v5536_v53  ;;  %5474 = vst.msk [vmem:[#allocation4 + $0x30] sm:$0xff] %vm330_vm0, %v5442_v27  ;;  %v5255_v51 = vadd.f32 %v5093_v54, %v4721_v56  ;;  %11469 = vmatmul.msk.f32.gmra.mxu1 %vm750_vm5, %v15124_v52  ;;  %11601 = vmatmul.msk.f32.gmra.mxu2 %vm750_vm5, %v11535_v32  ;;  %v11536_v52 = vld [vmem:[%s13600_s17 + $0x1ef] sm:$0xff]  ;;  %v11538_v53 = vld [vmem:[%s13600_s17 + $0x1ff] sm:$0xff] }
 0x4ae   : >> { %11731 = vmatmul.msk.f32.gmra.mxu3 %vm750_vm5, %v11665_v0 }
 0x4af   : >> { %11861 = vmatmul.msk.f32.gmra.mxu0 %vm750_vm5, %v15262_v41  ;;  %11897 = vst.msk [vmem:[%s15202_s29 + $0x48] sm:$0xff] %vm330_vm0, %v5565_v61  ;;  %v5323_v49 = vadd.f32 %v15138_v60, %v5255_v51 }
 0x4b0   : >> { %v4028_v15 = vpop.f32.mrf.mxu2 }
 0x4b1   : >> { %v5387_v46 = vmax.f32 %v5323_v49, 0.0  ;;  %v4188_v22 = vadd.f32 %v4028_v15, %v3651_v35  ;;  %v4562_v8 = vpop.f32.mrf.mxu3  ;;  %v15311_v49 = vld [vmem:[%s13600_s17 + $0x201] sm:$0xff] }
 0x4b2   : >> { %v3494_v38 = vpop.f32.mrf.mxu1 }
 0x4b3   : >> { %v5443_v36 = vmax.f32 %v5379_v6, %v5387_v46  ;;  %v3652_v42 = vadd.f32 %v3494_v38, %v14394_v10  ;;  %v4722_v25 = vadd.f32 %v4562_v8, %v4188_v22  ;;  %v11539_v8 = vld [vmem:[%s13600_s17 + $0x207] sm:$0xff] }
 0x4b4   : >> { %v5099_v54 = vpop.f32.mrf.mxu0 }
 0x4b5   : >> { %5475 = vst.msk [vmem:[#allocation4 + $0x38] sm:$0xff] %vm330_vm0, %v5443_v36  ;;  %v15283_v2 = vadd.f32 %v5096_v17, %v4722_v25  ;;  %11470 = vmatmul.msk.f32.gmra.mxu1 %vm750_vm5, %v15143_v26  ;;  %11602 = vmatmul.msk.f32.gmra.mxu2 %vm750_vm5, %v11536_v52  ;;  %v15295_v26 = vld [vmem:[%s13600_s17 + $0x1f9] sm:$0xff]  ;;  %v11669_v36 = vld [vmem:[%s13600_s17 + $0x208] sm:$0xff] }
 0x4b6   : >> { %11732 = vmatmul.msk.f32.gmra.mxu3 %vm750_vm5, %v11666_v45 }
 0x4b7   : >> { %11862 = vmatmul.msk.f32.gmra.mxu0 %vm750_vm5, %v15280_v55 }
 0x4b8   : >> { %v4031_v10 = vpop.f32.mrf.mxu2 }
 0x4b9   : >> { %v4189_v1 = vadd.f32 %v4031_v10, %v3652_v42  ;;  %v4565_v63 = vpop.f32.mrf.mxu3 }
 0x4ba   : >> { %v3497_v43 = vpop.f32.mrf.mxu1 }
 0x4bb   : >> { %v3653_v21 = vadd.f32 %v3497_v43, %v14408_v9  ;;  %v4723_v24 = vadd.f32 %v4565_v63, %v4189_v1  ;;  %v11540_v1 = vld [vmem:[%s13600_s17 + $0x20f] sm:$0xff] }
 0x4bc   : >> { %v5102_v50 = vpop.f32.mrf.mxu0  ;;  %v5506_v32 = vld [vmem:[#allocation4 + $0x30] ss:$2 sm:$0xff]  ;;  %v5538_v27 = vld [vmem:[#allocation4 + $0x31] ss:$2 sm:$0xff] }
 0x4bd   : >> { %v5566_v35 = vmax.f32 %v5506_v32, %v5538_v27  ;;  %v15297_v56 = vadd.f32 %v5099_v54, %v4723_v24  ;;  %11471 = vmatmul.msk.f32.gmra.mxu1 %vm750_vm5, %v15158_v39  ;;  %11603 = vmatmul.msk.f32.gmra.mxu2 %vm750_vm5, %v11537_v5  ;;  %v11668_v39 = vld [vmem:[%s13600_s17 + $0x200] sm:$0xff]  ;;  %v11670_v5 = vld [vmem:[%s13600_s17 + $0x210] sm:$0xff] }
 0x4be   : >> { %11733 = vmatmul.msk.f32.gmra.mxu3 %vm750_vm5, %v11667_v4  ;;  %v11541_v27 = vld [vmem:[%s13600_s17 + $0x217] sm:$0xff] }
 0x4bf   : >> { %11863 = vmatmul.msk.f32.gmra.mxu0 %vm750_vm5, %v15295_v26  ;;  %11898 = vst.msk [vmem:[%s15202_s29 + $0x50] sm:$0xff] %vm330_vm0, %v5566_v35 }
 0x4c0   : >> { %v4034_v9 = vpop.f32.mrf.mxu2 }
 0x4c1   : >> { %v4190_v0 = vadd.f32 %v4034_v9, %v3653_v21  ;;  %v4568_v17 = vpop.f32.mrf.mxu3 }
 0x4c2   : >> { %v3500_v44 = vpop.f32.mrf.mxu1 }
 0x4c3   : >> { %v3654_v30 = vadd.f32 %v3500_v44, %v14422_v19  ;;  %v4724_v61 = vadd.f32 %v4568_v17, %v4190_v0  ;;  %v11671_v0 = vld [vmem:[%s13600_s17 + $0x218] sm:$0xff] }
 0x4c4   : >> { %v5105_v51 = vpop.f32.mrf.mxu0 }
 0x4c5   : >> { %v15313_v15 = vadd.f32 %v5102_v50, %v4724_v61  ;;  %11472 = vmatmul.msk.f32.gmra.mxu1 %vm750_vm5, %v15174_v11  ;;  %11604 = vmatmul.msk.f32.gmra.mxu2 %vm750_vm5, %v11538_v53  ;;  %v15325_v11 = vld [vmem:[%s13600_s17 + $0x209] sm:$0xff] }
 0x4c6   : >> { %11734 = vmatmul.msk.f32.gmra.mxu3 %vm750_vm5, %v11668_v39  ;;  %v11542_v39 = vld [vmem:[%s13600_s17 + $0x21f] sm:$0xff] }
 0x4c7   : >> { %11864 = vmatmul.msk.f32.gmra.mxu0 %vm750_vm5, %v15311_v49 }
 0x4c8   : >> { %v4037_v19 = vpop.f32.mrf.mxu2 }
 0x4c9   : >> { %v4191_v6 = vadd.f32 %v4037_v19, %v3654_v30  ;;  %v4571_v46 = vpop.f32.mrf.mxu3 }
 0x4ca   : >> { %v3503_v22 = vpop.f32.mrf.mxu1 }
 0x4cb   : >> { %v3655_v38 = vadd.f32 %v3503_v22, %v14436_v23  ;;  %v4725_v52 = vadd.f32 %v4571_v46, %v4191_v6  ;;  %v11672_v6 = vld [vmem:[%s13600_s17 + $0x220] sm:$0xff] }
 0x4cc   : >> { %v5108_v42 = vpop.f32.mrf.mxu0  ;;  %v15367_v46 = vld [vmem:[%s13600_s17 + $0x221] sm:$0xff] }
 0x4cd   : >> { %v15327_v25 = vadd.f32 %v5105_v51, %v4725_v52  ;;  %11473 = vmatmul.msk.f32.gmra.mxu1 %vm750_vm5, %v15191_v7  ;;  %11605 = vmatmul.msk.f32.gmra.mxu2 %vm750_vm5, %v11539_v8  ;;  %v15339_v7 = vld [vmem:[%s13600_s17 + $0x211] sm:$0xff] }
 0x4ce   : >> { %11735 = vmatmul.msk.f32.gmra.mxu3 %vm750_vm5, %v11669_v36  ;;  %v11543_v36 = vld [vmem:[%s13600_s17 + $0x237] sm:$0xff] }
 0x4cf   : >> { %11865 = vmatmul.msk.f32.gmra.mxu0 %vm750_vm5, %v15325_v11 }
 0x4d0   : >> { %v4040_v23 = vpop.f32.mrf.mxu2 }
 0x4d1   : >> { %v4192_v45 = vadd.f32 %v4040_v23, %v3655_v38  ;;  %v4574_v54 = vpop.f32.mrf.mxu3  ;;  %v11673_v23 = vld [vmem:[%s13600_s17 + $0x238] sm:$0xff] }
 0x4d2   : >> { %v3506_v10 = vpop.f32.mrf.mxu1 }
 0x4d3   : >> { %v3656_v63 = vadd.f32 %v3506_v10, %v14450_v62  ;;  %v4726_v43 = vadd.f32 %v4574_v54, %v4192_v45  ;;  %v15380_v54 = vld [vmem:[%s13600_s17 + $0x239] sm:$0xff] }
 0x4d4   : >> { %v5111_v21 = vpop.f32.mrf.mxu0 }
 0x4d5   : >> { %v15341_v24 = vadd.f32 %v5108_v42, %v4726_v43  ;;  %11474 = vmatmul.msk.f32.gmra.mxu1 %vm750_vm5, %v15211_v34  ;;  %11606 = vmatmul.msk.f32.gmra.mxu2 %vm750_vm5, %v11540_v1  ;;  %v15353_v34 = vld [vmem:[%s13600_s17 + $0x219] sm:$0xff] }
 0x4d6   : >> { %11736 = vmatmul.msk.f32.gmra.mxu3 %vm750_vm5, %v11670_v5 }
 0x4d7   : >> { %11866 = vmatmul.msk.f32.gmra.mxu0 %vm750_vm5, %v15339_v7 }
 0x4d8   : >> { %v4043_v62 = vpop.f32.mrf.mxu2 }
 0x4d9   : >> { %v4193_v4 = vadd.f32 %v4043_v62, %v3656_v63  ;;  %v4577_v50 = vpop.f32.mrf.mxu3 }
 0x4da   : >> { %v3509_v32 = vpop.f32.mrf.mxu1 }
 0x4db   : >> { %v3657_v35 = vadd.f32 %v3509_v32, %v14464_v12  ;;  %v4727_v9 = vadd.f32 %v4577_v50, %v4193_v4  ;;  %v11674_v4 = vld [vmem:[%s13600_s17 + $0x240] sm:$0xff] }
 0x4dc   : >> { %v5114_v17 = vpop.f32.mrf.mxu0  ;;  %v15394_v32 = vld [vmem:[%s13600_s17 + $0x241] sm:$0xff] }
 0x4dd   : >> { %v15355_v44 = vadd.f32 %v5111_v21, %v4727_v9  ;;  %11475 = vmatmul.msk.f32.gmra.mxu1 %vm750_vm5, %v15227_v31  ;;  %11607 = vmatmul.msk.f32.gmra.mxu2 %vm750_vm5, %v11541_v27  ;;  %v11544_v21 = vld [vmem:[%s13600_s17 + $0x23f] sm:$0xff] }
 0x4de   : >> { %11737 = vmatmul.msk.f32.gmra.mxu3 %vm750_vm5, %v11671_v0 }
 0x4df   : >> { %11867 = vmatmul.msk.f32.gmra.mxu0 %vm750_vm5, %v15353_v34 }
 0x4e0   : >> { %v4046_v12 = vpop.f32.mrf.mxu2 }
 0x4e1   : >> { %v4194_v53 = vadd.f32 %v4046_v12, %v3657_v35  ;;  %v4580_v30 = vpop.f32.mrf.mxu3 }
 0x4e2   : >> { %v3512_v61 = vpop.f32.mrf.mxu1 }
 0x4e3   : >> { %v3658_v51 = vadd.f32 %v3512_v61, %v14478_v40  ;;  %v4728_v19 = vadd.f32 %v4580_v30, %v4194_v53  ;;  %v11545_v30 = vld [vmem:[%s13600_s17 + $0x247] sm:$0xff] }
 0x4e4   : >> { %v5117_v31 = vpop.f32.mrf.mxu0 }
 0x4e5   : >> { %v15369_v22 = vadd.f32 %v5114_v17, %v4728_v19  ;;  %11476 = vmatmul.msk.f32.gmra.mxu1 %vm750_vm5, %v15245_v18  ;;  %11608 = vmatmul.msk.f32.gmra.mxu2 %vm750_vm5, %v11542_v39  ;;  %v11675_v39 = vld [vmem:[%s13600_s17 + $0x248] sm:$0xff] }
 0x4e6   : >> { %11738 = vmatmul.msk.f32.gmra.mxu3 %vm750_vm5, %v11672_v6  ;;  %v15409_v19 = vld [vmem:[%s13600_s17 + $0x249] sm:$0xff]  ;;  %v5325_v6 = vadd.f32 %v15138_v60, %v15297_v56 }
 0x4e7   : >> { %11868 = vmatmul.msk.f32.gmra.mxu0 %vm750_vm5, %v15367_v46 }
 0x4e8   : >> { %v4049_v40 = vpop.f32.mrf.mxu2 }
 0x4e9   : >> { %v4195_v8 = vadd.f32 %v4049_v40, %v3658_v51  ;;  %v4583_v38 = vpop.f32.mrf.mxu3 }
 0x4ea   : >> { %v3515_v52 = vpop.f32.mrf.mxu1 }
 0x4eb   : >> { %v4729_v42 = vadd.f32 %v4583_v38, %v4195_v8  ;;  %v3659_v10 = vadd.f32 %v3515_v52, %v14492_v16  ;;  %v5389_v8 = vmax.f32 %v5325_v6, 0.0 }
 0x4ec   : >> { %v5120_v45 = vpop.f32.mrf.mxu0 }
 0x4ed   : >> { %v15382_v18 = vadd.f32 %v5117_v31, %v4729_v42  ;;  %11477 = vmatmul.msk.f32.gmra.mxu1 %vm750_vm5, %v15262_v41  ;;  %11609 = vmatmul.msk.f32.gmra.mxu2 %vm750_vm5, %v11543_v36  ;;  %v5324_v41 = vadd.f32 %v15138_v60, %v15283_v2 }
 0x4ee   : >> { %11739 = vmatmul.msk.f32.gmra.mxu3 %vm750_vm5, %v11673_v23  ;;  %v11546_v23 = vld [vmem:[%s13600_s17 + $0x24f] sm:$0xff] }
 0x4ef   : >> { %11869 = vmatmul.msk.f32.gmra.mxu0 %vm750_vm5, %v15380_v54  ;;  %v5388_v0 = vmax.f32 %v5324_v41, 0.0 }
 0x4f0   : >> { %v4052_v1 = vpop.f32.mrf.mxu2 }
 0x4f1   : >> { %v4196_v63 = vadd.f32 %v4052_v1, %v3659_v10  ;;  %v4586_v43 = vpop.f32.mrf.mxu3  ;;  %v11676_v10 = vld [vmem:[%s13600_s17 + $0x250] sm:$0xff] }
 0x4f2   : >> { %v3518_v5 = vpop.f32.mrf.mxu1 }
 0x4f3   : >> { %v4730_v62 = vadd.f32 %v4586_v43, %v4196_v63  ;;  %v3660_v16 = vadd.f32 %v3518_v5, %v14506_v28  ;;  %v15425_v63 = vld [vmem:[%s13600_s17 + $0x251] sm:$0xff]  ;;  %v5326_v43 = vadd.f32 %v15138_v60, %v15313_v15 }
 0x4f4   : >> { %v5123_v50 = vpop.f32.mrf.mxu0 }
 0x4f5   : >> { %v5264_v27 = vadd.f32 %v5120_v45, %v4730_v62  ;;  %11478 = vmatmul.msk.f32.gmra.mxu1 %vm750_vm5, %v15280_v55  ;;  %11610 = vmatmul.msk.f32.gmra.mxu2 %vm750_vm5, %v11544_v21  ;;  %v5390_v62 = vmax.f32 %v5326_v43, 0.0 }
 0x4f6   : >> { %11740 = vmatmul.msk.f32.gmra.mxu3 %vm750_vm5, %v11674_v4 }
 0x4f7   : >> { %11870 = vmatmul.msk.f32.gmra.mxu0 %vm750_vm5, %v15394_v32  ;;  %v5332_v35 = vadd.f32 %v15138_v60, %v5264_v27 }
 0x4f8   : >> { %v4055_v9 = vpop.f32.mrf.mxu2 }
 0x4f9   : >> { %v5396_v2 = vmax.f32 %v5332_v35, 0.0  ;;  %v4197_v17 = vadd.f32 %v4055_v9, %v3660_v16  ;;  %v4589_v12 = vpop.f32.mrf.mxu3  ;;  %v11547_v16 = vld [vmem:[%s13600_s17 + $0x257] sm:$0xff] }
 0x4fa   : >> { %v3521_v53 = vpop.f32.mrf.mxu1  ;;  %v11677_v9 = vld [vmem:[%s13600_s17 + $0x258] sm:$0xff] }
 0x4fb   : >> { %v5444_v55 = vmax.f32 %v5388_v0, %v5396_v2  ;;  %v4731_v61 = vadd.f32 %v4589_v12, %v4197_v17  ;;  %v3661_v31 = vadd.f32 %v3521_v53, %v14520_v37  ;;  %v15441_v2 = vld [vmem:[%s13600_s17 + $0x259] sm:$0xff] }
 0x4fc   : >> { %v5126_v51 = vpop.f32.mrf.mxu0 }
 0x4fd   : >> { %5476 = vst.msk [vmem:[#allocation4 + $0x40] sm:$0xff] %vm330_vm0, %v5444_v55  ;;  %v5265_v28 = vadd.f32 %v5123_v50, %v4731_v61  ;;  %11479 = vmatmul.msk.f32.gmra.mxu1 %vm750_vm5, %v15295_v26  ;;  %11611 = vmatmul.msk.f32.gmra.mxu2 %vm750_vm5, %v11545_v30 }
 0x4fe   : >> { %11741 = vmatmul.msk.f32.gmra.mxu3 %vm750_vm5, %v11675_v39 }
 0x4ff   : >> { %11871 = vmatmul.msk.f32.gmra.mxu0 %vm750_vm5, %v15409_v19  ;;  %v5333_v40 = vadd.f32 %v15138_v60, %v5265_v28 }
 0x500   : >> { %v4058_v56 = vpop.f32.mrf.mxu2 }
 0x501   : >> { %v5397_v38 = vmax.f32 %v5333_v40, 0.0  ;;  %v4198_v52 = vadd.f32 %v4058_v56, %v3661_v31  ;;  %v4592_v36 = vpop.f32.mrf.mxu3  ;;  %v11548_v31 = vld [vmem:[%s13600_s17 + $0x25f] sm:$0xff] }
 0x502   : >> { %v3524_v42 = vpop.f32.mrf.mxu1 }
 0x503   : >> { %v5445_v26 = vmax.f32 %v5389_v8, %v5397_v38  ;;  %v4732_v45 = vadd.f32 %v4592_v36, %v4198_v52  ;;  %v3662_v5 = vadd.f32 %v3524_v42, %v14534_v47  ;;  %v5327_v47 = vadd.f32 %v15138_v60, %v15327_v25  ;;  %v11678_v8 = vld [vmem:[%s13600_s17 + $0x260] sm:$0xff] }
 0x504   : >> { %v5129_v1 = vpop.f32.mrf.mxu0  ;;  %v15459_v52 = vld [vmem:[%s13600_s17 + $0x261] sm:$0xff]  ;;  %v5328_v36 = vadd.f32 %v15138_v60, %v15341_v24 }
 0x505   : >> { %5477 = vst.msk [vmem:[#allocation4 + $0x48] sm:$0xff] %vm330_vm0, %v5445_v26  ;;  %v5266_v37 = vadd.f32 %v5126_v51, %v4732_v45  ;;  %11480 = vmatmul.msk.f32.gmra.mxu1 %vm750_vm5, %v15311_v49  ;;  %11612 = vmatmul.msk.f32.gmra.mxu2 %vm750_vm5, %v11546_v23  ;;  %v5391_v39 = vmax.f32 %v5327_v47, 0.0 }
 0x506   : >> { %11742 = vmatmul.msk.f32.gmra.mxu3 %vm750_vm5, %v11676_v10  ;;  %v5392_v26 = vmax.f32 %v5328_v36, 0.0  ;;  %v11681_v36 = vld [vmem:[%s13600_s17 + $0x288] sm:$0xff] }
 0x507   : >> { %11872 = vmatmul.msk.f32.gmra.mxu0 %vm750_vm5, %v15425_v63  ;;  %v5334_v21 = vadd.f32 %v15138_v60, %v5266_v37  ;;  %v11549_v37 = vld [vmem:[%s13600_s17 + $0x267] sm:$0xff] }
 0x508   : >> { %v4061_v15 = vpop.f32.mrf.mxu2 }
 0x509   : >> { %v5398_v4 = vmax.f32 %v5334_v21, 0.0  ;;  %v4199_v50 = vadd.f32 %v4061_v15, %v3662_v5  ;;  %v4595_v41 = vpop.f32.mrf.mxu3  ;;  %v11679_v21 = vld [vmem:[%s13600_s17 + $0x268] sm:$0xff] }
 0x50a   : >> { %v3527_v27 = vpop.f32.mrf.mxu1 }
 0x50b   : >> { %v5446_v49 = vmax.f32 %v5390_v62, %v5398_v4  ;;  %v4733_v35 = vadd.f32 %v4595_v41, %v4199_v50  ;;  %v3663_v25 = vadd.f32 %v3527_v27, %v14548_v58  ;;  %v15475_v62 = vld [vmem:[%s13600_s17 + $0x269] sm:$0xff] }
 0x50c   : >> { %v5132_v0 = vpop.f32.mrf.mxu0  ;;  %v5508_v17 = vld [vmem:[#allocation4 + $0x40] ss:$2 sm:$0xff]  ;;  %v5540_v12 = vld [vmem:[#allocation4 + $0x41] ss:$2 sm:$0xff] }
 0x50d   : >> { %v5567_v53 = vmax.f32 %v5508_v17, %v5540_v12  ;;  %5478 = vst.msk [vmem:[#allocation4 + $0x50] sm:$0xff] %vm330_vm0, %v5446_v49  ;;  %v5267_v30 = vadd.f32 %v5129_v1, %v4733_v35  ;;  %11481 = vmatmul.msk.f32.gmra.mxu1 %vm750_vm5, %v15325_v11  ;;  %11613 = vmatmul.msk.f32.gmra.mxu2 %vm750_vm5, %v11547_v16  ;;  %v11550_v12 = vld [vmem:[%s13600_s17 + $0x26f] sm:$0xff] }
 0x50e   : >> { %11743 = vmatmul.msk.f32.gmra.mxu3 %vm750_vm5, %v11677_v9 }
 0x50f   : >> { %11873 = vmatmul.msk.f32.gmra.mxu0 %vm750_vm5, %v15441_v2  ;;  %11899 = vst.msk [vmem:[%s15202_s29 + $0x68] sm:$0xff] %vm330_vm0, %v5567_v53  ;;  %v5335_v55 = vadd.f32 %v15138_v60, %v5267_v30  ;;  %v11680_v30 = vld [vmem:[%s13600_s17 + $0x270] sm:$0xff] }
 0x510   : >> { %v4064_v61 = vpop.f32.mrf.mxu2 }
 0x511   : >> { %v5399_v51 = vmax.f32 %v5335_v55, 0.0  ;;  %v4200_v6 = vadd.f32 %v4064_v61, %v3663_v25  ;;  %v4598_v11 = vpop.f32.mrf.mxu3  ;;  %v15493_v55 = vld [vmem:[%s13600_s17 + $0x271] sm:$0xff]  ;;  %v5330_v61 = vadd.f32 %v15138_v60, %v15369_v22 }
 0x512   : >> { %v3530_v28 = vpop.f32.mrf.mxu1 }
 0x513   : >> { %v5447_v40 = vmax.f32 %v5391_v39, %v5399_v51  ;;  %v4734_v56 = vadd.f32 %v4598_v11, %v4200_v6  ;;  %v3664_v42 = vadd.f32 %v3530_v28, %v14562_v3  ;;  %v5329_v3 = vadd.f32 %v15138_v60, %v15355_v44 }
 0x514   : >> { %v5135_v38 = vpop.f32.mrf.mxu0  ;;  %v5394_v6 = vmax.f32 %v5330_v61, 0.0  ;;  %v11554_v61 = vld [vmem:[%s13600_s17 + $0x29f] sm:$0xff] }
 0x515   : >> { %5479 = vst.msk [vmem:[#allocation4 + $0x58] sm:$0xff] %vm330_vm0, %v5447_v40  ;;  %v5268_v58 = vadd.f32 %v5132_v0, %v4734_v56  ;;  %11482 = vmatmul.msk.f32.gmra.mxu1 %vm750_vm5, %v15339_v7  ;;  %11614 = vmatmul.msk.f32.gmra.mxu2 %vm750_vm5, %v11548_v31  ;;  %v5393_v35 = vmax.f32 %v5329_v3, 0.0  ;;  %v15528_v3 = vld [vmem:[%s13600_s17 + $0x291] sm:$0xff] }
 0x516   : >> { %11744 = vmatmul.msk.f32.gmra.mxu3 %vm750_vm5, %v11678_v8 }
 0x517   : >> { %11874 = vmatmul.msk.f32.gmra.mxu0 %vm750_vm5, %v15459_v52  ;;  %v5336_v23 = vadd.f32 %v15138_v60, %v5268_v58 }
 0x518   : >> { %v4067_v24 = vpop.f32.mrf.mxu2 }
 0x519   : >> { %v5400_v45 = vmax.f32 %v5336_v23, 0.0  ;;  %v4201_v10 = vadd.f32 %v4067_v24, %v3664_v42  ;;  %v4601_v1 = vpop.f32.mrf.mxu3  ;;  %v15510_v42 = vld [vmem:[%s13600_s17 + $0x289] sm:$0xff]  ;;  %v5331_v24 = vadd.f32 %v15138_v60, %v15382_v18 }
 0x51a   : >> { %v3533_v43 = vpop.f32.mrf.mxu1 }
 0x51b   : >> { %v5448_v7 = vmax.f32 %v5392_v26, %v5400_v45  ;;  %v4735_v5 = vadd.f32 %v4601_v1, %v4201_v10  ;;  %v3665_v44 = vadd.f32 %v3533_v43, %v14576_v29  ;;  %v5395_v10 = vmax.f32 %v5331_v24, 0.0  ;;  %v11556_v24 = vld [vmem:[%s13600_s17 + $0x2af] sm:$0xff] }
 0x51c   : >> { %v5138_v15 = vpop.f32.mrf.mxu0  ;;  %v5510_v4 = vld [vmem:[#allocation4 + $0x50] ss:$2 sm:$0xff]  ;;  %v5542_v50 = vld [vmem:[#allocation4 + $0x51] ss:$2 sm:$0xff] }
 0x51d   : >> { %v5568_v41 = vmax.f32 %v5510_v4, %v5542_v50  ;;  %5480 = vst.msk [vmem:[#allocation4 + $0x60] sm:$0xff] %vm330_vm0, %v5448_v7  ;;  %v5269_v27 = vadd.f32 %v5135_v38, %v4735_v5  ;;  %11483 = vmatmul.msk.f32.gmra.mxu1 %vm750_vm5, %v15353_v34  ;;  %11615 = vmatmul.msk.f32.gmra.mxu2 %vm750_vm5, %v11549_v37  ;;  %v11682_v4 = vld [vmem:[%s13600_s17 + $0x290] sm:$0xff] }
 0x51e   : >> { %11745 = vmatmul.msk.f32.gmra.mxu3 %vm750_vm5, %v11679_v21 }
 0x51f   : >> { %11875 = vmatmul.msk.f32.gmra.mxu0 %vm750_vm5, %v15475_v62  ;;  %11900 = vst.msk [vmem:[%s15202_s29 + $0x70] sm:$0xff] %vm330_vm0, %v5568_v41  ;;  %v5337_v16 = vadd.f32 %v15138_v60, %v5269_v27 }
 0x520   : >> { %v4070_v49 = vpop.f32.mrf.mxu2 }
 0x521   : >> { %v5401_v9 = vmax.f32 %v5337_v16, 0.0  ;;  %v4202_v0 = vadd.f32 %v4070_v49, %v3665_v44  ;;  %v4604_v34 = vpop.f32.mrf.mxu3  ;;  %v11553_v16 = vld [vmem:[%s13600_s17 + $0x297] sm:$0xff] }
 0x522   : >> { %v3536_v17 = vpop.f32.mrf.mxu1 }
 0x523   : >> { %v5449_v47 = vmax.f32 %v5393_v35, %v5401_v9  ;;  %v4736_v53 = vadd.f32 %v4604_v34, %v4202_v0  ;;  %v3666_v39 = vadd.f32 %v3536_v17, %v14590_v48  ;;  %v11683_v9 = vld [vmem:[%s13600_s17 + $0x298] sm:$0xff] }
 0x524   : >> { %v5141_v25 = vpop.f32.mrf.mxu0 }
 0x525   : >> { %5481 = vst.msk [vmem:[#allocation4 + $0x68] sm:$0xff] %vm330_vm0, %v5449_v47  ;;  %v5270_v29 = vadd.f32 %v5138_v15, %v4736_v53  ;;  %11484 = vmatmul.msk.f32.gmra.mxu1 %vm750_vm5, %v15367_v46  ;;  %11616 = vmatmul.msk.f32.gmra.mxu2 %vm750_vm5, %v11550_v12  ;;  %v11551_v46 = vld [vmem:[%s13600_s17 + $0x287] sm:$0xff] }
 0x526   : >> { %11746 = vmatmul.msk.f32.gmra.mxu3 %vm750_vm5, %v11680_v30 }
 0x527   : >> { %11876 = vmatmul.msk.f32.gmra.mxu0 %vm750_vm5, %v15493_v55  ;;  %v5338_v51 = vadd.f32 %v15138_v60, %v5270_v29 }
 0x528   : >> { %v4073_v22 = vpop.f32.mrf.mxu2 }
 0x529   : >> { %v5402_v11 = vmax.f32 %v5338_v51, 0.0  ;;  %v4203_v28 = vadd.f32 %v4073_v22, %v3666_v39  ;;  %v4607_v31 = vpop.f32.mrf.mxu3  ;;  %v15559_v22 = vld [vmem:[%s13600_s17 + $0x2a1] sm:$0xff] }
 0x52a   : >> { %v3539_v40 = vpop.f32.mrf.mxu1 }
 0x52b   : >> { %v5450_v56 = vmax.f32 %v5394_v6, %v5402_v11  ;;  %v3667_v8 = vadd.f32 %v3539_v40, %v14604_v20  ;;  %v4737_v38 = vadd.f32 %v4607_v31, %v4203_v28  ;;  %v11555_v40 = vld [vmem:[%s13600_s17 + $0x2a7] sm:$0xff] }
 0x52c   : >> { %v5144_v58 = vpop.f32.mrf.mxu0  ;;  %v5512_v23 = vld [vmem:[#allocation4 + $0x60] ss:$2 sm:$0xff]  ;;  %v5544_v48 = vld [vmem:[#allocation4 + $0x61] ss:$2 sm:$0xff] }
 0x52d   : >> { %v5569_v26 = vmax.f32 %v5512_v23, %v5544_v48  ;;  %5482 = vst.msk [vmem:[#allocation4 + $0x70] sm:$0xff] %vm330_vm0, %v5450_v56  ;;  %v5271_v45 = vadd.f32 %v5141_v25, %v4737_v38  ;;  %11485 = vmatmul.msk.f32.gmra.mxu1 %vm750_vm5, %v15380_v54  ;;  %11617 = vmatmul.msk.f32.gmra.mxu2 %vm750_vm5, %v11551_v46  ;;  %v11552_v54 = vld [vmem:[%s13600_s17 + $0x28f] sm:$0xff] }
 0x52e   : >> { %11747 = vmatmul.msk.f32.gmra.mxu3 %vm750_vm5, %v11681_v36 }
 0x52f   : >> { %11877 = vmatmul.msk.f32.gmra.mxu0 %vm750_vm5, %v15510_v42  ;;  %11901 = vst.msk [vmem:[%s15202_s29 + $0x78] sm:$0xff] %vm330_vm0, %v5569_v26  ;;  %v5339_v20 = vadd.f32 %v15138_v60, %v5271_v45 }
 0x530   : >> { %v4076_v18 = vpop.f32.mrf.mxu2 }
 0x531   : >> { %v5403_v1 = vmax.f32 %v5339_v20, 0.0  ;;  %v4204_v43 = vadd.f32 %v4076_v18, %v3667_v8  ;;  %v4610_v37 = vpop.f32.mrf.mxu3  ;;  %v11685_v8 = vld [vmem:[%s13600_s17 + $0x2a8] sm:$0xff]  ;;  %v11686_v20 = vld [vmem:[%s13600_s17 + $0x2b0] sm:$0xff] }
 0x532   : >> { %v3542_v7 = vpop.f32.mrf.mxu1 }
 0x533   : >> { %v5451_v5 = vmax.f32 %v5395_v10, %v5403_v1  ;;  %v3668_v21 = vadd.f32 %v3542_v7, %v14618_v13  ;;  %v4738_v15 = vadd.f32 %v4610_v37, %v4204_v43  ;;  %v11557_v7 = vld [vmem:[%s13600_s17 + $0x2b7] sm:$0xff] }
 0x534   : >> { %v5147_v50 = vpop.f32.mrf.mxu0 }
 0x535   : >> { %5483 = vst.msk [vmem:[#allocation4 + $0x78] sm:$0xff] %vm330_vm0, %v5451_v5  ;;  %v15531_v60 = vadd.f32 %v5144_v58, %v4738_v15  ;;  %11486 = vmatmul.msk.f32.gmra.mxu1 %vm750_vm5, %v15394_v32  ;;  %11618 = vmatmul.msk.f32.gmra.mxu2 %vm750_vm5, %v11552_v54  ;;  %v15543_v32 = vld [vmem:[%s13600_s17 + $0x299] sm:$0xff] }
 0x536   : >> { %11748 = vmatmul.msk.f32.gmra.mxu3 %vm750_vm5, %v11682_v4  ;;  %v18136_v54 = vld [vmem:[#allocation39_spill] sm:$0xff] }
 0x537   : >> { %11878 = vmatmul.msk.f32.gmra.mxu0 %vm750_vm5, %v15528_v3  ;;  %v11687_v15 = vld [vmem:[%s13600_s17 + $0x2b8] sm:$0xff] }
 0x538   : >> { %v4079_v13 = vpop.f32.mrf.mxu2 }
 0x539   : >> { %v4205_v41 = vadd.f32 %v4079_v13, %v3668_v21  ;;  %v4613_v27 = vpop.f32.mrf.mxu3 }
 0x53a   : >> { %v3545_v44 = vpop.f32.mrf.mxu1 }
 0x53b   : >> { %v3669_v49 = vadd.f32 %v3545_v44, %v14632_v14  ;;  %v4739_v35 = vadd.f32 %v4613_v27, %v4205_v41 }
 0x53c   : >> { %v5150_v0 = vpop.f32.mrf.mxu0  ;;  %v5514_v34 = vld [vmem:[#allocation4 + $0x70] ss:$2 sm:$0xff]  ;;  %v5546_v17 = vld [vmem:[#allocation4 + $0x71] ss:$2 sm:$0xff] }
 0x53d   : >> { %v5570_v12 = vmax.f32 %v5514_v34, %v5546_v17  ;;  %v15545_v47 = vadd.f32 %v5147_v50, %v4739_v35  ;;  %11487 = vmatmul.msk.f32.gmra.mxu1 %vm750_vm5, %v15409_v19  ;;  %11619 = vmatmul.msk.f32.gmra.mxu2 %vm750_vm5, %v11553_v16  ;;  %v11684_v19 = vld [vmem:[%s13600_s17 + $0x2a0] sm:$0xff] }
 0x53e   : >> { %11749 = vmatmul.msk.f32.gmra.mxu3 %vm750_vm5, %v11683_v9  ;;  %v11558_v16 = vld [vmem:[%s13600_s17 + $0x2bf] sm:$0xff] }
 0x53f   : >> { %11879 = vmatmul.msk.f32.gmra.mxu0 %vm750_vm5, %v15543_v32  ;;  %11902 = vst.msk [vmem:[%s15202_s29 + $0x80] sm:$0xff] %vm330_vm0, %v5570_v12  ;;  %v15615_v34 = vld [vmem:[%s13600_s17 + $0x2c1] sm:$0xff] }
 0x540   : >> { %v4082_v14 = vpop.f32.mrf.mxu2 }
 0x541   : >> { %v4206_v53 = vadd.f32 %v4082_v14, %v3669_v49  ;;  %v4616_v30 = vpop.f32.mrf.mxu3  ;;  %v18137_v49 = vld [vmem:[#allocation9_spill] sm:$0xff] }
 0x542   : >> { %v3548_v25 = vpop.f32.mrf.mxu1 }
 0x543   : >> { %v3670_v29 = vadd.f32 %v3548_v25, %v14646_v59  ;;  %v4740_v39 = vadd.f32 %v4616_v30, %v4206_v53  ;;  %v11559_v25 = vld [vmem:[%s13600_s17 + $0x2d7] sm:$0xff] }
 0x544   : >> { %v5153_v51 = vpop.f32.mrf.mxu0 }
 0x545   : >> { %v15561_v6 = vadd.f32 %v5150_v0, %v4740_v39  ;;  %11488 = vmatmul.msk.f32.gmra.mxu1 %vm750_vm5, %v15425_v63  ;;  %11620 = vmatmul.msk.f32.gmra.mxu2 %vm750_vm5, %v11554_v61  ;;  %v15573_v63 = vld [vmem:[%s13600_s17 + $0x2a9] sm:$0xff]  ;;  %v11688_v0 = vld [vmem:[%s13600_s17 + $0x2c0] sm:$0xff] }
 0x546   : >> { %11750 = vmatmul.msk.f32.gmra.mxu3 %vm750_vm5, %v11684_v19  ;;  %v11819_v19 = vld [vmem:[%s13600_s17 + $0x2d9] sm:$0xff] }
 0x547   : >> { %11880 = vmatmul.msk.f32.gmra.mxu0 %vm750_vm5, %v15559_v22 }
 0x548   : >> { %v4085_v59 = vpop.f32.mrf.mxu2 }
 0x549   : >> { %v4207_v11 = vadd.f32 %v4085_v59, %v3670_v29  ;;  %v4619_v28 = vpop.f32.mrf.mxu3  ;;  %v11689_v29 = vld [vmem:[%s13600_s17 + $0x2d8] sm:$0xff] }
 0x54a   : >> { %v3551_v31 = vpop.f32.mrf.mxu1 }
 0x54b   : >> { %v3671_v46 = vadd.f32 %v3551_v31, %v14660_v57  ;;  %v4741_v56 = vadd.f32 %v4619_v28, %v4207_v11 }
 0x54c   : >> { %v5156_v38 = vpop.f32.mrf.mxu0 }
 0x54d   : >> { %v15575_v36 = vadd.f32 %v5153_v51, %v4741_v56  ;;  %11489 = vmatmul.msk.f32.gmra.mxu1 %vm750_vm5, %v15441_v2  ;;  %11621 = vmatmul.msk.f32.gmra.mxu2 %vm750_vm5, %v11555_v40  ;;  %v15587_v2 = vld [vmem:[%s13600_s17 + $0x2b1] sm:$0xff]  ;;  %v18138_v51 = vld [vmem:[#allocation11_spill] sm:$0xff] }
 0x54e   : >> { %11751 = vmatmul.msk.f32.gmra.mxu3 %vm750_vm5, %v11685_v8  ;;  %v11690_v8 = vld [vmem:[%s13600_s17 + $0x2e0] sm:$0xff] }
 0x54f   : >> { %11881 = vmatmul.msk.f32.gmra.mxu0 %vm750_vm5, %v15573_v63 }
 0x550   : >> { %v4088_v57 = vpop.f32.mrf.mxu2 }
 0x551   : >> { %v4208_v58 = vadd.f32 %v4088_v57, %v3671_v46  ;;  %v4622_v23 = vpop.f32.mrf.mxu3  ;;  %v11560_v46 = vld [vmem:[%s13600_s17 + $0x2df] sm:$0xff] }
 0x552   : >> { %v3554_v48 = vpop.f32.mrf.mxu1  ;;  %v11820_v57 = vld [vmem:[%s13600_s17 + $0x2e1] sm:$0xff] }
 0x553   : >> { %v3672_v26 = vadd.f32 %v3554_v48, %v14674_v33  ;;  %v4742_v45 = vadd.f32 %v4622_v23, %v4208_v58  ;;  %v18139_v48 = vld [vmem:[#allocation13_spill] sm:$0xff] }
 0x554   : >> { %v5159_v18 = vpop.f32.mrf.mxu0 }
 0x555   : >> { %v15589_v10 = vadd.f32 %v5156_v38, %v4742_v45  ;;  %11490 = vmatmul.msk.f32.gmra.mxu1 %vm750_vm5, %v15459_v52  ;;  %11622 = vmatmul.msk.f32.gmra.mxu2 %vm750_vm5, %v11556_v24  ;;  %v15601_v52 = vld [vmem:[%s13600_s17 + $0x2b9] sm:$0xff] }
 0x556   : >> { %11752 = vmatmul.msk.f32.gmra.mxu3 %vm750_vm5, %v11686_v20 }
 0x557   : >> { %11882 = vmatmul.msk.f32.gmra.mxu0 %vm750_vm5, %v15587_v2 }
 0x558   : >> { %v4091_v33 = vpop.f32.mrf.mxu2 }
 0x559   : >> { %v4209_v1 = vadd.f32 %v4091_v33, %v3672_v26  ;;  %v4625_v43 = vpop.f32.mrf.mxu3 }
 0x55a   : >> { %v3557_v37 = vpop.f32.mrf.mxu1 }
 0x55b   : >> { %v3673_v5 = vadd.f32 %v3557_v37, %v18136_v54  ;;  %v4743_v21 = vadd.f32 %v4625_v43, %v4209_v1  ;;  %v11561_v43 = vld [vmem:[%s13600_s17 + $0x2e7] sm:$0xff] }
 0x55c   : >> { %v5162_v4 = vpop.f32.mrf.mxu0 }
 0x55d   : >> { %v15603_v50 = vadd.f32 %v5159_v18, %v4743_v21  ;;  %11491 = vmatmul.msk.f32.gmra.mxu1 %vm750_vm5, %v15475_v62  ;;  %11623 = vmatmul.msk.f32.gmra.mxu2 %vm750_vm5, %v11557_v7  ;;  %v11691_v7 = vld [vmem:[%s13600_s17 + $0x2e8] sm:$0xff] }
 0x55e   : >> { %11753 = vmatmul.msk.f32.gmra.mxu3 %vm750_vm5, %v11687_v15 }
 0x55f   : >> { %11883 = vmatmul.msk.f32.gmra.mxu0 %vm750_vm5, %v15601_v52 }
 0x560   : >> { %v4094_v13 = vpop.f32.mrf.mxu2 }
 0x561   : >> { %v4210_v41 = vadd.f32 %v4094_v13, %v3673_v5  ;;  %v4628_v27 = vpop.f32.mrf.mxu3  ;;  %v11821_v5 = vld [vmem:[%s13600_s17 + $0x2e9] sm:$0xff] }
 0x562   : >> { %v3560_v44 = vpop.f32.mrf.mxu1 }
 0x563   : >> { %v3674_v35 = vadd.f32 %v3560_v44, %v18137_v49  ;;  %v4744_v9 = vadd.f32 %v4628_v27, %v4210_v41 }
 0x564   : >> { %v5165_v62 = vpop.f32.mrf.mxu0 }
 0x565   : >> { %v15617_v17 = vadd.f32 %v5162_v4, %v4744_v9  ;;  %11492 = vmatmul.msk.f32.gmra.mxu1 %vm750_vm5, %v15493_v55  ;;  %11624 = vmatmul.msk.f32.gmra.mxu2 %vm750_vm5, %v11558_v16  ;;  %v18140_v4 = vld [vmem:[#allocation15_spill] sm:$0xff]  ;;  %v11562_v9 = vld [vmem:[%s13600_s17 + $0x2ef] sm:$0xff] }
 0x566   : >> { %11754 = vmatmul.msk.f32.gmra.mxu3 %vm750_vm5, %v11688_v0 }
 0x567   : >> { %11884 = vmatmul.msk.f32.gmra.mxu0 %vm750_vm5, %v15615_v34 }
 0x568   : >> { %v4097_v12 = vpop.f32.mrf.mxu2 }
 0x569   : >> { %v4211_v14 = vadd.f32 %v4097_v12, %v3674_v35  ;;  %v4631_v53 = vpop.f32.mrf.mxu3 }
 0x56a   : >> { %v3563_v30 = vpop.f32.mrf.mxu1 }
 0x56b   : >> { %v4745_v61 = vadd.f32 %v4631_v53, %v4211_v14  ;;  %v3675_v59 = vadd.f32 %v3563_v30, %v18138_v51  ;;  %v11822_v14 = vld [vmem:[%s13600_s17 + $0x2f1] sm:$0xff] }
 0x56c   : >> { %v5168_v39 = vpop.f32.mrf.mxu0 }
 0x56d   : >> { %v15628_v55 = vadd.f32 %v5165_v62, %v4745_v61  ;;  %11493 = vmatmul.msk.f32.gmra.mxu1 %vm750_vm5, %v15510_v42  ;;  %11625 = vmatmul.msk.f32.gmra.mxu2 %vm750_vm5, %v11559_v25  ;;  %v15642_v42 = vld [vmem:[%s17988_s2] ss:$0 sm:$0xff]  ;;  %v11692_v62 = vld [vmem:[%s13600_s17 + $0x2f0] sm:$0xff] }
 0x56e   : >> { %11755 = vmatmul.msk.f32.gmra.mxu3 %vm750_vm5, %v11689_v29  ;;  %v5340_v58 = vadd.f32 %v15642_v42, %v15531_v60  ;;  %v5341_v21 = vadd.f32 %v15642_v42, %v15545_v47  ;;  %v5342_v53 = vadd.f32 %v15642_v42, %v15561_v6  ;;  %v18141_v25 = vld [vmem:[#allocation17_spill] sm:$0xff] }
 0x56f   : >> { %11885 = vmatmul.msk.f32.gmra.mxu0 %vm750_vm5, %v11819_v19 }
 0x570   : >> { %v4100_v11 = vpop.f32.mrf.mxu2  ;;  %v5404_v20 = vmax.f32 %v5340_v58, 0.0  ;;  %v5405_v47 = vmax.f32 %v5341_v21, 0.0  ;;  %v5406_v6 = vmax.f32 %v5342_v53, 0.0  ;;  %v18143_v21 = vld [vmem:[#allocation21_spill] sm:$0xff] }
 0x571   : >> { %v4212_v28 = vadd.f32 %v4100_v11, %v3675_v59  ;;  %v4634_v31 = vpop.f32.mrf.mxu3 }
 0x572   : >> { %v3566_v40 = vpop.f32.mrf.mxu1 }
 0x573   : >> { %v4746_v56 = vadd.f32 %v4634_v31, %v4212_v28  ;;  %v3676_v24 = vadd.f32 %v3566_v40, %v18139_v48  ;;  %v11563_v28 = vld [vmem:[%s13600_s17 + $0x2f7] sm:$0xff] }
 0x574   : >> { %v5171_v38 = vpop.f32.mrf.mxu0  ;;  %v11693_v40 = vld [vmem:[%s13600_s17 + $0x2f8] sm:$0xff] }
 0x575   : >> { %v5280_v23 = vadd.f32 %v5168_v39, %v4746_v56  ;;  %11494 = vmatmul.msk.f32.gmra.mxu1 %vm750_vm5, %v15528_v3  ;;  %11626 = vmatmul.msk.f32.gmra.mxu2 %vm750_vm5, %v11560_v46  ;;  %v11823_v56 = vld [vmem:[%s13600_s17 + $0x2f9] sm:$0xff] }
 0x576   : >> { %11756 = vmatmul.msk.f32.gmra.mxu3 %vm750_vm5, %v11690_v8  ;;  %v18142_v48 = vld [vmem:[#allocation19_spill] sm:$0xff] }
 0x577   : >> { %11886 = vmatmul.msk.f32.gmra.mxu0 %vm750_vm5, %v11820_v57  ;;  %v5348_v26 = vadd.f32 %v15642_v42, %v5280_v23  ;;  %v5343_v57 = vadd.f32 %v15642_v42, %v15575_v36 }
 0x578   : >> { %v4103_v45 = vpop.f32.mrf.mxu2 }
 0x579   : >> { %v5412_v18 = vmax.f32 %v5348_v26, 0.0  ;;  %v4213_v60 = vadd.f32 %v4103_v45, %v3676_v24  ;;  %v4637_v33 = vpop.f32.mrf.mxu3  ;;  %v5407_v45 = vmax.f32 %v5343_v57, 0.0 }
 0x57a   : >> { %v3569_v1 = vpop.f32.mrf.mxu1 }
 0x57b   : >> { %v5452_v37 = vmax.f32 %v5404_v20, %v5412_v18  ;;  %v4747_v3 = vadd.f32 %v4637_v33, %v4213_v60  ;;  %v3677_v13 = vadd.f32 %v3569_v1, %v18140_v4  ;;  %v11564_v33 = vld [vmem:[%s13600_s17 + $0x2ff] sm:$0xff] }
 0x57c   : >> { %v5174_v54 = vpop.f32.mrf.mxu0 }
 0x57d   : >> { %5484 = vst.msk [vmem:[#allocation4 + $0x80] sm:$0xff] %vm330_vm0, %v5452_v37  ;;  %v5281_v15 = vadd.f32 %v5171_v38, %v4747_v3  ;;  %11495 = vmatmul.msk.f32.gmra.mxu1 %vm750_vm5, %v15543_v32  ;;  %11627 = vmatmul.msk.f32.gmra.mxu2 %vm750_vm5, %v11561_v43  ;;  %v11694_v37 = vld [vmem:[%s13600_s17 + $0x300] sm:$0xff] }
 0x57e   : >> { %11757 = vmatmul.msk.f32.gmra.mxu3 %vm750_vm5, %v11691_v7  ;;  %v11824_v7 = vld [vmem:[%s13600_s17 + $0x301] sm:$0xff] }
 0x57f   : >> { %11887 = vmatmul.msk.f32.gmra.mxu0 %vm750_vm5, %v11821_v5  ;;  %v5349_v41 = vadd.f32 %v15642_v42, %v5281_v15 }
 0x580   : >> { %v4106_v27 = vpop.f32.mrf.mxu2 }
 0x581   : >> { %v5413_v44 = vmax.f32 %v5349_v41, 0.0  ;;  %v4214_v16 = vadd.f32 %v4106_v27, %v3677_v13  ;;  %v4640_v49 = vpop.f32.mrf.mxu3 }
 0x582   : >> { %v3572_v35 = vpop.f32.mrf.mxu1 }
 0x583   : >> { %v5453_v0 = vmax.f32 %v5405_v47, %v5413_v44  ;;  %v4748_v32 = vadd.f32 %v4640_v49, %v4214_v16  ;;  %v3678_v61 = vadd.f32 %v3572_v35, %v18141_v25  ;;  %v11565_v16 = vld [vmem:[%s13600_s17 + $0x307] sm:$0xff] }
 0x584   : >> { %v5177_v12 = vpop.f32.mrf.mxu0  ;;  %v11695_v35 = vld [vmem:[%s13600_s17 + $0x308] sm:$0xff] }
 0x585   : >> { %5485 = vst.msk [vmem:[#allocation4 + $0x88] sm:$0xff] %vm330_vm0, %v5453_v0  ;;  %v5282_v30 = vadd.f32 %v5174_v54, %v4748_v32  ;;  %11496 = vmatmul.msk.f32.gmra.mxu1 %vm750_vm5, %v15559_v22  ;;  %11628 = vmatmul.msk.f32.gmra.mxu2 %vm750_vm5, %v11562_v9  ;;  %v5344_v54 = vadd.f32 %v15642_v42, %v15589_v10  ;;  %v11825_v0 = vld [vmem:[%s13600_s17 + $0x309] sm:$0xff] }
 0x586   : >> { %11758 = vmatmul.msk.f32.gmra.mxu3 %vm750_vm5, %v11692_v62 }
 0x587   : >> { %11888 = vmatmul.msk.f32.gmra.mxu0 %vm750_vm5, %v11822_v14  ;;  %v5350_v29 = vadd.f32 %v15642_v42, %v5282_v30  ;;  %v5408_v10 = vmax.f32 %v5344_v54, 0.0  ;;  %v18144_v30 = vld [vmem:[#allocation23_spill] sm:$0xff] }
 0x588   : >> { %v4109_v39 = vpop.f32.mrf.mxu2 }
 0x589   : >> { %v5414_v19 = vmax.f32 %v5350_v29, 0.0  ;;  %v4215_v51 = vadd.f32 %v4109_v39, %v3678_v61  ;;  %v4643_v59 = vpop.f32.mrf.mxu3 }
 0x58a   : >> { %v3575_v11 = vpop.f32.mrf.mxu1 }
 0x58b   : >> { %v5454_v22 = vmax.f32 %v5406_v6, %v5414_v19  ;;  %v4749_v31 = vadd.f32 %v4643_v59, %v4215_v51  ;;  %v3679_v36 = vadd.f32 %v3575_v11, %v18142_v48  ;;  %v11566_v51 = vld [vmem:[%s13600_s17 + $0x30f] sm:$0xff] }
 0x58c   : >> { %v5180_v46 = vpop.f32.mrf.mxu0  ;;  %v5516_v8 = vld [vmem:[#allocation4 + $0x80] ss:$2 sm:$0xff]  ;;  %v5548_v38 = vld [vmem:[#allocation4 + $0x81] ss:$2 sm:$0xff] }
 0x58d   : >> { %v5571_v58 = vmax.f32 %v5516_v8, %v5548_v38  ;;  %5486 = vst.msk [vmem:[#allocation4 + $0x90] sm:$0xff] %vm330_vm0, %v5454_v22  ;;  %v5283_v23 = vadd.f32 %v5177_v12, %v4749_v31  ;;  %11497 = vmatmul.msk.f32.gmra.mxu1 %vm750_vm5, %v15573_v63  ;;  %11629 = vmatmul.msk.f32.gmra.mxu2 %vm750_vm5, %v11563_v28  ;;  %v11696_v28 = vld [vmem:[%s13600_s17 + $0x310] sm:$0xff] }
 0x58e   : >> { %11759 = vmatmul.msk.f32.gmra.mxu3 %vm750_vm5, %v11693_v40  ;;  %v5345_v12 = vadd.f32 %v15642_v42, %v15603_v50  ;;  %v11826_v31 = vld [vmem:[%s13600_s17 + $0x311] sm:$0xff]  ;;  %v5346_v40 = vadd.f32 %v15642_v42, %v15617_v17  ;;  %s15819_s17 = smov (%p612_p11), 0  }
 0x58f   : >> { %11889 = vmatmul.msk.f32.gmra.mxu0 %vm750_vm5, %v11823_v56  ;;  %11903 = vst.msk [vmem:[%s15202_s29 + $0x98] sm:$0xff] %vm330_vm0, %v5571_v58  ;;  %v5351_v24 = vadd.f32 %v15642_v42, %v5283_v23  ;;  %v18145_v56 = vld [vmem:[#allocation25_spill] sm:$0xff] }
 0x590   : >> { %v4112_v26 = vpop.f32.mrf.mxu2  ;;  %v5409_v29 = vmax.f32 %v5345_v12, 0.0  ;;  %v5410_v58 = vmax.f32 %v5346_v40, 0.0 }
 0x591   : >> { %v5415_v20 = vmax.f32 %v5351_v24, 0.0  ;;  %v4216_v18 = vadd.f32 %v4112_v26, %v3679_v36  ;;  %v4646_v60 = vpop.f32.mrf.mxu3  ;;  %v18146_v26 = vld [vmem:[#allocation27_spill] sm:$0xff] }
 0x592   : >> { %v3578_v63 = vpop.f32.mrf.mxu1 }
 0x593   : >> { %v5455_v1 = vmax.f32 %v5407_v45, %v5415_v20  ;;  %v4750_v43 = vadd.f32 %v4646_v60, %v4216_v18  ;;  %v3680_v15 = vadd.f32 %v3578_v63, %v18143_v21  ;;  %v5347_v63 = vadd.f32 %v15642_v42, %v15628_v55 }
 0x594   : >> { %v5183_v3 = vpop.f32.mrf.mxu0 }
 0x595   : >> { %5487 = vst.msk [vmem:[#allocation4 + $0x98] sm:$0xff] %vm330_vm0, %v5455_v1  ;;  %v5284_v5 = vadd.f32 %v5180_v46, %v4750_v43  ;;  %11498 = vmatmul.msk.f32.gmra.mxu1 %vm750_vm5, %v15587_v2  ;;  %11630 = vmatmul.msk.f32.gmra.mxu2 %vm750_vm5, %v11564_v33 }
 0x596   : >> { %11760 = vmatmul.msk.f32.gmra.mxu3 %vm750_vm5, %v11694_v37 }
 0x597   : >> { %11890 = vmatmul.msk.f32.gmra.mxu0 %vm750_vm5, %v11824_v7  ;;  %v5352_v4 = vadd.f32 %v15642_v42, %v5284_v5 }
 0x598   : >> { %v4115_v13 = vpop.f32.mrf.mxu2 }
 0x599   : >> { %v5416_v41 = vmax.f32 %v5352_v4, 0.0  ;;  %v4217_v27 = vadd.f32 %v4115_v13, %v3680_v15  ;;  %v4649_v47 = vpop.f32.mrf.mxu3  ;;  %v18147_v4 = vld [vmem:[#allocation29_spill] sm:$0xff] }
 0x59a   : >> { %v3581_v44 = vpop.f32.mrf.mxu1 }
 0x59b   : >> { %v5456_v2 = vmax.f32 %v5408_v10, %v5416_v41  ;;  %v4751_v49 = vadd.f32 %v4649_v47, %v4217_v27  ;;  %v3681_v50 = vadd.f32 %v3581_v44, %v18144_v30 }
 0x59c   : >> { %v5186_v9 = vpop.f32.mrf.mxu0  ;;  %v5518_v32 = vld [vmem:[#allocation4 + $0x90] ss:$2 sm:$0xff]  ;;  %v5550_v62 = vld [vmem:[#allocation4 + $0x91] ss:$2 sm:$0xff] }
 0x59d   : >> { %v5572_v14 = vmax.f32 %v5518_v32, %v5550_v62  ;;  %5488 = vst.msk [vmem:[#allocation4 + $0xa0] sm:$0xff] %vm330_vm0, %v5456_v2  ;;  %v5285_v53 = vadd.f32 %v5183_v3, %v4751_v49  ;;  %11499 = vmatmul.msk.f32.gmra.mxu1 %vm750_vm5, %v15601_v52  ;;  %11631 = vmatmul.msk.f32.gmra.mxu2 %vm750_vm5, %v11565_v16  ;;  %v5411_v3 = vmax.f32 %v5347_v63, 0.0  ;;  %v18148_v2 = vld [vmem:[#allocation31_spill] sm:$0xff] }
 0x59e   : >> { %11761 = vmatmul.msk.f32.gmra.mxu3 %vm750_vm5, %v11695_v35 }
 0x59f   : >> { %11891 = vmatmul.msk.f32.gmra.mxu0 %vm750_vm5, %v11825_v0  ;;  %11904 = vst.msk [vmem:[%s15202_s29 + $0xa0] sm:$0xff] %vm330_vm0, %v5572_v14  ;;  %v5353_v25 = vadd.f32 %v15642_v42, %v5285_v53 }
 0x5a0   : >> { %v4118_v61 = vpop.f32.mrf.mxu2 }
 0x5a1   : >> { %v5417_v39 = vmax.f32 %v5353_v25, 0.0  ;;  %v4218_v6 = vadd.f32 %v4118_v61, %v3681_v50  ;;  %v4652_v19 = vpop.f32.mrf.mxu3  ;;  %v18149_v25 = vld [vmem:[#allocation33_spill] sm:$0xff] }
 0x5a2   : >> { %v3584_v52 = vpop.f32.mrf.mxu1 }
 0x5a3   : >> { %v5457_v59 = vmax.f32 %v5409_v29, %v5417_v39  ;;  %v4752_v11 = vadd.f32 %v4652_v19, %v4218_v6  ;;  %v3682_v8 = vadd.f32 %v3584_v52, %v18145_v56 }
 0x5a4   : >> { %v5189_v22 = vpop.f32.mrf.mxu0 }
 0x5a5   : >> { %5489 = vst.msk [vmem:[#allocation4 + $0xa8] sm:$0xff] %vm330_vm0, %v5457_v59  ;;  %v5286_v46 = vadd.f32 %v5186_v9, %v4752_v11  ;;  %11500 = vmatmul.msk.f32.gmra.mxu1 %vm750_vm5, %v15615_v34  ;;  %11632 = vmatmul.msk.f32.gmra.mxu2 %vm750_vm5, %v11566_v51  ;;  %v18150_v11 = vld [vmem:[#allocation35_spill] sm:$0xff] }
 0x5a6   : >> { %11762 = vmatmul.msk.f32.gmra.mxu3 %vm750_vm5, %v11696_v28 }
 0x5a7   : >> { %11892 = vmatmul.msk.f32.gmra.mxu0 %vm750_vm5, %v11826_v31  ;;  %v5354_v38 = vadd.f32 %v15642_v42, %v5286_v46 }
 0x5a8   : >> { %v4121_v57 = vpop.f32.mrf.mxu2 }
 0x5a9   : >> { %v5418_v17 = vmax.f32 %v5354_v38, 0.0  ;;  %v4219_v23 = vadd.f32 %v4121_v57, %v3682_v8  ;;  %v4655_v48 = vpop.f32.mrf.mxu3  ;;  %v18151_v57 = vld [vmem:[#allocation37_spill] sm:$0xff] }
 0x5aa   : >> { %v3587_v36 = vpop.f32.mrf.mxu1 }
 0x5ab   : >> { %v5458_v24 = vmax.f32 %v5410_v58, %v5418_v17  ;;  %v3683_v34 = vadd.f32 %v3587_v36, %v18146_v26  ;;  %v4753_v45 = vadd.f32 %v4655_v48, %v4219_v23 }
 0x5ac   : >> { %v5192_v20 = vpop.f32.mrf.mxu0  ;;  %v5520_v18 = vld [vmem:[#allocation4 + $0xa0] ss:$2 sm:$0xff]  ;;  %v5552_v60 = vld [vmem:[#allocation4 + $0xa1] ss:$2 sm:$0xff] }
 0x5ad   : >> { %v5573_v33 = vmax.f32 %v5520_v18, %v5552_v60  ;;  %5490 = vst.msk [vmem:[#allocation4 + $0xb0] sm:$0xff] %vm330_vm0, %v5458_v24  ;;  %v5287_v1 = vadd.f32 %v5189_v22, %v4753_v45  ;;  %v18152_v45 = vld [vmem:[#allocation40_spill] sm:$0xff] }
 0x5af   : >> { %11905 = vst.msk [vmem:[%s15202_s29 + $0xa8] sm:$0xff] %vm330_vm0, %v5573_v33  ;;  %v5355_v43 = vadd.f32 %v15642_v42, %v5287_v1 }
 0x5b0   : >> { %v4124_v37 = vpop.f32.mrf.mxu2 }
 0x5b1   : >> { %v5419_v7 = vmax.f32 %v5355_v43, 0.0  ;;  %v4220_v54 = vadd.f32 %v4124_v37, %v3683_v34  ;;  %v4658_v5 = vpop.f32.mrf.mxu3 }
 0x5b2   : >> { %v3590_v21 = vpop.f32.mrf.mxu1 }
 0x5b3   : >> { %v5459_v15 = vmax.f32 %v5411_v3, %v5419_v7  ;;  %v3684_v13 = vadd.f32 %v3590_v21, %v18147_v4  ;;  %v4754_v10 = vadd.f32 %v4658_v5, %v4220_v54  ;;  %v18153_v3 = vld [vmem:[#allocation10_spill] sm:$0xff] }
 0x5b4   : >> { %v5195_v55 = vpop.f32.mrf.mxu0 }
 0x5b5   : >> { %5491 = vst.msk [vmem:[#allocation4 + $0xb8] sm:$0xff] %vm330_vm0, %v5459_v15  ;;  %v15744_v41 = vadd.f32 %v5192_v20, %v4754_v10 }
 0x5b8   : >> { %v4127_v27 = vpop.f32.mrf.mxu2 }
 0x5b9   : >> { %v4221_v47 = vadd.f32 %v4127_v27, %v3684_v13  ;;  %v4661_v44 = vpop.f32.mrf.mxu3 }
 0x5ba   : >> { %v3593_v16 = vpop.f32.mrf.mxu1 }
 0x5bb   : >> { %v3685_v49 = vadd.f32 %v3593_v16, %v18148_v2  ;;  %v4755_v35 = vadd.f32 %v4661_v44, %v4221_v47  ;;  %v18154_v44 = vld [vmem:[#allocation12_spill] sm:$0xff] }
 0x5bc   : >> { %v5198_v9 = vpop.f32.mrf.mxu0  ;;  %v5522_v0 = vld [vmem:[#allocation4 + $0xb0] ss:$2 sm:$0xff]  ;;  %v5554_v32 = vld [vmem:[#allocation4 + $0xb1] ss:$2 sm:$0xff] }
 0x5bd   : >> { %v5574_v62 = vmax.f32 %v5522_v0, %v5554_v32  ;;  %v15747_v12 = vadd.f32 %v5195_v55, %v4755_v35 }
 0x5bf   : >> { %11906 = vst.msk [vmem:[%s15202_s29 + $0xb0] sm:$0xff] %vm330_vm0, %v5574_v62  ;;  %v5356_v62 = vadd.f32 %v15642_v42, %v15744_v41 }
 0x5c0   : >> { %v4130_v14 = vpop.f32.mrf.mxu2 }
 0x5c1   : >> { %v4222_v53 = vadd.f32 %v4130_v14, %v3685_v49  ;;  %v4664_v30 = vpop.f32.mrf.mxu3 }
 0x5c2   : >> { %v3596_v50 = vpop.f32.mrf.mxu1 }
 0x5c3   : >> { %v3686_v61 = vadd.f32 %v3596_v50, %v18149_v25  ;;  %v4756_v29 = vadd.f32 %v4664_v30, %v4222_v53  ;;  %v18155_v53 = vld [vmem:[#allocation14_spill] sm:$0xff] }
 0x5c4   : >> { %v5201_v39 = vpop.f32.mrf.mxu0 }
 0x5c5   : >> { %v15752_v6 = vadd.f32 %v5198_v9, %v4756_v29 }
 0x5c8   : >> { %v4133_v19 = vpop.f32.mrf.mxu2 }
 0x5c9   : >> { %v4223_v52 = vadd.f32 %v4133_v19, %v3686_v61  ;;  %v4667_v51 = vpop.f32.mrf.mxu3  ;;  %v5420_v61 = vmax.f32 %v5356_v62, 0.0 }
 0x5ca   : >> { %v3599_v59 = vpop.f32.mrf.mxu1 }
 0x5cb   : >> { %v3687_v28 = vadd.f32 %v3599_v59, %v18150_v11  ;;  %v4757_v22 = vadd.f32 %v4667_v51, %v4223_v52 }
 0x5cc   : >> { %v5204_v31 = vpop.f32.mrf.mxu0 }
 0x5cd   : >> { %v15755_v40 = vadd.f32 %v5201_v39, %v4757_v22  ;;  %v18156_v22 = vld [vmem:[#allocation16_spill] sm:$0xff] }
 0x5d0   : >> { %v4136_v46 = vpop.f32.mrf.mxu2 }
 0x5d1   : >> { %v4224_v56 = vadd.f32 %v4136_v46, %v3687_v28  ;;  %v4670_v8 = vpop.f32.mrf.mxu3  ;;  %v5357_v28 = vadd.f32 %v15642_v42, %v15747_v12 }
 0x5d2   : >> { %v3602_v38 = vpop.f32.mrf.mxu1 }
 0x5d3   : >> { %v3688_v58 = vadd.f32 %v3602_v38, %v18151_v57  ;;  %v4758_v17 = vadd.f32 %v4670_v8, %v4224_v56  ;;  %v5421_v8 = vmax.f32 %v5357_v28, 0.0 }
 0x5d4   : >> { %v5207_v23 = vpop.f32.mrf.mxu0 }
 0x5d5   : >> { %v15758_v48 = vadd.f32 %v5204_v31, %v4758_v17 }
 0x5d8   : >> { %v4139_v36 = vpop.f32.mrf.mxu2 }
 0x5d9   : >> { %v4225_v24 = vadd.f32 %v4139_v36, %v3688_v58  ;;  %v4673_v26 = vpop.f32.mrf.mxu3 }
 0x5da   : >> { %v3605_v34 = vpop.f32.mrf.mxu1 }
 0x5db   : >> { %v3689_v20 = vadd.f32 %v3605_v34, %v18152_v45  ;;  %v4759_v18 = vadd.f32 %v4673_v26, %v4225_v24  ;;  %v5358_v26 = vadd.f32 %v15642_v42, %v15752_v6  ;;  %v18157_v34 = vld [vmem:[#allocation18_spill] sm:$0xff]  ;;  %v5359_v6 = vadd.f32 %v15642_v42, %v15755_v40 }
 0x5dc   : >> { %v5210_v60 = vpop.f32.mrf.mxu0  ;;  %v5360_v40 = vadd.f32 %v15642_v42, %v15758_v48 }
 0x5dd   : >> { %v15761_v63 = vadd.f32 %v5207_v23, %v4759_v18 }
 0x5df   : >> { %v5361_v48 = vadd.f32 %v15642_v42, %v15761_v63 }
 0x5e0   : >> { %v4142_v33 = vpop.f32.mrf.mxu2 }
 0x5e1   : >> { %v4226_v1 = vadd.f32 %v4142_v33, %v3689_v20  ;;  %v4676_v43 = vpop.f32.mrf.mxu3 }
 0x5e2   : >> { %v3608_v37 = vpop.f32.mrf.mxu1 }
 0x5e3   : >> { %v3690_v7 = vadd.f32 %v3608_v37, %v18153_v3  ;;  %v4760_v54 = vadd.f32 %v4676_v43, %v4226_v1 }
 0x5e4   : >> { %v5213_v5 = vpop.f32.mrf.mxu0 }
 0x5e5   : >> { %v15764_v21 = vadd.f32 %v5210_v60, %v4760_v54  ;;  %v5422_v60 = vmax.f32 %v5358_v26, 0.0 }
 0x5e7   : >> { %v5362_v63 = vadd.f32 %v15642_v42, %v15764_v21 }
 0x5e8   : >> { %v4145_v15 = vpop.f32.mrf.mxu2 }
 0x5e9   : >> { %v4227_v4 = vadd.f32 %v4145_v15, %v3690_v7  ;;  %v4679_v13 = vpop.f32.mrf.mxu3 }
 0x5ea   : >> { %v3611_v10 = vpop.f32.mrf.mxu1 }
 0x5eb   : >> { %v4761_v55 = vadd.f32 %v4679_v13, %v4227_v4  ;;  %v3691_v16 = vadd.f32 %v3611_v10, %v18154_v44  ;;  %v18158_v10 = vld [vmem:[#allocation20_spill] sm:$0xff] }
 0x5ec   : >> { %v5216_v27 = vpop.f32.mrf.mxu0 }
 0x5ed   : >> { %v15766_v47 = vadd.f32 %v5213_v5, %v4761_v55 }
 0x5ef   : >> { %v5363_v21 = vadd.f32 %v15642_v42, %v15766_v47 }
 0x5f0   : >> { %v4148_v2 = vpop.f32.mrf.mxu2 }
 0x5f1   : >> { %v4228_v49 = vadd.f32 %v4148_v2, %v3691_v16  ;;  %v4682_v35 = vpop.f32.mrf.mxu3  ;;  %v5423_v16 = vmax.f32 %v5359_v6, 0.0 }
 0x5f2   : >> { %v3614_v9 = vpop.f32.mrf.mxu1 }
 0x5f3   : >> { %v4762_v0 = vadd.f32 %v4682_v35, %v4228_v49  ;;  %v3692_v30 = vadd.f32 %v3614_v9, %v18155_v53  ;;  %v18159_v53 = vld [vmem:[#allocation22_spill] sm:$0xff] }
 0x5f4   : >> { %v5219_v32 = vpop.f32.mrf.mxu0 }
 0x5f5   : >> { %v5296_v14 = vadd.f32 %v5216_v27, %v4762_v0 }
 0x5f7   : >> { %v5364_v50 = vadd.f32 %v15642_v42, %v5296_v14 }
 0x5f8   : >> { %v4151_v25 = vpop.f32.mrf.mxu2 }
 0x5f9   : >> { %v5428_v29 = vmax.f32 %v5364_v50, 0.0  ;;  %v4229_v39 = vadd.f32 %v4151_v25, %v3692_v30  ;;  %v4685_v19 = vpop.f32.mrf.mxu3 }
 0x5fa   : >> { %v3617_v52 = vpop.f32.mrf.mxu1 }
 0x5fb   : >> { %v5460_v51 = vmax.f32 %v5420_v61, %v5428_v29  ;;  %v4763_v59 = vadd.f32 %v4685_v19, %v4229_v39  ;;  %v3693_v31 = vadd.f32 %v3617_v52, %v18156_v22  ;;  %v5424_v61 = vmax.f32 %v5360_v40, 0.0 }
 0x5fc   : >> { %v5222_v11 = vpop.f32.mrf.mxu0 }
 0x5fd   : >> { %5492 = vst.msk [vmem:[#allocation4 + $0xc0] sm:$0xff] %vm330_vm0, %v5460_v51  ;;  %v5297_v41 = vadd.f32 %v5219_v32, %v4763_v59 }
 0x5ff   : >> { %v5365_v46 = vadd.f32 %v15642_v42, %v5297_v41 }
 0x600   : >> { %v4154_v56 = vpop.f32.mrf.mxu2 }
 0x601   : >> { %v5429_v38 = vmax.f32 %v5365_v46, 0.0  ;;  %v4230_v57 = vadd.f32 %v4154_v56, %v3693_v31  ;;  %v4688_v58 = vpop.f32.mrf.mxu3  ;;  %v18160_v31 = vld [vmem:[#allocation24_spill] sm:$0xff] }
 0x602   : >> { %v3620_v17 = vpop.f32.mrf.mxu1 }
 0x603   : >> { %v5461_v23 = vmax.f32 %v5421_v8, %v5429_v38  ;;  %v4764_v36 = vadd.f32 %v4688_v58, %v4230_v57  ;;  %v3694_v45 = vadd.f32 %v3620_v17, %v18157_v34  ;;  %v5425_v57 = vmax.f32 %v5361_v48, 0.0  ;;  %v18161_v34 = vld [vmem:[#allocation26_spill] sm:$0xff] }
 0x604   : >> { %v5225_v24 = vpop.f32.mrf.mxu0 }
 0x605   : >> { %5493 = vst.msk [vmem:[#allocation4 + $0xc8] sm:$0xff] %vm330_vm0, %v5461_v23  ;;  %v5298_v12 = vadd.f32 %v5222_v11, %v4764_v36 }
 0x607   : >> { %v5366_v20 = vadd.f32 %v15642_v42, %v5298_v12 }
 0x608   : >> { %v4157_v18 = vpop.f32.mrf.mxu2 }
 0x609   : >> { %v5430_v33 = vmax.f32 %v5366_v20, 0.0  ;;  %v4231_v1 = vadd.f32 %v4157_v18, %v3694_v45  ;;  %v4691_v43 = vpop.f32.mrf.mxu3 }
 0x60a   : >> { %v3623_v37 = vpop.f32.mrf.mxu1 }
 0x60b   : >> { %v5462_v3 = vmax.f32 %v5422_v60, %v5430_v33  ;;  %v4765_v7 = vadd.f32 %v4691_v43, %v4231_v1  ;;  %v3695_v55 = vadd.f32 %v3623_v37, %v18158_v10  ;;  %v5426_v60 = vmax.f32 %v5362_v63, 0.0 }
 0x60c   : >> { %v5524_v54 = vld [vmem:[#allocation4 + $0xc0] ss:$2 sm:$0xff]  ;;  %v5556_v5 = vld [vmem:[#allocation4 + $0xc1] ss:$2 sm:$0xff]  ;;  %v5228_v15 = vpop.f32.mrf.mxu0 }
 0x60d   : >> { %v5575_v4 = vmax.f32 %v5524_v54, %v5556_v5  ;;  %5494 = vst.msk [vmem:[#allocation4 + $0xd0] sm:$0xff] %vm330_vm0, %v5462_v3  ;;  %v5299_v13 = vadd.f32 %v5225_v24, %v4765_v7 }
 0x60f   : >> { %11907 = vst.msk [vmem:[%s15202_s29 + $0xc8] sm:$0xff] %vm330_vm0, %v5575_v4  ;;  %v5367_v27 = vadd.f32 %v15642_v42, %v5299_v13  ;;  %v5427_v13 = vmax.f32 %v5363_v21, 0.0 }
 0x610   : >> { %v4160_v44 = vpop.f32.mrf.mxu2 }
 0x611   : >> { %v5431_v2 = vmax.f32 %v5367_v27, 0.0  ;;  %v4232_v49 = vadd.f32 %v4160_v44, %v3695_v55  ;;  %v4694_v35 = vpop.f32.mrf.mxu3 }
 0x612   : >> { %v3626_v9 = vpop.f32.mrf.mxu1 }
 0x613   : >> { %v5463_v0 = vmax.f32 %v5423_v16, %v5431_v2  ;;  %v4766_v32 = vadd.f32 %v4694_v35, %v4232_v49  ;;  %v3696_v30 = vadd.f32 %v3626_v9, %v18159_v53 }
 0x614   : >> { %v5231_v14 = vpop.f32.mrf.mxu0 }
 0x615   : >> { %5495 = vst.msk [vmem:[#allocation4 + $0xd8] sm:$0xff] %vm330_vm0, %v5463_v0  ;;  %v5300_v62 = vadd.f32 %v5228_v15, %v4766_v32 }
 0x617   : >> { %v5368_v50 = vadd.f32 %v15642_v42, %v5300_v62 }
 0x618   : >> { %v4163_v25 = vpop.f32.mrf.mxu2 }
 0x619   : >> { %v5432_v29 = vmax.f32 %v5368_v50, 0.0  ;;  %v4233_v39 = vadd.f32 %v4163_v25, %v3696_v30  ;;  %v4697_v19 = vpop.f32.mrf.mxu3 }
 0x61a   : >> { %v3629_v52 = vpop.f32.mrf.mxu1 }
 0x61b   : >> { %v5464_v51 = vmax.f32 %v5424_v61, %v5432_v29  ;;  %v4767_v59 = vadd.f32 %v4697_v19, %v4233_v39  ;;  %v3697_v46 = vadd.f32 %v3629_v52, %v18160_v31 }
 0x61c   : >> { %v5526_v11 = vld [vmem:[#allocation4 + $0xd0] ss:$2 sm:$0xff]  ;;  %v5558_v28 = vld [vmem:[#allocation4 + $0xd1] ss:$2 sm:$0xff]  ;;  %v5234_v38 = vpop.f32.mrf.mxu0 }
 0x61d   : >> { %v5576_v41 = vmax.f32 %v5526_v11, %v5558_v28  ;;  %5496 = vst.msk [vmem:[#allocation4 + $0xe0] sm:$0xff] %vm330_vm0, %v5464_v51  ;;  %v5301_v22 = vadd.f32 %v5231_v14, %v4767_v59 }
 0x61f   : >> { %11908 = vst.msk [vmem:[%s15202_s29 + $0xd0] sm:$0xff] %vm330_vm0, %v5576_v41  ;;  %v5369_v56 = vadd.f32 %v15642_v42, %v5301_v22 }
 0x620   : >> { %v4166_v8 = vpop.f32.mrf.mxu2 }
 0x621   : >> { %v5433_v58 = vmax.f32 %v5369_v56, 0.0  ;;  %v4234_v17 = vadd.f32 %v4166_v8, %v3697_v46  ;;  %v4700_v23 = vpop.f32.mrf.mxu3 }
 0x622   : >> { %v3632_v26 = vpop.f32.mrf.mxu1 }
 0x623   : >> { %v5465_v36 = vmax.f32 %v5425_v57, %v5433_v58  ;;  %v4768_v24 = vadd.f32 %v4700_v23, %v4234_v17  ;;  %v3698_v45 = vadd.f32 %v3632_v26, %v18161_v34 }
 0x624   : >> { %v5237_v37 = vpop.f32.mrf.mxu0 }
 0x625   : >> { %5497 = vst.msk [vmem:[#allocation4 + $0xe8] sm:$0xff] %vm330_vm0, %v5465_v36  ;;  %v5302_v12 = vadd.f32 %v5234_v38, %v4768_v24 }
 0x627   : >> { %v5370_v20 = vadd.f32 %v15642_v42, %v5302_v12 }
 0x628   : >> { %v4169_v18 = vpop.f32.mrf.mxu2 }
 0x629   : >> { %v5434_v33 = vmax.f32 %v5370_v20, 0.0  ;;  %v4235_v1 = vadd.f32 %v4169_v18, %v3698_v45  ;;  %v4703_v43 = vpop.f32.mrf.mxu3 }
 0x62b   : >> { %v5466_v3 = vmax.f32 %v5426_v60, %v5434_v33  ;;  %v4769_v7 = vadd.f32 %v4703_v43, %v4235_v1 }
 0x62c   : >> { %v5528_v54 = vld [vmem:[#allocation4 + $0xe0] ss:$2 sm:$0xff]  ;;  %v5560_v5 = vld [vmem:[#allocation4 + $0xe1] ss:$2 sm:$0xff] }
 0x62d   : >> { %v5577_v15 = vmax.f32 %v5528_v54, %v5560_v5  ;;  %5498 = vst.msk [vmem:[#allocation4 + $0xf0] sm:$0xff] %vm330_vm0, %v5466_v3  ;;  %v5303_v6 = vadd.f32 %v5237_v37, %v4769_v7 }
 0x62f   : >> { %11909 = vst.msk [vmem:[%s15202_s29 + $0xd8] sm:$0xff] %vm330_vm0, %v5577_v15  ;;  %v5371_v4 = vadd.f32 %v15642_v42, %v5303_v6 }
 0x631   : >> { %v5435_v10 = vmax.f32 %v5371_v4, 0.0 }
 0x633   : >> { %v5467_v55 = vmax.f32 %v5427_v13, %v5435_v10 }
 0x635   : >> { %5499 = vst.msk [vmem:[#allocation4 + $0xf8] sm:$0xff] %vm330_vm0, %v5467_v55 }
 0x63b   : > { %614 = sbr.rel (!%p612_p11) target bundleno = 296 (0x128), region = 209 }
 0x63c   : >> { %v5530_v27 = vld [vmem:[#allocation4 + $0xf0] ss:$2 sm:$0xff]  ;;  %v5562_v44 = vld [vmem:[#allocation4 + $0xf1] ss:$2 sm:$0xff] }
 0x63d   : >> { %v5578_v16 = vmax.f32 %v5530_v27, %v5562_v44 }
 0x63f   : >> { %11910 = vst.msk [vmem:[%s15202_s29 + $0xe0] sm:$0xff] %vm330_vm0, %v5578_v16 }
 0x640 LB: >> { %v11913_v42 = vld [vmem:[%s17989_s3 + $0x8] sm:$0xff]  ;;  %v11978_v47 = vld [vmem:[%s17989_s3 + $0x10] sm:$0xff]  ;;  %v12045_v2 = vld [vmem:[%s17989_s3 + $0x18] sm:$0xff]  ;;  %s11912_s16 = smul.u32 384, %s12899_s17  ;;  %s12723_s14 = sshll.u32 %s12899_s17, 7  ;;  %s12899_s17 = sphi %s15819_s17, %s5604_s17  }
 0x641   : >> { %12727 = vmatpush.msra.mxu1 %v11913_v42  ;;  %12728 = vmatpush.msra.mxu2 %v11913_v42  ;;  %v5640_v49 = vld [vmem:[%s17989_s3] sm:$0xff]  ;;  %v12242_v41 = vld [vmem:[%s17989_s3 + $0x30] sm:$0xff]  ;;  %v12307_v22 = vld [vmem:[%s17989_s3 + $0x38] sm:$0xff]  ;;  %s16813_s26 = scalar_lea.vmem [#allocation3], %s12723_s14  ;;  %s5604_s17 = sadd.s32 1, %s12899_s17  }
 0x642   : >> { %12729 = vmatpush.msra.mxu3 %v11913_v42  ;;  %v12110_v35 = vld [vmem:[%s17989_s3 + $0x20] sm:$0xff]  ;;  %5786 = vmatpush.msra.mxu0 %v11913_v42  ;;  %s15840_s24 = scalar_lea.vmem [#allocation2], %s11912_s16  ;;  %v12175_v31 = vld [vmem:[%s17989_s3 + $0x28] sm:$0xff]  ;;  %p5601_p12 = scmp.ge.s32.totalorder %s5604_s17, 4  }
 0x643   : >> { %6238 = vmatpush.msrb.mxu2 %v11978_v47  ;;  %5995 = vmatpush.msrb.mxu1 %v5640_v49  ;;  %v12372_v57 = vld [vmem:[%s17989_s3 + $0x40] sm:$0xff]  ;;  %vm10680_vm6 = vcmask (%p5601_p12), 261120   ;;  %s12905_s14 = smov (%p5601_p12), 0  }
 0x644   : >> { %6516 = vmatpush.msrb.mxu3 %v12045_v2  ;;  %6791 = vmatpush.msrb.mxu0 %v12110_v35 }
 0x646   : >> { %v15843_v9 = vld [vmem:[%s15840_s24 + $0x68] sm:$0xff]  ;;  %v15860_v62 = vld [vmem:[%s15840_s24 + $0x70] sm:$0xff]  ;;  %v15877_v50 = vld [vmem:[%s15840_s24 + $0x78] sm:$0xff] }
 0x647   : >> { %v15846_v0 = vld [vmem:[%s15840_s24 + $0xc8] sm:$0xff]  ;;  %11922 = vmatmul.msk.f32.vlgmr.msra.gmra.mxu1 %vm330_vm0, %v15843_v9  ;;  %v15863_v14 = vld [vmem:[%s15840_s24 + $0xd0] sm:$0xff]  ;;  %v15880_v25 = vld [vmem:[%s15840_s24 + $0xd8] sm:$0xff] }
 0x648   : >> { %v15849_v32 = vld [vmem:[%s15840_s24 + $0x128] sm:$0xff]  ;;  %11930 = vmatmul.msk.f32.vlgmr.msra.gmra.mxu2 %vm330_vm0, %v15846_v0  ;;  %v15866_v53 = vld [vmem:[%s15840_s24 + $0x130] sm:$0xff]  ;;  %v15883_v61 = vld [vmem:[%s15840_s24 + $0x138] sm:$0xff]  ;;  %7066 = vmatpush.msra.mxu1 %v12175_v31 }
 0x649   : >> { %v5641_v40 = vld [vmem:[%s15840_s24 + $0x8] sm:$0xff]  ;;  %11938 = vmatmul.msk.f32.vlgmr.msra.gmra.mxu3 %vm330_vm0, %v15849_v32  ;;  %v5642_v30 = vld [vmem:[%s15840_s24 + $0x10] sm:$0xff]  ;;  %v5643_v29 = vld [vmem:[%s15840_s24 + $0x18] sm:$0xff]  ;;  %7344 = vmatpush.msra.mxu2 %v12242_v41 }
 0x64a   : >> { %11914 = vmatmul.msk.f32.vlgmr.msra.gmra.mxu0 %vm330_vm0, %v5641_v40  ;;  %v15894_v39 = vld [vmem:[%s15840_s24 + $0x80] sm:$0xff]  ;;  %v15911_v59 = vld [vmem:[%s15840_s24 + $0x98] sm:$0xff]  ;;  %7619 = vmatpush.msra.mxu3 %v12307_v22  ;;  %v15957_v58 = vld [vmem:[%s15840_s24 + $0xa8] sm:$0xff] }
 0x64b   : >> { %v15897_v19 = vld [vmem:[%s15840_s24 + $0xe0] sm:$0xff]  ;;  %v15914_v11 = vld [vmem:[%s15840_s24 + $0xf8] sm:$0xff]  ;;  %7894 = vmatpush.msra.mxu0 %v12372_v57  ;;  %v15960_v17 = vld [vmem:[%s15840_s24 + $0x108] sm:$0xff] }
 0x64c   : >> { %v15900_v52 = vld [vmem:[%s15840_s24 + $0x140] sm:$0xff]  ;;  %v15917_v28 = vld [vmem:[%s15840_s24 + $0x158] sm:$0xff]  ;;  %v15963_v23 = vld [vmem:[%s15840_s24 + $0x168] sm:$0xff] }
 0x64d   : >> { %v5644_v51 = vld [vmem:[%s15840_s24 + $0x20] sm:$0xff]  ;;  %v5645_v48 = vld [vmem:[%s15840_s24 + $0x38] sm:$0xff]  ;;  %v5647_v36 = vld [vmem:[%s15840_s24 + $0x48] sm:$0xff] }
 0x64e   : >> { %v15937_v46 = vld [vmem:[%s15840_s24 + $0xa0] sm:$0xff]  ;;  %v15974_v24 = vld [vmem:[%s15840_s24 + $0xb0] sm:$0xff] }
 0x64f   : >> { %11923 = vmatmul.msk.f32.gmra.mxu1 %vm330_vm0, %v15860_v62  ;;  %v15940_v56 = vld [vmem:[%s15840_s24 + $0x100] sm:$0xff]  ;;  %v15977_v26 = vld [vmem:[%s15840_s24 + $0x110] sm:$0xff] }
 0x650   : >> { %11931 = vmatmul.msk.f32.gmra.mxu2 %vm330_vm0, %v15863_v14  ;;  %v15943_v8 = vld [vmem:[%s15840_s24 + $0x160] sm:$0xff]  ;;  %v15980_v63 = vld [vmem:[%s15840_s24 + $0x170] sm:$0xff] }
 0x651   : >> { %11939 = vmatmul.msk.f32.gmra.mxu3 %vm330_vm0, %v15866_v53  ;;  %v5646_v38 = vld [vmem:[%s15840_s24 + $0x40] sm:$0xff]  ;;  %v5648_v12 = vld [vmem:[%s15840_s24 + $0x50] sm:$0xff] }
 0x652   : >> { %11915 = vmatmul.msk.f32.gmra.mxu0 %vm330_vm0, %v5642_v30  ;;  %v5608_v34 = vld [vmem:[%s15840_s24 + $0x7] sm:$0xff]  ;;  %v12013_v20 = vld [vmem:[%s15840_s24 + $0x37] sm:$0xff]  ;;  %v5609_v18 = vld [vmem:[%s15840_s24 + $0xf] sm:$0xff] }
 0x653   : >> { %v6093_v45 = vld [vmem:[%s15840_s24 + $0x9] sm:$0xff]  ;;  %v6094_v60 = vld [vmem:[%s15840_s24 + $0x11] sm:$0xff]  ;;  %v12014_v33 = vld [vmem:[%s15840_s24 + $0x3f] sm:$0xff] }
 0x654   : >> { %v5610_v1 = vld [vmem:[%s15840_s24 + $0x17] sm:$0xff]  ;;  %v12015_v37 = vld [vmem:[%s15840_s24 + $0x47] sm:$0xff]  ;;  %v5611_v3 = vld [vmem:[%s15840_s24 + $0x1f] sm:$0xff] }
 0x655   : >> { %v6095_v43 = vld [vmem:[%s15840_s24 + $0x19] sm:$0xff]  ;;  %v6096_v7 = vld [vmem:[%s15840_s24 + $0x21] sm:$0xff]  ;;  %v12016_v54 = vld [vmem:[%s15840_s24 + $0x4f] sm:$0xff] }
 0x656   : >> { %v16019_v5 = vld [vmem:[%s15840_s24 + $0x39] sm:$0xff]  ;;  %v16022_v21 = vld [vmem:[%s15840_s24 + $0x67] sm:$0xff]  ;;  %v16035_v6 = vld [vmem:[%s15840_s24 + $0x6f] sm:$0xff] }
 0x657   : >> { %11924 = vmatmul.msk.f32.gmra.mxu1 %vm330_vm0, %v15877_v50  ;;  %v16032_v15 = vld [vmem:[%s15840_s24 + $0x41] sm:$0xff]  ;;  %v16045_v4 = vld [vmem:[%s15840_s24 + $0x49] sm:$0xff]  ;;  %v16048_v13 = vld [vmem:[%s15840_s24 + $0x77] sm:$0xff] }
 0x658   : >> { %11932 = vmatmul.msk.f32.gmra.mxu2 %vm330_vm0, %v15880_v25  ;;  %v16058_v10 = vld [vmem:[%s15840_s24 + $0x51] sm:$0xff]  ;;  %v16061_v55 = vld [vmem:[%s15840_s24 + $0x7f] sm:$0xff]  ;;  %v16073_v44 = vld [vmem:[%s15840_s24 + $0x69] sm:$0xff] }
 0x659   : >> { %11940 = vmatmul.msk.f32.gmra.mxu3 %vm330_vm0, %v15883_v61  ;;  %v16076_v16 = vld [vmem:[%s15840_s24 + $0x97] sm:$0xff]  ;;  %v16098_v40 = vld [vmem:[%s15840_s24 + $0x9f] sm:$0xff]  ;;  %v16142_v57 = vld [vmem:[%s15840_s24 + $0xaf] sm:$0xff] }
 0x65a   : >> { %11916 = vmatmul.msk.f32.gmra.mxu0 %vm330_vm0, %v5643_v29  ;;  %v16095_v35 = vld [vmem:[%s15840_s24 + $0x71] sm:$0xff]  ;;  %18163 = vst [vmem:[#allocation43_spill] sm:$0xff] %v16098_v40 }
 0x65b   : >> { %18167 = vst [vmem:[#allocation47_spill] sm:$0xff] %v16142_v57 }
 0x65f   : >> { %11925 = vmatmul.msk.f32.gmra.mxu1 %vm330_vm0, %v15894_v39 }
 0x660   : >> { %11933 = vmatmul.msk.f32.gmra.mxu2 %vm330_vm0, %v15897_v19 }
 0x661   : >> { %11941 = vmatmul.msk.f32.gmra.mxu3 %vm330_vm0, %v15900_v52 }
 0x662   : >> { %11917 = vmatmul.msk.f32.gmra.mxu0 %vm330_vm0, %v5644_v51 }
 0x667   : >> { %11926 = vmatmul.msk.f32.gmra.mxu1 %vm330_vm0, %v15911_v59 }
 0x668   : >> { %11934 = vmatmul.msk.f32.gmra.mxu2 %vm330_vm0, %v15914_v11 }
 0x669   : >> { %11942 = vmatmul.msk.f32.gmra.mxu3 %vm330_vm0, %v15917_v28 }
 0x66a   : >> { %11918 = vmatmul.msk.f32.gmra.mxu0 %vm330_vm0, %v5645_v48 }
 0x66f   : >> { %11927 = vmatmul.msk.f32.gmra.mxu1 %vm330_vm0, %v15937_v46 }
 0x670   : >> { %11935 = vmatmul.msk.f32.gmra.mxu2 %vm330_vm0, %v15940_v56 }
 0x671   : >> { %11943 = vmatmul.msk.f32.gmra.mxu3 %vm330_vm0, %v15943_v8 }
 0x672   : >> { %11919 = vmatmul.msk.f32.gmra.mxu0 %vm330_vm0, %v5646_v38 }
 0x677   : >> { %11928 = vmatmul.msk.f32.gmra.mxu1 %vm330_vm0, %v15957_v58 }
 0x678   : >> { %11936 = vmatmul.msk.f32.gmra.mxu2 %vm330_vm0, %v15960_v17 }
 0x679   : >> { %11944 = vmatmul.msk.f32.gmra.mxu3 %vm330_vm0, %v15963_v23 }
 0x67a   : >> { %11920 = vmatmul.msk.f32.gmra.mxu0 %vm330_vm0, %v5647_v36 }
 0x67f   : >> { %11929 = vmatmul.msk.f32.gmra.mxu1 %vm330_vm0, %v15974_v24 }
 0x680   : >> { %11937 = vmatmul.msk.f32.gmra.mxu2 %vm330_vm0, %v15977_v26 }
 0x681   : >> { %11945 = vmatmul.msk.f32.gmra.mxu3 %vm330_vm0, %v15980_v63 }
 0x682   : >> { %11921 = vmatmul.msk.f32.gmra.mxu0 %vm330_vm0, %v5648_v12 }
 0x687   : >> { %11946 = vmatmul.msk.f32.vlgmr.msrb.gmra.mxu1 %vm330_vm0, %v5608_v34 }
 0x688   : >> { %11979 = vmatmul.msk.f32.vlgmr.msrb.gmra.mxu2 %vm330_vm0, %v6093_v45  ;;  %v16161_v45 = vld [vmem:[%s15840_s24 + $0x99] sm:$0xff] }
 0x689   : >> { %12046 = vmatmul.msk.f32.vlgmr.msrb.gmra.mxu3 %vm330_vm0, %v12013_v20  ;;  %18169 = vst [vmem:[#allocation49_spill] sm:$0xff] %v16161_v45 }
 0x68a   : >> { %12111 = vmatmul.msk.f32.vlgmr.msrb.gmra.mxu0 %vm330_vm0, %v5645_v48  ;;  %v16120_v48 = vld [vmem:[%s15840_s24 + $0xa7] sm:$0xff] }
 0x68b   : >> { %18165 = vst [vmem:[#allocation45_spill] sm:$0xff] %v16120_v48 }
 0x68f   : >> { %11947 = vmatmul.msk.f32.gmra.mxu1 %vm330_vm0, %v5609_v18 }
 0x690   : >> { %11980 = vmatmul.msk.f32.gmra.mxu2 %vm330_vm0, %v6094_v60 }
 0x691   : >> { %12047 = vmatmul.msk.f32.gmra.mxu3 %vm330_vm0, %v12014_v33 }
 0x692   : >> { %12112 = vmatmul.msk.f32.gmra.mxu0 %vm330_vm0, %v5646_v38  ;;  %v16139_v38 = vld [vmem:[%s15840_s24 + $0x81] sm:$0xff] }
 0x697   : >> { %11948 = vmatmul.msk.f32.gmra.mxu1 %vm330_vm0, %v5610_v1  ;;  %v16183_v1 = vld [vmem:[%s15840_s24 + $0xa1] sm:$0xff] }
 0x698   : >> { %11981 = vmatmul.msk.f32.gmra.mxu2 %vm330_vm0, %v6095_v43  ;;  %18173 = vst [vmem:[#allocation53_spill] sm:$0xff] %v16183_v1  ;;  %v16186_v43 = vld [vmem:[%s15840_s24 + $0xcf] sm:$0xff] }
 0x699   : >> { %12048 = vmatmul.msk.f32.gmra.mxu3 %vm330_vm0, %v12015_v37 }
 0x69a   : >> { %12113 = vmatmul.msk.f32.gmra.mxu0 %vm330_vm0, %v5647_v36 }
 0x69f   : >> { %11949 = vmatmul.msk.f32.gmra.mxu1 %vm330_vm0, %v5611_v3 }
 0x6a0   : >> { %11982 = vmatmul.msk.f32.gmra.mxu2 %vm330_vm0, %v6096_v7 }
 0x6a1   : >> { %12049 = vmatmul.msk.f32.gmra.mxu3 %vm330_vm0, %v12016_v54 }
 0x6a2   : >> { %12114 = vmatmul.msk.f32.gmra.mxu0 %vm330_vm0, %v5648_v12 }
 0x6a7   : >> { %11950 = vmatmul.msk.f32.gmra.mxu1 %vm330_vm0, %v12013_v20  ;;  %v16164_v20 = vld [vmem:[%s15840_s24 + $0xc7] sm:$0xff] }
 0x6a8   : >> { %11983 = vmatmul.msk.f32.gmra.mxu2 %vm330_vm0, %v16019_v5  ;;  %18170 = vst [vmem:[#allocation50_spill] sm:$0xff] %v16164_v20 }
 0x6a9   : >> { %12050 = vmatmul.msk.f32.gmra.mxu3 %vm330_vm0, %v16022_v21 }
 0x6aa   : >> { %12115 = vmatmul.msk.f32.gmra.mxu0 %vm330_vm0, %v15843_v9 }
 0x6af   : >> { %11951 = vmatmul.msk.f32.gmra.mxu1 %vm330_vm0, %v12014_v33 }
 0x6b0   : >> { %11984 = vmatmul.msk.f32.gmra.mxu2 %vm330_vm0, %v16032_v15 }
 0x6b1   : >> { %12051 = vmatmul.msk.f32.gmra.mxu3 %vm330_vm0, %v16035_v6 }
 0x6b2   : >> { %12116 = vmatmul.msk.f32.gmra.mxu0 %vm330_vm0, %v15860_v62 }
 0x6b7   : >> { %11952 = vmatmul.msk.f32.gmra.mxu1 %vm330_vm0, %v12015_v37 }
 0x6b8   : >> { %11985 = vmatmul.msk.f32.gmra.mxu2 %vm330_vm0, %v16045_v4 }
 0x6b9   : >> { %12052 = vmatmul.msk.f32.gmra.mxu3 %vm330_vm0, %v16048_v13 }
 0x6ba   : >> { %12117 = vmatmul.msk.f32.gmra.mxu0 %vm330_vm0, %v15877_v50 }
 0x6bf   : >> { %11953 = vmatmul.msk.f32.gmra.mxu1 %vm330_vm0, %v12016_v54  ;;  %v16205_v54 = vld [vmem:[%s15840_s24 + $0xa9] sm:$0xff] }
 0x6c0   : >> { %11986 = vmatmul.msk.f32.gmra.mxu2 %vm330_vm0, %v16058_v10  ;;  %18176 = vst [vmem:[#allocation56_spill] sm:$0xff] %v16205_v54 }
 0x6c1   : >> { %12053 = vmatmul.msk.f32.gmra.mxu3 %vm330_vm0, %v16061_v55 }
 0x6c2   : >> { %12118 = vmatmul.msk.f32.gmra.mxu0 %vm330_vm0, %v15894_v39 }
 0x6c4   : >> { %v16070_v27 = vpop.f32.mrf.mxu1 }
 0x6c7   : >> { %v16078_v42 = vpop.f32.mrf.mxu0  ;;  %11954 = vmatmul.msk.f32.gmra.mxu1 %vm330_vm0, %v16022_v21 }
 0x6c8   : >> { %11987 = vmatmul.msk.f32.gmra.mxu2 %vm330_vm0, %v16073_v44 }
 0x6c9   : >> { %12054 = vmatmul.msk.f32.gmra.mxu3 %vm330_vm0, %v16076_v16 }
 0x6ca   : >> { %12119 = vmatmul.msk.f32.gmra.mxu0 %vm330_vm0, %v15911_v59  ;;  %v16117_v59 = vld [vmem:[%s15840_s24 + $0x79] sm:$0xff] }
 0x6cb   : >> { %v16088_v47 = vpop.f32.mrf.mxu2 }
 0x6cc   : >> { %v16090_v2 = vpop.f32.mrf.mxu3  ;;  %v16092_v49 = vpop.f32.mrf.mxu1 }
 0x6cd   : >> { %18162 = vst [vmem:[#allocation42_spill] sm:$0xff] %v16090_v2  ;;  %v16230_v2 = vld [vmem:[%s15840_s24 + $0xdf] sm:$0xff] }
 0x6cf   : >> { %v16100_v30 = vpop.f32.mrf.mxu0  ;;  %11955 = vmatmul.msk.f32.gmra.mxu1 %vm330_vm0, %v16035_v6 }
 0x6d0   : >> { %11988 = vmatmul.msk.f32.gmra.mxu2 %vm330_vm0, %v16095_v35 }
 0x6d1   : >> { %12055 = vmatmul.msk.f32.gmra.mxu3 %vm330_vm0, %v16098_v40 }
 0x6d2   : >> { %12120 = vmatmul.msk.f32.gmra.mxu0 %vm330_vm0, %v15937_v46 }
 0x6d3   : >> { %v16110_v29 = vpop.f32.mrf.mxu2 }
 0x6d4   : >> { %v16112_v39 = vpop.f32.mrf.mxu3  ;;  %v16114_v51 = vpop.f32.mrf.mxu1 }
 0x6d5   : >> { %18164 = vst [vmem:[#allocation44_spill] sm:$0xff] %v16112_v39  ;;  %v16227_v39 = vld [vmem:[%s15840_s24 + $0xb1] sm:$0xff] }
 0x6d6   : >> { %18179 = vst [vmem:[#allocation59_spill] sm:$0xff] %v16227_v39 }
 0x6d7   : >> { %v16122_v41 = vpop.f32.mrf.mxu0  ;;  %11956 = vmatmul.msk.f32.gmra.mxu1 %vm330_vm0, %v16048_v13 }
 0x6d8   : >> { %11989 = vmatmul.msk.f32.gmra.mxu2 %vm330_vm0, %v16117_v59 }
 0x6d9   : >> { %12056 = vmatmul.msk.f32.gmra.mxu3 %vm330_vm0, %v16120_v48 }
 0x6da   : >> { %12121 = vmatmul.msk.f32.gmra.mxu0 %vm330_vm0, %v15957_v58 }
 0x6db   : >> { %v16132_v22 = vpop.f32.mrf.mxu2 }
 0x6dc   : >> { %v16134_v31 = vpop.f32.mrf.mxu3  ;;  %v16136_v46 = vpop.f32.mrf.mxu1 }
 0x6dd   : >> { %18166 = vst [vmem:[#allocation46_spill] sm:$0xff] %v16134_v31 }
 0x6df   : >> { %v16144_v36 = vpop.f32.mrf.mxu0  ;;  %11957 = vmatmul.msk.f32.gmra.mxu1 %vm330_vm0, %v16061_v55 }
 0x6e0   : >> { %11990 = vmatmul.msk.f32.gmra.mxu2 %vm330_vm0, %v16139_v38 }
 0x6e1   : >> { %12057 = vmatmul.msk.f32.gmra.mxu3 %vm330_vm0, %v16142_v57 }
 0x6e2   : >> { %12122 = vmatmul.msk.f32.gmra.mxu0 %vm330_vm0, %v15974_v24 }
 0x6e3   : >> { %v16154_v58 = vpop.f32.mrf.mxu2 }
 0x6e4   : >> { %v16156_v12 = vpop.f32.mrf.mxu3  ;;  %v16158_v34 = vpop.f32.mrf.mxu1 }
 0x6e5   : >> { %18168 = vst [vmem:[#allocation48_spill] sm:$0xff] %v16156_v12 }
 0x6e7   : >> { %v16166_v18 = vpop.f32.mrf.mxu0  ;;  %11958 = vmatmul.msk.f32.gmra.mxu1 %vm330_vm0, %v16076_v16 }
 0x6e8   : >> { %11991 = vmatmul.msk.f32.gmra.mxu2 %vm330_vm0, %v16161_v45 }
 0x6e9   : >> { %12058 = vmatmul.msk.f32.gmra.mxu3 %vm330_vm0, %v16164_v20 }
 0x6ea   : >> { %12123 = vmatmul.msk.f32.gmra.mxu0 %vm330_vm0, %v15846_v0 }
 0x6eb   : >> { %v16176_v24 = vpop.f32.mrf.mxu2 }
 0x6ec   : >> { %18171 = vst [vmem:[#allocation51_spill] sm:$0xff] %v16176_v24  ;;  %v16178_v60 = vpop.f32.mrf.mxu3  ;;  %v16180_v33 = vpop.f32.mrf.mxu1  ;;  %v16265_v24 = vld [vmem:[%s15840_s24 + $0xff] sm:$0xff] }
 0x6ed   : >> { %18172 = vst [vmem:[#allocation52_spill] sm:$0xff] %v16178_v60  ;;  %v16208_v60 = vld [vmem:[%s15840_s24 + $0xd7] sm:$0xff] }
 0x6ef   : >> { %v16188_v37 = vpop.f32.mrf.mxu0  ;;  %11959 = vmatmul.msk.f32.gmra.mxu1 %vm330_vm0, %v16098_v40  ;;  %v16262_v40 = vld [vmem:[%s15840_s24 + $0xd1] sm:$0xff] }
 0x6f0   : >> { %11992 = vmatmul.msk.f32.gmra.mxu2 %vm330_vm0, %v16183_v1 }
 0x6f1   : >> { %12059 = vmatmul.msk.f32.gmra.mxu3 %vm330_vm0, %v16186_v43 }
 0x6f2   : >> { %12124 = vmatmul.msk.f32.gmra.mxu0 %vm330_vm0, %v15863_v14 }
 0x6f3   : >> { %v16198_v0 = vpop.f32.mrf.mxu2 }
 0x6f4   : >> { %18174 = vst [vmem:[#allocation54_spill] sm:$0xff] %v16198_v0  ;;  %v16200_v3 = vpop.f32.mrf.mxu3  ;;  %v16202_v7 = vpop.f32.mrf.mxu1  ;;  %v16250_v0 = vld [vmem:[%s15840_s24 + $0xf7] sm:$0xff] }
 0x6f5   : >> { %18175 = vst [vmem:[#allocation55_spill] sm:$0xff] %v16200_v3 }
 0x6f7   : >> { %v16210_v12 = vpop.f32.mrf.mxu0  ;;  %11960 = vmatmul.msk.f32.gmra.mxu1 %vm330_vm0, %v16120_v48 }
 0x6f8   : >> { %11993 = vmatmul.msk.f32.gmra.mxu2 %vm330_vm0, %v16205_v54  ;;  %v16247_v54 = vld [vmem:[%s15840_s24 + $0xc9] sm:$0xff] }
 0x6f9   : >> { %12060 = vmatmul.msk.f32.gmra.mxu3 %vm330_vm0, %v16208_v60  ;;  %18182 = vst [vmem:[#allocation62_spill] sm:$0xff] %v16247_v54 }
 0x6fa   : >> { %12125 = vmatmul.msk.f32.gmra.mxu0 %vm330_vm0, %v15880_v25 }
 0x6fb   : >> { %v16220_v14 = vpop.f32.mrf.mxu2 }
 0x6fc   : >> { %18177 = vst [vmem:[#allocation57_spill] sm:$0xff] %v16220_v14  ;;  %v16222_v3 = vpop.f32.mrf.mxu3  ;;  %v16224_v31 = vpop.f32.mrf.mxu1 }
 0x6fd   : >> { %18178 = vst [vmem:[#allocation58_spill] sm:$0xff] %v16222_v3 }
 0x6ff   : >> { %v16232_v48 = vpop.f32.mrf.mxu0  ;;  %11961 = vmatmul.msk.f32.gmra.mxu1 %vm330_vm0, %v16142_v57 }
 0x700   : >> { %11994 = vmatmul.msk.f32.gmra.mxu2 %vm330_vm0, %v16227_v39 }
 0x701   : >> { %12061 = vmatmul.msk.f32.gmra.mxu3 %vm330_vm0, %v16230_v2 }
 0x702   : >> { %12126 = vmatmul.msk.f32.gmra.mxu0 %vm330_vm0, %v15897_v19 }
 0x703   : >> { %v16242_v25 = vpop.f32.mrf.mxu2 }
 0x704   : >> { %18180 = vst [vmem:[#allocation60_spill] sm:$0xff] %v16242_v25  ;;  %v16244_v3 = vpop.f32.mrf.mxu3  ;;  %v5997_v14 = vpop.f32.mrf.mxu1 }
 0x705   : >> { %18181 = vst [vmem:[#allocation61_spill] sm:$0xff] %v16244_v3  ;;  %v5998_v19 = vadd.f32 %v5997_v14, %v16078_v42 }
 0x707   : >> { %v6793_v57 = vpop.f32.mrf.mxu0  ;;  %11962 = vmatmul.msk.f32.gmra.mxu1 %vm330_vm0, %v16164_v20 }
 0x708   : >> { %11995 = vmatmul.msk.f32.gmra.mxu2 %vm330_vm0, %v16247_v54 }
 0x709   : >> { %12062 = vmatmul.msk.f32.gmra.mxu3 %vm330_vm0, %v16250_v0 }
 0x70a   : >> { %12127 = vmatmul.msk.f32.gmra.mxu0 %vm330_vm0, %v15914_v11 }
 0x70b   : >> { %v6240_v3 = vpop.f32.mrf.mxu2 }
 0x70c   : >> { %v6336_v25 = vadd.f32 %v6240_v3, %v5998_v19  ;;  %v6518_v39 = vpop.f32.mrf.mxu3  ;;  %v6000_v1 = vpop.f32.mrf.mxu1 }
 0x70d   : >> { %v6001_v11 = vadd.f32 %v6000_v1, %v16100_v30 }
 0x70e   : >> { %v6614_v20 = vadd.f32 %v6518_v39, %v6336_v25  ;;  %v16282_v25 = vld [vmem:[%s15840_s24 + $0x107] sm:$0xff] }
 0x70f   : >> { %v6796_v54 = vpop.f32.mrf.mxu0  ;;  %11963 = vmatmul.msk.f32.gmra.mxu1 %vm330_vm0, %v16186_v43 }
 0x710   : >> { %v16267_v45 = vadd.f32 %v6793_v57, %v6614_v20  ;;  %11996 = vmatmul.msk.f32.gmra.mxu2 %vm330_vm0, %v16262_v40  ;;  %v16279_v20 = vld [vmem:[%s15840_s24 + $0xd9] sm:$0xff] }
 0x711   : >> { %12063 = vmatmul.msk.f32.gmra.mxu3 %vm330_vm0, %v16265_v24 }
 0x712   : >> { %18183 = vst [vmem:[#allocation63_spill] sm:$0xff] %v16267_v45  ;;  %12128 = vmatmul.msk.f32.gmra.mxu0 %vm330_vm0, %v15940_v56 }
 0x713   : >> { %v6243_v42 = vpop.f32.mrf.mxu2 }
 0x714   : >> { %v6337_v39 = vadd.f32 %v6243_v42, %v6001_v11  ;;  %v6521_v3 = vpop.f32.mrf.mxu3  ;;  %v6003_v57 = vpop.f32.mrf.mxu1  ;;  %v16296_v42 = vld [vmem:[%s15840_s24 + $0xe1] sm:$0xff] }
 0x715   : >> { %v6004_v56 = vadd.f32 %v6003_v57, %v16122_v41 }
 0x716   : >> { %v6615_v14 = vadd.f32 %v6521_v3, %v6337_v39  ;;  %v16299_v3 = vld [vmem:[%s15840_s24 + $0x10f] sm:$0xff] }
 0x717   : >> { %v6799_v19 = vpop.f32.mrf.mxu0  ;;  %11964 = vmatmul.msk.f32.gmra.mxu1 %vm330_vm0, %v16208_v60 }
 0x718   : >> { %v16284_v45 = vadd.f32 %v6796_v54, %v6615_v14  ;;  %11997 = vmatmul.msk.f32.gmra.mxu2 %vm330_vm0, %v16279_v20 }
 0x719   : >> { %12064 = vmatmul.msk.f32.gmra.mxu3 %vm330_vm0, %v16282_v25 }
 0x71a   : >> { %18184 = vst [vmem:[#allocation64_spill] sm:$0xff] %v16284_v45  ;;  %12129 = vmatmul.msk.f32.gmra.mxu0 %vm330_vm0, %v15960_v17 }
 0x71b   : >> { %v6246_v30 = vpop.f32.mrf.mxu2 }
 0x71c   : >> { %v6338_v1 = vadd.f32 %v6246_v30, %v6004_v56  ;;  %v6524_v11 = vpop.f32.mrf.mxu3  ;;  %v6006_v54 = vpop.f32.mrf.mxu1  ;;  %v16313_v30 = vld [vmem:[%s15840_s24 + $0xf9] sm:$0xff] }
 0x71d   : >> { %v6007_v17 = vadd.f32 %v6006_v54, %v16144_v36 }
 0x71e   : >> { %v6616_v39 = vadd.f32 %v6524_v11, %v6338_v1  ;;  %v16316_v11 = vld [vmem:[%s15840_s24 + $0x127] sm:$0xff] }
 0x71f   : >> { %v6802_v14 = vpop.f32.mrf.mxu0  ;;  %11965 = vmatmul.msk.f32.gmra.mxu1 %vm330_vm0, %v16230_v2 }
 0x720   : >> { %v16301_v45 = vadd.f32 %v6799_v19, %v6616_v39  ;;  %11998 = vmatmul.msk.f32.gmra.mxu2 %vm330_vm0, %v16296_v42 }
 0x721   : >> { %12065 = vmatmul.msk.f32.gmra.mxu3 %vm330_vm0, %v16299_v3 }
 0x722   : >> { %18185 = vst [vmem:[#allocation65_spill] sm:$0xff] %v16301_v45  ;;  %12130 = vmatmul.msk.f32.gmra.mxu0 %vm330_vm0, %v15977_v26 }
 0x723   : >> { %v6249_v41 = vpop.f32.mrf.mxu2 }
 0x724   : >> { %v6339_v57 = vadd.f32 %v6249_v41, %v6007_v17  ;;  %v6527_v56 = vpop.f32.mrf.mxu3  ;;  %v6009_v19 = vpop.f32.mrf.mxu1  ;;  %v16330_v41 = vld [vmem:[%s15840_s24 + $0x101] sm:$0xff] }
 0x725   : >> { %v6010_v26 = vadd.f32 %v6009_v19, %v16166_v18 }
 0x726   : >> { %v6617_v1 = vadd.f32 %v6527_v56, %v6339_v57  ;;  %v16333_v56 = vld [vmem:[%s15840_s24 + $0x12f] sm:$0xff] }
 0x727   : >> { %v6805_v39 = vpop.f32.mrf.mxu0  ;;  %11966 = vmatmul.msk.f32.gmra.mxu1 %vm330_vm0, %v16250_v0 }
 0x728   : >> { %v16318_v45 = vadd.f32 %v6802_v14, %v6617_v1  ;;  %11999 = vmatmul.msk.f32.gmra.mxu2 %vm330_vm0, %v16313_v30 }
 0x729   : >> { %12066 = vmatmul.msk.f32.gmra.mxu3 %vm330_vm0, %v16316_v11 }
 0x72a   : >> { %18186 = vst [vmem:[#allocation66_spill] sm:$0xff] %v16318_v45  ;;  %12131 = vmatmul.msk.f32.gmra.mxu0 %vm330_vm0, %v15849_v32 }
 0x72b   : >> { %v6252_v36 = vpop.f32.mrf.mxu2 }
 0x72c   : >> { %v6340_v54 = vadd.f32 %v6252_v36, %v6010_v26  ;;  %v6530_v17 = vpop.f32.mrf.mxu3  ;;  %v6012_v14 = vpop.f32.mrf.mxu1  ;;  %v16347_v36 = vld [vmem:[%s15840_s24 + $0x109] sm:$0xff] }
 0x72d   : >> { %v6013_v32 = vadd.f32 %v6012_v14, %v16188_v37 }
 0x72e   : >> { %v6618_v57 = vadd.f32 %v6530_v17, %v6340_v54  ;;  %v16350_v17 = vld [vmem:[%s15840_s24 + $0x137] sm:$0xff] }
 0x72f   : >> { %v6808_v1 = vpop.f32.mrf.mxu0  ;;  %11967 = vmatmul.msk.f32.gmra.mxu1 %vm330_vm0, %v16265_v24 }
 0x730   : >> { %v16335_v45 = vadd.f32 %v6805_v39, %v6618_v57  ;;  %12000 = vmatmul.msk.f32.gmra.mxu2 %vm330_vm0, %v16330_v41 }
 0x731   : >> { %12067 = vmatmul.msk.f32.gmra.mxu3 %vm330_vm0, %v16333_v56 }
 0x732   : >> { %18187 = vst [vmem:[#allocation67_spill] sm:$0xff] %v16335_v45  ;;  %12132 = vmatmul.msk.f32.gmra.mxu0 %vm330_vm0, %v15866_v53 }
 0x733   : >> { %v6255_v18 = vpop.f32.mrf.mxu2 }
 0x734   : >> { %v6341_v19 = vadd.f32 %v6255_v18, %v6013_v32  ;;  %v6533_v26 = vpop.f32.mrf.mxu3  ;;  %v6015_v39 = vpop.f32.mrf.mxu1  ;;  %v16364_v18 = vld [vmem:[%s15840_s24 + $0x111] sm:$0xff] }
 0x735   : >> { %v6016_v53 = vadd.f32 %v6015_v39, %v16210_v12 }
 0x736   : >> { %v6619_v54 = vadd.f32 %v6533_v26, %v6341_v19  ;;  %v16367_v26 = vld [vmem:[%s15840_s24 + $0x13f] sm:$0xff] }
 0x737   : >> { %v6811_v57 = vpop.f32.mrf.mxu0  ;;  %11968 = vmatmul.msk.f32.gmra.mxu1 %vm330_vm0, %v16282_v25 }
 0x738   : >> { %v16352_v45 = vadd.f32 %v6808_v1, %v6619_v54  ;;  %12001 = vmatmul.msk.f32.gmra.mxu2 %vm330_vm0, %v16347_v36 }
 0x739   : >> { %12068 = vmatmul.msk.f32.gmra.mxu3 %vm330_vm0, %v16350_v17 }
 0x73a   : >> { %18188 = vst [vmem:[#allocation68_spill] sm:$0xff] %v16352_v45  ;;  %12133 = vmatmul.msk.f32.gmra.mxu0 %vm330_vm0, %v15883_v61 }
 0x73b   : >> { %v6258_v37 = vpop.f32.mrf.mxu2 }
 0x73c   : >> { %v6342_v14 = vadd.f32 %v6258_v37, %v6016_v53  ;;  %v6536_v32 = vpop.f32.mrf.mxu3  ;;  %v6018_v1 = vpop.f32.mrf.mxu1  ;;  %v16381_v37 = vld [vmem:[%s15840_s24 + $0x129] sm:$0xff] }
 0x73d   : >> { %v6019_v61 = vadd.f32 %v6018_v1, %v16232_v48 }
 0x73e   : >> { %v6620_v19 = vadd.f32 %v6536_v32, %v6342_v14  ;;  %v16384_v32 = vld [vmem:[%s15840_s24 + $0x157] sm:$0xff] }
 0x73f   : >> { %v6814_v54 = vpop.f32.mrf.mxu0  ;;  %11969 = vmatmul.msk.f32.gmra.mxu1 %vm330_vm0, %v16299_v3 }
 0x740   : >> { %v16369_v45 = vadd.f32 %v6811_v57, %v6620_v19  ;;  %12002 = vmatmul.msk.f32.gmra.mxu2 %vm330_vm0, %v16364_v18 }
 0x741   : >> { %12069 = vmatmul.msk.f32.gmra.mxu3 %vm330_vm0, %v16367_v26 }
 0x742   : >> { %18189 = vst [vmem:[#allocation69_spill] sm:$0xff] %v16369_v45  ;;  %12134 = vmatmul.msk.f32.gmra.mxu0 %vm330_vm0, %v15900_v52 }
 0x743   : >> { %v6261_v12 = vpop.f32.mrf.mxu2 }
 0x744   : >> { %v6343_v39 = vadd.f32 %v6261_v12, %v6019_v61  ;;  %v6539_v53 = vpop.f32.mrf.mxu3  ;;  %v6021_v57 = vpop.f32.mrf.mxu1  ;;  %v16398_v12 = vld [vmem:[%s15840_s24 + $0x131] sm:$0xff] }
 0x745   : >> { %v6022_v52 = vadd.f32 %v6021_v57, %v16070_v27 }
 0x746   : >> { %v6621_v14 = vadd.f32 %v6539_v53, %v6343_v39  ;;  %v16401_v53 = vld [vmem:[%s15840_s24 + $0x15f] sm:$0xff] }
 0x747   : >> { %v6817_v19 = vpop.f32.mrf.mxu0  ;;  %11970 = vmatmul.msk.f32.gmra.mxu1 %vm330_vm0, %v16316_v11 }
 0x748   : >> { %v16386_v45 = vadd.f32 %v6814_v54, %v6621_v14  ;;  %12003 = vmatmul.msk.f32.gmra.mxu2 %vm330_vm0, %v16381_v37 }
 0x749   : >> { %12070 = vmatmul.msk.f32.gmra.mxu3 %vm330_vm0, %v16384_v32 }
 0x74a   : >> { %18190 = vst [vmem:[#allocation70_spill] sm:$0xff] %v16386_v45  ;;  %12135 = vmatmul.msk.f32.gmra.mxu0 %vm330_vm0, %v15917_v28 }
 0x74b   : >> { %v6264_v48 = vpop.f32.mrf.mxu2 }
 0x74c   : >> { %v6344_v1 = vadd.f32 %v6264_v48, %v6022_v52  ;;  %v6542_v61 = vpop.f32.mrf.mxu3  ;;  %v6024_v54 = vpop.f32.mrf.mxu1  ;;  %v16415_v48 = vld [vmem:[%s15840_s24 + $0x139] sm:$0xff] }
 0x74d   : >> { %v6025_v28 = vadd.f32 %v6024_v54, %v16092_v49 }
 0x74e   : >> { %v6622_v39 = vadd.f32 %v6542_v61, %v6344_v1  ;;  %v16418_v61 = vld [vmem:[%s15840_s24 + $0x167] sm:$0xff] }
 0x74f   : >> { %v6820_v14 = vpop.f32.mrf.mxu0  ;;  %11971 = vmatmul.msk.f32.gmra.mxu1 %vm330_vm0, %v16333_v56 }
 0x750   : >> { %v16403_v45 = vadd.f32 %v6817_v19, %v6622_v39  ;;  %12004 = vmatmul.msk.f32.gmra.mxu2 %vm330_vm0, %v16398_v12 }
 0x751   : >> { %12071 = vmatmul.msk.f32.gmra.mxu3 %vm330_vm0, %v16401_v53 }
 0x752   : >> { %18191 = vst [vmem:[#allocation71_spill] sm:$0xff] %v16403_v45  ;;  %12136 = vmatmul.msk.f32.gmra.mxu0 %vm330_vm0, %v15943_v8 }
 0x753   : >> { %v6267_v27 = vpop.f32.mrf.mxu2 }
 0x754   : >> { %v6345_v57 = vadd.f32 %v6267_v27, %v6025_v28  ;;  %v6545_v52 = vpop.f32.mrf.mxu3  ;;  %v6027_v19 = vpop.f32.mrf.mxu1  ;;  %v16432_v27 = vld [vmem:[%s15840_s24 + $0x141] sm:$0xff] }
 0x755   : >> { %v6028_v8 = vadd.f32 %v6027_v19, %v16114_v51  ;;  %18193 = vst [vmem:[#allocation73_spill] sm:$0xff] %v16432_v27 }
 0x756   : >> { %v6623_v1 = vadd.f32 %v6545_v52, %v6345_v57  ;;  %v16435_v52 = vld [vmem:[%s15840_s24 + $0x16f] sm:$0xff] }
 0x757   : >> { %v6823_v39 = vpop.f32.mrf.mxu0  ;;  %11972 = vmatmul.msk.f32.gmra.mxu1 %vm330_vm0, %v16350_v17 }
 0x758   : >> { %v16420_v45 = vadd.f32 %v6820_v14, %v6623_v1  ;;  %12005 = vmatmul.msk.f32.gmra.mxu2 %vm330_vm0, %v16415_v48 }
 0x759   : >> { %12072 = vmatmul.msk.f32.gmra.mxu3 %vm330_vm0, %v16418_v61 }
 0x75a   : >> { %18192 = vst [vmem:[#allocation72_spill] sm:$0xff] %v16420_v45  ;;  %12137 = vmatmul.msk.f32.gmra.mxu0 %vm330_vm0, %v15963_v23 }
 0x75b   : >> { %v6270_v49 = vpop.f32.mrf.mxu2 }
 0x75c   : >> { %v6346_v54 = vadd.f32 %v6270_v49, %v6028_v8  ;;  %v6548_v28 = vpop.f32.mrf.mxu3  ;;  %v6030_v14 = vpop.f32.mrf.mxu1 }
 0x75d   : >> { %v6031_v23 = vadd.f32 %v6030_v14, %v16136_v46 }
 0x75e   : >> { %v6624_v57 = vadd.f32 %v6548_v28, %v6346_v54  ;;  %v16452_v28 = vld [vmem:[%s15840_s24 + $0x187] sm:$0xff] }
 0x75f   : >> { %v6826_v1 = vpop.f32.mrf.mxu0  ;;  %11973 = vmatmul.msk.f32.gmra.mxu1 %vm330_vm0, %v16367_v26  ;;  %18195 = vst [vmem:[#allocation75_spill] sm:$0xff] %v16452_v28 }
 0x760   : >> { %v16437_v45 = vadd.f32 %v6823_v39, %v6624_v57  ;;  %12006 = vmatmul.msk.f32.gmra.mxu2 %vm330_vm0, %v16432_v27  ;;  %v16449_v39 = vld [vmem:[%s15840_s24 + $0x159] sm:$0xff] }
 0x761   : >> { %12073 = vmatmul.msk.f32.gmra.mxu3 %vm330_vm0, %v16435_v52 }
 0x762   : >> { %18194 = vst [vmem:[#allocation74_spill] sm:$0xff] %v16437_v45  ;;  %12138 = vmatmul.msk.f32.gmra.mxu0 %vm330_vm0, %v15980_v63  ;;  %v16455_v45 = vld [vmem:[%s15840_s24 + $0x188] sm:$0xff] }
 0x763   : >> { %v6273_v51 = vpop.f32.mrf.mxu2  ;;  %18196 = vst [vmem:[#allocation76_spill] sm:$0xff] %v16455_v45 }
 0x764   : >> { %v6347_v19 = vadd.f32 %v6273_v51, %v6031_v23  ;;  %v6551_v8 = vpop.f32.mrf.mxu3  ;;  %v6033_v49 = vpop.f32.mrf.mxu1 }
 0x765   : >> { %v6034_v63 = vadd.f32 %v6033_v49, %v16158_v34 }
 0x766   : >> { %v6625_v54 = vadd.f32 %v6551_v8, %v6347_v19  ;;  %v16472_v8 = vld [vmem:[%s15840_s24 + $0x18f] sm:$0xff] }
 0x767   : >> { %v6829_v57 = vpop.f32.mrf.mxu0  ;;  %11974 = vmatmul.msk.f32.gmra.mxu1 %vm330_vm0, %v16384_v32  ;;  %18198 = vst [vmem:[#allocation78_spill] sm:$0xff] %v16472_v8 }
 0x768   : >> { %v16457_v27 = vadd.f32 %v6826_v1, %v6625_v54  ;;  %12007 = vmatmul.msk.f32.gmra.mxu2 %vm330_vm0, %v16449_v39  ;;  %v16469_v1 = vld [vmem:[%s15840_s24 + $0x161] sm:$0xff] }
 0x769   : >> { %12074 = vmatmul.msk.f32.gmra.mxu3 %vm330_vm0, %v16452_v28 }
 0x76a   : >> { %18197 = vst [vmem:[#allocation77_spill] sm:$0xff] %v16457_v27  ;;  %12139 = vmatmul.msk.f32.gmra.mxu0 %vm330_vm0, %v16455_v45  ;;  %v16475_v27 = vld [vmem:[%s15840_s24 + $0x190] sm:$0xff]  ;;  %v16495_v45 = vld [vmem:[%s15840_s24 + $0x198] sm:$0xff] }
 0x76b   : >> { %v6276_v46 = vpop.f32.mrf.mxu2  ;;  %18199 = vst [vmem:[#allocation79_spill] sm:$0xff] %v16475_v27 }
 0x76c   : >> { %v6348_v14 = vadd.f32 %v6276_v46, %v6034_v63  ;;  %v6554_v23 = vpop.f32.mrf.mxu3  ;;  %v6036_v51 = vpop.f32.mrf.mxu1 }
 0x76d   : >> { %v6037_v34 = vadd.f32 %v6036_v51, %v16180_v33 }
 0x76e   : >> { %v6626_v19 = vadd.f32 %v6554_v23, %v6348_v14 }
 0x76f   : >> { %v6832_v54 = vpop.f32.mrf.mxu0  ;;  %11975 = vmatmul.msk.f32.gmra.mxu1 %vm330_vm0, %v16401_v53 }
 0x770   : >> { %v16477_v28 = vadd.f32 %v6829_v57, %v6626_v19  ;;  %12008 = vmatmul.msk.f32.gmra.mxu2 %vm330_vm0, %v16469_v1  ;;  %v16489_v57 = vld [vmem:[%s15840_s24 + $0x169] sm:$0xff]  ;;  %v16492_v19 = vld [vmem:[%s15840_s24 + $0x197] sm:$0xff] }
 0x771   : >> { %12075 = vmatmul.msk.f32.gmra.mxu3 %vm330_vm0, %v16472_v8  ;;  %18201 = vst [vmem:[#allocation81_spill] sm:$0xff] %v16489_v57 }
 0x772   : >> { %18200 = vst [vmem:[#allocation80_spill] sm:$0xff] %v16477_v28  ;;  %12140 = vmatmul.msk.f32.gmra.mxu0 %vm330_vm0, %v16475_v27  ;;  %v16515_v27 = vld [vmem:[%s15840_s24 + $0x1a0] sm:$0xff] }
 0x773   : >> { %v6279_v49 = vpop.f32.mrf.mxu2 }
 0x774   : >> { %v6349_v63 = vadd.f32 %v6279_v49, %v6037_v34  ;;  %v6557_v46 = vpop.f32.mrf.mxu3  ;;  %v6039_v14 = vpop.f32.mrf.mxu1 }
 0x775   : >> { %v6040_v33 = vadd.f32 %v6039_v14, %v16202_v7 }
 0x776   : >> { %v6627_v23 = vadd.f32 %v6557_v46, %v6349_v63 }
 0x777   : >> { %v6835_v28 = vpop.f32.mrf.mxu0  ;;  %11976 = vmatmul.msk.f32.gmra.mxu1 %vm330_vm0, %v16418_v61 }
 0x778   : >> { %v16497_v8 = vadd.f32 %v6832_v54, %v6627_v23  ;;  %12009 = vmatmul.msk.f32.gmra.mxu2 %vm330_vm0, %v16489_v57  ;;  %v16509_v54 = vld [vmem:[%s15840_s24 + $0x171] sm:$0xff]  ;;  %v16512_v23 = vld [vmem:[%s15840_s24 + $0x19f] sm:$0xff] }
 0x779   : >> { %12076 = vmatmul.msk.f32.gmra.mxu3 %vm330_vm0, %v16492_v19 }
 0x77a   : >> { %18202 = vst [vmem:[#allocation82_spill] sm:$0xff] %v16497_v8  ;;  %12141 = vmatmul.msk.f32.gmra.mxu0 %vm330_vm0, %v16495_v45 }
 0x77b   : >> { %v6282_v51 = vpop.f32.mrf.mxu2 }
 0x77c   : >> { %v6350_v34 = vadd.f32 %v6282_v51, %v6040_v33  ;;  %v6560_v49 = vpop.f32.mrf.mxu3  ;;  %v6042_v63 = vpop.f32.mrf.mxu1 }
 0x77d   : >> { %v6043_v7 = vadd.f32 %v6042_v63, %v16224_v31 }
 0x77e   : >> { %v6628_v46 = vadd.f32 %v6560_v49, %v6350_v34 }
 0x77f   : >> { %v6838_v8 = vpop.f32.mrf.mxu0  ;;  %11977 = vmatmul.msk.f32.gmra.mxu1 %vm330_vm0, %v16435_v52 }
 0x780   : >> { %v16517_v57 = vadd.f32 %v6835_v28, %v6628_v46  ;;  %12010 = vmatmul.msk.f32.gmra.mxu2 %vm330_vm0, %v16509_v54 }
 0x781   : >> { %12077 = vmatmul.msk.f32.gmra.mxu3 %vm330_vm0, %v16512_v23 }
 0x782   : >> { %12142 = vmatmul.msk.f32.gmra.mxu0 %vm330_vm0, %v16515_v27 }
 0x783   : >> { %v6285_v14 = vpop.f32.mrf.mxu2 }
 0x784   : >> { %v6351_v33 = vadd.f32 %v6285_v14, %v6043_v7  ;;  %v6563_v51 = vpop.f32.mrf.mxu3  ;;  %v6045_v34 = vpop.f32.mrf.mxu1 }
 0x785   : >> { %v6046_v31 = vadd.f32 %v6045_v34, %v16088_v47 }
 0x786   : >> { %v6629_v28 = vadd.f32 %v6563_v51, %v6351_v33 }
 0x787   : >> { %v6841_v49 = vpop.f32.mrf.mxu0  ;;  %12176 = vmatmul.msk.f32.vlgmr.msra.gmra.mxu1 %vm330_vm0, %v16019_v5 }
 0x788   : >> { %v16528_v46 = vadd.f32 %v6838_v8, %v6629_v28  ;;  %12243 = vmatmul.msk.f32.vlgmr.msra.gmra.mxu2 %vm330_vm0, %v16022_v21 }
 0x789   : >> { %12308 = vmatmul.msk.f32.vlgmr.msra.gmra.mxu3 %vm330_vm0, %v15843_v9 }
 0x78a   : >> { %12373 = vmatmul.msk.f32.vlgmr.msra.gmra.mxu0 %vm330_vm0, %v16073_v44 }
 0x78b   : >> { %v6288_v63 = vpop.f32.mrf.mxu2 }
 0x78c   : >> { %v6352_v7 = vadd.f32 %v6288_v63, %v6046_v31  ;;  %v6566_v14 = vpop.f32.mrf.mxu3  ;;  %v6048_v33 = vpop.f32.mrf.mxu1 }
 0x78d   : >> { %v6049_v9 = vadd.f32 %v6048_v33, %v16110_v29  ;;  %v12278_v33 = vld [vmem:[%s15840_s24 + $0x80] sm:$0xff] }
 0x78e   : >> { %v6630_v8 = vadd.f32 %v6566_v14, %v6352_v7 }
 0x78f   : >> { %v6844_v51 = vpop.f32.mrf.mxu0  ;;  %12177 = vmatmul.msk.f32.gmra.mxu1 %vm330_vm0, %v16032_v15 }
 0x790   : >> { %v16539_v28 = vadd.f32 %v6841_v49, %v6630_v8  ;;  %12244 = vmatmul.msk.f32.gmra.mxu2 %vm330_vm0, %v16035_v6 }
 0x791   : >> { %12309 = vmatmul.msk.f32.gmra.mxu3 %vm330_vm0, %v15860_v62 }
 0x792   : >> { %12374 = vmatmul.msk.f32.gmra.mxu0 %vm330_vm0, %v16095_v35 }
 0x793   : >> { %v6291_v5 = vpop.f32.mrf.mxu2 }
 0x794   : >> { %v6353_v21 = vadd.f32 %v6291_v5, %v6049_v9  ;;  %v6569_v47 = vpop.f32.mrf.mxu3  ;;  %v6051_v34 = vpop.f32.mrf.mxu1 }
 0x795   : >> { %v6052_v62 = vadd.f32 %v6051_v34, %v16132_v22 }
 0x796   : >> { %v6631_v49 = vadd.f32 %v6569_v47, %v6353_v21  ;;  %v12279_v21 = vld [vmem:[%s15840_s24 + $0x98] sm:$0xff] }
 0x797   : >> { %v6847_v31 = vpop.f32.mrf.mxu0  ;;  %12178 = vmatmul.msk.f32.gmra.mxu1 %vm330_vm0, %v16045_v4 }
 0x798   : >> { %v16550_v63 = vadd.f32 %v6844_v51, %v6631_v49  ;;  %12245 = vmatmul.msk.f32.gmra.mxu2 %vm330_vm0, %v16048_v13 }
 0x799   : >> { %12310 = vmatmul.msk.f32.gmra.mxu3 %vm330_vm0, %v15877_v50 }
 0x79a   : >> { %12375 = vmatmul.msk.f32.gmra.mxu0 %vm330_vm0, %v16117_v59 }
 0x79b   : >> { %v6294_v15 = vpop.f32.mrf.mxu2 }
 0x79c   : >> { %v6354_v6 = vadd.f32 %v6294_v15, %v6052_v62  ;;  %v6572_v29 = vpop.f32.mrf.mxu3  ;;  %v6054_v7 = vpop.f32.mrf.mxu1 }
 0x79d   : >> { %v6055_v50 = vadd.f32 %v6054_v7, %v16154_v58 }
 0x79e   : >> { %v6632_v14 = vadd.f32 %v6572_v29, %v6354_v6  ;;  %v12280_v29 = vld [vmem:[%s15840_s24 + $0xa0] sm:$0xff] }
 0x79f   : >> { %v6850_v8 = vpop.f32.mrf.mxu0  ;;  %12179 = vmatmul.msk.f32.gmra.mxu1 %vm330_vm0, %v16058_v10  ;;  %v18203_v10 = vld [vmem:[#allocation49_spill] sm:$0xff] }
 0x7a0   : >> { %v16562_v4 = vadd.f32 %v6847_v31, %v6632_v14  ;;  %12246 = vmatmul.msk.f32.gmra.mxu2 %vm330_vm0, %v16061_v55  ;;  %v18204_v55 = vld [vmem:[#allocation51_spill] sm:$0xff] }
 0x7a1   : >> { %12311 = vmatmul.msk.f32.gmra.mxu3 %vm330_vm0, %v12278_v33  ;;  %v18207_v33 = vld [vmem:[#allocation54_spill] sm:$0xff] }
 0x7a2   : >> { %12376 = vmatmul.msk.f32.gmra.mxu0 %vm330_vm0, %v16139_v38 }
 0x7a3   : >> { %v6297_v13 = vpop.f32.mrf.mxu2 }
 0x7a4   : >> { %v6355_v22 = vadd.f32 %v6297_v13, %v6055_v50  ;;  %v6575_v51 = vpop.f32.mrf.mxu3  ;;  %v6057_v9 = vpop.f32.mrf.mxu1 }
 0x7a5   : >> { %v6058_v58 = vadd.f32 %v6057_v9, %v18204_v55  ;;  %v18209_v55 = vld [vmem:[#allocation56_spill] sm:$0xff] }
 0x7a6   : >> { %v6633_v5 = vadd.f32 %v6575_v51, %v6355_v22 }
 0x7a7   : >> { %v6853_v47 = vpop.f32.mrf.mxu0  ;;  %12180 = vmatmul.msk.f32.gmra.mxu1 %vm330_vm0, %v16073_v44  ;;  %v18205_v44 = vld [vmem:[#allocation43_spill] sm:$0xff] }
 0x7a8   : >> { %v16573_v34 = vadd.f32 %v6850_v8, %v6633_v5  ;;  %12247 = vmatmul.msk.f32.gmra.mxu2 %vm330_vm0, %v16076_v16  ;;  %v18206_v16 = vld [vmem:[#allocation53_spill] sm:$0xff] }
 0x7a9   : >> { %12312 = vmatmul.msk.f32.gmra.mxu3 %vm330_vm0, %v12279_v21  ;;  %v12281_v5 = vld [vmem:[%s15840_s24 + $0xa8] sm:$0xff] }
 0x7aa   : >> { %12377 = vmatmul.msk.f32.gmra.mxu0 %vm330_vm0, %v18203_v10 }
 0x7ab   : >> { %v6300_v49 = vpop.f32.mrf.mxu2 }
 0x7ac   : >> { %v6356_v31 = vadd.f32 %v6300_v49, %v6058_v58  ;;  %v6578_v62 = vpop.f32.mrf.mxu3  ;;  %v6060_v15 = vpop.f32.mrf.mxu1  ;;  %v18210_v58 = vld [vmem:[#allocation57_spill] sm:$0xff] }
 0x7ad   : >> { %v6061_v8 = vadd.f32 %v6060_v15, %v18207_v33 }
 0x7ae   : >> { %v6634_v6 = vadd.f32 %v6578_v62, %v6356_v31 }
 0x7af   : >> { %v6856_v7 = vpop.f32.mrf.mxu0  ;;  %12181 = vmatmul.msk.f32.gmra.mxu1 %vm330_vm0, %v16095_v35  ;;  %v18208_v35 = vld [vmem:[#allocation45_spill] sm:$0xff] }
 0x7b0   : >> { %v16584_v14 = vadd.f32 %v6853_v47, %v6634_v6  ;;  %12248 = vmatmul.msk.f32.gmra.mxu2 %vm330_vm0, %v18205_v44 }
 0x7b1   : >> { %12313 = vmatmul.msk.f32.gmra.mxu3 %vm330_vm0, %v12280_v29 }
 0x7b2   : >> { %12378 = vmatmul.msk.f32.gmra.mxu0 %vm330_vm0, %v18206_v16 }
 0x7b3   : >> { %v6303_v50 = vpop.f32.mrf.mxu2 }
 0x7b4   : >> { %v6357_v13 = vadd.f32 %v6303_v50, %v6061_v8  ;;  %v6581_v22 = vpop.f32.mrf.mxu3  ;;  %v6063_v51 = vpop.f32.mrf.mxu1  ;;  %v18212_v8 = vld [vmem:[#allocation59_spill] sm:$0xff]  ;;  %v18213_v50 = vld [vmem:[#allocation60_spill] sm:$0xff] }
 0x7b5   : >> { %v6064_v49 = vadd.f32 %v6063_v51, %v18210_v58 }
 0x7b6   : >> { %v6635_v9 = vadd.f32 %v6581_v22, %v6357_v13 }
 0x7b7   : >> { %v6859_v21 = vpop.f32.mrf.mxu0  ;;  %12182 = vmatmul.msk.f32.gmra.mxu1 %vm330_vm0, %v16117_v59  ;;  %v18211_v59 = vld [vmem:[#allocation47_spill] sm:$0xff] }
 0x7b8   : >> { %v16595_v47 = vadd.f32 %v6856_v7, %v6635_v9  ;;  %12249 = vmatmul.msk.f32.gmra.mxu2 %vm330_vm0, %v18208_v35  ;;  %v12282_v7 = vld [vmem:[%s15840_s24 + $0xb0] sm:$0xff]  ;;  %v12283_v35 = vld [vmem:[%s15840_s24 + $0xc8] sm:$0xff] }
 0x7b9   : >> { %12314 = vmatmul.msk.f32.gmra.mxu3 %vm330_vm0, %v12281_v5 }
 0x7ba   : >> { %12379 = vmatmul.msk.f32.gmra.mxu0 %vm330_vm0, %v18209_v55 }
 0x7bb   : >> { %v6306_v31 = vpop.f32.mrf.mxu2 }
 0x7bc   : >> { %v6358_v62 = vadd.f32 %v6306_v31, %v6064_v49  ;;  %v6584_v15 = vpop.f32.mrf.mxu3  ;;  %v6066_v6 = vpop.f32.mrf.mxu1  ;;  %v18215_v31 = vld [vmem:[#allocation62_spill] sm:$0xff] }
 0x7bd   : >> { %v6067_v13 = vadd.f32 %v6066_v6, %v18213_v50  ;;  %v12284_v50 = vld [vmem:[%s15840_s24 + $0xd0] sm:$0xff] }
 0x7be   : >> { %v6636_v29 = vadd.f32 %v6584_v15, %v6358_v62  ;;  %v18216_v62 = vld [vmem:[#allocation42_spill] sm:$0xff] }
 0x7bf   : >> { %v6862_v44 = vpop.f32.mrf.mxu0  ;;  %12183 = vmatmul.msk.f32.gmra.mxu1 %vm330_vm0, %v16139_v38  ;;  %v18214_v38 = vld [vmem:[#allocation50_spill] sm:$0xff] }
 0x7c0   : >> { %v16606_v33 = vadd.f32 %v6859_v21, %v6636_v29  ;;  %12250 = vmatmul.msk.f32.gmra.mxu2 %vm330_vm0, %v18211_v59 }
 0x7c1   : >> { %12315 = vmatmul.msk.f32.gmra.mxu3 %vm330_vm0, %v12282_v7 }
 0x7c2   : >> { %12380 = vmatmul.msk.f32.gmra.mxu0 %vm330_vm0, %v18212_v8 }
 0x7c3   : >> { %v6309_v22 = vpop.f32.mrf.mxu2 }
 0x7c4   : >> { %v6359_v51 = vadd.f32 %v6309_v22, %v6067_v13  ;;  %v6587_v9 = vpop.f32.mrf.mxu3  ;;  %v6069_v5 = vpop.f32.mrf.mxu1 }
 0x7c5   : >> { %v6070_v15 = vadd.f32 %v6069_v5, %v18216_v62 }
 0x7c6   : >> { %v6637_v21 = vadd.f32 %v6587_v9, %v6359_v51 }
 0x7c7   : >> { %v6865_v58 = vpop.f32.mrf.mxu0  ;;  %12184 = vmatmul.msk.f32.gmra.mxu1 %vm330_vm0, %v18203_v10  ;;  %v18217_v10 = vld [vmem:[#allocation44_spill] sm:$0xff] }
 0x7c8   : >> { %v16617_v49 = vadd.f32 %v6862_v44, %v6637_v21  ;;  %12251 = vmatmul.msk.f32.gmra.mxu2 %vm330_vm0, %v18214_v38  ;;  %v12285_v38 = vld [vmem:[%s15840_s24 + $0xd8] sm:$0xff] }
 0x7c9   : >> { %12316 = vmatmul.msk.f32.gmra.mxu3 %vm330_vm0, %v12283_v35 }
 0x7ca   : >> { %12381 = vmatmul.msk.f32.gmra.mxu0 %vm330_vm0, %v18215_v31 }
 0x7cb   : >> { %v6312_v6 = vpop.f32.mrf.mxu2 }
 0x7cc   : >> { %v6360_v29 = vadd.f32 %v6312_v6, %v6070_v15  ;;  %v6590_v7 = vpop.f32.mrf.mxu3  ;;  %v6072_v59 = vpop.f32.mrf.mxu1 }
 0x7cd   : >> { %v6073_v51 = vadd.f32 %v6072_v59, %v18217_v10 }
 0x7ce   : >> { %v6638_v44 = vadd.f32 %v6590_v7, %v6360_v29 }
 0x7cf   : >> { %v6868_v13 = vpop.f32.mrf.mxu0  ;;  %12185 = vmatmul.msk.f32.gmra.mxu1 %vm330_vm0, %v18206_v16 }
 0x7d0   : >> { %v16628_v22 = vadd.f32 %v6865_v58, %v6638_v44  ;;  %12252 = vmatmul.msk.f32.gmra.mxu2 %vm330_vm0, %v16186_v43  ;;  %v18218_v43 = vld [vmem:[#allocation46_spill] sm:$0xff] }
 0x7d1   : >> { %12317 = vmatmul.msk.f32.gmra.mxu3 %vm330_vm0, %v12284_v50  ;;  %v12286_v50 = vld [vmem:[%s15840_s24 + $0xe0] sm:$0xff] }
 0x7d2   : >> { %12382 = vmatmul.msk.f32.gmra.mxu0 %vm330_vm0, %v16262_v40 }
 0x7d3   : >> { %v6315_v9 = vpop.f32.mrf.mxu2 }
 0x7d4   : >> { %v6361_v5 = vadd.f32 %v6315_v9, %v6073_v51  ;;  %v6593_v21 = vpop.f32.mrf.mxu3  ;;  %v6075_v35 = vpop.f32.mrf.mxu1 }
 0x7d5   : >> { %v6076_v16 = vadd.f32 %v6075_v35, %v18218_v43 }
 0x7d6   : >> { %v6639_v58 = vadd.f32 %v6593_v21, %v6361_v5 }
 0x7d7   : >> { %v6871_v62 = vpop.f32.mrf.mxu0  ;;  %12186 = vmatmul.msk.f32.gmra.mxu1 %vm330_vm0, %v18209_v55 }
 0x7d8   : >> { %v16639_v15 = vadd.f32 %v6868_v13, %v6639_v58  ;;  %12253 = vmatmul.msk.f32.gmra.mxu2 %vm330_vm0, %v16208_v60  ;;  %v18219_v60 = vld [vmem:[#allocation48_spill] sm:$0xff] }
 0x7d9   : >> { %12318 = vmatmul.msk.f32.gmra.mxu3 %vm330_vm0, %v12285_v38  ;;  %v12287_v58 = vld [vmem:[%s15840_s24 + $0xf8] sm:$0xff] }
 0x7da   : >> { %12383 = vmatmul.msk.f32.gmra.mxu0 %vm330_vm0, %v16279_v20 }
 0x7db   : >> { %v6318_v6 = vpop.f32.mrf.mxu2 }
 0x7dc   : >> { %v6362_v29 = vadd.f32 %v6318_v6, %v6076_v16  ;;  %v6596_v7 = vpop.f32.mrf.mxu3  ;;  %v6078_v59 = vpop.f32.mrf.mxu1 }
 0x7dd   : >> { %v6079_v55 = vadd.f32 %v6078_v59, %v18219_v60  ;;  %v12288_v59 = vld [vmem:[%s15840_s24 + $0x100] sm:$0xff] }
 0x7de   : >> { %v6640_v44 = vadd.f32 %v6596_v7, %v6362_v29 }
 0x7df   : >> { %v6874_v13 = vpop.f32.mrf.mxu0  ;;  %12187 = vmatmul.msk.f32.gmra.mxu1 %vm330_vm0, %v18212_v8 }
 0x7e0   : >> { %v16650_v10 = vadd.f32 %v6871_v62, %v6640_v44  ;;  %12254 = vmatmul.msk.f32.gmra.mxu2 %vm330_vm0, %v16230_v2  ;;  %v18220_v2 = vld [vmem:[#allocation52_spill] sm:$0xff] }
 0x7e1   : >> { %12319 = vmatmul.msk.f32.gmra.mxu3 %vm330_vm0, %v12286_v50 }
 0x7e2   : >> { %12384 = vmatmul.msk.f32.gmra.mxu0 %vm330_vm0, %v16296_v42 }
 0x7e3   : >> { %v6321_v51 = vpop.f32.mrf.mxu2 }
 0x7e4   : >> { %v6363_v9 = vadd.f32 %v6321_v51, %v6079_v55  ;;  %v6599_v5 = vpop.f32.mrf.mxu3  ;;  %v6081_v21 = vpop.f32.mrf.mxu1 }
 0x7e5   : >> { %v6082_v8 = vadd.f32 %v6081_v21, %v18220_v2 }
 0x7e6   : >> { %v6641_v35 = vadd.f32 %v6599_v5, %v6363_v9  ;;  %v12289_v5 = vld [vmem:[%s15840_s24 + $0x108] sm:$0xff] }
 0x7e7   : >> { %v6877_v38 = vpop.f32.mrf.mxu0  ;;  %12188 = vmatmul.msk.f32.gmra.mxu1 %vm330_vm0, %v18215_v31 }
 0x7e8   : >> { %v16661_v62 = vadd.f32 %v6874_v13, %v6641_v35  ;;  %12255 = vmatmul.msk.f32.gmra.mxu2 %vm330_vm0, %v16250_v0  ;;  %v18221_v0 = vld [vmem:[#allocation55_spill] sm:$0xff] }
 0x7e9   : >> { %12320 = vmatmul.msk.f32.gmra.mxu3 %vm330_vm0, %v12287_v58 }
 0x7ea   : >> { %12385 = vmatmul.msk.f32.gmra.mxu0 %vm330_vm0, %v16313_v30 }
 0x7eb   : >> { %v6324_v43 = vpop.f32.mrf.mxu2 }
 0x7ec   : >> { %v6364_v16 = vadd.f32 %v6324_v43, %v6082_v8  ;;  %v6602_v6 = vpop.f32.mrf.mxu3  ;;  %v6084_v29 = vpop.f32.mrf.mxu1 }
 0x7ed   : >> { %v6085_v31 = vadd.f32 %v6084_v29, %v18221_v0 }
 0x7ee   : >> { %v6642_v7 = vadd.f32 %v6602_v6, %v6364_v16  ;;  %v12290_v16 = vld [vmem:[%s15840_s24 + $0x110] sm:$0xff] }
 0x7ef   : >> { %v6880_v44 = vpop.f32.mrf.mxu0  ;;  %12189 = vmatmul.msk.f32.gmra.mxu1 %vm330_vm0, %v16262_v40  ;;  %v18222_v40 = vld [vmem:[#allocation58_spill] sm:$0xff] }
 0x7f0   : >> { %v16672_v50 = vadd.f32 %v6877_v38, %v6642_v7  ;;  %12256 = vmatmul.msk.f32.gmra.mxu2 %vm330_vm0, %v16265_v24 }
 0x7f1   : >> { %12321 = vmatmul.msk.f32.gmra.mxu3 %vm330_vm0, %v12288_v59 }
 0x7f2   : >> { %12386 = vmatmul.msk.f32.gmra.mxu0 %vm330_vm0, %v16330_v41 }
 0x7f3   : >> { %v6327_v13 = vpop.f32.mrf.mxu2 }
 0x7f4   : >> { %v6365_v60 = vadd.f32 %v6327_v13, %v6085_v31  ;;  %v6605_v55 = vpop.f32.mrf.mxu3  ;;  %v6087_v51 = vpop.f32.mrf.mxu1  ;;  %v12291_v13 = vld [vmem:[%s15840_s24 + $0x128] sm:$0xff] }
 0x7f5   : >> { %v6088_v24 = vadd.f32 %v6087_v51, %v18222_v40  ;;  %v12293_v40 = vld [vmem:[%s15840_s24 + $0x138] sm:$0xff] }
 0x7f6   : >> { %v6643_v9 = vadd.f32 %v6605_v55, %v6365_v60 }
 0x7f7   : >> { %v6883_v21 = vpop.f32.mrf.mxu0  ;;  %12190 = vmatmul.msk.f32.gmra.mxu1 %vm330_vm0, %v16279_v20  ;;  %v18223_v20 = vld [vmem:[#allocation61_spill] sm:$0xff] }
 0x7f8   : >> { %v16683_v35 = vadd.f32 %v6880_v44, %v6643_v9  ;;  %12257 = vmatmul.msk.f32.gmra.mxu2 %vm330_vm0, %v16282_v25  ;;  %v12292_v9 = vld [vmem:[%s15840_s24 + $0x130] sm:$0xff] }
 0x7f9   : >> { %12322 = vmatmul.msk.f32.gmra.mxu3 %vm330_vm0, %v12289_v5 }
 0x7fa   : >> { %12387 = vmatmul.msk.f32.gmra.mxu0 %vm330_vm0, %v16347_v36 }
 0x7fb   : >> { %v6330_v58 = vpop.f32.mrf.mxu2 }
 0x7fc   : >> { %v6366_v38 = vadd.f32 %v6330_v58, %v6088_v24  ;;  %v6608_v2 = vpop.f32.mrf.mxu3  ;;  %v6090_v8 = vpop.f32.mrf.mxu1 }
 0x7fd   : >> { %v6091_v25 = vadd.f32 %v6090_v8, %v18223_v20 }
 0x7fe   : >> { %v6644_v43 = vadd.f32 %v6608_v2, %v6366_v38  ;;  %v12294_v38 = vld [vmem:[%s15840_s24 + $0x140] sm:$0xff] }
 0x7ff   : >> { %v6886_v6 = vpop.f32.mrf.mxu0  ;;  %12191 = vmatmul.msk.f32.gmra.mxu1 %vm330_vm0, %v16296_v42 }
 0x800   : >> { %v16694_v29 = vadd.f32 %v6883_v21, %v6644_v43  ;;  %12258 = vmatmul.msk.f32.gmra.mxu2 %vm330_vm0, %v16299_v3 }
 0x801   : >> { %12323 = vmatmul.msk.f32.gmra.mxu3 %vm330_vm0, %v12290_v16 }
 0x802   : >> { %12388 = vmatmul.msk.f32.gmra.mxu0 %vm330_vm0, %v16364_v18 }
 0x803   : >> { %v6333_v7 = vpop.f32.mrf.mxu2 }
 0x804   : >> { %v6367_v59 = vadd.f32 %v6333_v7, %v6091_v25  ;;  %v6611_v44 = vpop.f32.mrf.mxu3  ;;  %v7068_v0 = vpop.f32.mrf.mxu1  ;;  %v12295_v25 = vld [vmem:[%s15840_s24 + $0x158] sm:$0xff] }
 0x806   : >> { %v6645_v31 = vadd.f32 %v6611_v44, %v6367_v59  ;;  %v18227_v44 = vld [vmem:[#allocation67_spill] sm:$0xff] }
 0x807   : >> { %v7896_v60 = vpop.f32.mrf.mxu0  ;;  %12192 = vmatmul.msk.f32.gmra.mxu1 %vm330_vm0, %v16313_v30 }
 0x808   : >> { %v16705_v55 = vadd.f32 %v6886_v6, %v6645_v31  ;;  %12259 = vmatmul.msk.f32.gmra.mxu2 %vm330_vm0, %v16316_v11 }
 0x809   : >> { %12324 = vmatmul.msk.f32.gmra.mxu3 %vm330_vm0, %v12291_v13 }
 0x80a   : >> { %12389 = vmatmul.msk.f32.gmra.mxu0 %vm330_vm0, %v16381_v37 }
 0x80b   : >> { %v7346_v42 = vpop.f32.mrf.mxu2 }
 0x80c   : >> { %v7621_v3 = vpop.f32.mrf.mxu3  ;;  %v7071_v51 = vpop.f32.mrf.mxu1 }
 0x80f   : >> { %v7899_v5 = vpop.f32.mrf.mxu0  ;;  %12193 = vmatmul.msk.f32.gmra.mxu1 %vm330_vm0, %v16330_v41 }
 0x810   : >> { %12260 = vmatmul.msk.f32.gmra.mxu2 %vm330_vm0, %v16333_v56 }
 0x811   : >> { %12325 = vmatmul.msk.f32.gmra.mxu3 %vm330_vm0, %v12292_v9 }
 0x812   : >> { %12390 = vmatmul.msk.f32.gmra.mxu0 %vm330_vm0, %v16398_v12 }
 0x813   : >> { %v7349_v30 = vpop.f32.mrf.mxu2 }
 0x814   : >> { %v7624_v11 = vpop.f32.mrf.mxu3  ;;  %v7074_v21 = vpop.f32.mrf.mxu1 }
 0x817   : >> { %v16723_v24 = vpop.f32.mrf.mxu0  ;;  %12194 = vmatmul.msk.f32.gmra.mxu1 %vm330_vm0, %v16347_v36  ;;  %v18224_v36 = vld [vmem:[#allocation73_spill] sm:$0xff] }
 0x818   : >> { %12261 = vmatmul.msk.f32.gmra.mxu2 %vm330_vm0, %v16350_v17  ;;  %v18225_v17 = vld [vmem:[#allocation63_spill] sm:$0xff] }
 0x819   : >> { %12326 = vmatmul.msk.f32.gmra.mxu3 %vm330_vm0, %v12293_v40  ;;  %v7164_v8 = vadd.f32 %v7068_v0, %v18225_v17 }
 0x81a   : >> { %12391 = vmatmul.msk.f32.gmra.mxu0 %vm330_vm0, %v16415_v48 }
 0x81b   : >> { %v7352_v41 = vpop.f32.mrf.mxu2  ;;  %v7442_v16 = vadd.f32 %v7346_v42, %v7164_v8 }
 0x81c   : >> { %v7627_v56 = vpop.f32.mrf.mxu3  ;;  %v7077_v58 = vpop.f32.mrf.mxu1 }
 0x81d   : >> { %v7717_v59 = vadd.f32 %v7621_v3, %v7442_v16  ;;  %v16758_v3 = vld [vmem:[%s17990_s4] ss:$0 sm:$0xff] }
 0x81f   : >> { %v16733_v2 = vpop.f32.mrf.mxu0  ;;  %12195 = vmatmul.msk.f32.gmra.mxu1 %vm330_vm0, %v16364_v18  ;;  %v18226_v18 = vld [vmem:[#allocation64_spill] sm:$0xff]  ;;  %v7992_v42 = vadd.f32 %v7896_v60, %v7717_v59  ;;  %v18228_v60 = vld [vmem:[#allocation65_spill] sm:$0xff] }
 0x820   : >> { %12262 = vmatmul.msk.f32.gmra.mxu2 %vm330_vm0, %v16367_v26  ;;  %v7165_v26 = vadd.f32 %v7071_v51, %v18226_v18  ;;  %v12296_v51 = vld [vmem:[%s15840_s24 + $0x160] sm:$0xff] }
 0x821   : >> { %12327 = vmatmul.msk.f32.gmra.mxu3 %vm330_vm0, %v12294_v38  ;;  %v8028_v8 = vadd.f32 %v16758_v3, %v7992_v42  ;;  %v12297_v42 = vld [vmem:[%s15840_s24 + $0x168] sm:$0xff] }
 0x822   : >> { %12392 = vmatmul.msk.f32.gmra.mxu0 %vm330_vm0, %v18224_v36  ;;  %v7443_v31 = vadd.f32 %v7349_v30, %v7165_v26  ;;  %v7166_v30 = vadd.f32 %v7074_v21, %v18228_v60 }
 0x823   : >> { %v7355_v43 = vpop.f32.mrf.mxu2  ;;  %v8060_v18 = vmax.f32 %v8028_v8, 0.0 }
 0x824   : >> { %v16743_v6 = vpop.f32.mrf.mxu3  ;;  %v7080_v20 = vpop.f32.mrf.mxu1  ;;  %v7718_v17 = vadd.f32 %v7624_v11, %v7443_v31  ;;  %v7444_v26 = vadd.f32 %v7352_v41, %v7166_v30  ;;  %v18231_v41 = vld [vmem:[#allocation66_spill] sm:$0xff] }
 0x825   : >> { %v7168_v0 = vadd.f32 %v7080_v20, %v18227_v44  ;;  %v18229_v20 = vld [vmem:[#allocation68_spill] sm:$0xff] }
 0x826   : >> { %v7993_v59 = vadd.f32 %v7899_v5, %v7718_v17  ;;  %v18230_v5 = vld [vmem:[#allocation81_spill] sm:$0xff] }
 0x827   : >> { %v7908_v7 = vpop.f32.mrf.mxu0  ;;  %12196 = vmatmul.msk.f32.gmra.mxu1 %vm330_vm0, %v16381_v37 }
 0x828   : >> { %12263 = vmatmul.msk.f32.gmra.mxu2 %vm330_vm0, %v16384_v32 }
 0x829   : >> { %12328 = vmatmul.msk.f32.gmra.mxu3 %vm330_vm0, %v12295_v25 }
 0x82a   : >> { %12393 = vmatmul.msk.f32.gmra.mxu0 %vm330_vm0, %v16449_v39 }
 0x82b   : >> { %v7358_v13 = vpop.f32.mrf.mxu2 }
 0x82c   : >> { %v7446_v37 = vadd.f32 %v7358_v13, %v7168_v0  ;;  %v7633_v9 = vpop.f32.mrf.mxu3  ;;  %v7083_v32 = vpop.f32.mrf.mxu1 }
 0x82d   : >> { %v7169_v25 = vadd.f32 %v7083_v32, %v18229_v20  ;;  %v7167_v32 = vadd.f32 %v7077_v58, %v18231_v41 }
 0x82e   : >> { %v7721_v40 = vadd.f32 %v7633_v9, %v7446_v37  ;;  %v8029_v9 = vadd.f32 %v16758_v3, %v7993_v59  ;;  %v12298_v59 = vld [vmem:[%s15840_s24 + $0x170] sm:$0xff] }
 0x82f   : >> { %v7911_v38 = vpop.f32.mrf.mxu0  ;;  %12197 = vmatmul.msk.f32.gmra.mxu1 %vm330_vm0, %v16398_v12 }
 0x830   : >> { %v7996_v16 = vadd.f32 %v7908_v7, %v7721_v40  ;;  %12264 = vmatmul.msk.f32.gmra.mxu2 %vm330_vm0, %v16401_v53  ;;  %v7719_v40 = vadd.f32 %v7627_v56, %v7444_v26  ;;  %v8061_v8 = vmax.f32 %v8029_v9, 0.0  ;;  %v12364_v9 = vld [vmem:[%s15840_s24 + $0x189] sm:$0xff] }
 0x831   : >> { %12329 = vmatmul.msk.f32.gmra.mxu3 %vm330_vm0, %v12296_v51  ;;  %v18232_v51 = vld [vmem:[#allocation69_spill] sm:$0xff] }
 0x832   : >> { %12394 = vmatmul.msk.f32.gmra.mxu0 %vm330_vm0, %v16469_v1  ;;  %v8032_v11 = vadd.f32 %v16758_v3, %v7996_v16  ;;  %v7994_v16 = vadd.f32 %v16723_v24, %v7719_v40  ;;  %v18233_v24 = vld [vmem:[#allocation70_spill] sm:$0xff] }
 0x833   : >> { %v7361_v7 = vpop.f32.mrf.mxu2 }
 0x834   : >> { %v8064_v12 = vmax.f32 %v8032_v11, 0.0  ;;  %v7447_v44 = vadd.f32 %v7361_v7, %v7169_v25  ;;  %v7636_v0 = vpop.f32.mrf.mxu3  ;;  %v7086_v53 = vpop.f32.mrf.mxu1  ;;  %v8030_v58 = vadd.f32 %v16758_v3, %v7994_v16 }
 0x835   : >> { %v7170_v17 = vadd.f32 %v7086_v53, %v18232_v51 }
 0x836   : >> { %v8092_v31 = vmax.f32 %v8060_v18, %v8064_v12  ;;  %v7722_v13 = vadd.f32 %v7636_v0, %v7447_v44  ;;  %v8062_v44 = vmax.f32 %v8030_v58, 0.0 }
 0x837   : >> { %v7914_v37 = vpop.f32.mrf.mxu0  ;;  %12198 = vmatmul.msk.f32.gmra.mxu1 %vm330_vm0, %v16415_v48  ;;  %v7445_v48 = vadd.f32 %v7355_v43, %v7167_v32 }
 0x838   : >> { %8108 = vst.msk [vmem:[#allocation4] sm:$0xff] %vm536_vm2, %v8092_v31  ;;  %v7997_v21 = vadd.f32 %v7911_v38, %v7722_v13  ;;  %12265 = vmatmul.msk.f32.gmra.mxu2 %vm330_vm0, %v16418_v61 }
 0x839   : >> { %12330 = vmatmul.msk.f32.gmra.mxu3 %vm330_vm0, %v12297_v42  ;;  %v7720_v18 = vadd.f32 %v16743_v6, %v7445_v48 }
 0x83a   : >> { %12395 = vmatmul.msk.f32.gmra.mxu0 %vm330_vm0, %v18230_v5  ;;  %v8033_v56 = vadd.f32 %v16758_v3, %v7997_v21 }
 0x83b   : >> { %v7364_v38 = vpop.f32.mrf.mxu2  ;;  %v7995_v0 = vadd.f32 %v16733_v2, %v7720_v18  ;;  %v18234_v2 = vld [vmem:[#allocation75_spill] sm:$0xff] }
 0x83c   : >> { %v8065_v60 = vmax.f32 %v8033_v56, 0.0  ;;  %v7448_v30 = vadd.f32 %v7364_v38, %v7170_v17  ;;  %v7639_v61 = vpop.f32.mrf.mxu3  ;;  %v7089_v20 = vpop.f32.mrf.mxu1  ;;  %v18235_v17 = vld [vmem:[#allocation76_spill] sm:$0xff] }
 0x83d   : >> { %v7171_v43 = vadd.f32 %v7089_v20, %v18233_v24  ;;  %v8031_v41 = vadd.f32 %v16758_v3, %v7995_v0  ;;  %v18236_v20 = vld [vmem:[#allocation78_spill] sm:$0xff]  ;;  %v16832_v18 = vld [vmem:[%s15840_s24 + $0x199] sm:$0xff] }
 0x83e   : >> { %v8093_v25 = vmax.f32 %v8061_v8, %v8065_v60  ;;  %v7723_v11 = vadd.f32 %v7639_v61, %v7448_v30  ;;  %v12365_v61 = vld [vmem:[%s15840_s24 + $0x191] sm:$0xff] }
 0x83f   : >> { %v7917_v7 = vpop.f32.mrf.mxu0  ;;  %12199 = vmatmul.msk.f32.gmra.mxu1 %vm330_vm0, %v18224_v36  ;;  %v8063_v38 = vmax.f32 %v8031_v41, 0.0 }
 0x840   : >> { %8109 = vst.msk [vmem:[#allocation4 + $0x8] sm:$0xff] %vm536_vm2, %v8093_v25  ;;  %v7998_v26 = vadd.f32 %v7914_v37, %v7723_v11  ;;  %12266 = vmatmul.msk.f32.gmra.mxu2 %vm330_vm0, %v16435_v52  ;;  %v18237_v25 = vld [vmem:[#allocation79_spill] sm:$0xff] }
 0x841   : >> { %12331 = vmatmul.msk.f32.gmra.mxu3 %vm330_vm0, %v12298_v59 }
 0x842   : >> { %12396 = vmatmul.msk.f32.gmra.mxu0 %vm330_vm0, %v16509_v54  ;;  %v8034_v12 = vadd.f32 %v16758_v3, %v7998_v26 }
 0x843   : >> { %v7367_v6 = vpop.f32.mrf.mxu2 }
 0x844   : >> { %v8066_v53 = vmax.f32 %v8034_v12, 0.0  ;;  %v7449_v36 = vadd.f32 %v7367_v6, %v7171_v43  ;;  %v7642_v31 = vpop.f32.mrf.mxu3  ;;  %v7092_v13 = vpop.f32.mrf.mxu1 }
 0x846   : >> { %v8094_v52 = vmax.f32 %v8062_v44, %v8066_v53  ;;  %v7724_v42 = vadd.f32 %v7642_v31, %v7449_v36 }
 0x847   : >> { %v16801_v37 = vpop.f32.mrf.mxu0  ;;  %v8124_v40 = vld [vmem:[#allocation4] ss:$2 sm:$0xff]  ;;  %v8140_v21 = vld [vmem:[#allocation4 + $0x1] ss:$2 sm:$0xff]  ;;  %12200 = vmatmul.msk.f32.gmra.mxu1 %vm330_vm0, %v16449_v39 }
 0x848   : >> { %v8155_v32 = vmax.f32 %v8124_v40, %v8140_v21  ;;  %8110 = vst.msk [vmem:[#allocation4 + $0x10] sm:$0xff] %vm536_vm2, %v8094_v52  ;;  %v7999_v51 = vadd.f32 %v7917_v7, %v7724_v42  ;;  %12267 = vmatmul.msk.f32.gmra.mxu2 %vm330_vm0, %v18234_v2  ;;  %v12238_v52 = vld [vmem:[%s15840_s24 + $0x1b7] sm:$0xff] }
 0x849   : >> { %12332 = vmatmul.msk.f32.gmra.mxu3 %vm330_vm0, %v18235_v17  ;;  %v12303_v42 = vld [vmem:[%s15840_s24 + $0x1b8] sm:$0xff] }
 0x84a   : >> { %12397 = vmatmul.msk.f32.gmra.mxu0 %vm330_vm0, %v12364_v9  ;;  %12407 = vst.msk [vmem:[%s16813_s26 + $0x28] sm:$0xff] %vm536_vm2, %v8155_v32  ;;  %v8035_v56 = vadd.f32 %v16758_v3, %v7999_v51  ;;  %v12368_v40 = vld [vmem:[%s15840_s24 + $0x1b9] sm:$0xff] }
 0x84b   : >> { %v7370_v8 = vpop.f32.mrf.mxu2  ;;  %v18240_v21 = vld [vmem:[#allocation80_spill] sm:$0xff] }
 0x84c   : >> { %v8067_v16 = vmax.f32 %v8035_v56, 0.0  ;;  %v7645_v39 = vpop.f32.mrf.mxu3  ;;  %v7095_v48 = vpop.f32.mrf.mxu1 }
 0x84e   : >> { %v8095_v60 = vmax.f32 %v8063_v38, %v8067_v16  ;;  %v12239_v38 = vld [vmem:[%s15840_s24 + $0x1bf] sm:$0xff] }
 0x84f   : >> { %v16818_v30 = vpop.f32.mrf.mxu0  ;;  %12201 = vmatmul.msk.f32.gmra.mxu1 %vm330_vm0, %v16469_v1  ;;  %v12304_v16 = vld [vmem:[%s15840_s24 + $0x1c0] sm:$0xff] }
 0x850   : >> { %8111 = vst.msk [vmem:[#allocation4 + $0x18] sm:$0xff] %vm536_vm2, %v8095_v60  ;;  %12268 = vmatmul.msk.f32.gmra.mxu2 %vm330_vm0, %v18236_v20  ;;  %v12369_v60 = vld [vmem:[%s15840_s24 + $0x1c1] sm:$0xff] }
 0x851   : >> { %12333 = vmatmul.msk.f32.gmra.mxu3 %vm330_vm0, %v18237_v25 }
 0x852   : >> { %12398 = vmatmul.msk.f32.gmra.mxu0 %vm330_vm0, %v12365_v61 }
 0x853   : >> { %v7373_v11 = vpop.f32.mrf.mxu2 }
 0x854   : >> { %v7648_v59 = vpop.f32.mrf.mxu3  ;;  %v7098_v7 = vpop.f32.mrf.mxu1 }
 0x857   : >> { %v16829_v58 = vpop.f32.mrf.mxu0  ;;  %v8126_v26 = vld [vmem:[#allocation4 + $0x10] ss:$2 sm:$0xff]  ;;  %v8142_v24 = vld [vmem:[#allocation4 + $0x11] ss:$2 sm:$0xff]  ;;  %12202 = vmatmul.msk.f32.gmra.mxu1 %vm330_vm0, %v18230_v5  ;;  %v16849_v5 = vld [vmem:[%s15840_s24 + $0x1a1] sm:$0xff] }
 0x858   : >> { %v8156_v1 = vmax.f32 %v8126_v26, %v8142_v24  ;;  %12269 = vmatmul.msk.f32.gmra.mxu2 %vm330_vm0, %v16492_v19  ;;  %v18242_v26 = vld [vmem:[#allocation82_spill] sm:$0xff] }
 0x859   : >> { %12334 = vmatmul.msk.f32.gmra.mxu3 %vm330_vm0, %v16495_v45  ;;  %v18238_v45 = vld [vmem:[#allocation71_spill] sm:$0xff] }
 0x85a   : >> { %12399 = vmatmul.msk.f32.gmra.mxu0 %vm330_vm0, %v16832_v18  ;;  %12408 = vst.msk [vmem:[%s16813_s26 + $0x30] sm:$0xff] %vm536_vm2, %v8156_v1  ;;  %v7172_v19 = vadd.f32 %v7092_v13, %v18238_v45 }
 0x85b   : >> { %v7376_v43 = vpop.f32.mrf.mxu2 }
 0x85c   : >> { %v7651_v12 = vpop.f32.mrf.mxu3  ;;  %v16844_v6 = vpop.f32.mrf.mxu1  ;;  %v7450_v53 = vadd.f32 %v7370_v8, %v7172_v19 }
 0x85f   : >> { %v16846_v44 = vpop.f32.mrf.mxu0  ;;  %12203 = vmatmul.msk.f32.gmra.mxu1 %vm330_vm0, %v16509_v54 }
 0x860   : >> { %12270 = vmatmul.msk.f32.gmra.mxu2 %vm330_vm0, %v16512_v23  ;;  %v7725_v23 = vadd.f32 %v7645_v39, %v7450_v53 }
 0x861   : >> { %12335 = vmatmul.msk.f32.gmra.mxu3 %vm330_vm0, %v16515_v27  ;;  %v18239_v27 = vld [vmem:[#allocation72_spill] sm:$0xff] }
 0x862   : >> { %12400 = vmatmul.msk.f32.gmra.mxu0 %vm330_vm0, %v16849_v5  ;;  %v7173_v13 = vadd.f32 %v7095_v48, %v18239_v27  ;;  %v8000_v2 = vadd.f32 %v16801_v37, %v7725_v23  ;;  %v18241_v37 = vld [vmem:[#allocation74_spill] sm:$0xff] }
 0x863   : >> { %v16860_v0 = vpop.f32.mrf.mxu2  ;;  %v12305_v27 = vld [vmem:[%s15840_s24 + $0x1c8] sm:$0xff] }
 0x864   : >> { %v16862_v36 = vpop.f32.mrf.mxu3  ;;  %v7104_v31 = vpop.f32.mrf.mxu1  ;;  %v7451_v32 = vadd.f32 %v7373_v11, %v7173_v13  ;;  %v8036_v48 = vadd.f32 %v16758_v3, %v8000_v2  ;;  %v7174_v11 = vadd.f32 %v7098_v7, %v18241_v37  ;;  %v12370_v7 = vld [vmem:[%s15840_s24 + $0x1c9] sm:$0xff] }
 0x865   : >> { %v7176_v41 = vadd.f32 %v7104_v31, %v18240_v21 }
 0x866   : >> { %v7726_v20 = vadd.f32 %v7648_v59, %v7451_v32  ;;  %v8068_v19 = vmax.f32 %v8036_v48, 0.0  ;;  %v7452_v53 = vadd.f32 %v7376_v43, %v7174_v11  ;;  %v12306_v48 = vld [vmem:[%s15840_s24 + $0x1d0] sm:$0xff] }
 0x867   : >> { %v7932_v54 = vpop.f32.mrf.mxu0  ;;  %12204 = vmatmul.msk.f32.gmra.mxu1 %vm330_vm0, %v12364_v9 }
 0x868   : >> { %12271 = vmatmul.msk.f32.gmra.mxu2 %vm330_vm0, %v12238_v52  ;;  %v8001_v1 = vadd.f32 %v16818_v30, %v7726_v20  ;;  %v18243_v30 = vld [vmem:[#allocation77_spill] sm:$0xff] }
 0x869   : >> { %12336 = vmatmul.msk.f32.gmra.mxu3 %vm330_vm0, %v12303_v42  ;;  %v7175_v43 = vadd.f32 %v16844_v6, %v18243_v30 }
 0x86a   : >> { %12401 = vmatmul.msk.f32.gmra.mxu0 %vm330_vm0, %v12368_v40  ;;  %v8037_v21 = vadd.f32 %v16758_v3, %v8001_v1 }
 0x86b   : >> { %v7382_v51 = vpop.f32.mrf.mxu2 }
 0x86c   : >> { %v7454_v17 = vadd.f32 %v7382_v51, %v7176_v41  ;;  %v7657_v56 = vpop.f32.mrf.mxu3  ;;  %v7107_v8 = vpop.f32.mrf.mxu1  ;;  %v7727_v41 = vadd.f32 %v7651_v12, %v7452_v53  ;;  %v8069_v2 = vmax.f32 %v8037_v21, 0.0 }
 0x86d   : >> { %v7177_v24 = vadd.f32 %v7107_v8, %v18242_v26 }
 0x86e   : >> { %v7729_v9 = vadd.f32 %v7657_v56, %v7454_v17  ;;  %v8002_v56 = vadd.f32 %v16829_v58, %v7727_v41 }
 0x86f   : >> { %v7935_v39 = vpop.f32.mrf.mxu0  ;;  %12205 = vmatmul.msk.f32.gmra.mxu1 %vm330_vm0, %v12365_v61 }
 0x870   : >> { %v8004_v25 = vadd.f32 %v7932_v54, %v7729_v9  ;;  %12272 = vmatmul.msk.f32.gmra.mxu2 %vm330_vm0, %v12239_v38  ;;  %v12240_v54 = vld [vmem:[%s15840_s24 + $0x1c7] sm:$0xff] }
 0x871   : >> { %12337 = vmatmul.msk.f32.gmra.mxu3 %vm330_vm0, %v12304_v16 }
 0x872   : >> { %12402 = vmatmul.msk.f32.gmra.mxu0 %vm330_vm0, %v12369_v60  ;;  %v8040_v59 = vadd.f32 %v16758_v3, %v8004_v25  ;;  %v12371_v25 = vld [vmem:[%s15840_s24 + $0x1d1] sm:$0xff] }
 0x873   : >> { %v7385_v45 = vpop.f32.mrf.mxu2 }
 0x874   : >> { %v8072_v61 = vmax.f32 %v8040_v59, 0.0  ;;  %v7455_v31 = vadd.f32 %v7385_v45, %v7177_v24  ;;  %v7660_v52 = vpop.f32.mrf.mxu3  ;;  %v7110_v42 = vpop.f32.mrf.mxu1 }
 0x875   : >> { %v7178_v12 = vadd.f32 %v7110_v42, %v16517_v57  ;;  %v8038_v57 = vadd.f32 %v16758_v3, %v8002_v56 }
 0x876   : >> { %v8096_v40 = vmax.f32 %v8068_v19, %v8072_v61  ;;  %v7730_v23 = vadd.f32 %v7660_v52, %v7455_v31 }
 0x877   : >> { %v7938_v13 = vpop.f32.mrf.mxu0  ;;  %12206 = vmatmul.msk.f32.gmra.mxu1 %vm330_vm0, %v16832_v18  ;;  %v7453_v18 = vadd.f32 %v16860_v0, %v7175_v43  ;;  %v8070_v24 = vmax.f32 %v8038_v57, 0.0 }
 0x878   : >> { %8112 = vst.msk [vmem:[#allocation4 + $0x20] sm:$0xff] %vm536_vm2, %v8096_v40  ;;  %v8005_v32 = vadd.f32 %v7935_v39, %v7730_v23  ;;  %12273 = vmatmul.msk.f32.gmra.mxu2 %vm330_vm0, %v12240_v54  ;;  %v12241_v39 = vld [vmem:[%s15840_s24 + $0x1cf] sm:$0xff] }
 0x879   : >> { %12338 = vmatmul.msk.f32.gmra.mxu3 %vm330_vm0, %v12305_v27  ;;  %v7728_v37 = vadd.f32 %v16862_v36, %v7453_v18 }
 0x87a   : >> { %12403 = vmatmul.msk.f32.gmra.mxu0 %vm330_vm0, %v12370_v7  ;;  %v8041_v51 = vadd.f32 %v16758_v3, %v8005_v32 }
 0x87b   : >> { %v7388_v17 = vpop.f32.mrf.mxu2  ;;  %v8003_v36 = vadd.f32 %v16846_v44, %v7728_v37 }
 0x87c   : >> { %v8073_v8 = vmax.f32 %v8041_v51, 0.0  ;;  %v7456_v38 = vadd.f32 %v7388_v17, %v7178_v12  ;;  %v7663_v9 = vpop.f32.mrf.mxu3  ;;  %v7113_v16 = vpop.f32.mrf.mxu1 }
 0x87d   : >> { %v7179_v58 = vadd.f32 %v7113_v16, %v16528_v46  ;;  %v8039_v42 = vadd.f32 %v16758_v3, %v8003_v36 }
 0x87e   : >> { %v8097_v60 = vmax.f32 %v8069_v2, %v8073_v8  ;;  %v7731_v20 = vadd.f32 %v7663_v9, %v7456_v38 }
 0x87f   : >> { %v7941_v6 = vpop.f32.mrf.mxu0  ;;  %12207 = vmatmul.msk.f32.gmra.mxu1 %vm330_vm0, %v16849_v5  ;;  %v8071_v23 = vmax.f32 %v8039_v42, 0.0 }
 0x880   : >> { %8113 = vst.msk [vmem:[#allocation4 + $0x28] sm:$0xff] %vm536_vm2, %v8097_v60  ;;  %v8006_v11 = vadd.f32 %v7938_v13, %v7731_v20  ;;  %12274 = vmatmul.msk.f32.gmra.mxu2 %vm330_vm0, %v12241_v39 }
 0x881   : >> { %12339 = vmatmul.msk.f32.gmra.mxu3 %vm330_vm0, %v12306_v48 }
 0x882   : >> { %12404 = vmatmul.msk.f32.gmra.mxu0 %vm330_vm0, %v12371_v25  ;;  %v8042_v0 = vadd.f32 %v16758_v3, %v8006_v11 }
 0x883   : >> { %v7391_v26 = vpop.f32.mrf.mxu2 }
 0x884   : >> { %v8074_v59 = vmax.f32 %v8042_v0, 0.0  ;;  %v7457_v1 = vadd.f32 %v7391_v26, %v7179_v58  ;;  %v7666_v45 = vpop.f32.mrf.mxu3  ;;  %v7116_v19 = vpop.f32.mrf.mxu1 }
 0x885   : >> { %v7180_v9 = vadd.f32 %v7116_v19, %v16539_v28 }
 0x886   : >> { %v8098_v5 = vmax.f32 %v8070_v24, %v8074_v59  ;;  %v7732_v53 = vadd.f32 %v7666_v45, %v7457_v1 }
 0x887   : >> { %v7944_v61 = vpop.f32.mrf.mxu0  ;;  %v8128_v31 = vld [vmem:[#allocation4 + $0x20] ss:$2 sm:$0xff]  ;;  %v8144_v52 = vld [vmem:[#allocation4 + $0x21] ss:$2 sm:$0xff] }
 0x888   : >> { %v8157_v54 = vmax.f32 %v8128_v31, %v8144_v52  ;;  %8114 = vst.msk [vmem:[#allocation4 + $0x30] sm:$0xff] %vm536_vm2, %v8098_v5  ;;  %v8007_v46 = vadd.f32 %v7941_v6, %v7732_v53 }
 0x88a   : >> { %12409 = vst.msk [vmem:[%s16813_s26 + $0x48] sm:$0xff] %vm536_vm2, %v8157_v54  ;;  %v8043_v40 = vadd.f32 %v16758_v3, %v8007_v46 }
 0x88b   : >> { %v7394_v44 = vpop.f32.mrf.mxu2 }
 0x88c   : >> { %v8075_v27 = vmax.f32 %v8043_v40, 0.0  ;;  %v7669_v13 = vpop.f32.mrf.mxu3  ;;  %v7119_v7 = vpop.f32.mrf.mxu1  ;;  %v7458_v39 = vadd.f32 %v7394_v44, %v7180_v9 }
 0x88d   : >> { %v7181_v25 = vadd.f32 %v7119_v7, %v16550_v63 }
 0x88e   : >> { %v8099_v21 = vmax.f32 %v8071_v23, %v8075_v27  ;;  %v7733_v6 = vadd.f32 %v7669_v13, %v7458_v39 }
 0x88f   : >> { %v7947_v41 = vpop.f32.mrf.mxu0 }
 0x890   : >> { %8115 = vst.msk [vmem:[#allocation4 + $0x38] sm:$0xff] %vm536_vm2, %v8099_v21  ;;  %v8008_v58 = vadd.f32 %v7944_v61, %v7733_v6 }
 0x892   : >> { %v8044_v28 = vadd.f32 %v16758_v3, %v8008_v58 }
 0x893   : >> { %v7397_v32 = vpop.f32.mrf.mxu2 }
 0x894   : >> { %v7672_v30 = vpop.f32.mrf.mxu3  ;;  %v7122_v43 = vpop.f32.mrf.mxu1  ;;  %v7459_v37 = vadd.f32 %v7397_v32, %v7181_v25  ;;  %v8076_v31 = vmax.f32 %v8044_v28, 0.0 }
 0x895   : >> { %v7182_v19 = vadd.f32 %v7122_v43, %v16562_v4 }
 0x896   : >> { %v7734_v1 = vadd.f32 %v7672_v30, %v7459_v37 }
 0x897   : >> { %v7950_v12 = vpop.f32.mrf.mxu0  ;;  %v8130_v51 = vld [vmem:[#allocation4 + $0x30] ss:$2 sm:$0xff]  ;;  %v8146_v2 = vld [vmem:[#allocation4 + $0x31] ss:$2 sm:$0xff] }
 0x898   : >> { %v8158_v17 = vmax.f32 %v8130_v51, %v8146_v2  ;;  %v8009_v53 = vadd.f32 %v7947_v41, %v7734_v1 }
 0x89a   : >> { %12410 = vst.msk [vmem:[%s16813_s26 + $0x50] sm:$0xff] %vm536_vm2, %v8158_v17  ;;  %v8045_v27 = vadd.f32 %v16758_v3, %v8009_v53 }
 0x89b   : >> { %v7400_v56 = vpop.f32.mrf.mxu2 }
 0x89c   : >> { %v7675_v18 = vpop.f32.mrf.mxu3  ;;  %v7125_v8 = vpop.f32.mrf.mxu1  ;;  %v7460_v52 = vadd.f32 %v7400_v56, %v7182_v19  ;;  %v8077_v41 = vmax.f32 %v8045_v27, 0.0 }
 0x89e   : >> { %v7735_v13 = vadd.f32 %v7675_v18, %v7460_v52 }
 0x89f   : >> { %v7953_v38 = vpop.f32.mrf.mxu0 }
 0x8a0   : >> { %v8010_v30 = vadd.f32 %v7950_v12, %v7735_v13 }
 0x8a3   : >> { %v7403_v16 = vpop.f32.mrf.mxu2 }
 0x8a4   : >> { %v7678_v60 = vpop.f32.mrf.mxu3  ;;  %v7128_v20 = vpop.f32.mrf.mxu1 }
 0x8a5   : >> { %v7184_v57 = vadd.f32 %v7128_v20, %v16584_v14  ;;  %v8046_v20 = vadd.f32 %v16758_v3, %v8010_v30 }
 0x8a7   : >> { %v7956_v48 = vpop.f32.mrf.mxu0  ;;  %v8078_v12 = vmax.f32 %v8046_v20, 0.0 }
 0x8ab   : >> { %v7406_v11 = vpop.f32.mrf.mxu2 }
 0x8ac   : >> { %v7462_v0 = vadd.f32 %v7406_v11, %v7184_v57  ;;  %v7681_v26 = vpop.f32.mrf.mxu3  ;;  %v7131_v24 = vpop.f32.mrf.mxu1 }
 0x8ad   : >> { %v7185_v5 = vadd.f32 %v7131_v24, %v16595_v47  ;;  %v7183_v47 = vadd.f32 %v7125_v8, %v16573_v34 }
 0x8ae   : >> { %v7737_v36 = vadd.f32 %v7681_v26, %v7462_v0 }
 0x8af   : >> { %v7959_v59 = vpop.f32.mrf.mxu0  ;;  %v7461_v43 = vadd.f32 %v7403_v16, %v7183_v47 }
 0x8b0   : >> { %v8012_v45 = vadd.f32 %v7956_v48, %v7737_v36 }
 0x8b1   : >> { %v7736_v48 = vadd.f32 %v7678_v60, %v7461_v43 }
 0x8b2   : >> { %v8048_v63 = vadd.f32 %v16758_v3, %v8012_v45 }
 0x8b3   : >> { %v7409_v14 = vpop.f32.mrf.mxu2  ;;  %v8011_v16 = vadd.f32 %v7953_v38, %v7736_v48 }
 0x8b4   : >> { %v8080_v61 = vmax.f32 %v8048_v63, 0.0  ;;  %v7463_v42 = vadd.f32 %v7409_v14, %v7185_v5  ;;  %v7684_v54 = vpop.f32.mrf.mxu3  ;;  %v7134_v46 = vpop.f32.mrf.mxu1 }
 0x8b5   : >> { %v7186_v7 = vadd.f32 %v7134_v46, %v16606_v33  ;;  %v8047_v36 = vadd.f32 %v16758_v3, %v8011_v16 }
 0x8b6   : >> { %v8100_v40 = vmax.f32 %v8076_v31, %v8080_v61  ;;  %v7738_v44 = vadd.f32 %v7684_v54, %v7463_v42 }
 0x8b7   : >> { %v7962_v23 = vpop.f32.mrf.mxu0  ;;  %v8079_v28 = vmax.f32 %v8047_v36, 0.0 }
 0x8b8   : >> { %8116 = vst.msk [vmem:[#allocation4 + $0x40] sm:$0xff] %vm536_vm2, %v8100_v40  ;;  %v8013_v4 = vadd.f32 %v7959_v59, %v7738_v44 }
 0x8ba   : >> { %v8049_v21 = vadd.f32 %v16758_v3, %v8013_v4 }
 0x8bb   : >> { %v7412_v32 = vpop.f32.mrf.mxu2 }
 0x8bc   : >> { %v8081_v51 = vmax.f32 %v8049_v21, 0.0  ;;  %v7464_v2 = vadd.f32 %v7412_v32, %v7186_v7  ;;  %v7687_v17 = vpop.f32.mrf.mxu3  ;;  %v7137_v56 = vpop.f32.mrf.mxu1 }
 0x8bd   : >> { %v7187_v33 = vadd.f32 %v7137_v56, %v16617_v49 }
 0x8be   : >> { %v8101_v9 = vmax.f32 %v8077_v41, %v8081_v51  ;;  %v7739_v39 = vadd.f32 %v7687_v17, %v7464_v2 }
 0x8bf   : >> { %v7965_v18 = vpop.f32.mrf.mxu0 }
 0x8c0   : >> { %8117 = vst.msk [vmem:[#allocation4 + $0x48] sm:$0xff] %vm536_vm2, %v8101_v9  ;;  %v8014_v34 = vadd.f32 %v7962_v23, %v7739_v39 }
 0x8c2   : >> { %v8050_v8 = vadd.f32 %v16758_v3, %v8014_v34 }
 0x8c3   : >> { %v7415_v6 = vpop.f32.mrf.mxu2 }
 0x8c4   : >> { %v8082_v25 = vmax.f32 %v8050_v8, 0.0  ;;  %v7465_v57 = vadd.f32 %v7415_v6, %v7187_v33  ;;  %v7690_v37 = vpop.f32.mrf.mxu3  ;;  %v7140_v11 = vpop.f32.mrf.mxu1 }
 0x8c5   : >> { %v7188_v13 = vadd.f32 %v7140_v11, %v16628_v22 }
 0x8c6   : >> { %v8102_v58 = vmax.f32 %v8078_v12, %v8082_v25  ;;  %v7740_v0 = vadd.f32 %v7690_v37, %v7465_v57 }
 0x8c7   : >> { %v7968_v26 = vpop.f32.mrf.mxu0  ;;  %v8132_v24 = vld [vmem:[#allocation4 + $0x40] ss:$2 sm:$0xff]  ;;  %v8148_v60 = vld [vmem:[#allocation4 + $0x41] ss:$2 sm:$0xff] }
 0x8c8   : >> { %v8159_v59 = vmax.f32 %v8132_v24, %v8148_v60  ;;  %8118 = vst.msk [vmem:[#allocation4 + $0x50] sm:$0xff] %vm536_vm2, %v8102_v58  ;;  %v8015_v49 = vadd.f32 %v7965_v18, %v7740_v0 }
 0x8ca   : >> { %12411 = vst.msk [vmem:[%s16813_s26 + $0x68] sm:$0xff] %vm536_vm2, %v8159_v59  ;;  %v8051_v1 = vadd.f32 %v16758_v3, %v8015_v49 }
 0x8cb   : >> { %v7418_v38 = vpop.f32.mrf.mxu2 }
 0x8cc   : >> { %v8083_v45 = vmax.f32 %v8051_v1, 0.0  ;;  %v7693_v19 = vpop.f32.mrf.mxu3  ;;  %v7143_v5 = vpop.f32.mrf.mxu1  ;;  %v7466_v47 = vadd.f32 %v7418_v38, %v7188_v13 }
 0x8cd   : >> { %v7189_v30 = vadd.f32 %v7143_v5, %v16639_v15 }
 0x8ce   : >> { %v8103_v63 = vmax.f32 %v8079_v28, %v8083_v45  ;;  %v7741_v32 = vadd.f32 %v7693_v19, %v7466_v47 }
 0x8cf   : >> { %v7971_v53 = vpop.f32.mrf.mxu0 }
 0x8d0   : >> { %8119 = vst.msk [vmem:[#allocation4 + $0x58] sm:$0xff] %vm536_vm2, %v8103_v63  ;;  %v8016_v17 = vadd.f32 %v7968_v26, %v7741_v32 }
 0x8d2   : >> { %v8052_v22 = vadd.f32 %v16758_v3, %v8016_v17 }
 0x8d3   : >> { %v7421_v14 = vpop.f32.mrf.mxu2 }
 0x8d4   : >> { %v7696_v31 = vpop.f32.mrf.mxu3  ;;  %v7146_v52 = vpop.f32.mrf.mxu1  ;;  %v7467_v51 = vadd.f32 %v7421_v14, %v7189_v30  ;;  %v8084_v12 = vmax.f32 %v8052_v22, 0.0 }
 0x8d5   : >> { %v7190_v33 = vadd.f32 %v7146_v52, %v16650_v10 }
 0x8d6   : >> { %v7742_v20 = vadd.f32 %v7696_v31, %v7467_v51 }
 0x8d7   : >> { %v7974_v61 = vpop.f32.mrf.mxu0  ;;  %v8134_v42 = vld [vmem:[#allocation4 + $0x50] ss:$2 sm:$0xff]  ;;  %v8150_v54 = vld [vmem:[#allocation4 + $0x51] ss:$2 sm:$0xff] }
 0x8d8   : >> { %v8160_v46 = vmax.f32 %v8134_v42, %v8150_v54  ;;  %v8017_v6 = vadd.f32 %v7971_v53, %v7742_v20  ;;  %v12482_v20 = vld [vmem:[%s17991_s5 + $0x28] sm:$0xff] (%p5601_p12) }
 0x8da   : >> { %12412 = vst.msk [vmem:[%s16813_s26 + $0x70] sm:$0xff] %vm536_vm2, %v8160_v46  ;;  %v8053_v26 = vadd.f32 %v16758_v3, %v8017_v6 }
 0x8db   : >> { %v7424_v40 = vpop.f32.mrf.mxu2 }
 0x8dc   : >> { %v7699_v44 = vpop.f32.mrf.mxu3  ;;  %v7149_v23 = vpop.f32.mrf.mxu1  ;;  %v7468_v16 = vadd.f32 %v7424_v40, %v7190_v33  ;;  %v8085_v59 = vmax.f32 %v8053_v26, 0.0 }
 0x8de   : >> { %v7743_v24 = vadd.f32 %v7699_v44, %v7468_v16  ;;  %v8207_v16 = vld [vmem:[%s17991_s5] sm:$0xff] (%p5601_p12) }
 0x8df   : >> { %v7977_v27 = vpop.f32.mrf.mxu0 }
 0x8e0   : >> { %v8018_v38 = vadd.f32 %v7974_v61, %v7743_v24 }
 0x8e2   : >> { %v8054_v31 = vadd.f32 %v16758_v3, %v8018_v38 }
 0x8e3   : >> { %v7427_v4 = vpop.f32.mrf.mxu2 }
 0x8e4   : >> { %v7702_v7 = vpop.f32.mrf.mxu3  ;;  %v7152_v21 = vpop.f32.mrf.mxu1  ;;  %v8086_v61 = vmax.f32 %v8054_v31, 0.0 }
 0x8e5   : >> { %v7192_v43 = vadd.f32 %v7152_v21, %v16672_v50 }
 0x8e7   : >> { %v7980_v41 = vpop.f32.mrf.mxu0 }
 0x8eb   : >> { %v7430_v2 = vpop.f32.mrf.mxu2 }
 0x8ec   : >> { %v7470_v56 = vadd.f32 %v7430_v2, %v7192_v43  ;;  %v7705_v9 = vpop.f32.mrf.mxu3  ;;  %v7155_v39 = vpop.f32.mrf.mxu1 }
 0x8ed   : >> { %v7193_v8 = vadd.f32 %v7155_v39, %v16683_v35  ;;  %v7191_v35 = vadd.f32 %v7149_v23, %v16661_v62 }
 0x8ee   : >> { %v7745_v18 = vadd.f32 %v7705_v9, %v7470_v56  ;;  %v12415_v9 = vld [vmem:[%s17991_s5 + $0x10] sm:$0xff] (%p5601_p12) }
 0x8ef   : >> { %v7983_v34 = vpop.f32.mrf.mxu0  ;;  %v7469_v28 = vadd.f32 %v7427_v4, %v7191_v35 }
 0x8f0   : >> { %v8020_v48 = vadd.f32 %v7980_v41, %v7745_v18 }
 0x8f1   : >> { %v7744_v52 = vadd.f32 %v7702_v7, %v7469_v28  ;;  %v12652_v28 = vld [vmem:[%s17991_s5 + $0x78] sm:$0xff] (%p5601_p12) }
 0x8f2   : >> { %v8056_v15 = vadd.f32 %v16758_v3, %v8020_v48  ;;  %v8208_v48 = vld [vmem:[%s17991_s5 + $0x8] sm:$0xff] (%p5601_p12) }
 0x8f3   : >> { %v7433_v50 = vpop.f32.mrf.mxu2  ;;  %v8019_v46 = vadd.f32 %v7977_v27, %v7744_v52 }
 0x8f4   : >> { %v8088_v25 = vmax.f32 %v8056_v15, 0.0  ;;  %v7471_v57 = vadd.f32 %v7433_v50, %v7193_v8  ;;  %v7708_v37 = vpop.f32.mrf.mxu3  ;;  %v7158_v11 = vpop.f32.mrf.mxu1  ;;  %v12550_v8 = vld [vmem:[%s17991_s5 + $0x48] sm:$0xff] (%p5601_p12)  ;;  %v12481_v15 = vld [vmem:[%s17991_s5 + $0x20] sm:$0xff] (%p5601_p12)  ;;  %v12515_v50 = vld [vmem:[%s17991_s5 + $0x30] sm:$0xff] (%p5601_p12) }
 0x8f5   : >> { %v7194_v60 = vadd.f32 %v7158_v11, %v16694_v29  ;;  %v8055_v41 = vadd.f32 %v16758_v3, %v8019_v46 }
 0x8f6   : >> { %v8104_v58 = vmax.f32 %v8084_v12, %v8088_v25  ;;  %v7746_v0 = vadd.f32 %v7708_v37, %v7471_v57  ;;  %v12549_v37 = vld [vmem:[%s17991_s5 + $0x40] sm:$0xff] (%p5601_p12) }
 0x8f7   : >> { %v7986_v1 = vpop.f32.mrf.mxu0  ;;  %v8087_v27 = vmax.f32 %v8055_v41, 0.0 }
 0x8f8   : >> { %8120 = vst.msk [vmem:[#allocation4 + $0x60] sm:$0xff] %vm536_vm2, %v8104_v58  ;;  %v8021_v10 = vadd.f32 %v7983_v34, %v7746_v0  ;;  %v12516_v34 = vld [vmem:[%s17991_s5 + $0x38] sm:$0xff] (%p5601_p12) }
 0x8fa   : >> { %v8057_v36 = vadd.f32 %v16758_v3, %v8021_v10 }
 0x8fb   : >> { %v7436_v49 = vpop.f32.mrf.mxu2 }
 0x8fc   : >> { %v8089_v45 = vmax.f32 %v8057_v36, 0.0  ;;  %v7472_v19 = vadd.f32 %v7436_v49, %v7194_v60  ;;  %v7711_v5 = vpop.f32.mrf.mxu3  ;;  %v7161_v14 = vpop.f32.mrf.mxu1 }
 0x8fd   : >> { %v7195_v29 = vadd.f32 %v7161_v14, %v16705_v55  ;;  %v12686_v14 = vld [vmem:[%s17991_s5 + $0x88] sm:$0xff] (%p5601_p12) }
 0x8fe   : >> { %v8105_v63 = vmax.f32 %v8085_v59, %v8089_v45  ;;  %v7747_v53 = vadd.f32 %v7711_v5, %v7472_v19  ;;  %v12584_v45 = vld [vmem:[%s17991_s5 + $0x58] sm:$0xff] (%p5601_p12) }
 0x8ff   : >> { %v7989_v13 = vpop.f32.mrf.mxu0 }
 0x900   : >> { %8121 = vst.msk [vmem:[#allocation4 + $0x68] sm:$0xff] %vm536_vm2, %v8105_v63  ;;  %v8022_v62 = vadd.f32 %v7986_v1, %v7747_v53  ;;  %v12618_v1 = vld [vmem:[%s17991_s5 + $0x68] sm:$0xff] (%p5601_p12) }
 0x902   : >> { %v8058_v42 = vadd.f32 %v16758_v3, %v8022_v62 }
 0x903   : >> { %v7439_v54 = vpop.f32.mrf.mxu2 }
 0x904   : >> { %v8090_v40 = vmax.f32 %v8058_v42, 0.0  ;;  %v7473_v44 = vadd.f32 %v7439_v54, %v7195_v29  ;;  %v7714_v23 = vpop.f32.mrf.mxu3 }
 0x906   : >> { %v8106_v4 = vmax.f32 %v8086_v61, %v8090_v40  ;;  %v7748_v47 = vadd.f32 %v7714_v23, %v7473_v44 }
 0x907   : >> { %v8136_v21 = vld [vmem:[#allocation4 + $0x60] ss:$2 sm:$0xff]  ;;  %v8152_v7 = vld [vmem:[#allocation4 + $0x61] ss:$2 sm:$0xff] }
 0x908   : >> { %v8161_v32 = vmax.f32 %v8136_v21, %v8152_v7  ;;  %8122 = vst.msk [vmem:[#allocation4 + $0x70] sm:$0xff] %vm536_vm2, %v8106_v4  ;;  %v8023_v55 = vadd.f32 %v7989_v13, %v7748_v47 }
 0x90a   : >> { %12413 = vst.msk [vmem:[%s16813_s26 + $0x88] sm:$0xff] %vm536_vm2, %v8161_v32  ;;  %v8059_v30 = vadd.f32 %v16758_v3, %v8023_v55  ;;  %v12416_v3 = vld [vmem:[%s17991_s5 + $0x18] sm:$0xff] (%p5601_p12) }
 0x90b   : > { %12730 = vmatpush.msra.mxu1 (%p5601_p12), %v12416_v3  ;;  %12731 = vmatpush.msra.mxu2 (%p5601_p12), %v12416_v3 }
 0x90c   : >> { %v8091_v43 = vmax.f32 %v8059_v30, 0.0  ;;  %12732 = vmatpush.msra.mxu3 (%p5601_p12), %v12416_v3  ;;  %8354 = vmatpush.msra.mxu0 (%p5601_p12), %v12416_v3 }
 0x90d   : > { %12733 = vmatpush.msra.mxu1 (%p5601_p12), %v12415_v9  ;;  %12734 = vmatpush.msra.mxu2 (%p5601_p12), %v12415_v9 }
 0x90e   : >> { %v8107_v51 = vmax.f32 %v8087_v27, %v8091_v43  ;;  %12735 = vmatpush.msra.mxu3 (%p5601_p12), %v12415_v9  ;;  %8355 = vmatpush.msra.mxu0 (%p5601_p12), %v12415_v9 }
 0x90f   : > { %8807 = vmatpush.msrb.mxu2 (%p5601_p12), %v12482_v20  ;;  %8563 = vmatpush.msrb.mxu1 (%p5601_p12), %v8208_v48 }
 0x910   : >> { %8123 = vst.msk [vmem:[#allocation4 + $0x78] sm:$0xff] %vm536_vm2, %v8107_v51  ;;  %9084 = vmatpush.msrb.mxu3 (%p5601_p12), %v12516_v34  ;;  %9360 = vmatpush.msrb.mxu0 (%p5601_p12), %v12550_v8 }
 0x911   : > { %8808 = vmatpush.msrb.mxu2 (%p5601_p12), %v12481_v15  ;;  %8564 = vmatpush.msrb.mxu1 (%p5601_p12), %v8207_v16 }
 0x912   : > { %9085 = vmatpush.msrb.mxu3 (%p5601_p12), %v12515_v50  ;;  %9361 = vmatpush.msrb.mxu0 (%p5601_p12), %v12549_v37 }
 0x916   : > { %5603 = sbr.rel (!%p5601_p12) target bundleno = 1600 (0x640), region = 220 }
 0x917   : >> { %v8138_v2 = vld [vmem:[#allocation4 + $0x70] ss:$2 sm:$0xff]  ;;  %v8154_v17 = vld [vmem:[#allocation4 + $0x71] ss:$2 sm:$0xff] }
 0x918   : >> { %v8162_v56 = vmax.f32 %v8138_v2, %v8154_v17 }
 0x91a   : >> { %12414 = vst.msk [vmem:[%s16813_s26 + $0x90] sm:$0xff] %vm536_vm2, %v8162_v56 }
 0x921   : > { %v16981_v39 = vld [vmem:[#allocation3 + $0x88] sm:$0xff]  ;;  %v17008_v6 = vld [vmem:[#allocation3 + $0x90] sm:$0xff] }
 0x922   : > { %v16983_v18 = vld [vmem:[#allocation3 + $0x108] sm:$0xff]  ;;  %12425 = vmatmul.msk.f32.vlgmr.msra.gmra.mxu1 %vm536_vm2, %v16981_v39  ;;  %v17014_v12 = vld [vmem:[#allocation3 + $0x110] sm:$0xff] }
 0x923   : > { %v16988_v22 = vld [vmem:[#allocation3 + $0x188] sm:$0xff]  ;;  %12433 = vmatmul.msk.f32.vlgmr.msra.gmra.mxu2 %vm536_vm2, %v16983_v18  ;;  %v17019_v25 = vld [vmem:[#allocation3 + $0x190] sm:$0xff]  ;;  %9636 = vmatpush.msra.mxu1 %v12584_v45 }
 0x924   : > { %v8209_v33 = vld [vmem:[#allocation3 + $0x8] sm:$0xff]  ;;  %12441 = vmatmul.msk.f32.vlgmr.msra.gmra.mxu3 %vm536_vm2, %v16988_v22  ;;  %v8210_v57 = vld [vmem:[#allocation3 + $0x10] sm:$0xff]  ;;  %9913 = vmatpush.msra.mxu2 %v12618_v1 }
 0x925   : > { %12417 = vmatmul.msk.f32.vlgmr.msra.gmra.mxu0 %vm536_vm2, %v8209_v33  ;;  %v17031_v11 = vld [vmem:[#allocation3 + $0xa8] sm:$0xff]  ;;  %v17044_v24 = vld [vmem:[#allocation3 + $0xb0] sm:$0xff]  ;;  %10189 = vmatpush.msra.mxu3 %v12652_v28 }
 0x926   : > { %v17033_v58 = vld [vmem:[#allocation3 + $0x128] sm:$0xff]  ;;  %v17046_v10 = vld [vmem:[#allocation3 + $0x130] sm:$0xff]  ;;  %10465 = vmatpush.msra.mxu0 %v12686_v14 }
 0x927   : > { %v17035_v0 = vld [vmem:[#allocation3 + $0x1a8] sm:$0xff]  ;;  %v17048_v35 = vld [vmem:[#allocation3 + $0x1b0] sm:$0xff] }
 0x928   : > { %v8211_v26 = vld [vmem:[#allocation3 + $0x28] sm:$0xff]  ;;  %v8212_v60 = vld [vmem:[#allocation3 + $0x30] sm:$0xff] }
 0x929   : > { %v17057_v36 = vld [vmem:[#allocation3 + $0xc8] sm:$0xff]  ;;  %v17082_v19 = vld [vmem:[#allocation3 + $0xd0] sm:$0xff] }
 0x92a   : > { %12426 = vmatmul.msk.f32.gmra.mxu1 %vm536_vm2, %v17008_v6  ;;  %v17059_v59 = vld [vmem:[#allocation3 + $0x148] sm:$0xff]  ;;  %v17084_v5 = vld [vmem:[#allocation3 + $0x150] sm:$0xff] }
 0x92b   : > { %12434 = vmatmul.msk.f32.gmra.mxu2 %vm536_vm2, %v17014_v12  ;;  %v17061_v49 = vld [vmem:[#allocation3 + $0x1c8] sm:$0xff]  ;;  %v17086_v63 = vld [vmem:[#allocation3 + $0x1d0] sm:$0xff] }
 0x92c   : > { %12442 = vmatmul.msk.f32.gmra.mxu3 %vm536_vm2, %v17019_v25  ;;  %v17070_v38 = vld [vmem:[#allocation3 + $0x48] sm:$0xff]  ;;  %v17092_v53 = vld [vmem:[#allocation3 + $0x50] sm:$0xff] }
 0x92d   : > { %12418 = vmatmul.msk.f32.gmra.mxu0 %vm536_vm2, %v8210_v57  ;;  %v17101_v31 = vld [vmem:[#allocation3 + $0xe8] sm:$0xff]  ;;  %v17117_v42 = vld [vmem:[#allocation3 + $0xf0] sm:$0xff] }
 0x92e   : > { %v17103_v52 = vld [vmem:[#allocation3 + $0x168] sm:$0xff]  ;;  %v17119_v54 = vld [vmem:[#allocation3 + $0x170] sm:$0xff] }
 0x92f   : > { %v17105_v62 = vld [vmem:[#allocation3 + $0x1e8] sm:$0xff]  ;;  %v17121_v61 = vld [vmem:[#allocation3 + $0x1f0] sm:$0xff] }
 0x930   : > { %v17111_v29 = vld [vmem:[#allocation3 + $0x68] sm:$0xff]  ;;  %v17127_v46 = vld [vmem:[#allocation3 + $0x70] sm:$0xff] }
 0x931   : > { %v8175_v40 = vld [vmem:[#allocation3 + $0x7] sm:$0xff]  ;;  %v8176_v13 = vld [vmem:[#allocation3 + $0xf] sm:$0xff] }
 0x932   : > { %12427 = vmatmul.msk.f32.gmra.mxu1 %vm536_vm2, %v17031_v11  ;;  %v8662_v44 = vld [vmem:[#allocation3 + $0x9] sm:$0xff]  ;;  %v8663_v4 = vld [vmem:[#allocation3 + $0x11] sm:$0xff] }
 0x933   : > { %12435 = vmatmul.msk.f32.gmra.mxu2 %vm536_vm2, %v17033_v58  ;;  %v8939_v23 = vld [vmem:[#allocation3 + $0x27] sm:$0xff]  ;;  %v8940_v47 = vld [vmem:[#allocation3 + $0x2f] sm:$0xff] }
 0x934   : > { %12443 = vmatmul.msk.f32.gmra.mxu3 %vm536_vm2, %v17035_v0  ;;  %v17141_v21 = vld [vmem:[#allocation3 + $0x29] sm:$0xff]  ;;  %v17152_v41 = vld [vmem:[#allocation3 + $0x31] sm:$0xff] }
 0x935   : > { %12419 = vmatmul.msk.f32.gmra.mxu0 %vm536_vm2, %v8211_v26  ;;  %v17143_v7 = vld [vmem:[#allocation3 + $0x47] sm:$0xff]  ;;  %v17154_v32 = vld [vmem:[#allocation3 + $0x4f] sm:$0xff] }
 0x936   : > { %v17163_v55 = vld [vmem:[#allocation3 + $0x49] sm:$0xff]  ;;  %v17175_v27 = vld [vmem:[#allocation3 + $0x51] sm:$0xff] }
 0x937   : > { %v17165_v30 = vld [vmem:[#allocation3 + $0x67] sm:$0xff]  ;;  %v17177_v43 = vld [vmem:[#allocation3 + $0x6f] sm:$0xff] }
 0x938   : > { %v17187_v51 = vld [vmem:[#allocation3 + $0x69] sm:$0xff]  ;;  %v17199_v17 = vld [vmem:[#allocation3 + $0x71] sm:$0xff] }
 0x939   : > { %v17189_v2 = vld [vmem:[#allocation3 + $0x87] sm:$0xff]  ;;  %v17201_v56 = vld [vmem:[#allocation3 + $0x8f] sm:$0xff] }
 0x93a   : > { %12428 = vmatmul.msk.f32.gmra.mxu1 %vm536_vm2, %v17044_v24  ;;  %18244 = vst [vmem:[#allocation83_spill] sm:$0xff] %v17201_v56  ;;  %v17213_v9 = vld [vmem:[#allocation3 + $0x89] sm:$0xff]  ;;  %v17233_v8 = vld [vmem:[#allocation3 + $0x91] sm:$0xff] }
 0x93b   : > { %12436 = vmatmul.msk.f32.gmra.mxu2 %vm536_vm2, %v17046_v10  ;;  %18245 = vst [vmem:[#allocation84_spill] sm:$0xff] %v17213_v9  ;;  %v17235_v15 = vld [vmem:[#allocation3 + $0xaf] sm:$0xff] }
 0x93c   : > { %12444 = vmatmul.msk.f32.gmra.mxu3 %vm536_vm2, %v17048_v35  ;;  %18248 = vst [vmem:[#allocation87_spill] sm:$0xff] %v17233_v8  ;;  %v17253_v37 = vld [vmem:[#allocation3 + $0xa9] sm:$0xff]  ;;  %v17273_v28 = vld [vmem:[#allocation3 + $0xb1] sm:$0xff] }
 0x93d   : > { %12420 = vmatmul.msk.f32.gmra.mxu0 %vm536_vm2, %v8212_v60  ;;  %18249 = vst [vmem:[#allocation88_spill] sm:$0xff] %v17235_v15  ;;  %v17275_v45 = vld [vmem:[#allocation3 + $0xcf] sm:$0xff] }
 0x93e   : > { %18251 = vst [vmem:[#allocation90_spill] sm:$0xff] %v17253_v37 }
 0x93f   : > { %18254 = vst [vmem:[#allocation93_spill] sm:$0xff] %v17273_v28 }
 0x940   : > { %18255 = vst [vmem:[#allocation94_spill] sm:$0xff] %v17275_v45 }
 0x942   : > { %12429 = vmatmul.msk.f32.gmra.mxu1 %vm536_vm2, %v17057_v36 }
 0x943   : > { %12437 = vmatmul.msk.f32.gmra.mxu2 %vm536_vm2, %v17059_v59 }
 0x944   : > { %12445 = vmatmul.msk.f32.gmra.mxu3 %vm536_vm2, %v17061_v49 }
 0x945   : > { %12421 = vmatmul.msk.f32.gmra.mxu0 %vm536_vm2, %v17070_v38 }
 0x94a   : > { %12430 = vmatmul.msk.f32.gmra.mxu1 %vm536_vm2, %v17082_v19 }
 0x94b   : > { %12438 = vmatmul.msk.f32.gmra.mxu2 %vm536_vm2, %v17084_v5 }
 0x94c   : > { %12446 = vmatmul.msk.f32.gmra.mxu3 %vm536_vm2, %v17086_v63 }
 0x94d   : > { %12422 = vmatmul.msk.f32.gmra.mxu0 %vm536_vm2, %v17092_v53 }
 0x952   : > { %12431 = vmatmul.msk.f32.gmra.mxu1 %vm536_vm2, %v17101_v31 }
 0x953   : > { %12439 = vmatmul.msk.f32.gmra.mxu2 %vm536_vm2, %v17103_v52 }
 0x954   : > { %12447 = vmatmul.msk.f32.gmra.mxu3 %vm536_vm2, %v17105_v62 }
 0x955   : > { %12423 = vmatmul.msk.f32.gmra.mxu0 %vm536_vm2, %v17111_v29 }
 0x95a   : > { %12432 = vmatmul.msk.f32.gmra.mxu1 %vm536_vm2, %v17117_v42 }
 0x95b   : > { %12440 = vmatmul.msk.f32.gmra.mxu2 %vm536_vm2, %v17119_v54 }
 0x95c   : > { %12448 = vmatmul.msk.f32.gmra.mxu3 %vm536_vm2, %v17121_v61 }
 0x95d   : > { %12424 = vmatmul.msk.f32.gmra.mxu0 %vm536_vm2, %v17127_v46 }
 0x962   : > { %12449 = vmatmul.msk.f32.vlgmr.msrb.gmra.mxu1 %vm536_vm2, %v8175_v40 }
 0x963   : > { %12483 = vmatmul.msk.f32.vlgmr.msrb.gmra.mxu2 %vm536_vm2, %v8662_v44 }
 0x964   : > { %12517 = vmatmul.msk.f32.vlgmr.msrb.gmra.mxu3 %vm536_vm2, %v8939_v23 }
 0x965   : > { %12551 = vmatmul.msk.f32.vlgmr.msrb.gmra.mxu0 %vm536_vm2, %v8211_v26 }
 0x96a   : > { %12450 = vmatmul.msk.f32.gmra.mxu1 %vm536_vm2, %v8176_v13  ;;  %v17295_v13 = vld [vmem:[#allocation3 + $0xe7] sm:$0xff] }
 0x96b   : > { %12484 = vmatmul.msk.f32.gmra.mxu2 %vm536_vm2, %v8663_v4  ;;  %18258 = vst [vmem:[#allocation97_spill] sm:$0xff] %v17295_v13  ;;  %v12617_v4 = vld [vmem:[%s17991_s5 + $0x60] sm:$0xff] }
 0x96c   : > { %12518 = vmatmul.msk.f32.gmra.mxu3 %vm536_vm2, %v8940_v47  ;;  %9914 = vmatpush.msra.mxu2 %v12617_v4 }
 0x96d   : > { %12552 = vmatmul.msk.f32.gmra.mxu0 %vm536_vm2, %v8212_v60 }
 0x972   : > { %12451 = vmatmul.msk.f32.gmra.mxu1 %vm536_vm2, %v8939_v23  ;;  %v17293_v23 = vld [vmem:[#allocation3 + $0xc9] sm:$0xff] }
 0x973   : > { %12485 = vmatmul.msk.f32.gmra.mxu2 %vm536_vm2, %v17141_v21  ;;  %18257 = vst [vmem:[#allocation96_spill] sm:$0xff] %v17293_v23 }
 0x974   : > { %12519 = vmatmul.msk.f32.gmra.mxu3 %vm536_vm2, %v17143_v7 }
 0x975   : > { %12553 = vmatmul.msk.f32.gmra.mxu0 %vm536_vm2, %v17070_v38 }
 0x97a   : > { %12452 = vmatmul.msk.f32.gmra.mxu1 %vm536_vm2, %v8940_v47 }
 0x97b   : > { %12486 = vmatmul.msk.f32.gmra.mxu2 %vm536_vm2, %v17152_v41 }
 0x97c   : > { %12520 = vmatmul.msk.f32.gmra.mxu3 %vm536_vm2, %v17154_v32 }
 0x97d   : > { %12554 = vmatmul.msk.f32.gmra.mxu0 %vm536_vm2, %v17092_v53 }
 0x982   : > { %12453 = vmatmul.msk.f32.gmra.mxu1 %vm536_vm2, %v17143_v7 }
 0x983   : > { %12487 = vmatmul.msk.f32.gmra.mxu2 %vm536_vm2, %v17163_v55 }
 0x984   : > { %12521 = vmatmul.msk.f32.gmra.mxu3 %vm536_vm2, %v17165_v30 }
 0x985   : > { %12555 = vmatmul.msk.f32.gmra.mxu0 %vm536_vm2, %v17111_v29 }
 0x98a   : > { %12454 = vmatmul.msk.f32.gmra.mxu1 %vm536_vm2, %v17154_v32 }
 0x98b   : > { %12488 = vmatmul.msk.f32.gmra.mxu2 %vm536_vm2, %v17175_v27 }
 0x98c   : > { %12522 = vmatmul.msk.f32.gmra.mxu3 %vm536_vm2, %v17177_v43 }
 0x98d   : > { %12556 = vmatmul.msk.f32.gmra.mxu0 %vm536_vm2, %v17127_v46 }
 0x992   : > { %12455 = vmatmul.msk.f32.gmra.mxu1 %vm536_vm2, %v17165_v30 }
 0x993   : > { %12489 = vmatmul.msk.f32.gmra.mxu2 %vm536_vm2, %v17187_v51 }
 0x994   : > { %12523 = vmatmul.msk.f32.gmra.mxu3 %vm536_vm2, %v17189_v2 }
 0x995   : > { %12557 = vmatmul.msk.f32.gmra.mxu0 %vm536_vm2, %v16981_v39  ;;  %v17215_v39 = vld [vmem:[#allocation3 + $0xa7] sm:$0xff] }
 0x996   : > { %18246 = vst [vmem:[#allocation85_spill] sm:$0xff] %v17215_v39 }
 0x99a   : > { %12456 = vmatmul.msk.f32.gmra.mxu1 %vm536_vm2, %v17177_v43 }
 0x99b   : > { %12490 = vmatmul.msk.f32.gmra.mxu2 %vm536_vm2, %v17199_v17 }
 0x99c   : > { %12524 = vmatmul.msk.f32.gmra.mxu3 %vm536_vm2, %v17201_v56 }
 0x99d   : > { %12558 = vmatmul.msk.f32.gmra.mxu0 %vm536_vm2, %v17008_v6 }
 0x99f   : > { %v17211_v3 = vpop.f32.mrf.mxu1 }
 0x9a2   : > { %12457 = vmatmul.msk.f32.gmra.mxu1 %vm536_vm2, %v17189_v2  ;;  %v17221_v20 = vpop.f32.mrf.mxu0 }
 0x9a3   : > { %12491 = vmatmul.msk.f32.gmra.mxu2 %vm536_vm2, %v17213_v9 }
 0x9a4   : > { %12525 = vmatmul.msk.f32.gmra.mxu3 %vm536_vm2, %v17215_v39 }
 0x9a5   : > { %12559 = vmatmul.msk.f32.gmra.mxu0 %vm536_vm2, %v17031_v11  ;;  %v17255_v11 = vld [vmem:[#allocation3 + $0xc7] sm:$0xff] }
 0x9a6   : > { %v17225_v48 = vpop.f32.mrf.mxu2  ;;  %18252 = vst [vmem:[#allocation91_spill] sm:$0xff] %v17255_v11 }
 0x9a7   : > { %v17229_v34 = vpop.f32.mrf.mxu1  ;;  %v17231_v33 = vpop.f32.mrf.mxu3 }
 0x9a8   : > { %18247 = vst [vmem:[#allocation86_spill] sm:$0xff] %v17231_v33  ;;  %v17324_v33 = vld [vmem:[#allocation3 + $0xef] sm:$0xff] }
 0x9a9   : > { %18261 = vst [vmem:[#allocation100_spill] sm:$0xff] %v17324_v33 }
 0x9aa   : > { %12458 = vmatmul.msk.f32.gmra.mxu1 %vm536_vm2, %v17201_v56  ;;  %v17241_v6 = vpop.f32.mrf.mxu0 }
 0x9ab   : > { %12492 = vmatmul.msk.f32.gmra.mxu2 %vm536_vm2, %v17233_v8 }
 0x9ac   : > { %12526 = vmatmul.msk.f32.gmra.mxu3 %vm536_vm2, %v17235_v15 }
 0x9ad   : > { %12560 = vmatmul.msk.f32.gmra.mxu0 %vm536_vm2, %v17044_v24 }
 0x9ae   : > { %v17245_v50 = vpop.f32.mrf.mxu2 }
 0x9af   : > { %v17249_v16 = vpop.f32.mrf.mxu1  ;;  %v17251_v57 = vpop.f32.mrf.mxu3 }
 0x9b0   : > { %18250 = vst [vmem:[#allocation89_spill] sm:$0xff] %v17251_v57 }
 0x9b2   : > { %12459 = vmatmul.msk.f32.gmra.mxu1 %vm536_vm2, %v17215_v39  ;;  %v17261_v26 = vpop.f32.mrf.mxu0  ;;  %v17385_v39 = vld [vmem:[#allocation3 + $0x127] sm:$0xff] }
 0x9b3   : > { %12493 = vmatmul.msk.f32.gmra.mxu2 %vm536_vm2, %v17253_v37 }
 0x9b4   : > { %12527 = vmatmul.msk.f32.gmra.mxu3 %vm536_vm2, %v17255_v11 }
 0x9b5   : > { %12561 = vmatmul.msk.f32.gmra.mxu0 %vm536_vm2, %v17057_v36 }
 0x9b6   : > { %v17265_v24 = vpop.f32.mrf.mxu2 }
 0x9b7   : > { %v17269_v60 = vpop.f32.mrf.mxu1  ;;  %v17271_v1 = vpop.f32.mrf.mxu3 }
 0x9b8   : > { %18253 = vst [vmem:[#allocation92_spill] sm:$0xff] %v17271_v1  ;;  %v12583_v1 = vld [vmem:[%s17991_s5 + $0x50] sm:$0xff] }
 0x9b9   : > { %9637 = vmatpush.msra.mxu1 %v12583_v1 }
 0x9ba   : > { %12460 = vmatmul.msk.f32.gmra.mxu1 %vm536_vm2, %v17235_v15  ;;  %v17281_v14 = vpop.f32.mrf.mxu0  ;;  %v17365_v15 = vld [vmem:[#allocation3 + $0xf1] sm:$0xff] }
 0x9bb   : > { %12494 = vmatmul.msk.f32.gmra.mxu2 %vm536_vm2, %v17273_v28  ;;  %18268 = vst [vmem:[#allocation107_spill] sm:$0xff] %v17365_v15 }
 0x9bc   : > { %12528 = vmatmul.msk.f32.gmra.mxu3 %vm536_vm2, %v17275_v45 }
 0x9bd   : > { %12562 = vmatmul.msk.f32.gmra.mxu0 %vm536_vm2, %v17082_v19  ;;  %v12651_v19 = vld [vmem:[%s17991_s5 + $0x70] sm:$0xff] }
 0x9be   : > { %v17285_v36 = vpop.f32.mrf.mxu2  ;;  %10190 = vmatpush.msra.mxu3 %v12651_v19  ;;  %v12685_v19 = vld [vmem:[%s17991_s5 + $0x80] sm:$0xff] }
 0x9bf   : > { %v17289_v40 = vpop.f32.mrf.mxu1  ;;  %v17291_v44 = vpop.f32.mrf.mxu3  ;;  %10466 = vmatpush.msra.mxu0 %v12685_v19 }
 0x9c0   : > { %18256 = vst [vmem:[#allocation95_spill] sm:$0xff] %v17291_v44 }
 0x9c2   : > { %12461 = vmatmul.msk.f32.gmra.mxu1 %vm536_vm2, %v17255_v11  ;;  %v17304_v47 = vpop.f32.mrf.mxu0  ;;  %v17347_v11 = vld [vmem:[#allocation3 + $0x107] sm:$0xff] }
 0x9c3   : > { %12495 = vmatmul.msk.f32.gmra.mxu2 %vm536_vm2, %v17293_v23  ;;  %v17322_v23 = vld [vmem:[#allocation3 + $0xd1] sm:$0xff]  ;;  %18265 = vst [vmem:[#allocation104_spill] sm:$0xff] %v17347_v11 }
 0x9c4   : > { %12529 = vmatmul.msk.f32.gmra.mxu3 %vm536_vm2, %v17295_v13  ;;  %18260 = vst [vmem:[#allocation99_spill] sm:$0xff] %v17322_v23 }
 0x9c5   : > { %12563 = vmatmul.msk.f32.gmra.mxu0 %vm536_vm2, %v17101_v31 }
 0x9c6   : > { %v17311_v44 = vpop.f32.mrf.mxu2 }
 0x9c7   : > { %v17318_v57 = vpop.f32.mrf.mxu1  ;;  %v17320_v4 = vpop.f32.mrf.mxu3 }
 0x9c8   : > { %18259 = vst [vmem:[#allocation98_spill] sm:$0xff] %v17320_v4 }
 0x9ca   : > { %12462 = vmatmul.msk.f32.gmra.mxu1 %vm536_vm2, %v17275_v45  ;;  %v17330_v31 = vpop.f32.mrf.mxu0 }
 0x9cb   : > { %12496 = vmatmul.msk.f32.gmra.mxu2 %vm536_vm2, %v17322_v23  ;;  %v17345_v23 = vld [vmem:[#allocation3 + $0xe9] sm:$0xff] }
 0x9cc   : > { %12530 = vmatmul.msk.f32.gmra.mxu3 %vm536_vm2, %v17324_v33  ;;  %18264 = vst [vmem:[#allocation103_spill] sm:$0xff] %v17345_v23 }
 0x9cd   : > { %12564 = vmatmul.msk.f32.gmra.mxu0 %vm536_vm2, %v17117_v42 }
 0x9ce   : > { %v17337_v4 = vpop.f32.mrf.mxu2 }
 0x9cf   : > { %18262 = vst [vmem:[#allocation101_spill] sm:$0xff] %v17337_v4  ;;  %v17341_v1 = vpop.f32.mrf.mxu1  ;;  %v17343_v45 = vpop.f32.mrf.mxu3  ;;  %v17396_v4 = vld [vmem:[#allocation3 + $0x111] sm:$0xff] }
 0x9d0   : > { %18263 = vst [vmem:[#allocation102_spill] sm:$0xff] %v17343_v45 }
 0x9d2   : > { %12463 = vmatmul.msk.f32.gmra.mxu1 %vm536_vm2, %v17295_v13  ;;  %v17353_v28 = vpop.f32.mrf.mxu0  ;;  %v17367_v13 = vld [vmem:[#allocation3 + $0x10f] sm:$0xff] }
 0x9d3   : > { %12497 = vmatmul.msk.f32.gmra.mxu2 %vm536_vm2, %v17345_v23 }
 0x9d4   : > { %12531 = vmatmul.msk.f32.gmra.mxu3 %vm536_vm2, %v17347_v11 }
 0x9d5   : > { %12565 = vmatmul.msk.f32.gmra.mxu0 %vm536_vm2, %v16983_v18 }
 0x9d6   : > { %v17357_v42 = vpop.f32.mrf.mxu2 }
 0x9d7   : > { %18266 = vst [vmem:[#allocation105_spill] sm:$0xff] %v17357_v42  ;;  %v17361_v19 = vpop.f32.mrf.mxu1  ;;  %v17363_v45 = vpop.f32.mrf.mxu3  ;;  %v17383_v42 = vld [vmem:[#allocation3 + $0x109] sm:$0xff] }
 0x9d8   : > { %18267 = vst [vmem:[#allocation106_spill] sm:$0xff] %v17363_v45 }
 0x9da   : > { %12464 = vmatmul.msk.f32.gmra.mxu1 %vm536_vm2, %v17324_v33  ;;  %v17373_v23 = vpop.f32.mrf.mxu0 }
 0x9db   : > { %12498 = vmatmul.msk.f32.gmra.mxu2 %vm536_vm2, %v17365_v15 }
 0x9dc   : > { %12532 = vmatmul.msk.f32.gmra.mxu3 %vm536_vm2, %v17367_v13 }
 0x9dd   : > { %12566 = vmatmul.msk.f32.gmra.mxu0 %vm536_vm2, %v17014_v12 }
 0x9de   : > { %v17377_v18 = vpop.f32.mrf.mxu2 }
 0x9df   : > { %18269 = vst [vmem:[#allocation108_spill] sm:$0xff] %v17377_v18  ;;  %v17381_v45 = vpop.f32.mrf.mxu3  ;;  %v8566_v37 = vpop.f32.mrf.mxu1 }
 0x9e0   : > { %18270 = vst [vmem:[#allocation109_spill] sm:$0xff] %v17381_v45  ;;  %v8567_v33 = vadd.f32 %v8566_v37, %v17221_v20 }
 0x9e2   : > { %12465 = vmatmul.msk.f32.gmra.mxu1 %vm536_vm2, %v17347_v11  ;;  %v9363_v15 = vpop.f32.mrf.mxu0  ;;  %v17398_v11 = vld [vmem:[#allocation3 + $0x12f] sm:$0xff] }
 0x9e3   : > { %12499 = vmatmul.msk.f32.gmra.mxu2 %vm536_vm2, %v17383_v42 }
 0x9e4   : > { %12533 = vmatmul.msk.f32.gmra.mxu3 %vm536_vm2, %v17385_v39 }
 0x9e5   : > { %12567 = vmatmul.msk.f32.gmra.mxu0 %vm536_vm2, %v17033_v58 }
 0x9e6   : > { %v8810_v12 = vpop.f32.mrf.mxu2 }
 0x9e7   : > { %v8906_v18 = vadd.f32 %v8810_v12, %v8567_v33  ;;  %v8569_v45 = vpop.f32.mrf.mxu1  ;;  %v9087_v8 = vpop.f32.mrf.mxu3  ;;  %v17413_v12 = vld [vmem:[#allocation3 + $0x147] sm:$0xff] }
 0x9e8   : > { %v8570_v33 = vadd.f32 %v8569_v45, %v17241_v6 }
 0x9e9   : > { %v9183_v56 = vadd.f32 %v9087_v8, %v8906_v18 }
 0x9ea   : > { %12466 = vmatmul.msk.f32.gmra.mxu1 %vm536_vm2, %v17367_v13  ;;  %v9366_v20 = vpop.f32.mrf.mxu0 }
 0x9eb   : > { %v17400_v9 = vadd.f32 %v9363_v15, %v9183_v56  ;;  %12500 = vmatmul.msk.f32.gmra.mxu2 %vm536_vm2, %v17396_v4  ;;  %v17411_v15 = vld [vmem:[#allocation3 + $0x129] sm:$0xff] }
 0x9ec   : > { %12534 = vmatmul.msk.f32.gmra.mxu3 %vm536_vm2, %v17398_v11 }
 0x9ed   : > { %18271 = vst [vmem:[#allocation110_spill] sm:$0xff] %v17400_v9  ;;  %12568 = vmatmul.msk.f32.gmra.mxu0 %vm536_vm2, %v17046_v10 }
 0x9ee   : > { %v8813_v58 = vpop.f32.mrf.mxu2 }
 0x9ef   : > { %v8907_v37 = vadd.f32 %v8813_v58, %v8570_v33  ;;  %v8572_v8 = vpop.f32.mrf.mxu1  ;;  %v9090_v56 = vpop.f32.mrf.mxu3 }
 0x9f0   : > { %v8573_v45 = vadd.f32 %v8572_v8, %v17261_v26 }
 0x9f1   : > { %v9184_v18 = vadd.f32 %v9090_v56, %v8907_v37  ;;  %v17426_v37 = vld [vmem:[#allocation3 + $0x131] sm:$0xff] }
 0x9f2   : > { %12467 = vmatmul.msk.f32.gmra.mxu1 %vm536_vm2, %v17385_v39  ;;  %v9369_v6 = vpop.f32.mrf.mxu0 }
 0x9f3   : > { %v17415_v9 = vadd.f32 %v9366_v20, %v9184_v18  ;;  %12501 = vmatmul.msk.f32.gmra.mxu2 %vm536_vm2, %v17411_v15  ;;  %v17428_v18 = vld [vmem:[#allocation3 + $0x14f] sm:$0xff] }
 0x9f4   : > { %12535 = vmatmul.msk.f32.gmra.mxu3 %vm536_vm2, %v17413_v12 }
 0x9f5   : > { %18272 = vst [vmem:[#allocation111_spill] sm:$0xff] %v17415_v9  ;;  %12569 = vmatmul.msk.f32.gmra.mxu0 %vm536_vm2, %v17059_v59 }
 0x9f6   : > { %v8816_v10 = vpop.f32.mrf.mxu2 }
 0x9f7   : > { %v8908_v33 = vadd.f32 %v8816_v10, %v8573_v45  ;;  %v8575_v58 = vpop.f32.mrf.mxu1  ;;  %v9093_v20 = vpop.f32.mrf.mxu3 }
 0x9f8   : > { %v8576_v8 = vadd.f32 %v8575_v58, %v17281_v14 }
 0x9f9   : > { %v9185_v56 = vadd.f32 %v9093_v20, %v8908_v33  ;;  %v17441_v33 = vld [vmem:[#allocation3 + $0x149] sm:$0xff] }
 0x9fa   : > { %12468 = vmatmul.msk.f32.gmra.mxu1 %vm536_vm2, %v17398_v11  ;;  %v9372_v26 = vpop.f32.mrf.mxu0 }
 0x9fb   : > { %v17430_v9 = vadd.f32 %v9369_v6, %v9185_v56  ;;  %12502 = vmatmul.msk.f32.gmra.mxu2 %vm536_vm2, %v17426_v37  ;;  %v17443_v56 = vld [vmem:[#allocation3 + $0x167] sm:$0xff] }
 0x9fc   : > { %12536 = vmatmul.msk.f32.gmra.mxu3 %vm536_vm2, %v17428_v18 }
 0x9fd   : > { %18273 = vst [vmem:[#allocation112_spill] sm:$0xff] %v17430_v9  ;;  %12570 = vmatmul.msk.f32.gmra.mxu0 %vm536_vm2, %v17084_v5 }
 0x9fe   : > { %v8819_v59 = vpop.f32.mrf.mxu2 }
 0x9ff   : > { %v8909_v45 = vadd.f32 %v8819_v59, %v8576_v8  ;;  %v8578_v10 = vpop.f32.mrf.mxu1  ;;  %v9096_v6 = vpop.f32.mrf.mxu3 }
 0xa00   : > { %v8579_v58 = vadd.f32 %v8578_v10, %v17304_v47 }
 0xa01   : > { %v9186_v20 = vadd.f32 %v9096_v6, %v8909_v45  ;;  %v17456_v45 = vld [vmem:[#allocation3 + $0x151] sm:$0xff] }
 0xa02   : > { %12469 = vmatmul.msk.f32.gmra.mxu1 %vm536_vm2, %v17413_v12  ;;  %v9375_v14 = vpop.f32.mrf.mxu0 }
 0xa03   : > { %v17445_v9 = vadd.f32 %v9372_v26, %v9186_v20  ;;  %12503 = vmatmul.msk.f32.gmra.mxu2 %vm536_vm2, %v17441_v33  ;;  %v17458_v20 = vld [vmem:[#allocation3 + $0x16f] sm:$0xff] }
 0xa04   : > { %12537 = vmatmul.msk.f32.gmra.mxu3 %vm536_vm2, %v17443_v56 }
 0xa05   : > { %18274 = vst [vmem:[#allocation113_spill] sm:$0xff] %v17445_v9  ;;  %12571 = vmatmul.msk.f32.gmra.mxu0 %vm536_vm2, %v17103_v52 }
 0xa06   : > { %v8822_v5 = vpop.f32.mrf.mxu2 }
 0xa07   : > { %v8910_v8 = vadd.f32 %v8822_v5, %v8579_v58  ;;  %v8581_v59 = vpop.f32.mrf.mxu1  ;;  %v9099_v26 = vpop.f32.mrf.mxu3 }
 0xa08   : > { %v8582_v10 = vadd.f32 %v8581_v59, %v17330_v31 }
 0xa09   : > { %v9187_v6 = vadd.f32 %v9099_v26, %v8910_v8  ;;  %v17471_v8 = vld [vmem:[#allocation3 + $0x169] sm:$0xff] }
 0xa0a   : > { %12470 = vmatmul.msk.f32.gmra.mxu1 %vm536_vm2, %v17428_v18  ;;  %v9378_v47 = vpop.f32.mrf.mxu0 }
 0xa0b   : > { %v17460_v9 = vadd.f32 %v9375_v14, %v9187_v6  ;;  %12504 = vmatmul.msk.f32.gmra.mxu2 %vm536_vm2, %v17456_v45  ;;  %v17473_v6 = vld [vmem:[#allocation3 + $0x187] sm:$0xff] }
 0xa0c   : > { %12538 = vmatmul.msk.f32.gmra.mxu3 %vm536_vm2, %v17458_v20 }
 0xa0d   : > { %18275 = vst [vmem:[#allocation114_spill] sm:$0xff] %v17460_v9  ;;  %12572 = vmatmul.msk.f32.gmra.mxu0 %vm536_vm2, %v17119_v54 }
 0xa0e   : > { %v8825_v52 = vpop.f32.mrf.mxu2 }
 0xa0f   : > { %v8911_v58 = vadd.f32 %v8825_v52, %v8582_v10  ;;  %v8584_v5 = vpop.f32.mrf.mxu1  ;;  %v9102_v14 = vpop.f32.mrf.mxu3 }
 0xa10   : > { %v8585_v59 = vadd.f32 %v8584_v5, %v17353_v28 }
 0xa11   : > { %v9188_v26 = vadd.f32 %v9102_v14, %v8911_v58  ;;  %v17486_v58 = vld [vmem:[#allocation3 + $0x171] sm:$0xff] }
 0xa12   : > { %12471 = vmatmul.msk.f32.gmra.mxu1 %vm536_vm2, %v17443_v56  ;;  %v9381_v31 = vpop.f32.mrf.mxu0 }
 0xa13   : > { %v17475_v9 = vadd.f32 %v9378_v47, %v9188_v26  ;;  %12505 = vmatmul.msk.f32.gmra.mxu2 %vm536_vm2, %v17471_v8  ;;  %v17488_v26 = vld [vmem:[#allocation3 + $0x18f] sm:$0xff] }
 0xa14   : > { %12539 = vmatmul.msk.f32.gmra.mxu3 %vm536_vm2, %v17473_v6 }
 0xa15   : > { %18276 = vst [vmem:[#allocation115_spill] sm:$0xff] %v17475_v9  ;;  %12573 = vmatmul.msk.f32.gmra.mxu0 %vm536_vm2, %v16988_v22 }
 0xa16   : > { %v8828_v54 = vpop.f32.mrf.mxu2 }
 0xa17   : > { %v8912_v10 = vadd.f32 %v8828_v54, %v8585_v59  ;;  %v8587_v52 = vpop.f32.mrf.mxu1  ;;  %v9105_v47 = vpop.f32.mrf.mxu3 }
 0xa18   : > { %v8588_v5 = vadd.f32 %v8587_v52, %v17373_v23 }
 0xa19   : > { %v9189_v14 = vadd.f32 %v9105_v47, %v8912_v10  ;;  %v17501_v10 = vld [vmem:[#allocation3 + $0x189] sm:$0xff] }
 0xa1a   : > { %12472 = vmatmul.msk.f32.gmra.mxu1 %vm536_vm2, %v17458_v20  ;;  %v9384_v28 = vpop.f32.mrf.mxu0 }
 0xa1b   : > { %v17490_v9 = vadd.f32 %v9381_v31, %v9189_v14  ;;  %12506 = vmatmul.msk.f32.gmra.mxu2 %vm536_vm2, %v17486_v58  ;;  %v17503_v14 = vld [vmem:[#allocation3 + $0x1a7] sm:$0xff] }
 0xa1c   : > { %12540 = vmatmul.msk.f32.gmra.mxu3 %vm536_vm2, %v17488_v26 }
 0xa1d   : > { %18277 = vst [vmem:[#allocation116_spill] sm:$0xff] %v17490_v9  ;;  %12574 = vmatmul.msk.f32.gmra.mxu0 %vm536_vm2, %v17019_v25 }
 0xa1e   : > { %v8831_v22 = vpop.f32.mrf.mxu2 }
 0xa1f   : > { %v8913_v59 = vadd.f32 %v8831_v22, %v8588_v5  ;;  %v8590_v54 = vpop.f32.mrf.mxu1  ;;  %v9108_v31 = vpop.f32.mrf.mxu3 }
 0xa20   : > { %v8591_v52 = vadd.f32 %v8590_v54, %v17211_v3 }
 0xa21   : > { %v9190_v47 = vadd.f32 %v9108_v31, %v8913_v59  ;;  %v17516_v59 = vld [vmem:[#allocation3 + $0x191] sm:$0xff] }
 0xa22   : > { %12473 = vmatmul.msk.f32.gmra.mxu1 %vm536_vm2, %v17473_v6  ;;  %v9387_v23 = vpop.f32.mrf.mxu0 }
 0xa23   : > { %v17505_v9 = vadd.f32 %v9384_v28, %v9190_v47  ;;  %12507 = vmatmul.msk.f32.gmra.mxu2 %vm536_vm2, %v17501_v10  ;;  %v17518_v47 = vld [vmem:[#allocation3 + $0x1af] sm:$0xff] }
 0xa24   : > { %12541 = vmatmul.msk.f32.gmra.mxu3 %vm536_vm2, %v17503_v14 }
 0xa25   : > { %18278 = vst [vmem:[#allocation117_spill] sm:$0xff] %v17505_v9  ;;  %12575 = vmatmul.msk.f32.gmra.mxu0 %vm536_vm2, %v17035_v0 }
 0xa26   : > { %v8834_v25 = vpop.f32.mrf.mxu2 }
 0xa27   : > { %v8914_v5 = vadd.f32 %v8834_v25, %v8591_v52  ;;  %v8593_v22 = vpop.f32.mrf.mxu1  ;;  %v9111_v28 = vpop.f32.mrf.mxu3 }
 0xa28   : > { %v8594_v54 = vadd.f32 %v8593_v22, %v17229_v34 }
 0xa29   : > { %v9191_v31 = vadd.f32 %v9111_v28, %v8914_v5  ;;  %v17531_v5 = vld [vmem:[#allocation3 + $0x1a9] sm:$0xff] }
 0xa2a   : > { %12474 = vmatmul.msk.f32.gmra.mxu1 %vm536_vm2, %v17488_v26  ;;  %v9390_v3 = vpop.f32.mrf.mxu0 }
 0xa2b   : > { %v17520_v9 = vadd.f32 %v9387_v23, %v9191_v31  ;;  %12508 = vmatmul.msk.f32.gmra.mxu2 %vm536_vm2, %v17516_v59  ;;  %v8965_v31 = vld [vmem:[#allocation3 + $0x1c7] sm:$0xff] }
 0xa2c   : > { %12542 = vmatmul.msk.f32.gmra.mxu3 %vm536_vm2, %v17518_v47 }
 0xa2d   : > { %18279 = vst [vmem:[#allocation118_spill] sm:$0xff] %v17520_v9  ;;  %12576 = vmatmul.msk.f32.gmra.mxu0 %vm536_vm2, %v17048_v35 }
 0xa2e   : > { %v8837_v0 = vpop.f32.mrf.mxu2 }
 0xa2f   : > { %v8915_v52 = vadd.f32 %v8837_v0, %v8594_v54  ;;  %v8596_v25 = vpop.f32.mrf.mxu1  ;;  %v9114_v23 = vpop.f32.mrf.mxu3 }
 0xa30   : > { %v8597_v22 = vadd.f32 %v8596_v25, %v17249_v16 }
 0xa31   : > { %v9192_v28 = vadd.f32 %v9114_v23, %v8915_v52 }
 0xa32   : > { %12475 = vmatmul.msk.f32.gmra.mxu1 %vm536_vm2, %v17503_v14  ;;  %v9393_v34 = vpop.f32.mrf.mxu0 }
 0xa33   : > { %v17533_v9 = vadd.f32 %v9390_v3, %v9192_v28  ;;  %12509 = vmatmul.msk.f32.gmra.mxu2 %vm536_vm2, %v17531_v5  ;;  %v17543_v3 = vld [vmem:[#allocation3 + $0x1b1] sm:$0xff] }
 0xa34   : > { %12543 = vmatmul.msk.f32.gmra.mxu3 %vm536_vm2, %v8965_v31  ;;  %v8966_v28 = vld [vmem:[#allocation3 + $0x1cf] sm:$0xff] }
 0xa35   : > { %18280 = vst [vmem:[#allocation119_spill] sm:$0xff] %v17533_v9  ;;  %12577 = vmatmul.msk.f32.gmra.mxu0 %vm536_vm2, %v17061_v49 }
 0xa36   : > { %v8840_v35 = vpop.f32.mrf.mxu2 }
 0xa37   : > { %v8916_v54 = vadd.f32 %v8840_v35, %v8597_v22  ;;  %v8599_v0 = vpop.f32.mrf.mxu1  ;;  %v9117_v52 = vpop.f32.mrf.mxu3 }
 0xa38   : > { %v8600_v25 = vadd.f32 %v8599_v0, %v17269_v60 }
 0xa39   : > { %v9193_v23 = vadd.f32 %v9117_v52, %v8916_v54 }
 0xa3a   : > { %12476 = vmatmul.msk.f32.gmra.mxu1 %vm536_vm2, %v17518_v47  ;;  %v9396_v16 = vpop.f32.mrf.mxu0 }
 0xa3b   : > { %v17545_v9 = vadd.f32 %v9393_v34, %v9193_v23  ;;  %12510 = vmatmul.msk.f32.gmra.mxu2 %vm536_vm2, %v17543_v3  ;;  %v17555_v34 = vld [vmem:[#allocation3 + $0x1c9] sm:$0xff] }
 0xa3c   : > { %12544 = vmatmul.msk.f32.gmra.mxu3 %vm536_vm2, %v8966_v28  ;;  %v8967_v23 = vld [vmem:[#allocation3 + $0x1e7] sm:$0xff] }
 0xa3d   : > { %18281 = vst [vmem:[#allocation120_spill] sm:$0xff] %v17545_v9  ;;  %12578 = vmatmul.msk.f32.gmra.mxu0 %vm536_vm2, %v17086_v63 }
 0xa3e   : > { %v8843_v49 = vpop.f32.mrf.mxu2 }
 0xa3f   : > { %v8917_v22 = vadd.f32 %v8843_v49, %v8600_v25  ;;  %v8602_v35 = vpop.f32.mrf.mxu1  ;;  %v9120_v54 = vpop.f32.mrf.mxu3 }
 0xa40   : > { %v8603_v0 = vadd.f32 %v8602_v35, %v17289_v40 }
 0xa41   : > { %v9194_v52 = vadd.f32 %v9120_v54, %v8917_v22  ;;  %v17566_v54 = vld [vmem:[#allocation3 + $0x1d1] sm:$0xff] }
 0xa42   : > { %12477 = vmatmul.msk.f32.gmra.mxu1 %vm536_vm2, %v8965_v31  ;;  %v9399_v60 = vpop.f32.mrf.mxu0 }
 0xa43   : > { %v17557_v9 = vadd.f32 %v9396_v16, %v9194_v52  ;;  %12511 = vmatmul.msk.f32.gmra.mxu2 %vm536_vm2, %v17555_v34  ;;  %v8968_v52 = vld [vmem:[#allocation3 + $0x1ef] sm:$0xff] }
 0xa44   : > { %12545 = vmatmul.msk.f32.gmra.mxu3 %vm536_vm2, %v8967_v23 }
 0xa45   : > { %18282 = vst [vmem:[#allocation121_spill] sm:$0xff] %v17557_v9  ;;  %12579 = vmatmul.msk.f32.gmra.mxu0 %vm536_vm2, %v17105_v62  ;;  %v9246_v9 = vld [vmem:[#allocation3 + $0x210] sm:$0xff] }
 0xa46   : > { %v8846_v25 = vpop.f32.mrf.mxu2 }
 0xa47   : > { %v8918_v63 = vadd.f32 %v8846_v25, %v8603_v0  ;;  %v8605_v49 = vpop.f32.mrf.mxu1  ;;  %v9123_v22 = vpop.f32.mrf.mxu3 }
 0xa48   : > { %v8606_v35 = vadd.f32 %v8605_v49, %v17318_v57  ;;  %v9245_v49 = vld [vmem:[#allocation3 + $0x208] sm:$0xff] }
 0xa49   : > { %v9195_v16 = vadd.f32 %v9123_v22, %v8918_v63  ;;  %v17577_v22 = vld [vmem:[#allocation3 + $0x1e9] sm:$0xff] }
 0xa4a   : > { %12478 = vmatmul.msk.f32.gmra.mxu1 %vm536_vm2, %v8966_v28  ;;  %v9402_v40 = vpop.f32.mrf.mxu0 }
 0xa4b   : > { %v17568_v31 = vadd.f32 %v9399_v60, %v9195_v16  ;;  %12512 = vmatmul.msk.f32.gmra.mxu2 %vm536_vm2, %v17566_v54  ;;  %v8969_v16 = vld [vmem:[#allocation3 + $0x207] sm:$0xff] }
 0xa4c   : > { %12546 = vmatmul.msk.f32.gmra.mxu3 %vm536_vm2, %v8968_v52 }
 0xa4d   : > { %18283 = vst [vmem:[#allocation122_spill] sm:$0xff] %v17568_v31  ;;  %12580 = vmatmul.msk.f32.gmra.mxu0 %vm536_vm2, %v17121_v61 }
 0xa4e   : > { %v8849_v0 = vpop.f32.mrf.mxu2 }
 0xa4f   : > { %v8919_v62 = vadd.f32 %v8849_v0, %v8606_v35  ;;  %v8608_v25 = vpop.f32.mrf.mxu1  ;;  %v9126_v63 = vpop.f32.mrf.mxu3 }
 0xa50   : > { %v8609_v35 = vadd.f32 %v8608_v25, %v17341_v1 }
 0xa51   : > { %v9196_v60 = vadd.f32 %v9126_v63, %v8919_v62  ;;  %v8693_v63 = vld [vmem:[#allocation3 + $0x1f1] sm:$0xff] }
 0xa52   : > { %12479 = vmatmul.msk.f32.gmra.mxu1 %vm536_vm2, %v8967_v23  ;;  %v9405_v57 = vpop.f32.mrf.mxu0 }
 0xa53   : > { %v17579_v28 = vadd.f32 %v9402_v40, %v9196_v60  ;;  %12513 = vmatmul.msk.f32.gmra.mxu2 %vm536_vm2, %v17577_v22  ;;  %v8970_v60 = vld [vmem:[#allocation3 + $0x20f] sm:$0xff] }
 0xa54   : > { %12547 = vmatmul.msk.f32.gmra.mxu3 %vm536_vm2, %v8969_v16 }
 0xa55   : > { %18284 = vst [vmem:[#allocation123_spill] sm:$0xff] %v17579_v28  ;;  %12581 = vmatmul.msk.f32.gmra.mxu0 %vm536_vm2, %v9245_v49 }
 0xa56   : > { %v8852_v61 = vpop.f32.mrf.mxu2 }
 0xa57   : > { %v8920_v0 = vadd.f32 %v8852_v61, %v8609_v35  ;;  %v8611_v31 = vpop.f32.mrf.mxu1  ;;  %v9129_v62 = vpop.f32.mrf.mxu3 }
 0xa58   : > { %v8612_v1 = vadd.f32 %v8611_v31, %v17361_v19 }
 0xa59   : > { %v9197_v40 = vadd.f32 %v9129_v62, %v8920_v0 }
 0xa5a   : > { %12480 = vmatmul.msk.f32.gmra.mxu1 %vm536_vm2, %v8968_v52  ;;  %v9408_v23 = vpop.f32.mrf.mxu0 }
 0xa5b   : > { %v17587_v28 = vadd.f32 %v9405_v57, %v9197_v40  ;;  %12514 = vmatmul.msk.f32.gmra.mxu2 %vm536_vm2, %v8693_v63 }
 0xa5c   : > { %12548 = vmatmul.msk.f32.gmra.mxu3 %vm536_vm2, %v8970_v60 }
 0xa5d   : > { %12582 = vmatmul.msk.f32.gmra.mxu0 %vm536_vm2, %v9246_v9 }
 0xa5e   : > { %v8855_v25 = vpop.f32.mrf.mxu2 }
 0xa5f   : > { %v8921_v16 = vadd.f32 %v8855_v25, %v8612_v1  ;;  %v8614_v49 = vpop.f32.mrf.mxu1  ;;  %v9132_v35 = vpop.f32.mrf.mxu3 }
 0xa60   : > { %v8615_v19 = vadd.f32 %v8614_v49, %v17225_v48 }
 0xa61   : > { %v9198_v61 = vadd.f32 %v9132_v35, %v8921_v16 }
 0xa62   : > { %12585 = vmatmul.msk.f32.vlgmr.msra.gmra.mxu1 %vm536_vm2, %v17141_v21  ;;  %v9411_v52 = vpop.f32.mrf.mxu0 }
 0xa63   : > { %v17594_v0 = vadd.f32 %v9408_v23, %v9198_v61  ;;  %12619 = vmatmul.msk.f32.vlgmr.msra.gmra.mxu2 %vm536_vm2, %v17143_v7 }
 0xa64   : > { %12653 = vmatmul.msk.f32.vlgmr.msra.gmra.mxu3 %vm536_vm2, %v17070_v38 }
 0xa65   : > { %12687 = vmatmul.msk.f32.vlgmr.msra.gmra.mxu0 %vm536_vm2, %v17163_v55 }
 0xa66   : > { %v8858_v31 = vpop.f32.mrf.mxu2 }
 0xa67   : > { %v8922_v57 = vadd.f32 %v8858_v31, %v8615_v19  ;;  %v8617_v9 = vpop.f32.mrf.mxu1  ;;  %v9135_v62 = vpop.f32.mrf.mxu3 }
 0xa68   : > { %v8618_v7 = vadd.f32 %v8617_v9, %v17245_v50 }
 0xa69   : > { %v9199_v63 = vadd.f32 %v9135_v62, %v8922_v57  ;;  %v10048_v57 = vld [vmem:[#allocation3 + $0x88] sm:$0xff] }
 0xa6a   : > { %12586 = vmatmul.msk.f32.gmra.mxu1 %vm536_vm2, %v17152_v41  ;;  %v9414_v21 = vpop.f32.mrf.mxu0  ;;  %v18285_v62 = vld [vmem:[#allocation84_spill] sm:$0xff] }
 0xa6b   : > { %v17605_v40 = vadd.f32 %v9411_v52, %v9199_v63  ;;  %12620 = vmatmul.msk.f32.gmra.mxu2 %vm536_vm2, %v17154_v32 }
 0xa6c   : > { %12654 = vmatmul.msk.f32.gmra.mxu3 %vm536_vm2, %v17092_v53 }
 0xa6d   : > { %12688 = vmatmul.msk.f32.gmra.mxu0 %vm536_vm2, %v17175_v27 }
 0xa6e   : > { %v8861_v38 = vpop.f32.mrf.mxu2 }
 0xa6f   : > { %v8923_v48 = vadd.f32 %v8861_v38, %v8618_v7  ;;  %v8620_v60 = vpop.f32.mrf.mxu1  ;;  %v9138_v23 = vpop.f32.mrf.mxu3  ;;  %v10049_v38 = vld [vmem:[#allocation3 + $0x90] sm:$0xff] }
 0xa70   : > { %v8621_v32 = vadd.f32 %v8620_v60, %v17265_v24 }
 0xa71   : > { %v9200_v1 = vadd.f32 %v9138_v23, %v8923_v48 }
 0xa72   : > { %12587 = vmatmul.msk.f32.gmra.mxu1 %vm536_vm2, %v17163_v55  ;;  %v9417_v41 = vpop.f32.mrf.mxu0 }
 0xa73   : > { %v17616_v25 = vadd.f32 %v9414_v21, %v9200_v1  ;;  %12621 = vmatmul.msk.f32.gmra.mxu2 %vm536_vm2, %v17165_v30 }
 0xa74   : > { %12655 = vmatmul.msk.f32.gmra.mxu3 %vm536_vm2, %v17111_v29 }
 0xa75   : > { %12689 = vmatmul.msk.f32.gmra.mxu0 %vm536_vm2, %v17187_v51 }
 0xa76   : > { %v8864_v53 = vpop.f32.mrf.mxu2 }
 0xa77   : > { %v8924_v50 = vadd.f32 %v8864_v53, %v8621_v32  ;;  %v8623_v16 = vpop.f32.mrf.mxu1  ;;  %v9141_v49 = vpop.f32.mrf.mxu3 }
 0xa78   : > { %v8624_v30 = vadd.f32 %v8623_v16, %v17285_v36  ;;  %v10050_v16 = vld [vmem:[#allocation3 + $0xa8] sm:$0xff] }
 0xa79   : > { %v9201_v35 = vadd.f32 %v9141_v49, %v8924_v50 }
 0xa7a   : > { %12588 = vmatmul.msk.f32.gmra.mxu1 %vm536_vm2, %v17175_v27  ;;  %v9420_v55 = vpop.f32.mrf.mxu0 }
 0xa7b   : > { %v17627_v61 = vadd.f32 %v9417_v41, %v9201_v35  ;;  %12622 = vmatmul.msk.f32.gmra.mxu2 %vm536_vm2, %v17177_v43  ;;  %v18288_v41 = vld [vmem:[#allocation87_spill] sm:$0xff] }
 0xa7c   : > { %12656 = vmatmul.msk.f32.gmra.mxu3 %vm536_vm2, %v17127_v46 }
 0xa7d   : > { %12690 = vmatmul.msk.f32.gmra.mxu0 %vm536_vm2, %v17199_v17 }
 0xa7e   : > { %v8867_v29 = vpop.f32.mrf.mxu2 }
 0xa7f   : > { %v8925_v24 = vadd.f32 %v8867_v29, %v8624_v30  ;;  %v8626_v52 = vpop.f32.mrf.mxu1  ;;  %v9144_v19 = vpop.f32.mrf.mxu3 }
 0xa80   : > { %v8627_v46 = vadd.f32 %v8626_v52, %v17311_v44  ;;  %v18287_v44 = vld [vmem:[#allocation101_spill] sm:$0xff]  ;;  %v18291_v52 = vld [vmem:[#allocation90_spill] sm:$0xff] }
 0xa81   : > { %v9202_v31 = vadd.f32 %v9144_v19, %v8925_v24 }
 0xa82   : > { %12589 = vmatmul.msk.f32.gmra.mxu1 %vm536_vm2, %v17187_v51  ;;  %v9423_v27 = vpop.f32.mrf.mxu0  ;;  %v18286_v51 = vld [vmem:[#allocation83_spill] sm:$0xff] }
 0xa83   : > { %v17638_v9 = vadd.f32 %v9420_v55, %v9202_v31  ;;  %12623 = vmatmul.msk.f32.gmra.mxu2 %vm536_vm2, %v17189_v2  ;;  %v18290_v55 = vld [vmem:[#allocation105_spill] sm:$0xff] }
 0xa84   : > { %12657 = vmatmul.msk.f32.gmra.mxu3 %vm536_vm2, %v10048_v57 }
 0xa85   : > { %12691 = vmatmul.msk.f32.gmra.mxu0 %vm536_vm2, %v18285_v62 }
 0xa86   : > { %v8870_v43 = vpop.f32.mrf.mxu2 }
 0xa87   : > { %v8926_v36 = vadd.f32 %v8870_v43, %v8627_v46  ;;  %v8629_v63 = vpop.f32.mrf.mxu1  ;;  %v9147_v21 = vpop.f32.mrf.mxu3  ;;  %v18292_v43 = vld [vmem:[#allocation88_spill] sm:$0xff] }
 0xa88   : > { %v8630_v60 = vadd.f32 %v8629_v63, %v18287_v44 }
 0xa89   : > { %v9203_v7 = vadd.f32 %v9147_v21, %v8926_v36 }
 0xa8a   : > { %12590 = vmatmul.msk.f32.gmra.mxu1 %vm536_vm2, %v17199_v17  ;;  %v9426_v2 = vpop.f32.mrf.mxu0  ;;  %v18289_v17 = vld [vmem:[#allocation85_spill] sm:$0xff] }
 0xa8b   : > { %v17648_v48 = vadd.f32 %v9423_v27, %v9203_v7  ;;  %12624 = vmatmul.msk.f32.gmra.mxu2 %vm536_vm2, %v18286_v51  ;;  %v10051_v27 = vld [vmem:[#allocation3 + $0xb0] sm:$0xff] }
 0xa8c   : > { %12658 = vmatmul.msk.f32.gmra.mxu3 %vm536_vm2, %v10049_v38  ;;  %v18294_v38 = vld [vmem:[#allocation93_spill] sm:$0xff] }
 0xa8d   : > { %12692 = vmatmul.msk.f32.gmra.mxu0 %vm536_vm2, %v18288_v41 }
 0xa8e   : > { %v8873_v23 = vpop.f32.mrf.mxu2 }
 0xa8f   : > { %v8927_v1 = vadd.f32 %v8873_v23, %v8630_v60  ;;  %v8632_v32 = vpop.f32.mrf.mxu1  ;;  %v9150_v53 = vpop.f32.mrf.mxu3  ;;  %v10052_v60 = vld [vmem:[#allocation3 + $0xc8] sm:$0xff] }
 0xa90   : > { %v8633_v30 = vadd.f32 %v8632_v32, %v18290_v55  ;;  %v18296_v32 = vld [vmem:[#allocation86_spill] sm:$0xff] }
 0xa91   : > { %v9204_v50 = vadd.f32 %v9150_v53, %v8927_v1  ;;  %v18295_v1 = vld [vmem:[#allocation91_spill] sm:$0xff] }
 0xa92   : > { %12591 = vmatmul.msk.f32.gmra.mxu1 %vm536_vm2, %v18285_v62  ;;  %v9429_v35 = vpop.f32.mrf.mxu0  ;;  %v18293_v62 = vld [vmem:[#allocation108_spill] sm:$0xff] }
 0xa93   : > { %v17658_v49 = vadd.f32 %v9426_v2, %v9204_v50  ;;  %12625 = vmatmul.msk.f32.gmra.mxu2 %vm536_vm2, %v18289_v17  ;;  %v18297_v17 = vld [vmem:[#allocation96_spill] sm:$0xff] }
 0xa94   : > { %12659 = vmatmul.msk.f32.gmra.mxu3 %vm536_vm2, %v10050_v16 }
 0xa95   : > { %12693 = vmatmul.msk.f32.gmra.mxu0 %vm536_vm2, %v18291_v52 }
 0xa96   : > { %v8876_v29 = vpop.f32.mrf.mxu2 }
 0xa97   : > { %v8928_v24 = vadd.f32 %v8876_v29, %v8633_v30  ;;  %v8635_v19 = vpop.f32.mrf.mxu1  ;;  %v9153_v31 = vpop.f32.mrf.mxu3  ;;  %v10053_v29 = vld [vmem:[#allocation3 + $0xd0] sm:$0xff] }
 0xa98   : > { %v8636_v63 = vadd.f32 %v8635_v19, %v18293_v62 }
 0xa99   : > { %v9205_v57 = vadd.f32 %v9153_v31, %v8928_v24  ;;  %v18299_v31 = vld [vmem:[#allocation89_spill] sm:$0xff] }
 0xa9a   : > { %12592 = vmatmul.msk.f32.gmra.mxu1 %vm536_vm2, %v18288_v41  ;;  %v9432_v36 = vpop.f32.mrf.mxu0 }
 0xa9b   : > { %v17668_v46 = vadd.f32 %v9429_v35, %v9205_v57  ;;  %12626 = vmatmul.msk.f32.gmra.mxu2 %vm536_vm2, %v18292_v43 }
 0xa9c   : > { %12660 = vmatmul.msk.f32.gmra.mxu3 %vm536_vm2, %v10051_v27 }
 0xa9d   : > { %12694 = vmatmul.msk.f32.gmra.mxu0 %vm536_vm2, %v18294_v38 }
 0xa9e   : > { %v8879_v21 = vpop.f32.mrf.mxu2 }
 0xa9f   : > { %v8929_v7 = vadd.f32 %v8879_v21, %v8636_v63  ;;  %v8638_v51 = vpop.f32.mrf.mxu1  ;;  %v9156_v2 = vpop.f32.mrf.mxu3 }
 0xaa0   : > { %v8639_v53 = vadd.f32 %v8638_v51, %v18296_v32  ;;  %v18303_v32 = vld [vmem:[#allocation103_spill] sm:$0xff] }
 0xaa1   : > { %v9206_v44 = vadd.f32 %v9156_v2, %v8929_v7  ;;  %v10054_v7 = vld [vmem:[#allocation3 + $0xe8] sm:$0xff] }
 0xaa2   : > { %12593 = vmatmul.msk.f32.gmra.mxu1 %vm536_vm2, %v18291_v52  ;;  %v9435_v41 = vpop.f32.mrf.mxu0  ;;  %v18298_v52 = vld [vmem:[#allocation94_spill] sm:$0xff] }
 0xaa3   : > { %v17678_v23 = vadd.f32 %v9432_v36, %v9206_v44  ;;  %12627 = vmatmul.msk.f32.gmra.mxu2 %vm536_vm2, %v18295_v1  ;;  %v18300_v36 = vld [vmem:[#allocation99_spill] sm:$0xff]  ;;  %v18302_v44 = vld [vmem:[#allocation92_spill] sm:$0xff] }
 0xaa4   : > { %12661 = vmatmul.msk.f32.gmra.mxu3 %vm536_vm2, %v10052_v60 }
 0xaa5   : > { %12695 = vmatmul.msk.f32.gmra.mxu0 %vm536_vm2, %v18297_v17 }
 0xaa6   : > { %v8882_v50 = vpop.f32.mrf.mxu2 }
 0xaa7   : > { %v8930_v16 = vadd.f32 %v8882_v50, %v8639_v53  ;;  %v8641_v35 = vpop.f32.mrf.mxu1  ;;  %v9159_v55 = vpop.f32.mrf.mxu3 }
 0xaa8   : > { %v8642_v57 = vadd.f32 %v8641_v35, %v18299_v31  ;;  %v10055_v35 = vld [vmem:[#allocation3 + $0xf0] sm:$0xff] }
 0xaa9   : > { %v9207_v30 = vadd.f32 %v9159_v55, %v8930_v16 }
 0xaaa   : > { %12594 = vmatmul.msk.f32.gmra.mxu1 %vm536_vm2, %v18294_v38  ;;  %v9438_v19 = vpop.f32.mrf.mxu0  ;;  %v18301_v38 = vld [vmem:[#allocation97_spill] sm:$0xff] }
 0xaab   : > { %v17688_v24 = vadd.f32 %v9435_v41, %v9207_v30  ;;  %12628 = vmatmul.msk.f32.gmra.mxu2 %vm536_vm2, %v18298_v52 }
 0xaac   : > { %12662 = vmatmul.msk.f32.gmra.mxu3 %vm536_vm2, %v10053_v29  ;;  %v18305_v29 = vld [vmem:[#allocation95_spill] sm:$0xff] }
 0xaad   : > { %12696 = vmatmul.msk.f32.gmra.mxu0 %vm536_vm2, %v18300_v36 }
 0xaae   : > { %v8885_v27 = vpop.f32.mrf.mxu2 }
 0xaaf   : > { %v8931_v43 = vadd.f32 %v8885_v27, %v8642_v57  ;;  %v8644_v62 = vpop.f32.mrf.mxu1  ;;  %v9162_v63 = vpop.f32.mrf.mxu3  ;;  %v18306_v57 = vld [vmem:[#allocation107_spill] sm:$0xff] }
 0xab0   : > { %v8645_v60 = vadd.f32 %v8644_v62, %v18302_v44 }
 0xab1   : > { %v9208_v21 = vadd.f32 %v9162_v63, %v8931_v43  ;;  %v10056_v63 = vld [vmem:[#allocation3 + $0x108] sm:$0xff] }
 0xab2   : > { %12595 = vmatmul.msk.f32.gmra.mxu1 %vm536_vm2, %v18297_v17  ;;  %v9441_v2 = vpop.f32.mrf.mxu0  ;;  %v18304_v17 = vld [vmem:[#allocation100_spill] sm:$0xff] }
 0xab3   : > { %v17698_v51 = vadd.f32 %v9438_v19, %v9208_v21  ;;  %12629 = vmatmul.msk.f32.gmra.mxu2 %vm536_vm2, %v18301_v38  ;;  %v18308_v38 = vld [vmem:[#allocation98_spill] sm:$0xff] }
 0xab4   : > { %12663 = vmatmul.msk.f32.gmra.mxu3 %vm536_vm2, %v10054_v7 }
 0xab5   : > { %12697 = vmatmul.msk.f32.gmra.mxu0 %vm536_vm2, %v18303_v32 }
 0xab6   : > { %v8888_v1 = vpop.f32.mrf.mxu2 }
 0xab7   : > { %v8932_v41 = vadd.f32 %v8888_v1, %v8645_v60  ;;  %v8647_v53 = vpop.f32.mrf.mxu1  ;;  %v9165_v50 = vpop.f32.mrf.mxu3 }
 0xab8   : > { %v8648_v52 = vadd.f32 %v8647_v53, %v18305_v29 }
 0xab9   : > { %v9209_v16 = vadd.f32 %v9165_v50, %v8932_v41  ;;  %v10057_v50 = vld [vmem:[#allocation3 + $0x110] sm:$0xff] }
 0xaba   : > { %12596 = vmatmul.msk.f32.gmra.mxu1 %vm536_vm2, %v18300_v36  ;;  %v9444_v30 = vpop.f32.mrf.mxu0  ;;  %v18307_v36 = vld [vmem:[#allocation104_spill] sm:$0xff] }
 0xabb   : > { %v17708_v55 = vadd.f32 %v9441_v2, %v9209_v16  ;;  %12630 = vmatmul.msk.f32.gmra.mxu2 %vm536_vm2, %v18304_v17 }
 0xabc   : > { %12664 = vmatmul.msk.f32.gmra.mxu3 %vm536_vm2, %v10055_v35  ;;  %v18309_v35 = vld [vmem:[#allocation102_spill] sm:$0xff] }
 0xabd   : > { %12698 = vmatmul.msk.f32.gmra.mxu0 %vm536_vm2, %v18306_v57 }
 0xabe   : > { %v8891_v19 = vpop.f32.mrf.mxu2 }
 0xabf   : > { %v8933_v31 = vadd.f32 %v8891_v19, %v8648_v52  ;;  %v8650_v27 = vpop.f32.mrf.mxu1  ;;  %v9168_v43 = vpop.f32.mrf.mxu3 }
 0xac0   : > { %v8651_v2 = vadd.f32 %v8650_v27, %v18308_v38  ;;  %v10058_v27 = vld [vmem:[#allocation3 + $0x128] sm:$0xff] }
 0xac1   : > { %v9210_v62 = vadd.f32 %v9168_v43, %v8933_v31 }
 0xac2   : > { %12597 = vmatmul.msk.f32.gmra.mxu1 %vm536_vm2, %v18303_v32  ;;  %v9447_v7 = vpop.f32.mrf.mxu0 }
 0xac3   : > { %v17718_v21 = vadd.f32 %v9444_v30, %v9210_v62  ;;  %12631 = vmatmul.msk.f32.gmra.mxu2 %vm536_vm2, %v18307_v36 }
 0xac4   : > { %12665 = vmatmul.msk.f32.gmra.mxu3 %vm536_vm2, %v10056_v63 }
 0xac5   : > { %12699 = vmatmul.msk.f32.gmra.mxu0 %vm536_vm2, %v17383_v42 }
 0xac6   : > { %v8894_v44 = vpop.f32.mrf.mxu2 }
 0xac7   : > { %v8934_v60 = vadd.f32 %v8894_v44, %v8651_v2  ;;  %v8653_v1 = vpop.f32.mrf.mxu1  ;;  %v9171_v41 = vpop.f32.mrf.mxu3  ;;  %v10059_v44 = vld [vmem:[#allocation3 + $0x130] sm:$0xff] }
 0xac8   : > { %v8654_v17 = vadd.f32 %v8653_v1, %v18309_v35 }
 0xac9   : > { %v9211_v53 = vadd.f32 %v9171_v41, %v8934_v60 }
 0xaca   : > { %12598 = vmatmul.msk.f32.gmra.mxu1 %vm536_vm2, %v18306_v57  ;;  %v9450_v32 = vpop.f32.mrf.mxu0  ;;  %v18310_v57 = vld [vmem:[#allocation106_spill] sm:$0xff] }
 0xacb   : > { %v17728_v16 = vadd.f32 %v9447_v7, %v9211_v53  ;;  %12632 = vmatmul.msk.f32.gmra.mxu2 %vm536_vm2, %v17367_v13 }
 0xacc   : > { %12666 = vmatmul.msk.f32.gmra.mxu3 %vm536_vm2, %v10057_v50 }
 0xacd   : > { %12700 = vmatmul.msk.f32.gmra.mxu0 %vm536_vm2, %v17396_v4 }
 0xace   : > { %v8897_v30 = vpop.f32.mrf.mxu2 }
 0xacf   : > { %v8935_v29 = vadd.f32 %v8897_v30, %v8654_v17  ;;  %v8656_v52 = vpop.f32.mrf.mxu1  ;;  %v9174_v19 = vpop.f32.mrf.mxu3  ;;  %v10060_v17 = vld [vmem:[#allocation3 + $0x148] sm:$0xff] }
 0xad0   : > { %v8657_v62 = vadd.f32 %v8656_v52, %v18310_v57 }
 0xad1   : > { %v9212_v31 = vadd.f32 %v9174_v19, %v8935_v29  ;;  %v10061_v19 = vld [vmem:[#allocation3 + $0x150] sm:$0xff] }
 0xad2   : > { %12599 = vmatmul.msk.f32.gmra.mxu1 %vm536_vm2, %v17383_v42  ;;  %v9453_v13 = vpop.f32.mrf.mxu0  ;;  %v18311_v42 = vld [vmem:[#allocation109_spill] sm:$0xff] }
 0xad3   : > { %v17738_v43 = vadd.f32 %v9450_v32, %v9212_v31  ;;  %12633 = vmatmul.msk.f32.gmra.mxu2 %vm536_vm2, %v17385_v39  ;;  %v18312_v31 = vld [vmem:[#allocation110_spill] sm:$0xff] }
 0xad4   : > { %12667 = vmatmul.msk.f32.gmra.mxu3 %vm536_vm2, %v10058_v27 }
 0xad5   : > { %12701 = vmatmul.msk.f32.gmra.mxu0 %vm536_vm2, %v17411_v15 }
 0xad6   : > { %v8900_v63 = vpop.f32.mrf.mxu2 }
 0xad7   : > { %v8936_v36 = vadd.f32 %v8900_v63, %v8657_v62  ;;  %v8659_v7 = vpop.f32.mrf.mxu1  ;;  %v9177_v38 = vpop.f32.mrf.mxu3  ;;  %v10062_v63 = vld [vmem:[#allocation3 + $0x168] sm:$0xff] }
 0xad8   : > { %v8660_v1 = vadd.f32 %v8659_v7, %v18311_v42  ;;  %v17785_v42 = vld [vmem:[%s17992_s6] ss:$0 sm:$0xff] }
 0xad9   : > { %v9213_v2 = vadd.f32 %v9177_v38, %v8936_v36  ;;  %v18314_v38 = vld [vmem:[#allocation112_spill] sm:$0xff] }
 0xada   : > { %12600 = vmatmul.msk.f32.gmra.mxu1 %vm536_vm2, %v17396_v4  ;;  %v9456_v39 = vpop.f32.mrf.mxu0 }
 0xadb   : > { %v17748_v60 = vadd.f32 %v9453_v13, %v9213_v2  ;;  %12634 = vmatmul.msk.f32.gmra.mxu2 %vm536_vm2, %v17398_v11 }
 0xadc   : > { %12668 = vmatmul.msk.f32.gmra.mxu3 %vm536_vm2, %v10059_v44 }
 0xadd   : > { %12702 = vmatmul.msk.f32.gmra.mxu0 %vm536_vm2, %v17426_v37 }
 0xade   : > { %v8903_v41 = vpop.f32.mrf.mxu2 }
 0xadf   : > { %v8937_v53 = vadd.f32 %v8903_v41, %v8660_v1  ;;  %v9180_v50 = vpop.f32.mrf.mxu3  ;;  %v9639_v32 = vpop.f32.mrf.mxu1 }
 0xae0   : > { %v9735_v27 = vadd.f32 %v9639_v32, %v18312_v31 }
 0xae1   : > { %v9214_v35 = vadd.f32 %v9180_v50, %v8937_v53  ;;  %v10063_v50 = vld [vmem:[#allocation3 + $0x170] sm:$0xff] }
 0xae2   : > { %12601 = vmatmul.msk.f32.gmra.mxu1 %vm536_vm2, %v17411_v15  ;;  %v10468_v11 = vpop.f32.mrf.mxu0 }
 0xae3   : > { %v17758_v30 = vadd.f32 %v9456_v39, %v9214_v35  ;;  %12635 = vmatmul.msk.f32.gmra.mxu2 %vm536_vm2, %v17413_v12 }
 0xae4   : > { %12669 = vmatmul.msk.f32.gmra.mxu3 %vm536_vm2, %v10060_v17 }
 0xae5   : > { %12703 = vmatmul.msk.f32.gmra.mxu0 %vm536_vm2, %v17441_v33 }
 0xae6   : > { %v9916_v4 = vpop.f32.mrf.mxu2 }
 0xae7   : > { %v9642_v29 = vpop.f32.mrf.mxu1  ;;  %v10192_v52 = vpop.f32.mrf.mxu3  ;;  %v10012_v13 = vadd.f32 %v9916_v4, %v9735_v27  ;;  %v18315_v4 = vld [vmem:[#allocation113_spill] sm:$0xff] }
 0xae9   : > { %v10288_v36 = vadd.f32 %v10192_v52, %v10012_v13 }
 0xaea   : > { %12602 = vmatmul.msk.f32.gmra.mxu1 %vm536_vm2, %v17426_v37  ;;  %v10471_v15 = vpop.f32.mrf.mxu0 }
 0xaeb   : > { %12636 = vmatmul.msk.f32.gmra.mxu2 %vm536_vm2, %v17428_v18  ;;  %v18313_v18 = vld [vmem:[#allocation111_spill] sm:$0xff]  ;;  %v10564_v39 = vadd.f32 %v10468_v11, %v10288_v36 }
 0xaec   : > { %12670 = vmatmul.msk.f32.gmra.mxu3 %vm536_vm2, %v10061_v19  ;;  %v9736_v7 = vadd.f32 %v9642_v29, %v18313_v18 }
 0xaed   : > { %12704 = vmatmul.msk.f32.gmra.mxu0 %vm536_vm2, %v17456_v45  ;;  %v10600_v32 = vadd.f32 %v17785_v42, %v10564_v39 }
 0xaee   : > { %v9919_v12 = vpop.f32.mrf.mxu2 }
 0xaef   : > { %v9645_v57 = vpop.f32.mrf.mxu1  ;;  %v10195_v62 = vpop.f32.mrf.mxu3  ;;  %v10013_v1 = vadd.f32 %v9919_v12, %v9736_v7  ;;  %v10632_v31 = vmax.f32 %v10600_v32, 0.0 }
 0xaf0   : > { %v9737_v2 = vadd.f32 %v9645_v57, %v18314_v38 }
 0xaf1   : > { %v10289_v35 = vadd.f32 %v10195_v62, %v10013_v1 }
 0xaf2   : > { %12603 = vmatmul.msk.f32.gmra.mxu1 %vm536_vm2, %v17441_v33  ;;  %v10474_v37 = vpop.f32.mrf.mxu0 }
 0xaf3   : > { %12637 = vmatmul.msk.f32.gmra.mxu2 %vm536_vm2, %v17443_v56  ;;  %v10565_v27 = vadd.f32 %v10471_v15, %v10289_v35 }
 0xaf4   : > { %12671 = vmatmul.msk.f32.gmra.mxu3 %vm536_vm2, %v10062_v63  ;;  %v10064_v63 = vld [vmem:[#allocation3 + $0x188] sm:$0xff] }
 0xaf5   : > { %12705 = vmatmul.msk.f32.gmra.mxu0 %vm536_vm2, %v17471_v8  ;;  %v10601_v36 = vadd.f32 %v17785_v42, %v10565_v27 }
 0xaf6   : > { %v9922_v44 = vpop.f32.mrf.mxu2 }
 0xaf7   : > { %v10014_v41 = vadd.f32 %v9922_v44, %v9737_v2  ;;  %v9648_v33 = vpop.f32.mrf.mxu1  ;;  %v10198_v56 = vpop.f32.mrf.mxu3  ;;  %v10633_v38 = vmax.f32 %v10601_v36, 0.0 }
 0xaf8   : > { %v9738_v29 = vadd.f32 %v9648_v33, %v18315_v4 }
 0xaf9   : > { %v10290_v53 = vadd.f32 %v10198_v56, %v10014_v41  ;;  %v10065_v41 = vld [vmem:[#allocation3 + $0x190] sm:$0xff] }
 0xafa   : > { %12604 = vmatmul.msk.f32.gmra.mxu1 %vm536_vm2, %v17456_v45  ;;  %v10477_v11 = vpop.f32.mrf.mxu0 }
 0xafb   : > { %v10566_v17 = vadd.f32 %v10474_v37, %v10290_v53  ;;  %12638 = vmatmul.msk.f32.gmra.mxu2 %vm536_vm2, %v17458_v20 }
 0xafc   : > { %12672 = vmatmul.msk.f32.gmra.mxu3 %vm536_vm2, %v10063_v50 }
 0xafd   : > { %v10602_v52 = vadd.f32 %v17785_v42, %v10566_v17  ;;  %12706 = vmatmul.msk.f32.gmra.mxu0 %vm536_vm2, %v17486_v58 }
 0xafe   : > { %v9925_v19 = vpop.f32.mrf.mxu2 }
 0xaff   : > { %v10634_v12 = vmax.f32 %v10602_v52, 0.0  ;;  %v10015_v13 = vadd.f32 %v9925_v19, %v9738_v29  ;;  %v9651_v45 = vpop.f32.mrf.mxu1  ;;  %v10201_v57 = vpop.f32.mrf.mxu3  ;;  %v18317_v29 = vld [vmem:[#allocation115_spill] sm:$0xff]  ;;  %v18318_v19 = vld [vmem:[#allocation116_spill] sm:$0xff] }
 0xb01   : > { %v10664_v62 = vmax.f32 %v10632_v31, %v10634_v12  ;;  %v10291_v20 = vadd.f32 %v10201_v57, %v10015_v13 }
 0xb02   : > { %12605 = vmatmul.msk.f32.gmra.mxu1 %vm536_vm2, %v17471_v8  ;;  %v10480_v15 = vpop.f32.mrf.mxu0 }
 0xb03   : > { %10681 = vst.msk [vmem:[#allocation4] sm:$0xff] %vm10680_vm6, %v10664_v62  ;;  %v10567_v37 = vadd.f32 %v10477_v11, %v10291_v20  ;;  %12639 = vmatmul.msk.f32.gmra.mxu2 %vm536_vm2, %v17473_v6  ;;  %v18316_v6 = vld [vmem:[#allocation114_spill] sm:$0xff]  ;;  %v10066_v11 = vld [vmem:[#allocation3 + $0x1a8] sm:$0xff] }
 0xb04   : > { %12673 = vmatmul.msk.f32.gmra.mxu3 %vm536_vm2, %v10064_v63  ;;  %v9739_v33 = vadd.f32 %v9651_v45, %v18316_v6  ;;  %v9792_v6 = vld [vmem:[#allocation3 + $0x1c7] sm:$0xff] }
 0xb05   : > { %v10603_v18 = vadd.f32 %v17785_v42, %v10567_v37  ;;  %12707 = vmatmul.msk.f32.gmra.mxu0 %vm536_vm2, %v17501_v10 }
 0xb06   : > { %v9928_v7 = vpop.f32.mrf.mxu2 }
 0xb07   : > { %v10635_v2 = vmax.f32 %v10603_v18, 0.0  ;;  %v9654_v44 = vpop.f32.mrf.mxu1  ;;  %v10204_v39 = vpop.f32.mrf.mxu3  ;;  %v10016_v53 = vadd.f32 %v9928_v7, %v9739_v33 }
 0xb08   : > { %v9740_v52 = vadd.f32 %v9654_v44, %v18317_v29 }
 0xb09   : > { %v10665_v1 = vmax.f32 %v10633_v38, %v10635_v2 }
 0xb0a   : > { %12606 = vmatmul.msk.f32.gmra.mxu1 %vm536_vm2, %v17486_v58  ;;  %v10483_v8 = vpop.f32.mrf.mxu0  ;;  %v10292_v58 = vadd.f32 %v10204_v39, %v10016_v53 }
 0xb0b   : > { %10682 = vst.msk [vmem:[#allocation4 + $0x8] sm:$0xff] %vm10680_vm6, %v10665_v1  ;;  %12640 = vmatmul.msk.f32.gmra.mxu2 %vm536_vm2, %v17488_v26 }
 0xb0c   : > { %12674 = vmatmul.msk.f32.gmra.mxu3 %vm536_vm2, %v10065_v41  ;;  %v10568_v12 = vadd.f32 %v10480_v15, %v10292_v58  ;;  %v18319_v15 = vld [vmem:[#allocation117_spill] sm:$0xff]  ;;  %v9515_v41 = vld [vmem:[#allocation3 + $0x1a9] sm:$0xff] }
 0xb0d   : > { %12708 = vmatmul.msk.f32.gmra.mxu0 %vm536_vm2, %v17516_v59  ;;  %v9516_v58 = vld [vmem:[#allocation3 + $0x1b1] sm:$0xff] }
 0xb0e   : > { %v9931_v56 = vpop.f32.mrf.mxu2  ;;  %v10604_v20 = vadd.f32 %v17785_v42, %v10568_v12 }
 0xb0f   : > { %v9657_v50 = vpop.f32.mrf.mxu1  ;;  %v10207_v32 = vpop.f32.mrf.mxu3  ;;  %v10017_v13 = vadd.f32 %v9931_v56, %v9740_v52  ;;  %v10068_v56 = vld [vmem:[#allocation3 + $0x1c8] sm:$0xff]  ;;  %v10069_v52 = vld [vmem:[#allocation3 + $0x1d0] sm:$0xff] }
 0xb10   : > { %v9741_v31 = vadd.f32 %v9657_v50, %v18318_v19  ;;  %v10636_v38 = vmax.f32 %v10604_v20, 0.0  ;;  %v10070_v20 = vld [vmem:[#allocation3 + $0x1e8] sm:$0xff] }
 0xb11   : > { %v10293_v63 = vadd.f32 %v10207_v32, %v10017_v13 }
 0xb12   : > { %v10697_v35 = vld [vmem:[#allocation4] ss:$2 sm:$0xff]  ;;  %v10713_v17 = vld [vmem:[#allocation4 + $0x1] ss:$2 sm:$0xff]  ;;  %12607 = vmatmul.msk.f32.gmra.mxu1 %vm536_vm2, %v17501_v10  ;;  %v10486_v26 = vpop.f32.mrf.mxu0 }
 0xb13   : > { %v10728_v4 = vmax.f32 %v10697_v35, %v10713_v17  ;;  %12641 = vmatmul.msk.f32.gmra.mxu2 %vm536_vm2, %v17503_v14  ;;  %v10067_v14 = vld [vmem:[#allocation3 + $0x1b0] sm:$0xff]  ;;  %v10569_v2 = vadd.f32 %v10483_v8, %v10293_v63 }
 0xb14   : > { %12675 = vmatmul.msk.f32.gmra.mxu3 %vm536_vm2, %v10066_v11 }
 0xb15   : > { %10736 = vst.msk [vmem:[#allocation5] sm:$0xff] %vm10680_vm6, %v10728_v4  ;;  %12709 = vmatmul.msk.f32.gmra.mxu0 %vm536_vm2, %v17531_v5  ;;  %v10605_v53 = vadd.f32 %v17785_v42, %v10569_v2 }
 0xb16   : > { %v9934_v27 = vpop.f32.mrf.mxu2 }
 0xb17   : > { %v10018_v45 = vadd.f32 %v9934_v27, %v9741_v31  ;;  %v9660_v10 = vpop.f32.mrf.mxu1  ;;  %v10210_v57 = vpop.f32.mrf.mxu3  ;;  %v10637_v35 = vmax.f32 %v10605_v53, 0.0  ;;  %v18320_v31 = vld [vmem:[#allocation118_spill] sm:$0xff] }
 0xb18   : > { %v9742_v18 = vadd.f32 %v9660_v10, %v18319_v15  ;;  %v9517_v10 = vld [vmem:[#allocation3 + $0x1c9] sm:$0xff] }
 0xb19   : > { %v10294_v62 = vadd.f32 %v10210_v57, %v10018_v45  ;;  %v9794_v57 = vld [vmem:[#allocation3 + $0x1e7] sm:$0xff] }
 0xb1a   : > { %12608 = vmatmul.msk.f32.gmra.mxu1 %vm536_vm2, %v17516_v59  ;;  %v10489_v37 = vpop.f32.mrf.mxu0  ;;  %v18321_v15 = vld [vmem:[#allocation119_spill] sm:$0xff] }
 0xb1b   : > { %v10570_v36 = vadd.f32 %v10486_v26, %v10294_v62  ;;  %12642 = vmatmul.msk.f32.gmra.mxu2 %vm536_vm2, %v17518_v47  ;;  %v9793_v26 = vld [vmem:[#allocation3 + $0x1cf] sm:$0xff] }
 0xb1c   : > { %12676 = vmatmul.msk.f32.gmra.mxu3 %vm536_vm2, %v10067_v14 }
 0xb1d   : > { %v10606_v7 = vadd.f32 %v17785_v42, %v10570_v36  ;;  %12710 = vmatmul.msk.f32.gmra.mxu0 %vm536_vm2, %v17543_v3 }
 0xb1e   : > { %v9937_v5 = vpop.f32.mrf.mxu2 }
 0xb1f   : > { %v10638_v44 = vmax.f32 %v10606_v7, 0.0  ;;  %v10019_v39 = vadd.f32 %v9937_v5, %v9742_v18  ;;  %v9663_v1 = vpop.f32.mrf.mxu1  ;;  %v10213_v59 = vpop.f32.mrf.mxu3  ;;  %v18322_v7 = vld [vmem:[#allocation120_spill] sm:$0xff] }
 0xb20   : > { %v9743_v27 = vadd.f32 %v9663_v1, %v18320_v31  ;;  %v9796_v31 = vld [vmem:[#allocation3 + $0x207] sm:$0xff] }
 0xb21   : > { %v10666_v47 = vmax.f32 %v10636_v38, %v10638_v44  ;;  %v10295_v33 = vadd.f32 %v10213_v59, %v10019_v39  ;;  %v9518_v59 = vld [vmem:[#allocation3 + $0x1d1] sm:$0xff] }
 0xb22   : > { %12609 = vmatmul.msk.f32.gmra.mxu1 %vm536_vm2, %v9515_v41  ;;  %v10492_v8 = vpop.f32.mrf.mxu0  ;;  %v9795_v41 = vld [vmem:[#allocation3 + $0x1ef] sm:$0xff] }
 0xb23   : > { %10683 = vst.msk [vmem:[#allocation4 + $0x10] sm:$0xff] %vm10680_vm6, %v10666_v47  ;;  %v10571_v50 = vadd.f32 %v10489_v37, %v10295_v33  ;;  %12643 = vmatmul.msk.f32.gmra.mxu2 %vm536_vm2, %v9792_v6  ;;  %v10071_v47 = vld [vmem:[#allocation3 + $0x1f0] sm:$0xff] }
 0xb24   : > { %12677 = vmatmul.msk.f32.gmra.mxu3 %vm536_vm2, %v10068_v56 }
 0xb25   : > { %v10607_v32 = vadd.f32 %v17785_v42, %v10571_v50  ;;  %12711 = vmatmul.msk.f32.gmra.mxu0 %vm536_vm2, %v17555_v34 }
 0xb26   : > { %v9940_v3 = vpop.f32.mrf.mxu2 }
 0xb27   : > { %v10639_v17 = vmax.f32 %v10607_v32, 0.0  ;;  %v9666_v11 = vpop.f32.mrf.mxu1  ;;  %v10216_v4 = vpop.f32.mrf.mxu3  ;;  %v10020_v13 = vadd.f32 %v9940_v3, %v9743_v27  ;;  %v18323_v32 = vld [vmem:[#allocation121_spill] sm:$0xff] }
 0xb28   : > { %v9744_v18 = vadd.f32 %v9666_v11, %v18321_v15 }
 0xb29   : > { %v10667_v29 = vmax.f32 %v10637_v35, %v10639_v17  ;;  %v10296_v36 = vadd.f32 %v10216_v4, %v10020_v13  ;;  %v10072_v13 = vld [vmem:[#allocation3 + $0x208] sm:$0xff] }
 0xb2a   : > { %12610 = vmatmul.msk.f32.gmra.mxu1 %vm536_vm2, %v9516_v58  ;;  %v10495_v19 = vpop.f32.mrf.mxu0 }
 0xb2b   : > { %10684 = vst.msk [vmem:[#allocation4 + $0x18] sm:$0xff] %vm10680_vm6, %v10667_v29  ;;  %12644 = vmatmul.msk.f32.gmra.mxu2 %vm536_vm2, %v9793_v26  ;;  %v10572_v38 = vadd.f32 %v10492_v8, %v10296_v36  ;;  %v10347_v8 = vld [vmem:[#allocation3 + $0x1f1] sm:$0xff] }
 0xb2c   : > { %12678 = vmatmul.msk.f32.gmra.mxu3 %vm536_vm2, %v10069_v52  ;;  %v9519_v52 = vld [vmem:[#allocation3 + $0x1e9] sm:$0xff] }
 0xb2d   : > { %12712 = vmatmul.msk.f32.gmra.mxu0 %vm536_vm2, %v17566_v54  ;;  %v10608_v33 = vadd.f32 %v17785_v42, %v10572_v38 }
 0xb2e   : > { %v9943_v12 = vpop.f32.mrf.mxu2 }
 0xb2f   : > { %v9669_v34 = vpop.f32.mrf.mxu1  ;;  %v10219_v45 = vpop.f32.mrf.mxu3  ;;  %v10021_v2 = vadd.f32 %v9943_v12, %v9744_v18  ;;  %v10640_v17 = vmax.f32 %v10608_v33, 0.0  ;;  %v10073_v18 = vld [vmem:[#allocation3 + $0x210] sm:$0xff] }
 0xb30   : > { %v9745_v54 = vadd.f32 %v9669_v34, %v18322_v7 }
 0xb31   : > { %v10297_v56 = vadd.f32 %v10219_v45, %v10021_v2 }
 0xb32   : > { %v10699_v62 = vld [vmem:[#allocation4 + $0x10] ss:$2 sm:$0xff]  ;;  %v10715_v14 = vld [vmem:[#allocation4 + $0x11] ss:$2 sm:$0xff]  ;;  %12611 = vmatmul.msk.f32.gmra.mxu1 %vm536_vm2, %v9517_v10  ;;  %v10498_v37 = vpop.f32.mrf.mxu0 }
 0xb33   : > { %v10729_v63 = vmax.f32 %v10699_v62, %v10715_v14  ;;  %12645 = vmatmul.msk.f32.gmra.mxu2 %vm536_vm2, %v9794_v57  ;;  %v10573_v11 = vadd.f32 %v10495_v19, %v10297_v56  ;;  %v10348_v10 = vld [vmem:[#allocation3 + $0x209] sm:$0xff] }
 0xb34   : > { %12679 = vmatmul.msk.f32.gmra.mxu3 %vm536_vm2, %v10070_v20 }
 0xb35   : > { %10737 = vst.msk [vmem:[#allocation5 + $0x8] sm:$0xff] %vm10680_vm6, %v10729_v63  ;;  %12713 = vmatmul.msk.f32.gmra.mxu0 %vm536_vm2, %v17577_v22  ;;  %v10609_v34 = vadd.f32 %v17785_v42, %v10573_v11 }
 0xb36   : > { %v9946_v5 = vpop.f32.mrf.mxu2 }
 0xb37   : > { %v10022_v44 = vadd.f32 %v9946_v5, %v9745_v54  ;;  %v9672_v39 = vpop.f32.mrf.mxu1  ;;  %v10222_v1 = vpop.f32.mrf.mxu3  ;;  %v10641_v14 = vmax.f32 %v10609_v34, 0.0  ;;  %v10349_v54 = vld [vmem:[#allocation3 + $0x211] sm:$0xff]  ;;  %v18324_v5 = vld [vmem:[#allocation122_spill] sm:$0xff] }
 0xb38   : > { %v9746_v3 = vadd.f32 %v9672_v39, %v18323_v32 }
 0xb39   : > { %v10298_v6 = vadd.f32 %v10222_v1, %v10022_v44 }
 0xb3a   : > { %12612 = vmatmul.msk.f32.gmra.mxu1 %vm536_vm2, %v9518_v59  ;;  %v10501_v50 = vpop.f32.mrf.mxu0  ;;  %v9798_v59 = vld [vmem:[#allocation3 + $0x227] sm:$0xff] }
 0xb3b   : > { %v10574_v53 = vadd.f32 %v10498_v37, %v10298_v6  ;;  %12646 = vmatmul.msk.f32.gmra.mxu2 %vm536_vm2, %v9795_v41  ;;  %v9797_v37 = vld [vmem:[#allocation3 + $0x20f] sm:$0xff] }
 0xb3c   : > { %12680 = vmatmul.msk.f32.gmra.mxu3 %vm536_vm2, %v10071_v47  ;;  %v10074_v47 = vld [vmem:[#allocation3 + $0x228] sm:$0xff] }
 0xb3d   : > { %v10610_v22 = vadd.f32 %v17785_v42, %v10574_v53  ;;  %12714 = vmatmul.msk.f32.gmra.mxu0 %vm536_vm2, %v10347_v8 }
 0xb3e   : > { %v9949_v35 = vpop.f32.mrf.mxu2 }
 0xb3f   : > { %v10642_v4 = vmax.f32 %v10610_v22, 0.0  ;;  %v10023_v58 = vadd.f32 %v9949_v35, %v9746_v3  ;;  %v9675_v26 = vpop.f32.mrf.mxu1  ;;  %v10225_v29 = vpop.f32.mrf.mxu3 }
 0xb40   : > { %v9747_v38 = vadd.f32 %v9675_v26, %v18324_v5  ;;  %v9799_v26 = vld [vmem:[#allocation3 + $0x22f] sm:$0xff] }
 0xb41   : > { %v10668_v27 = vmax.f32 %v10640_v17, %v10642_v4  ;;  %v10299_v12 = vadd.f32 %v10225_v29, %v10023_v58 }
 0xb42   : > { %12613 = vmatmul.msk.f32.gmra.mxu1 %vm536_vm2, %v9519_v52  ;;  %v10504_v19 = vpop.f32.mrf.mxu0  ;;  %v10075_v52 = vld [vmem:[#allocation3 + $0x230] sm:$0xff] }
 0xb43   : > { %10685 = vst.msk [vmem:[#allocation4 + $0x20] sm:$0xff] %vm10680_vm6, %v10668_v27  ;;  %v10575_v45 = vadd.f32 %v10501_v50, %v10299_v12  ;;  %12647 = vmatmul.msk.f32.gmra.mxu2 %vm536_vm2, %v9796_v31  ;;  %v10350_v50 = vld [vmem:[#allocation3 + $0x229] sm:$0xff] }
 0xb44   : > { %12681 = vmatmul.msk.f32.gmra.mxu3 %vm536_vm2, %v10072_v13  ;;  %v10351_v13 = vld [vmem:[#allocation3 + $0x231] sm:$0xff] }
 0xb45   : > { %v10611_v57 = vadd.f32 %v17785_v42, %v10575_v45  ;;  %12715 = vmatmul.msk.f32.gmra.mxu0 %vm536_vm2, %v10348_v10 }
 0xb46   : > { %v9952_v62 = vpop.f32.mrf.mxu2 }
 0xb47   : > { %v10643_v20 = vmax.f32 %v10611_v57, 0.0  ;;  %v9678_v63 = vpop.f32.mrf.mxu1  ;;  %v10228_v36 = vpop.f32.mrf.mxu3  ;;  %v10024_v44 = vadd.f32 %v9952_v62, %v9747_v38 }
 0xb49   : > { %v10669_v15 = vmax.f32 %v10641_v14, %v10643_v20  ;;  %v10300_v56 = vadd.f32 %v10228_v36, %v10024_v44 }
 0xb4a   : > { %12614 = vmatmul.msk.f32.gmra.mxu1 %vm536_vm2, %v10347_v8  ;;  %v10507_v7 = vpop.f32.mrf.mxu0  ;;  %v18325_v8 = vld [vmem:[#allocation123_spill] sm:$0xff] }
 0xb4b   : > { %10686 = vst.msk [vmem:[#allocation4 + $0x28] sm:$0xff] %vm10680_vm6, %v10669_v15  ;;  %12648 = vmatmul.msk.f32.gmra.mxu2 %vm536_vm2, %v9797_v37  ;;  %v9748_v32 = vadd.f32 %v9678_v63, %v18325_v8  ;;  %v10576_v35 = vadd.f32 %v10504_v19, %v10300_v56 }
 0xb4c   : > { %12682 = vmatmul.msk.f32.gmra.mxu3 %vm536_vm2, %v10073_v18 }
 0xb4d   : > { %12716 = vmatmul.msk.f32.gmra.mxu0 %vm536_vm2, %v10349_v54  ;;  %v10612_v31 = vadd.f32 %v17785_v42, %v10576_v35 }
 0xb4e   : > { %v9955_v2 = vpop.f32.mrf.mxu2 }
 0xb4f   : > { %v9681_v39 = vpop.f32.mrf.mxu1  ;;  %v10231_v1 = vpop.f32.mrf.mxu3  ;;  %v10025_v17 = vadd.f32 %v9955_v2, %v9748_v32 }
 0xb50   : > { %v9749_v3 = vadd.f32 %v9681_v39, %v17587_v28 }
 0xb51   : > { %v10301_v27 = vadd.f32 %v10231_v1, %v10025_v17 }
 0xb52   : > { %v10701_v41 = vld [vmem:[#allocation4 + $0x20] ss:$2 sm:$0xff]  ;;  %v10717_v6 = vld [vmem:[#allocation4 + $0x21] ss:$2 sm:$0xff]  ;;  %12615 = vmatmul.msk.f32.gmra.mxu1 %vm536_vm2, %v10348_v10  ;;  %v10510_v53 = vpop.f32.mrf.mxu0  ;;  %v10644_v10 = vmax.f32 %v10612_v31, 0.0 }
 0xb53   : > { %v10730_v33 = vmax.f32 %v10701_v41, %v10717_v6  ;;  %12649 = vmatmul.msk.f32.gmra.mxu2 %vm536_vm2, %v9798_v59  ;;  %v10577_v57 = vadd.f32 %v10507_v7, %v10301_v27 }
 0xb54   : > { %12683 = vmatmul.msk.f32.gmra.mxu3 %vm536_vm2, %v10074_v47 }
 0xb55   : > { %10738 = vst.msk [vmem:[#allocation5 + $0x10] sm:$0xff] %vm10680_vm6, %v10730_v33  ;;  %12717 = vmatmul.msk.f32.gmra.mxu0 %vm536_vm2, %v10350_v50  ;;  %v10613_v15 = vadd.f32 %v17785_v42, %v10577_v57 }
 0xb56   : > { %v9958_v22 = vpop.f32.mrf.mxu2 }
 0xb57   : > { %v10026_v11 = vadd.f32 %v9958_v22, %v9749_v3  ;;  %v9684_v4 = vpop.f32.mrf.mxu1  ;;  %v10234_v58 = vpop.f32.mrf.mxu3  ;;  %v10645_v38 = vmax.f32 %v10613_v15, 0.0 }
 0xb58   : > { %v9750_v34 = vadd.f32 %v9684_v4, %v17594_v0 }
 0xb59   : > { %v10302_v29 = vadd.f32 %v10234_v58, %v10026_v11 }
 0xb5a   : > { %12616 = vmatmul.msk.f32.gmra.mxu1 %vm536_vm2, %v10349_v54  ;;  %v10513_v28 = vpop.f32.mrf.mxu0 }
 0xb5b   : > { %v10578_v12 = vadd.f32 %v10510_v53, %v10302_v29  ;;  %12650 = vmatmul.msk.f32.gmra.mxu2 %vm536_vm2, %v9799_v26 }
 0xb5c   : > { %12684 = vmatmul.msk.f32.gmra.mxu3 %vm536_vm2, %v10075_v52 }
 0xb5d   : > { %v10614_v45 = vadd.f32 %v17785_v42, %v10578_v12  ;;  %12718 = vmatmul.msk.f32.gmra.mxu0 %vm536_vm2, %v10351_v13 }
 0xb5e   : > { %v9961_v19 = vpop.f32.mrf.mxu2 }
 0xb5f   : > { %v10646_v62 = vmax.f32 %v10614_v45, 0.0  ;;  %v10027_v14 = vadd.f32 %v9961_v19, %v9750_v34  ;;  %v9687_v20 = vpop.f32.mrf.mxu1  ;;  %v10237_v63 = vpop.f32.mrf.mxu3 }
 0xb60   : > { %v9751_v59 = vadd.f32 %v9687_v20, %v17605_v40 }
 0xb61   : > { %v10670_v36 = vmax.f32 %v10644_v10, %v10646_v62  ;;  %v10303_v37 = vadd.f32 %v10237_v63, %v10027_v14 }
 0xb62   : > { %v10516_v18 = vpop.f32.mrf.mxu0 }
 0xb63   : > { %10687 = vst.msk [vmem:[#allocation4 + $0x30] sm:$0xff] %vm10680_vm6, %v10670_v36  ;;  %v10579_v0 = vadd.f32 %v10513_v28, %v10303_v37 }
 0xb65   : > { %v10615_v54 = vadd.f32 %v17785_v42, %v10579_v0 }
 0xb66   : > { %v9964_v5 = vpop.f32.mrf.mxu2 }
 0xb67   : > { %v10647_v2 = vmax.f32 %v10615_v54, 0.0  ;;  %v9690_v7 = vpop.f32.mrf.mxu1  ;;  %v10240_v44 = vpop.f32.mrf.mxu3  ;;  %v10028_v6 = vadd.f32 %v9964_v5, %v9751_v59 }
 0xb68   : > { %v9752_v3 = vadd.f32 %v9690_v7, %v17616_v25 }
 0xb69   : > { %v10671_v39 = vmax.f32 %v10645_v38, %v10647_v2  ;;  %v10304_v8 = vadd.f32 %v10240_v44, %v10028_v6 }
 0xb6a   : > { %v10519_v1 = vpop.f32.mrf.mxu0 }
 0xb6b   : > { %10688 = vst.msk [vmem:[#allocation4 + $0x38] sm:$0xff] %vm10680_vm6, %v10671_v39  ;;  %v10580_v17 = vadd.f32 %v10516_v18, %v10304_v8 }
 0xb6d   : > { %v10616_v29 = vadd.f32 %v17785_v42, %v10580_v17 }
 0xb6e   : > { %v9967_v41 = vpop.f32.mrf.mxu2 }
 0xb6f   : > { %v9693_v47 = vpop.f32.mrf.mxu1  ;;  %v10243_v33 = vpop.f32.mrf.mxu3  ;;  %v10029_v11 = vadd.f32 %v9967_v41, %v9752_v3  ;;  %v10648_v25 = vmax.f32 %v10616_v29, 0.0 }
 0xb70   : > { %v9753_v22 = vadd.f32 %v9693_v47, %v17627_v61 }
 0xb71   : > { %v10305_v52 = vadd.f32 %v10243_v33, %v10029_v11 }
 0xb72   : > { %v10703_v56 = vld [vmem:[#allocation4 + $0x30] ss:$2 sm:$0xff]  ;;  %v10719_v53 = vld [vmem:[#allocation4 + $0x31] ss:$2 sm:$0xff]  ;;  %v10522_v32 = vpop.f32.mrf.mxu0 }
 0xb73   : > { %v10731_v50 = vmax.f32 %v10703_v56, %v10719_v53  ;;  %v10581_v34 = vadd.f32 %v10519_v1, %v10305_v52 }
 0xb75   : > { %10739 = vst.msk [vmem:[#allocation5 + $0x18] sm:$0xff] %vm10680_vm6, %v10731_v50  ;;  %v10617_v14 = vadd.f32 %v17785_v42, %v10581_v34 }
 0xb76   : > { %v9970_v35 = vpop.f32.mrf.mxu2 }
 0xb77   : > { %v10030_v4 = vadd.f32 %v9970_v35, %v9753_v22  ;;  %v9696_v40 = vpop.f32.mrf.mxu1  ;;  %v10246_v58 = vpop.f32.mrf.mxu3  ;;  %v10649_v37 = vmax.f32 %v10617_v14, 0.0 }
 0xb78   : > { %v9754_v12 = vadd.f32 %v9696_v40, %v17638_v9 }
 0xb79   : > { %v10306_v26 = vadd.f32 %v10246_v58, %v10030_v4 }
 0xb7a   : > { %v10525_v27 = vpop.f32.mrf.mxu0 }
 0xb7b   : > { %v10582_v31 = vadd.f32 %v10522_v32, %v10306_v26 }
 0xb7d   : > { %v10618_v28 = vadd.f32 %v17785_v42, %v10582_v31 }
 0xb7e   : > { %v9973_v13 = vpop.f32.mrf.mxu2 }
 0xb7f   : > { %v10650_v61 = vmax.f32 %v10618_v28, 0.0  ;;  %v10031_v45 = vadd.f32 %v9973_v13, %v9754_v12  ;;  %v9699_v19 = vpop.f32.mrf.mxu1  ;;  %v10249_v10 = vpop.f32.mrf.mxu3 }
 0xb80   : > { %v9755_v38 = vadd.f32 %v9699_v19, %v17648_v48 }
 0xb81   : > { %v10672_v57 = vmax.f32 %v10648_v25, %v10650_v61  ;;  %v10307_v62 = vadd.f32 %v10249_v10, %v10031_v45 }
 0xb82   : > { %v10528_v63 = vpop.f32.mrf.mxu0 }
 0xb83   : > { %10689 = vst.msk [vmem:[#allocation4 + $0x40] sm:$0xff] %vm10680_vm6, %v10672_v57  ;;  %v10583_v20 = vadd.f32 %v10525_v27, %v10307_v62 }
 0xb85   : > { %v10619_v36 = vadd.f32 %v17785_v42, %v10583_v20 }
 0xb86   : > { %v9976_v9 = vpop.f32.mrf.mxu2 }
 0xb87   : > { %v10651_v15 = vmax.f32 %v10619_v36, 0.0  ;;  %v9702_v0 = vpop.f32.mrf.mxu1  ;;  %v10252_v18 = vpop.f32.mrf.mxu3  ;;  %v10032_v7 = vadd.f32 %v9976_v9, %v9755_v38 }
 0xb88   : > { %v9756_v33 = vadd.f32 %v9702_v0, %v17658_v49 }
 0xb89   : > { %v10673_v54 = vmax.f32 %v10649_v37, %v10651_v15  ;;  %v10308_v6 = vadd.f32 %v10252_v18, %v10032_v7 }
 0xb8a   : > { %v10531_v5 = vpop.f32.mrf.mxu0 }
 0xb8b   : > { %10690 = vst.msk [vmem:[#allocation4 + $0x48] sm:$0xff] %vm10680_vm6, %v10673_v54  ;;  %v10584_v50 = vadd.f32 %v10528_v63, %v10308_v6 }
 0xb8d   : > { %v10620_v35 = vadd.f32 %v17785_v42, %v10584_v50 }
 0xb8e   : > { %v9979_v2 = vpop.f32.mrf.mxu2 }
 0xb8f   : > { %v9705_v44 = vpop.f32.mrf.mxu1  ;;  %v10255_v39 = vpop.f32.mrf.mxu3  ;;  %v10033_v8 = vadd.f32 %v9979_v2, %v9756_v33  ;;  %v10652_v49 = vmax.f32 %v10620_v35, 0.0 }
 0xb90   : > { %v9757_v56 = vadd.f32 %v9705_v44, %v17668_v46 }
 0xb91   : > { %v10309_v17 = vadd.f32 %v10255_v39, %v10033_v8 }
 0xb92   : > { %v10705_v1 = vld [vmem:[#allocation4 + $0x40] ss:$2 sm:$0xff]  ;;  %v10721_v59 = vld [vmem:[#allocation4 + $0x41] ss:$2 sm:$0xff]  ;;  %v10534_v47 = vpop.f32.mrf.mxu0 }
 0xb93   : > { %v10732_v41 = vmax.f32 %v10705_v1, %v10721_v59  ;;  %v10585_v29 = vadd.f32 %v10531_v5, %v10309_v17 }
 0xb95   : > { %10740 = vst.msk [vmem:[#allocation5 + $0x20] sm:$0xff] %vm10680_vm6, %v10732_v41  ;;  %v10621_v13 = vadd.f32 %v17785_v42, %v10585_v29 }
 0xb96   : > { %v9982_v53 = vpop.f32.mrf.mxu2 }
 0xb97   : > { %v10034_v32 = vadd.f32 %v9982_v53, %v9757_v56  ;;  %v9708_v48 = vpop.f32.mrf.mxu1  ;;  %v10258_v3 = vpop.f32.mrf.mxu3  ;;  %v10653_v45 = vmax.f32 %v10621_v13, 0.0 }
 0xb98   : > { %v9758_v40 = vadd.f32 %v9708_v48, %v17678_v23 }
 0xb99   : > { %v10310_v22 = vadd.f32 %v10258_v3, %v10034_v32 }
 0xb9a   : > { %v10537_v4 = vpop.f32.mrf.mxu0 }
 0xb9b   : > { %v10586_v11 = vadd.f32 %v10534_v47, %v10310_v22 }
 0xb9d   : > { %v10622_v58 = vadd.f32 %v17785_v42, %v10586_v11 }
 0xb9e   : > { %v9985_v26 = vpop.f32.mrf.mxu2 }
 0xb9f   : > { %v10654_v46 = vmax.f32 %v10622_v58, 0.0  ;;  %v10035_v52 = vadd.f32 %v9985_v26, %v9758_v40  ;;  %v9711_v31 = vpop.f32.mrf.mxu1  ;;  %v10261_v27 = vpop.f32.mrf.mxu3 }
 0xba0   : > { %v9759_v20 = vadd.f32 %v9711_v31, %v17688_v24 }
 0xba1   : > { %v10674_v12 = vmax.f32 %v10652_v49, %v10654_v46  ;;  %v10311_v28 = vadd.f32 %v10261_v27, %v10035_v52 }
 0xba2   : > { %v10540_v34 = vpop.f32.mrf.mxu0 }
 0xba3   : > { %10691 = vst.msk [vmem:[#allocation4 + $0x50] sm:$0xff] %vm10680_vm6, %v10674_v12  ;;  %v10587_v25 = vadd.f32 %v10537_v4, %v10311_v28 }
 0xba5   : > { %v10623_v61 = vadd.f32 %v17785_v42, %v10587_v25 }
 0xba6   : > { %v9988_v23 = vpop.f32.mrf.mxu2 }
 0xba7   : > { %v10655_v19 = vmax.f32 %v10623_v61, 0.0  ;;  %v9714_v10 = vpop.f32.mrf.mxu1  ;;  %v10264_v57 = vpop.f32.mrf.mxu3  ;;  %v10036_v36 = vadd.f32 %v9988_v23, %v9759_v20 }
 0xba8   : > { %v9760_v38 = vadd.f32 %v9714_v10, %v17698_v51 }
 0xba9   : > { %v10675_v62 = vmax.f32 %v10653_v45, %v10655_v19  ;;  %v10312_v54 = vadd.f32 %v10264_v57, %v10036_v36 }
 0xbaa   : > { %v10543_v14 = vpop.f32.mrf.mxu0 }
 0xbab   : > { %10692 = vst.msk [vmem:[#allocation4 + $0x58] sm:$0xff] %vm10680_vm6, %v10675_v62  ;;  %v10588_v44 = vadd.f32 %v10540_v34, %v10312_v54 }
 0xbad   : > { %v10624_v6 = vadd.f32 %v17785_v42, %v10588_v44 }
 0xbae   : > { %v9991_v63 = vpop.f32.mrf.mxu2 }
 0xbaf   : > { %v9717_v9 = vpop.f32.mrf.mxu1  ;;  %v10267_v37 = vpop.f32.mrf.mxu3  ;;  %v10037_v39 = vadd.f32 %v9991_v63, %v9760_v38  ;;  %v10656_v51 = vmax.f32 %v10624_v6, 0.0 }
 0xbb0   : > { %v9761_v2 = vadd.f32 %v9717_v9, %v17708_v55 }
 0xbb1   : > { %v10313_v47 = vadd.f32 %v10267_v37, %v10037_v39 }
 0xbb2   : > { %v10707_v15 = vld [vmem:[#allocation4 + $0x50] ss:$2 sm:$0xff]  ;;  %v10723_v0 = vld [vmem:[#allocation4 + $0x51] ss:$2 sm:$0xff]  ;;  %v10546_v5 = vpop.f32.mrf.mxu0 }
 0xbb3   : > { %v10733_v18 = vmax.f32 %v10707_v15, %v10723_v0  ;;  %v10589_v32 = vadd.f32 %v10543_v14, %v10313_v47 }
 0xbb5   : > { %10741 = vst.msk [vmem:[#allocation5 + $0x28] sm:$0xff] %vm10680_vm6, %v10733_v18  ;;  %v10625_v11 = vadd.f32 %v17785_v42, %v10589_v32 }
 0xbb6   : > { %v9994_v7 = vpop.f32.mrf.mxu2 }
 0xbb7   : > { %v10038_v1 = vadd.f32 %v9994_v7, %v9761_v2  ;;  %v9720_v24 = vpop.f32.mrf.mxu1  ;;  %v10270_v59 = vpop.f32.mrf.mxu3  ;;  %v10657_v26 = vmax.f32 %v10625_v11, 0.0 }
 0xbb8   : > { %v9762_v53 = vadd.f32 %v9720_v24, %v17718_v21 }
 0xbb9   : > { %v10314_v41 = vadd.f32 %v10270_v59, %v10038_v1 }
 0xbba   : > { %v10549_v56 = vpop.f32.mrf.mxu0 }
 0xbbb   : > { %v10590_v33 = vadd.f32 %v10546_v5, %v10314_v41 }
 0xbbd   : > { %v10626_v50 = vadd.f32 %v17785_v42, %v10590_v33 }
 0xbbe   : > { %v9997_v8 = vpop.f32.mrf.mxu2 }
 0xbbf   : > { %v10658_v55 = vmax.f32 %v10626_v50, 0.0  ;;  %v10039_v48 = vadd.f32 %v9997_v8, %v9762_v53  ;;  %v9723_v3 = vpop.f32.mrf.mxu1  ;;  %v10273_v22 = vpop.f32.mrf.mxu3  ;;  %v12901_v50 = vmov 0.0  }
 0xbc0   : > { %v9763_v27 = vadd.f32 %v9723_v3, %v17728_v16 }
 0xbc1   : > { %v10676_v35 = vmax.f32 %v10656_v51, %v10658_v55  ;;  %v10315_v17 = vadd.f32 %v10273_v22, %v10039_v48 }
 0xbc2   : > { %v10552_v40 = vpop.f32.mrf.mxu0 }
 0xbc3   : > { %10693 = vst.msk [vmem:[#allocation4 + $0x60] sm:$0xff] %vm10680_vm6, %v10676_v35  ;;  %v10591_v4 = vadd.f32 %v10549_v56, %v10315_v17 }
 0xbc5   : > { %v10627_v58 = vadd.f32 %v17785_v42, %v10591_v4 }
 0xbc6   : > { %v10000_v21 = vpop.f32.mrf.mxu2 }
 0xbc7   : > { %v10659_v49 = vmax.f32 %v10627_v58, 0.0  ;;  %v9726_v29 = vpop.f32.mrf.mxu1  ;;  %v10276_v46 = vpop.f32.mrf.mxu3  ;;  %v10040_v28 = vadd.f32 %v10000_v21, %v9763_v27 }
 0xbc8   : > { %v9764_v19 = vadd.f32 %v9726_v29, %v17738_v43 }
 0xbc9   : > { %v10677_v52 = vmax.f32 %v10657_v26, %v10659_v49  ;;  %v10316_v45 = vadd.f32 %v10276_v46, %v10040_v28 }
 0xbca   : > { %v10555_v31 = vpop.f32.mrf.mxu0 }
 0xbcb   : > { %10694 = vst.msk [vmem:[#allocation4 + $0x68] sm:$0xff] %vm10680_vm6, %v10677_v52  ;;  %v10592_v14 = vadd.f32 %v10552_v40, %v10316_v45 }
 0xbcd   : > { %v10628_v37 = vadd.f32 %v17785_v42, %v10592_v14 }
 0xbce   : > { %v10003_v12 = vpop.f32.mrf.mxu2 }
 0xbcf   : > { %v9729_v13 = vpop.f32.mrf.mxu1  ;;  %v10279_v25 = vpop.f32.mrf.mxu3  ;;  %v10041_v20 = vadd.f32 %v10003_v12, %v9764_v19  ;;  %v10660_v43 = vmax.f32 %v10628_v37, 0.0 }
 0xbd0   : > { %v9765_v10 = vadd.f32 %v9729_v13, %v17748_v60 }
 0xbd1   : > { %v10317_v15 = vadd.f32 %v10279_v25, %v10041_v20 }
 0xbd2   : > { %v10709_v34 = vld [vmem:[#allocation4 + $0x60] ss:$2 sm:$0xff]  ;;  %v10725_v61 = vld [vmem:[#allocation4 + $0x61] ss:$2 sm:$0xff]  ;;  %v10558_v62 = vpop.f32.mrf.mxu0 }
 0xbd3   : > { %v10734_v23 = vmax.f32 %v10709_v34, %v10725_v61  ;;  %v10593_v38 = vadd.f32 %v10555_v31, %v10317_v15 }
 0xbd5   : > { %10742 = vst.msk [vmem:[#allocation5 + $0x30] sm:$0xff] %vm10680_vm6, %v10734_v23  ;;  %v10629_v24 = vadd.f32 %v17785_v42, %v10593_v38 }
 0xbd6   : > { %v10006_v57 = vpop.f32.mrf.mxu2 }
 0xbd7   : > { %v10042_v63 = vadd.f32 %v10006_v57, %v9765_v10  ;;  %v10282_v16 = vpop.f32.mrf.mxu3  ;;  %v9732_v9 = vpop.f32.mrf.mxu1  ;;  %v10661_v6 = vmax.f32 %v10629_v24, 0.0 }
 0xbd8   : > { %v9766_v18 = vadd.f32 %v9732_v9, %v17758_v30 }
 0xbd9   : > { %v10318_v36 = vadd.f32 %v10282_v16, %v10042_v63 }
 0xbda   : > { %v10561_v44 = vpop.f32.mrf.mxu0 }
 0xbdb   : > { %v10594_v0 = vadd.f32 %v10558_v62, %v10318_v36 }
 0xbdd   : > { %v10630_v54 = vadd.f32 %v17785_v42, %v10594_v0 }
 0xbde   : > { %v10009_v5 = vpop.f32.mrf.mxu2 }
 0xbdf   : > { %v10662_v60 = vmax.f32 %v10630_v54, 0.0  ;;  %v10043_v2 = vadd.f32 %v10009_v5, %v9766_v18  ;;  %v10285_v7 = vpop.f32.mrf.mxu3 }
 0xbe1   : > { %v10678_v39 = vmax.f32 %v10660_v43, %v10662_v60  ;;  %v10319_v1 = vadd.f32 %v10285_v7, %v10043_v2 }
 0xbe3   : > { %10695 = vst.msk [vmem:[#allocation4 + $0x70] sm:$0xff] %vm10680_vm6, %v10678_v39  ;;  %v10595_v59 = vadd.f32 %v10561_v44, %v10319_v1 }
 0xbe5   : > { %v10631_v41 = vadd.f32 %v17785_v42, %v10595_v59 }
 0xbe7   : > { %v10663_v30 = vmax.f32 %v10631_v41, 0.0 }
 0xbe9   : > { %v10679_v47 = vmax.f32 %v10661_v6, %v10663_v30 }
 0xbeb   : > { %10696 = vst.msk [vmem:[#allocation4 + $0x78] sm:$0xff] %vm10680_vm6, %v10679_v47 }
 0xbf2   : > { %v10711_v33 = vld [vmem:[#allocation4 + $0x70] ss:$2 sm:$0xff]  ;;  %v10727_v56 = vld [vmem:[#allocation4 + $0x71] ss:$2 sm:$0xff] }
 0xbf3   : > { %v10735_v53 = vmax.f32 %v10711_v33, %v10727_v56 }
 0xbf5   : > { %10743 = vst.msk [vmem:[#allocation5 + $0x38] sm:$0xff] %vm10680_vm6, %v10735_v53 }
 0xbf6 LB: >> { %s12719_s26 = sshll.u32 %s12907_s14, 5  ;;  %s10751_s22 = scalar_lea.vmem [#allocation5], %s12907_s14  ;;  %s12907_s14 = sphi %s12905_s14, %s10749_s14   ;;  %v12903_v50 = vphi %v12901_v50, %v12902_v50  }
 0xbf7   : >> { %s10754_s16 = scalar_lea.vmem %s17993_s7, %s12719_s26  ;;  %s10749_s14 = sadd.s32 1, %s12907_s14  }
 0xbf8   : >> { %v10758_v42 = vld [vmem:[%s10754_s16 + $0x18] sm:$0xff]  ;;  %v10757_v8 = vld [vmem:[%s10754_s16 + $0x10] sm:$0xff]  ;;  %v10756_v51 = vld [vmem:[%s10754_s16 + $0x8] sm:$0xff]  ;;  %p10746_p13 = scmp.ge.s32.totalorder %s10749_s14, 64  }
 0xbf9   : >> { %10774 = vmatpush.msra.mxu0 %v10758_v42  ;;  %v10755_v32 = vld [vmem:[%s10754_s16] sm:$0xff]  ;;  %s10797_s26 = scalar_lea.hbm (%p10746_p13), %s17995_s9, %s12981_s13  ;;  %s10799_s24 = sshll.u32 (%p10746_p13), %s13570_s27, 4  ;;  %vm10786_vm7 = vcmask (%p10746_p13), 516096   ;;  %s10800_s24 = int_to_ptr.vmem [resolvable:$true] %s10799_s24 }
 0xbfa   : > { %v10783_v22 = vld [vmem:[%s17994_s8] sm:$0x1] (%p10746_p13)  ;;  %s10801_s28 = sshll.u32 (%p10746_p13), %s10797_s26, 4  ;;  %s10789_s14 = scalar_lea.sflag (%p10746_p13), [#allocation7], %s323_s21  ;;  %s10802_s28 = int_to_ptr.hbm [resolvable:$true] %s10801_s28 }
 0xbfb   : >> { %10775 = vmatpush.msra.mxu0 %v10757_v8  ;;  %s12827_s16 = sshra.s32 (%p10746_p13), %s10802_s28, 4  ;;  %s12833_s13 = scalar_lea.hbm (%p10746_p13), %s17995_s9, 2  ;;  %s12828_s16 = int_to_ptr.hbm [resolvable:$true] %s12827_s16 }
 0xbfc   : >> { %v10752_v55 = vld [vmem:[%s10751_s22] sm:$0x1]  ;;  %s12829_s22 = scalar_lea.hbm (%p10746_p13), %s12828_s16, 1  ;;  %p12834_p3 = scmp.lt.s32.totalorder (%p10746_p13), %s12828_s16, %s17995_s9 }
 0xbfd   : >> { %10776 = vmatpush.msra.mxu0 %v10756_v51  ;;  %p12830_p0 = scmp.ne.s32.totalorder (%p10746_p13), %s12828_s16, %s12829_s22  ;;  %p12835_p4 = scmp.lt.s32.totalorder (%p10746_p13), %s12833_s13, %s12829_s22 }
 0xbff   : >> { %10777 = vmatpush.msra.mxu0 %v10755_v32  ;;  %p12831_p1 = pnand (%p10746_p13), %p12830_p0, %p12998_p5  ;;  %p12836_p7 = por (%p10746_p13), %p12835_p4, %p12834_p3 }
 0xc00   : >> { %12720 = vmatmul.msk.f32.vlgmr.msra.gmra.mxu0 %vm10680_vm6, %v10752_v55 }
 0xc01   : > { %p12832_p2 = pneg (%p10746_p13), %p12831_p1 }
 0xc03   : > { %p12837_p8 = pnand (%p10746_p13), %p12836_p7, %p12832_p2 }
 0xc7c   : > { %10748 = sbr.rel (!%p10746_p13) target bundleno = 3062 (0xbf6), region = 231 }
 0xc7d   : >> { %v10779_v48 = vpop.f32.mrf.mxu0 }
 0xc7e   : >> { %v10782_v3 = vadd.f32 %v12903_v50, %v10779_v48  }
 0xc80   : >> { %v12902_v50 = vmov %v10782_v3   ;;  %v10784_v35 = vadd.f32 (%p10746_p13), %v10783_v22, %v10782_v3 }
 0xc82   : > { %v10785_v17 = vmax.f32 %v10784_v35, 0.0 }
 0xc84   : > { %10787 = vst.msk [vmem:[%s13570_s27] sm:$0x1] %vm10786_vm7, %v10785_v17 }
 0xc85   : > { %12840 = shalt.err (!%p12837_p8)
}
 0xc86   : > { %12737 = dma.vmem_to_hbm [thread:$0]  (%p12998_p5), %s10800_s24, 16, %s10802_s28, %s10789_s14  }
 0xc87 PF: > { %p12743_p9 = scmp.ge.s32.totalorder %s12891_s12, 2  ;;  %s10813_s21 = sand.u32 1, %s12879_s30  }
 0xc88   : > { %s10814_s27 = scalar_lea.sflag [#allocation7], %s10813_s21 }
 0xc89   : > { %p12740_p10 = pnand %p12743_p9, %p13002_p6 }
 0xc8b   : > { %p12741_p11 = pneg %p12740_p10 }
 0xc8d   : > { %12874 = dma.done.wait (%p12741_p11), %s10814_s27, 16  }
 0xc8e   : > { %12876 = vsyncadd (%p12741_p11), %s10814_s27, 4294967280  ;;  %p19_p12 = scmp.ge.s32.totalorder %s12985_s15, 4   ;;  %s18326_s30 = smov %s12883_s10 }
 0xc8f   : > { %s18327_s10 = smov %s12887_s11  ;;  %s18328_s11 = smov %s12996_s18 }
 0xc90   : > { %s18329_s12 = smov %s12985_s15  ;;  %21 = sbr.rel (!%p19_p12) target bundleno = 3 (0x3), region = 242 }
 0xc95   :  { %10819 = vsyncpa [#allocation7], 1 }
 0xc96   :  { %10821 = vsyncpa [#allocation7 + $0x1], 1 }

</bundles_post_ra>
